<compile_context>
chip_gen: v7x
topology: tpu7x:2x2x1
jax: 0.10.0
libtpu: 0.0.40
codegen_flags: <defaults>
</compile_context>

<pallas_src>
import jax
import jax.numpy as jnp
from jax import lax
from jax.experimental import pallas as pl
from jax.experimental.pallas import tpu as pltpu

EPS = 1e-5  # nn.BatchNorm3d default eps


# ----------------------------- Pallas kernels ------------------------------ #

def _make_conv_bn_relu_pool_kernel(*, G, Kp, C, P, TS, TK):
    """Conv(3x3x3) + BN(batch stats) + ReLU + MaxPool(2,2,2) for one layer.

    p_ref:     (R, P*F)  bf16 lane-packed im2col patches, R = G*Kp, rows ordered
               g-major (g = pool offset dd*4+hh*2+ww), P pooled positions per row.
    w_ref:     (P*F, P*C) bf16 block-diagonal conv weight.
    gamma/beta:(1, P*C)  f32 BN affine params, tiled P times along lanes.
    o_ref:     (Kp, P*C) f32 pooled output (byte-identical to (K, C) row-major).
    y_ref:     (R, P*C)  f32 VMEM scratch holding the conv output.
    """
    R = G * Kp
    PC = P * C
    inv_cnt = 1.0 / float(R * P)          # = 1 / (N*D*H*W) conv positions

    def kernel(p_ref, w_ref, gamma_ref, beta_ref, o_ref, y_ref):
        # ---- pass 1: conv for all pool offsets as ONE bf16 MXU matmul ----
        y_ref[...] = jnp.dot(p_ref[...], w_ref[...],
                             preferred_element_type=jnp.float32)

        # ---- pass 2: BN batch stats (sum & sum-of-squares), chunked ----
        def stats_body(i, carry):
            s, ss = carry
            blk = y_ref[pl.ds(pl.multiple_of(i * TS, TS), TS), :]
            return (s + jnp.sum(blk, axis=0, keepdims=True),
                    ss + jnp.sum(blk * blk, axis=0, keepdims=True))

        zero = jnp.zeros((1, PC), jnp.float32)
        s, ss = lax.fori_loop(0, R // TS, stats_body, (zero, zero))

        if P > 1:
            # Fold the P packed lane-groups onto the C channels; after the fold
            # every lane-group holds the full per-channel totals (XLU rolls).
            s_tot, ss_tot = s, ss
            for a in range(1, P):
                s_tot = s_tot + pltpu.roll(s, a * C, 1)
                ss_tot = ss_tot + pltpu.roll(ss, a * C, 1)
            s, ss = s_tot, ss_tot

        mu = s * inv_cnt
        var = jnp.maximum(ss * inv_cnt - mu * mu, 0.0)   # biased batch variance
        scale = gamma_ref[...] * lax.rsqrt(var + EPS)
        shift = beta_ref[...] - mu * scale

        # ---- pass 3: BN affine + ReLU + 2x2x2 max-pool (max over g), ----
        # ---- tiled over output rows to bound vreg pressure            ----
        def pool_body(i, carry):
            base = pl.multiple_of(i * TK, TK)
            m = jnp.full((TK, PC), -jnp.inf, jnp.float32)
            for g in range(G):
                yg = y_ref[pl.ds(g * Kp + base, TK), :]
                m = jnp.maximum(m, jnp.maximum(yg * scale + shift, 0.0))
            o_ref[pl.ds(base, TK), :] = m
            return carry

        lax.fori_loop(0, Kp // TK, pool_body, 0)

    return kernel


def conv_bn_relu_pool(p, w4, gamma_t, beta_t, *, G, Kp, C, P):
    R, Fp = p.shape
    PC = P * C
    TS = min(R, 128)          # stats chunk rows
    TK = min(Kp, 64)          # pool/affine chunk rows
    assert R == G * Kp and R % TS == 0 and Kp % TK == 0
    kernel = _make_conv_bn_relu_pool_kernel(G=G, Kp=Kp, C=C, P=P, TS=TS, TK=TK)
    return pl.pallas_call(
        kernel,
        out_shape=jax.ShapeDtypeStruct((Kp, PC), jnp.float32),
        grid=(1,),
        in_specs=[pl.BlockSpec((R, Fp), lambda i: (0, 0)),
                  pl.BlockSpec((Fp, PC), lambda i: (0, 0)),
                  pl.BlockSpec((1, PC), lambda i: (0, 0)),
                  pl.BlockSpec((1, PC), lambda i: (0, 0))],
        out_specs=pl.BlockSpec((Kp, PC), lambda i: (0, 0)),
        scratch_shapes=[pltpu.VMEM((R, PC), jnp.float32)],
        compiler_params=pltpu.CompilerParams(
            dimension_semantics=("arbitrary",),
            vmem_limit_bytes=16 * 1024 * 1024),
    )(p, w4, gamma_t, beta_t)


def _make_conv3_gap_fc_kernel(*, G, K3, N, C3):
    """Layer-3 conv+BN+ReLU+pool fused with GlobalAvgPool + Linear."""
    R3 = G * K3
    S = K3 // N                 # pooled spatial positions per sample
    inv_cnt = 1.0 / float(R3)

    def kernel(p_ref, w_ref, gamma_ref, beta_ref, fcw_ref, fcb_ref, o_ref):
        y = jnp.dot(p_ref[...], w_ref[...],
                    preferred_element_type=jnp.float32)          # (R3, C3)
        s = jnp.sum(y, axis=0, keepdims=True)
        ss = jnp.sum(y * y, axis=0, keepdims=True)
        mu = s * inv_cnt
        var = jnp.maximum(ss * inv_cnt - mu * mu, 0.0)
        scale = gamma_ref[...] * lax.rsqrt(var + EPS)
        shift = beta_ref[...] - mu * scale
        a = jnp.maximum(y * scale + shift, 0.0)                  # BN + ReLU
        m = jnp.full((K3, C3), -jnp.inf, jnp.float32)
        for g in range(G):                                       # 2x2x2 max-pool
            m = jnp.maximum(m, a[g * K3:(g + 1) * K3, :])
        gp = jnp.sum(m.reshape(N, S, C3), axis=1) * (1.0 / float(S))  # GAP
        o_ref[...] = (jnp.dot(gp.astype(jnp.bfloat16), fcw_ref[...],
                              preferred_element_type=jnp.float32)
                      + fcb_ref[...])

    return kernel


def conv3_gap_fc(p3, w3, gamma, beta, fcw, fcb, *, G, K3, N):
    R3, F3 = p3.shape
    C3 = w3.shape[1]
    NC = fcw.shape[1]
    kernel = _make_conv3_gap_fc_kernel(G=G, K3=K3, N=N, C3=C3)
    return pl.pallas_call(
        kernel,
        out_shape=jax.ShapeDtypeStruct((N, NC), jnp.float32),
        grid=(1,),
        in_specs=[pl.BlockSpec((R3, F3), lambda i: (0, 0)),
                  pl.BlockSpec((F3, C3), lambda i: (0, 0)),
                  pl.BlockSpec((1, C3), lambda i: (0, 0)),
                  pl.BlockSpec((1, C3), lambda i: (0, 0)),
                  pl.BlockSpec((C3, NC), lambda i: (0, 0)),
                  pl.BlockSpec((1, NC), lambda i: (0, 0))],
        out_specs=pl.BlockSpec((N, NC), lambda i: (0, 0)),
        compiler_params=pltpu.CompilerParams(
            dimension_semantics=("arbitrary",),
            vmem_limit_bytes=16 * 1024 * 1024),
    )(p3, w3, gamma, beta, fcw, fcb)


# --------------------------------- glue ------------------------------------ #

def im2col_pool_order(x):
    """x: (N, D, H, W, C) -> patches (8*N*Do*Ho*Wo, 27*C); rows are g-major with
    g = dd*4+hh*2+ww (pool offset), then (n, do, ho, wo) row-major."""
    N, D, H, W, C = x.shape
    Do, Ho, Wo = D // 2, H // 2, W // 2
    xp = jnp.pad(x, ((0, 0), (1, 1), (1, 1), (1, 1), (0, 0)))
    taps = [xp[:, kd:kd + D, kh:kh + H, kw:kw + W, :]
            for kd in range(3) for kh in range(3) for kw in range(3)]
    t = jnp.stack(taps, axis=-2)                      # (N, D, H, W, 27, C)
    t = t.reshape(N, Do, 2, Ho, 2, Wo, 2, 27, C)
    t = t.transpose(2, 4, 6, 0, 1, 3, 5, 7, 8)        # (dd,hh,ww, N,Do,Ho,Wo, 27, C)
    return t.reshape(8 * N * Do * Ho * Wo, 27 * C)


@jax.jit
def cnn3d_forward(x_ncdhw, params):
    x = jnp.transpose(x_ncdhw, (0, 2, 3, 4, 1)).astype(jnp.float32)  # -> NDHWC
    N = x.shape[0]
    convs = params["convs"]

    # layers 1 & 2: lane-packed conv + BN + ReLU + pool
    for li in range(2):
        w, _b, gamma, beta = convs[li]     # conv bias cancelled by BN mean
        D, H, W, Cin = x.shape[1:]
        Cout = w.shape[-1]
        assert 128 % Cout == 0
        P = 128 // Cout                    # lane-packing factor (4, 2)
        K = N * (D // 2) * (H // 2) * (W // 2)
        assert K % P == 0
        F = 27 * Cin
        p = im2col_pool_order(x)                                  # (8K, F) f32
        p = p.reshape(8 * K // P, P * F).astype(jnp.bfloat16)     # lane-packed rows
        wm = w.reshape(F, Cout)
        w4 = jnp.kron(jnp.eye(P, dtype=wm.dtype), wm).astype(jnp.bfloat16)
        out = conv_bn_relu_pool(p, w4,
                                jnp.tile(gamma, (1, P)), jnp.tile(beta, (1, P)),
                                G=8, Kp=K // P, C=Cout, P=P)      # (K//P, 128)
        x = out.reshape(N, D // 2, H // 2, W // 2, Cout)          # byte-identical

    # layer 3 + GAP + FC, fused into a single kernel
    w, _b, gamma, beta = convs[2]
    D, H, W, Cin = x.shape[1:]
    Cout = w.shape[-1]                     # 128 (already lane-dense)
    K3 = N * (D // 2) * (H // 2) * (W // 2)
    p3 = im2col_pool_order(x).astype(jnp.bfloat16)                # (8*K3, 27*Cin)
    w3 = w.reshape(27 * Cin, Cout).astype(jnp.bfloat16)
    return conv3_gap_fc(p3, w3, gamma, beta,
                        params["fc_w"].astype(jnp.bfloat16), params["fc_b"],
                        G=8, K3=K3, N=N)


def init_params(key, in_channels, num_classes):
    chans = [in_channels, 32, 64, 128]
    keys = jax.random.split(key, 8)
    convs = []
    for i in range(3):
        cin, cout = chans[i], chans[i + 1]
        # conv weight stored in DHWIO layout (kd, kh, kw, Cin, Cout)
        w = jax.random.normal(keys[2 * i], (3, 3, 3, cin, cout), jnp.float32)
        w = w * (1.0 / jnp.sqrt(27.0 * cin))
        b = jax.random.normal(keys[2 * i + 1], (1, cout), jnp.float32) * 0.1
        gamma = jnp.ones((1, cout), jnp.float32)      # BatchNorm3d defaults
        beta = jnp.zeros((1, cout), jnp.float32)
        convs.append((w, b, gamma, beta))
    fc_w = jax.random.normal(keys[6], (128, num_classes), jnp.float32) / jnp.sqrt(128.0)
    fc_b = jax.random.normal(keys[7], (1, num_classes), jnp.float32) * 0.1
    return {"convs": convs, "fc_w": fc_w, "fc_b": fc_b}


def cnn3d_reference(x_ncdhw, params):
    """Pure-JAX reference (no Pallas).  Conv/FC use the same bf16-in / f32-acc
    arithmetic as the kernels; the conv bias is kept (it cancels under BN)."""
    x = jnp.transpose(x_ncdhw, (0, 2, 3, 4, 1)).astype(jnp.float32)
    for (w, b, gamma, beta) in params["convs"]:
        y = lax.conv_general_dilated(
            x.astype(jnp.bfloat16), w.astype(jnp.bfloat16),
            window_strides=(1, 1, 1), padding="SAME",
            dimension_numbers=("NDHWC", "DHWIO", "NDHWC"),
            preferred_element_type=jnp.float32) + b.reshape(1, 1, 1, 1, -1)
        mu = jnp.mean(y, axis=(0, 1, 2, 3), keepdims=True)
        var = jnp.mean((y - mu) ** 2, axis=(0, 1, 2, 3), keepdims=True)
        y = (y - mu) * lax.rsqrt(var + EPS)
        y = y * gamma.reshape(1, 1, 1, 1, -1) + beta.reshape(1, 1, 1, 1, -1)
        y = jnp.maximum(y, 0.0)
        x = lax.reduce_window(y, -jnp.inf, lax.max,
                              window_dimensions=(1, 2, 2, 2, 1),
                              window_strides=(1, 2, 2, 2, 1), padding="VALID")
    g = jnp.mean(x, axis=(1, 2, 3))
    return (jnp.dot(g.astype(jnp.bfloat16), params["fc_w"].astype(jnp.bfloat16),
                    preferred_element_type=jnp.float32) + params["fc_b"])


if __name__ == "__main__":
    key = jax.random.PRNGKey(0)
    k_x, k_p = jax.random.split(key)
    N, C, D, H, W = 2, 4, 16, 16, 16          # PyTorch input (N, C, D, H, W)
    num_classes = 10
    x = jax.random.normal(k_x, (N, C, D, H, W), jnp.float32)
    params = init_params(k_p, C, num_classes)

    out = jax.block_until_ready(cnn3d_forward(x, params))
    assert out.shape == (N, num_classes)

    ref = jax.block_until_ready(cnn3d_reference(x, params))
    # bf16 matmuls (per the perf review) loosen agreement vs the old f32-HIGHEST
    # setup; both paths use bf16-in/f32-acc so 5e-3 is comfortable.
    if not jnp.allclose(out, ref, rtol=5e-3, atol=5e-3):
        raise AssertionError(
            f"mismatch vs reference: max abs diff = {float(jnp.max(jnp.abs(out - ref)))}")
    print("KERNEL_OK")
</pallas_src>

<mosaic_0001>
module attributes {stable_mosaic.version = 11 : i64} {
  func.func @kernel(%arg0: i32, %arg1: memref<2048x432xbf16, #tpu.memory_space<vmem>>, %arg2: memref<432x128xbf16, #tpu.memory_space<vmem>>, %arg3: memref<1x128xf32, #tpu.memory_space<vmem>>, %arg4: memref<1x128xf32, #tpu.memory_space<vmem>>, %arg5: memref<256x128xf32, #tpu.memory_space<vmem>>, %arg6: memref<2048x128xf32, #tpu.memory_space<vmem>>) attributes {dimension_semantics = [#tpu.dimension_semantics<arbitrary>], iteration_bounds = array<i64: 1>, scalar_prefetch = 0 : i64, scratch_operands = 1 : i64, tpu.core_type = #tpu.core_type<tc>, window_params = [{pipeline_mode = #tpu.pipeline_mode<synchronous>, transform_indices = @transform_0, window_bounds = array<i64: 2048, 432>}, {pipeline_mode = #tpu.pipeline_mode<synchronous>, transform_indices = @transform_1, window_bounds = array<i64: 432, 128>}, {pipeline_mode = #tpu.pipeline_mode<synchronous>, transform_indices = @transform_2, window_bounds = array<i64: 1, 128>}, {pipeline_mode = #tpu.pipeline_mode<synchronous>, transform_indices = @transform_3, window_bounds = array<i64: 1, 128>}, {pipeline_mode = #tpu.pipeline_mode<synchronous>, transform_indices = @transform_4, window_bounds = array<i64: 256, 128>}]} {
    %c0 = arith.constant 0 : index
    %c0_0 = arith.constant 0 : index
    %0 = vector.load %arg1[%c0, %c0_0] : memref<2048x432xbf16, #tpu.memory_space<vmem>>, vector<2048x432xbf16>
    %c0_1 = arith.constant 0 : index
    %c0_2 = arith.constant 0 : index
    %1 = vector.load %arg2[%c0_1, %c0_2] : memref<432x128xbf16, #tpu.memory_space<vmem>>, vector<432x128xbf16>
    %cst = arith.constant dense<0.000000e+00> : vector<2048x128xf32>
    %2 = tpu.matmul %0, %1, %cst {dimension_numbers = #tpu.dot_dimension_numbers<[1], [0], [0], [1], [0, 0, 1, 1], [], []>} : vector<2048x432xbf16>, vector<432x128xbf16>, vector<2048x128xf32> -> vector<2048x128xf32>
    %c0_3 = arith.constant 0 : index
    %c0_4 = arith.constant 0 : index
    %3 = vector.load %arg6[%c0_3, %c0_4] : memref<2048x128xf32, #tpu.memory_space<vmem>>, vector<2048x128xf32>
    tpu.vector_store %arg6[%c0_3, %c0_4], %2 {strides = array<i32>} : memref<2048x128xf32, #tpu.memory_space<vmem>>, vector<2048x128xf32>,
    %cst_5 = arith.constant 0.000000e+00 : f32
    %4 = vector.broadcast %cst_5 : f32 to vector<1x128xf32>
    %c0_i32 = arith.constant 0 : i32
    %c16_i32 = arith.constant 16 : i32
    %5 = arith.addi %c0_i32, %c16_i32 : i32
    %c1_i32 = arith.constant 1 : i32
    %6:2 = scf.for %arg7 = %c0_i32 to %5 step %c1_i32 iter_args(%arg8 = %4, %arg9 = %4) -> (vector<1x128xf32>, vector<1x128xf32>)  : i32 {
      %c128_i32 = arith.constant 128 : i32
      %36 = arith.muli %arg7, %c128_i32 : i32
      %37 = tpu.assume_multiple %36, 128 : i32
      %38 = arith.index_cast %37 : i32 to index
      %c0_21 = arith.constant 0 : index
      %39 = vector.load %arg6[%38, %c0_21] : memref<2048x128xf32, #tpu.memory_space<vmem>>, vector<128x128xf32>
      %cst_22 = arith.constant dense<0.000000e+00> : vector<128xf32>
      %40 = vector.multi_reduction <add>, %39, %cst_22 [0] : vector<128x128xf32> to vector<128xf32>
      %41 = vector.shape_cast %40 : vector<128xf32> to vector<1x128xf32>
      %42 = arith.addf %arg8, %41 : vector<1x128xf32>
      %43 = arith.mulf %39, %39 : vector<128x128xf32>
      %cst_23 = arith.constant dense<0.000000e+00> : vector<128xf32>
      %44 = vector.multi_reduction <add>, %43, %cst_23 [0] : vector<128x128xf32> to vector<128xf32>
      %45 = vector.shape_cast %44 : vector<128xf32> to vector<1x128xf32>
      %46 = arith.addf %arg9, %45 : vector<1x128xf32>
      scf.yield %42, %46 : vector<1x128xf32>, vector<1x128xf32>
    }
    %c16_i32_6 = arith.constant 16 : i32
    %c32_i32 = arith.constant 32 : i32
    %7 = tpu.dynamic_rotate %6#0 by %c32_i32 dim 1 : vector<1x128xf32>, i32 -> vector<1x128xf32>
    %8 = arith.addf %6#0, %7 : vector<1x128xf32>
    %c32_i32_7 = arith.constant 32 : i32
    %9 = tpu.dynamic_rotate %6#1 by %c32_i32_7 dim 1 : vector<1x128xf32>, i32 -> vector<1x128xf32>
    %10 = arith.addf %6#1, %9 : vector<1x128xf32>
    %c64_i32 = arith.constant 64 : i32
    %11 = tpu.dynamic_rotate %6#0 by %c64_i32 dim 1 : vector<1x128xf32>, i32 -> vector<1x128xf32>
    %12 = arith.addf %8, %11 : vector<1x128xf32>
    %c64_i32_8 = arith.constant 64 : i32
    %13 = tpu.dynamic_rotate %6#1 by %c64_i32_8 dim 1 : vector<1x128xf32>, i32 -> vector<1x128xf32>
    %14 = arith.addf %10, %13 : vector<1x128xf32>
    %c96_i32 = arith.constant 96 : i32
    %15 = tpu.dynamic_rotate %6#0 by %c96_i32 dim 1 : vector<1x128xf32>, i32 -> vector<1x128xf32>
    %16 = arith.addf %12, %15 : vector<1x128xf32>
    %c96_i32_9 = arith.constant 96 : i32
    %17 = tpu.dynamic_rotate %6#1 by %c96_i32_9 dim 1 : vector<1x128xf32>, i32 -> vector<1x128xf32>
    %18 = arith.addf %14, %17 : vector<1x128xf32>
    %cst_10 = arith.constant 1.22070313E-4 : f32
    %19 = vector.broadcast %cst_10 : f32 to vector<1x128xf32>
    %20 = arith.mulf %16, %19 : vector<1x128xf32>
    %cst_11 = arith.constant 1.22070313E-4 : f32
    %21 = vector.broadcast %cst_11 : f32 to vector<1x128xf32>
    %22 = arith.mulf %18, %21 : vector<1x128xf32>
    %23 = arith.mulf %20, %20 : vector<1x128xf32>
    %24 = arith.subf %22, %23 : vector<1x128xf32>
    %cst_12 = arith.constant 0.000000e+00 : f32
    %25 = vector.broadcast %cst_12 : f32 to vector<1x128xf32>
    %26 = arith.maximumf %24, %25 : vector<1x128xf32>
    %c0_13 = arith.constant 0 : index
    %c0_14 = arith.constant 0 : index
    %27 = vector.load %arg3[%c0_13, %c0_14] : memref<1x128xf32, #tpu.memory_space<vmem>>, vector<1x128xf32>
    %cst_15 = arith.constant 9.99999974E-6 : f32
    %28 = vector.broadcast %cst_15 : f32 to vector<1x128xf32>
    %29 = arith.addf %26, %28 : vector<1x128xf32>
    %30 = math.rsqrt %29 : vector<1x128xf32>
    %31 = arith.mulf %27, %30 : vector<1x128xf32>
    %c0_16 = arith.constant 0 : index
    %c0_17 = arith.constant 0 : index
    %32 = vector.load %arg4[%c0_16, %c0_17] : memref<1x128xf32, #tpu.memory_space<vmem>>, vector<1x128xf32>
    %33 = arith.mulf %20, %31 : vector<1x128xf32>
    %34 = arith.subf %32, %33 : vector<1x128xf32>
    %c0_i32_18 = arith.constant 0 : i32
    %c4_i32 = arith.constant 4 : i32
    %35 = arith.addi %c0_i32_18, %c4_i32 : i32
    %c1_i32_19 = arith.constant 1 : i32
    scf.for %arg7 = %c0_i32_18 to %35 step %c1_i32_19  : i32 {
      %c64_i32_21 = arith.constant 64 : i32
      %36 = arith.muli %arg7, %c64_i32_21 : i32
      %37 = tpu.assume_multiple %36, 64 : i32
      %cst_22 = arith.constant 0xFF800000 : f32
      %38 = vector.broadcast %cst_22 : f32 to vector<64x128xf32>
      %c0_i32_23 = arith.constant 0 : i32
      %39 = arith.addi %c0_i32_23, %37 : i32
      %40 = arith.index_cast %39 : i32 to index
      %c0_24 = arith.constant 0 : index
      %41 = vector.load %arg6[%40, %c0_24] : memref<2048x128xf32, #tpu.memory_space<vmem>>, vector<64x128xf32>
      %42 = vector.broadcast %31 : vector<1x128xf32> to vector<64x128xf32>
      %43 = arith.mulf %41, %42 : vector<64x128xf32>
      %44 = vector.broadcast %34 : vector<1x128xf32> to vector<64x128xf32>
      %45 = arith.addf %43, %44 : vector<64x128xf32>
      %cst_25 = arith.constant 0.000000e+00 : f32
      %46 = vector.broadcast %cst_25 : f32 to vector<64x128xf32>
      %47 = arith.maximumf %45, %46 : vector<64x128xf32>
      %48 = arith.maximumf %38, %47 : vector<64x128xf32>
      %c256_i32 = arith.constant 256 : i32
      %49 = arith.addi %c256_i32, %37 : i32
      %50 = arith.index_cast %49 : i32 to index
      %c0_26 = arith.constant 0 : index
      %51 = vector.load %arg6[%50, %c0_26] : memref<2048x128xf32, #tpu.memory_space<vmem>>, vector<64x128xf32>
      %52 = vector.broadcast %31 : vector<1x128xf32> to vector<64x128xf32>
      %53 = arith.mulf %51, %52 : vector<64x128xf32>
      %54 = vector.broadcast %34 : vector<1x128xf32> to vector<64x128xf32>
      %55 = arith.addf %53, %54 : vector<64x128xf32>
      %cst_27 = arith.constant 0.000000e+00 : f32
      %56 = vector.broadcast %cst_27 : f32 to vector<64x128xf32>
      %57 = arith.maximumf %55, %56 : vector<64x128xf32>
      %58 = arith.maximumf %48, %57 : vector<64x128xf32>
      %c512_i32 = arith.constant 512 : i32
      %59 = arith.addi %c512_i32, %37 : i32
      %60 = arith.index_cast %59 : i32 to index
      %c0_28 = arith.constant 0 : index
      %61 = vector.load %arg6[%60, %c0_28] : memref<2048x128xf32, #tpu.memory_space<vmem>>, vector<64x128xf32>
      %62 = vector.broadcast %31 : vector<1x128xf32> to vector<64x128xf32>
      %63 = arith.mulf %61, %62 : vector<64x128xf32>
      %64 = vector.broadcast %34 : vector<1x128xf32> to vector<64x128xf32>
      %65 = arith.addf %63, %64 : vector<64x128xf32>
      %cst_29 = arith.constant 0.000000e+00 : f32
      %66 = vector.broadcast %cst_29 : f32 to vector<64x128xf32>
      %67 = arith.maximumf %65, %66 : vector<64x128xf32>
      %68 = arith.maximumf %58, %67 : vector<64x128xf32>
      %c768_i32 = arith.constant 768 : i32
      %69 = arith.addi %c768_i32, %37 : i32
      %70 = arith.index_cast %69 : i32 to index
      %c0_30 = arith.constant 0 : index
      %71 = vector.load %arg6[%70, %c0_30] : memref<2048x128xf32, #tpu.memory_space<vmem>>, vector<64x128xf32>
      %72 = vector.broadcast %31 : vector<1x128xf32> to vector<64x128xf32>
      %73 = arith.mulf %71, %72 : vector<64x128xf32>
      %74 = vector.broadcast %34 : vector<1x128xf32> to vector<64x128xf32>
      %75 = arith.addf %73, %74 : vector<64x128xf32>
      %cst_31 = arith.constant 0.000000e+00 : f32
      %76 = vector.broadcast %cst_31 : f32 to vector<64x128xf32>
      %77 = arith.maximumf %75, %76 : vector<64x128xf32>
      %78 = arith.maximumf %68, %77 : vector<64x128xf32>
      %c1024_i32 = arith.constant 1024 : i32
      %79 = arith.addi %c1024_i32, %37 : i32
      %80 = arith.index_cast %79 : i32 to index
      %c0_32 = arith.constant 0 : index
      %81 = vector.load %arg6[%80, %c0_32] : memref<2048x128xf32, #tpu.memory_space<vmem>>, vector<64x128xf32>
      %82 = vector.broadcast %31 : vector<1x128xf32> to vector<64x128xf32>
      %83 = arith.mulf %81, %82 : vector<64x128xf32>
      %84 = vector.broadcast %34 : vector<1x128xf32> to vector<64x128xf32>
      %85 = arith.addf %83, %84 : vector<64x128xf32>
      %cst_33 = arith.constant 0.000000e+00 : f32
      %86 = vector.broadcast %cst_33 : f32 to vector<64x128xf32>
      %87 = arith.maximumf %85, %86 : vector<64x128xf32>
      %88 = arith.maximumf %78, %87 : vector<64x128xf32>
      %c1280_i32 = arith.constant 1280 : i32
      %89 = arith.addi %c1280_i32, %37 : i32
      %90 = arith.index_cast %89 : i32 to index
      %c0_34 = arith.constant 0 : index
      %91 = vector.load %arg6[%90, %c0_34] : memref<2048x128xf32, #tpu.memory_space<vmem>>, vector<64x128xf32>
      %92 = vector.broadcast %31 : vector<1x128xf32> to vector<64x128xf32>
      %93 = arith.mulf %91, %92 : vector<64x128xf32>
      %94 = vector.broadcast %34 : vector<1x128xf32> to vector<64x128xf32>
      %95 = arith.addf %93, %94 : vector<64x128xf32>
      %cst_35 = arith.constant 0.000000e+00 : f32
      %96 = vector.broadcast %cst_35 : f32 to vector<64x128xf32>
      %97 = arith.maximumf %95, %96 : vector<64x128xf32>
      %98 = arith.maximumf %88, %97 : vector<64x128xf32>
      %c1536_i32 = arith.constant 1536 : i32
      %99 = arith.addi %c1536_i32, %37 : i32
      %100 = arith.index_cast %99 : i32 to index
      %c0_36 = arith.constant 0 : index
      %101 = vector.load %arg6[%100, %c0_36] : memref<2048x128xf32, #tpu.memory_space<vmem>>, vector<64x128xf32>
      %102 = vector.broadcast %31 : vector<1x128xf32> to vector<64x128xf32>
      %103 = arith.mulf %101, %102 : vector<64x128xf32>
      %104 = vector.broadcast %34 : vector<1x128xf32> to vector<64x128xf32>
      %105 = arith.addf %103, %104 : vector<64x128xf32>
      %cst_37 = arith.constant 0.000000e+00 : f32
      %106 = vector.broadcast %cst_37 : f32 to vector<64x128xf32>
      %107 = arith.maximumf %105, %106 : vector<64x128xf32>
      %108 = arith.maximumf %98, %107 : vector<64x128xf32>
      %c1792_i32 = arith.constant 1792 : i32
      %109 = arith.addi %c1792_i32, %37 : i32
      %110 = arith.index_cast %109 : i32 to index
      %c0_38 = arith.constant 0 : index
      %111 = vector.load %arg6[%110, %c0_38] : memref<2048x128xf32, #tpu.memory_space<vmem>>, vector<64x128xf32>
      %112 = vector.broadcast %31 : vector<1x128xf32> to vector<64x128xf32>
      %113 = arith.mulf %111, %112 : vector<64x128xf32>
      %114 = vector.broadcast %34 : vector<1x128xf32> to vector<64x128xf32>
      %115 = arith.addf %113, %114 : vector<64x128xf32>
      %cst_39 = arith.constant 0.000000e+00 : f32
      %116 = vector.broadcast %cst_39 : f32 to vector<64x128xf32>
      %117 = arith.maximumf %115, %116 : vector<64x128xf32>
      %118 = arith.maximumf %108, %117 : vector<64x128xf32>
      %119 = arith.index_cast %37 : i32 to index
      %c0_40 = arith.constant 0 : index
      %120 = vector.load %arg5[%119, %c0_40] : memref<256x128xf32, #tpu.memory_space<vmem>>, vector<64x128xf32>
      tpu.vector_store %arg5[%119, %c0_40], %118 {strides = array<i32>} : memref<256x128xf32, #tpu.memory_space<vmem>>, vector<64x128xf32>,
    }
    %c4_i32_20 = arith.constant 4 : i32
    return
  }
  func.func @transform_0(%arg0: i32) -> (i32, i32) {
    %c0_i32 = arith.constant 0 : i32
    %c0_i32_0 = arith.constant 0 : i32
    %c0_i32_1 = arith.constant 0 : i32
    return %c0_i32, %c0_i32_0 : i32, i32
  }
  func.func @transform_1(%arg0: i32) -> (i32, i32) {
    %c0_i32 = arith.constant 0 : i32
    %c0_i32_0 = arith.constant 0 : i32
    %c0_i32_1 = arith.constant 0 : i32
    return %c0_i32, %c0_i32_0 : i32, i32
  }
  func.func @transform_2(%arg0: i32) -> (i32, i32) {
    %c0_i32 = arith.constant 0 : i32
    %c0_i32_0 = arith.constant 0 : i32
    %c0_i32_1 = arith.constant 0 : i32
    return %c0_i32, %c0_i32_0 : i32, i32
  }
  func.func @transform_3(%arg0: i32) -> (i32, i32) {
    %c0_i32 = arith.constant 0 : i32
    %c0_i32_0 = arith.constant 0 : i32
    %c0_i32_1 = arith.constant 0 : i32
    return %c0_i32, %c0_i32_0 : i32, i32
  }
  func.func @transform_4(%arg0: i32) -> (i32, i32) {
    %c0_i32 = arith.constant 0 : i32
    %c0_i32_0 = arith.constant 0 : i32
    %c0_i32_1 = arith.constant 0 : i32
    return %c0_i32, %c0_i32_0 : i32, i32
  }
}

module attributes {stable_mosaic.version = 11 : i64} {
  func.func @kernel(%arg0: i32, %arg1: memref<512x1728xbf16, #tpu.memory_space<vmem>>, %arg2: memref<1728x128xbf16, #tpu.memory_space<vmem>>, %arg3: memref<1x128xf32, #tpu.memory_space<vmem>>, %arg4: memref<1x128xf32, #tpu.memory_space<vmem>>, %arg5: memref<64x128xf32, #tpu.memory_space<vmem>>, %arg6: memref<512x128xf32, #tpu.memory_space<vmem>>) attributes {dimension_semantics = [#tpu.dimension_semantics<arbitrary>], iteration_bounds = array<i64: 1>, scalar_prefetch = 0 : i64, scratch_operands = 1 : i64, tpu.core_type = #tpu.core_type<tc>, window_params = [{pipeline_mode = #tpu.pipeline_mode<synchronous>, transform_indices = @transform_0, window_bounds = array<i64: 512, 1728>}, {pipeline_mode = #tpu.pipeline_mode<synchronous>, transform_indices = @transform_1, window_bounds = array<i64: 1728, 128>}, {pipeline_mode = #tpu.pipeline_mode<synchronous>, transform_indices = @transform_2, window_bounds = array<i64: 1, 128>}, {pipeline_mode = #tpu.pipeline_mode<synchronous>, transform_indices = @transform_3, window_bounds = array<i64: 1, 128>}, {pipeline_mode = #tpu.pipeline_mode<synchronous>, transform_indices = @transform_4, window_bounds = array<i64: 64, 128>}]} {
    %c0 = arith.constant 0 : index
    %c0_0 = arith.constant 0 : index
    %0 = vector.load %arg1[%c0, %c0_0] : memref<512x1728xbf16, #tpu.memory_space<vmem>>, vector<512x1728xbf16>
    %c0_1 = arith.constant 0 : index
    %c0_2 = arith.constant 0 : index
    %1 = vector.load %arg2[%c0_1, %c0_2] : memref<1728x128xbf16, #tpu.memory_space<vmem>>, vector<1728x128xbf16>
    %cst = arith.constant dense<0.000000e+00> : vector<512x128xf32>
    %2 = tpu.matmul %0, %1, %cst {dimension_numbers = #tpu.dot_dimension_numbers<[1], [0], [0], [1], [0, 0, 1, 1], [], []>} : vector<512x1728xbf16>, vector<1728x128xbf16>, vector<512x128xf32> -> vector<512x128xf32>
    %c0_3 = arith.constant 0 : index
    %c0_4 = arith.constant 0 : index
    %3 = vector.load %arg6[%c0_3, %c0_4] : memref<512x128xf32, #tpu.memory_space<vmem>>, vector<512x128xf32>
    tpu.vector_store %arg6[%c0_3, %c0_4], %2 {strides = array<i32>} : memref<512x128xf32, #tpu.memory_space<vmem>>, vector<512x128xf32>,
    %cst_5 = arith.constant 0.000000e+00 : f32
    %4 = vector.broadcast %cst_5 : f32 to vector<1x128xf32>
    %c0_i32 = arith.constant 0 : i32
    %c4_i32 = arith.constant 4 : i32
    %5 = arith.addi %c0_i32, %c4_i32 : i32
    %c1_i32 = arith.constant 1 : i32
    %6:2 = scf.for %arg7 = %c0_i32 to %5 step %c1_i32 iter_args(%arg8 = %4, %arg9 = %4) -> (vector<1x128xf32>, vector<1x128xf32>)  : i32 {
      %c128_i32_39 = arith.constant 128 : i32
      %112 = arith.muli %arg7, %c128_i32_39 : i32
      %113 = tpu.assume_multiple %112, 128 : i32
      %114 = arith.index_cast %113 : i32 to index
      %c0_40 = arith.constant 0 : index
      %115 = vector.load %arg6[%114, %c0_40] : memref<512x128xf32, #tpu.memory_space<vmem>>, vector<128x128xf32>
      %cst_41 = arith.constant dense<0.000000e+00> : vector<128xf32>
      %116 = vector.multi_reduction <add>, %115, %cst_41 [0] : vector<128x128xf32> to vector<128xf32>
      %117 = vector.shape_cast %116 : vector<128xf32> to vector<1x128xf32>
      %118 = arith.addf %arg8, %117 : vector<1x128xf32>
      %119 = arith.mulf %115, %115 : vector<128x128xf32>
      %cst_42 = arith.constant dense<0.000000e+00> : vector<128xf32>
      %120 = vector.multi_reduction <add>, %119, %cst_42 [0] : vector<128x128xf32> to vector<128xf32>
      %121 = vector.shape_cast %120 : vector<128xf32> to vector<1x128xf32>
      %122 = arith.addf %arg9, %121 : vector<1x128xf32>
      scf.yield %118, %122 : vector<1x128xf32>, vector<1x128xf32>
    }
    %c4_i32_6 = arith.constant 4 : i32
    %c64_i32 = arith.constant 64 : i32
    %7 = tpu.dynamic_rotate %6#0 by %c64_i32 dim 1 : vector<1x128xf32>, i32 -> vector<1x128xf32>
    %8 = arith.addf %6#0, %7 : vector<1x128xf32>
    %c64_i32_7 = arith.constant 64 : i32
    %9 = tpu.dynamic_rotate %6#1 by %c64_i32_7 dim 1 : vector<1x128xf32>, i32 -> vector<1x128xf32>
    %10 = arith.addf %6#1, %9 : vector<1x128xf32>
    %cst_8 = arith.constant 9.765625E-4 : f32
    %11 = vector.broadcast %cst_8 : f32 to vector<1x128xf32>
    %12 = arith.mulf %8, %11 : vector<1x128xf32>
    %cst_9 = arith.constant 9.765625E-4 : f32
    %13 = vector.broadcast %cst_9 : f32 to vector<1x128xf32>
    %14 = arith.mulf %10, %13 : vector<1x128xf32>
    %15 = arith.mulf %12, %12 : vector<1x128xf32>
    %16 = arith.subf %14, %15 : vector<1x128xf32>
    %cst_10 = arith.constant 0.000000e+00 : f32
    %17 = vector.broadcast %cst_10 : f32 to vector<1x128xf32>
    %18 = arith.maximumf %16, %17 : vector<1x128xf32>
    %c0_11 = arith.constant 0 : index
    %c0_12 = arith.constant 0 : index
    %19 = vector.load %arg3[%c0_11, %c0_12] : memref<1x128xf32, #tpu.memory_space<vmem>>, vector<1x128xf32>
    %cst_13 = arith.constant 9.99999974E-6 : f32
    %20 = vector.broadcast %cst_13 : f32 to vector<1x128xf32>
    %21 = arith.addf %18, %20 : vector<1x128xf32>
    %22 = math.rsqrt %21 : vector<1x128xf32>
    %23 = arith.mulf %19, %22 : vector<1x128xf32>
    %c0_14 = arith.constant 0 : index
    %c0_15 = arith.constant 0 : index
    %24 = vector.load %arg4[%c0_14, %c0_15] : memref<1x128xf32, #tpu.memory_space<vmem>>, vector<1x128xf32>
    %25 = arith.mulf %12, %23 : vector<1x128xf32>
    %26 = arith.subf %24, %25 : vector<1x128xf32>
    %c0_i32_16 = arith.constant 0 : i32
    %c64_i32_17 = arith.constant 64 : i32
    %27 = arith.muli %c0_i32_16, %c64_i32_17 : i32
    %28 = tpu.assume_multiple %27, 64 : i32
    %cst_18 = arith.constant 0xFF800000 : f32
    %29 = vector.broadcast %cst_18 : f32 to vector<64x128xf32>
    %c0_i32_19 = arith.constant 0 : i32
    %30 = arith.addi %c0_i32_19, %28 : i32
    %31 = arith.index_cast %30 : i32 to index
    %c0_20 = arith.constant 0 : index
    %32 = vector.load %arg6[%31, %c0_20] : memref<512x128xf32, #tpu.memory_space<vmem>>, vector<64x128xf32>
    %33 = vector.broadcast %23 : vector<1x128xf32> to vector<64x128xf32>
    %34 = arith.mulf %32, %33 : vector<64x128xf32>
    %35 = vector.broadcast %26 : vector<1x128xf32> to vector<64x128xf32>
    %36 = arith.addf %34, %35 : vector<64x128xf32>
    %cst_21 = arith.constant 0.000000e+00 : f32
    %37 = vector.broadcast %cst_21 : f32 to vector<64x128xf32>
    %38 = arith.maximumf %36, %37 : vector<64x128xf32>
    %39 = arith.maximumf %29, %38 : vector<64x128xf32>
    %c64_i32_22 = arith.constant 64 : i32
    %40 = arith.addi %c64_i32_22, %28 : i32
    %41 = arith.index_cast %40 : i32 to index
    %c0_23 = arith.constant 0 : index
    %42 = vector.load %arg6[%41, %c0_23] : memref<512x128xf32, #tpu.memory_space<vmem>>, vector<64x128xf32>
    %43 = vector.broadcast %23 : vector<1x128xf32> to vector<64x128xf32>
    %44 = arith.mulf %42, %43 : vector<64x128xf32>
    %45 = vector.broadcast %26 : vector<1x128xf32> to vector<64x128xf32>
    %46 = arith.addf %44, %45 : vector<64x128xf32>
    %cst_24 = arith.constant 0.000000e+00 : f32
    %47 = vector.broadcast %cst_24 : f32 to vector<64x128xf32>
    %48 = arith.maximumf %46, %47 : vector<64x128xf32>
    %49 = arith.maximumf %39, %48 : vector<64x128xf32>
    %c128_i32 = arith.constant 128 : i32
    %50 = arith.addi %c128_i32, %28 : i32
    %51 = arith.index_cast %50 : i32 to index
    %c0_25 = arith.constant 0 : index
    %52 = vector.load %arg6[%51, %c0_25] : memref<512x128xf32, #tpu.memory_space<vmem>>, vector<64x128xf32>
    %53 = vector.broadcast %23 : vector<1x128xf32> to vector<64x128xf32>
    %54 = arith.mulf %52, %53 : vector<64x128xf32>
    %55 = vector.broadcast %26 : vector<1x128xf32> to vector<64x128xf32>
    %56 = arith.addf %54, %55 : vector<64x128xf32>
    %cst_26 = arith.constant 0.000000e+00 : f32
    %57 = vector.broadcast %cst_26 : f32 to vector<64x128xf32>
    %58 = arith.maximumf %56, %57 : vector<64x128xf32>
    %59 = arith.maximumf %49, %58 : vector<64x128xf32>
    %c192_i32 = arith.constant 192 : i32
    %60 = arith.addi %c192_i32, %28 : i32
    %61 = arith.index_cast %60 : i32 to index
    %c0_27 = arith.constant 0 : index
    %62 = vector.load %arg6[%61, %c0_27] : memref<512x128xf32, #tpu.memory_space<vmem>>, vector<64x128xf32>
    %63 = vector.broadcast %23 : vector<1x128xf32> to vector<64x128xf32>
    %64 = arith.mulf %62, %63 : vector<64x128xf32>
    %65 = vector.broadcast %26 : vector<1x128xf32> to vector<64x128xf32>
    %66 = arith.addf %64, %65 : vector<64x128xf32>
    %cst_28 = arith.constant 0.000000e+00 : f32
    %67 = vector.broadcast %cst_28 : f32 to vector<64x128xf32>
    %68 = arith.maximumf %66, %67 : vector<64x128xf32>
    %69 = arith.maximumf %59, %68 : vector<64x128xf32>
    %c256_i32 = arith.constant 256 : i32
    %70 = arith.addi %c256_i32, %28 : i32
    %71 = arith.index_cast %70 : i32 to index
    %c0_29 = arith.constant 0 : index
    %72 = vector.load %arg6[%71, %c0_29] : memref<512x128xf32, #tpu.memory_space<vmem>>, vector<64x128xf32>
    %73 = vector.broadcast %23 : vector<1x128xf32> to vector<64x128xf32>
    %74 = arith.mulf %72, %73 : vector<64x128xf32>
    %75 = vector.broadcast %26 : vector<1x128xf32> to vector<64x128xf32>
    %76 = arith.addf %74, %75 : vector<64x128xf32>
    %cst_30 = arith.constant 0.000000e+00 : f32
    %77 = vector.broadcast %cst_30 : f32 to vector<64x128xf32>
    %78 = arith.maximumf %76, %77 : vector<64x128xf32>
    %79 = arith.maximumf %69, %78 : vector<64x128xf32>
    %c320_i32 = arith.constant 320 : i32
    %80 = arith.addi %c320_i32, %28 : i32
    %81 = arith.index_cast %80 : i32 to index
    %c0_31 = arith.constant 0 : index
    %82 = vector.load %arg6[%81, %c0_31] : memref<512x128xf32, #tpu.memory_space<vmem>>, vector<64x128xf32>
    %83 = vector.broadcast %23 : vector<1x128xf32> to vector<64x128xf32>
    %84 = arith.mulf %82, %83 : vector<64x128xf32>
    %85 = vector.broadcast %26 : vector<1x128xf32> to vector<64x128xf32>
    %86 = arith.addf %84, %85 : vector<64x128xf32>
    %cst_32 = arith.constant 0.000000e+00 : f32
    %87 = vector.broadcast %cst_32 : f32 to vector<64x128xf32>
    %88 = arith.maximumf %86, %87 : vector<64x128xf32>
    %89 = arith.maximumf %79, %88 : vector<64x128xf32>
    %c384_i32 = arith.constant 384 : i32
    %90 = arith.addi %c384_i32, %28 : i32
    %91 = arith.index_cast %90 : i32 to index
    %c0_33 = arith.constant 0 : index
    %92 = vector.load %arg6[%91, %c0_33] : memref<512x128xf32, #tpu.memory_space<vmem>>, vector<64x128xf32>
    %93 = vector.broadcast %23 : vector<1x128xf32> to vector<64x128xf32>
    %94 = arith.mulf %92, %93 : vector<64x128xf32>
    %95 = vector.broadcast %26 : vector<1x128xf32> to vector<64x128xf32>
    %96 = arith.addf %94, %95 : vector<64x128xf32>
    %cst_34 = arith.constant 0.000000e+00 : f32
    %97 = vector.broadcast %cst_34 : f32 to vector<64x128xf32>
    %98 = arith.maximumf %96, %97 : vector<64x128xf32>
    %99 = arith.maximumf %89, %98 : vector<64x128xf32>
    %c448_i32 = arith.constant 448 : i32
    %100 = arith.addi %c448_i32, %28 : i32
    %101 = arith.index_cast %100 : i32 to index
    %c0_35 = arith.constant 0 : index
    %102 = vector.load %arg6[%101, %c0_35] : memref<512x128xf32, #tpu.memory_space<vmem>>, vector<64x128xf32>
    %103 = vector.broadcast %23 : vector<1x128xf32> to vector<64x128xf32>
    %104 = arith.mulf %102, %103 : vector<64x128xf32>
    %105 = vector.broadcast %26 : vector<1x128xf32> to vector<64x128xf32>
    %106 = arith.addf %104, %105 : vector<64x128xf32>
    %cst_36 = arith.constant 0.000000e+00 : f32
    %107 = vector.broadcast %cst_36 : f32 to vector<64x128xf32>
    %108 = arith.maximumf %106, %107 : vector<64x128xf32>
    %109 = arith.maximumf %99, %108 : vector<64x128xf32>
    %110 = arith.index_cast %28 : i32 to index
    %c0_37 = arith.constant 0 : index
    %111 = vector.load %arg5[%110, %c0_37] : memref<64x128xf32, #tpu.memory_space<vmem>>, vector<64x128xf32>
    tpu.vector_store %arg5[%110, %c0_37], %109 {strides = array<i32>} : memref<64x128xf32, #tpu.memory_space<vmem>>, vector<64x128xf32>,
    %c1_i32_38 = arith.constant 1 : i32
    return
  }
  func.func @transform_0(%arg0: i32) -> (i32, i32) {
    %c0_i32 = arith.constant 0 : i32
    %c0_i32_0 = arith.constant 0 : i32
    %c0_i32_1 = arith.constant 0 : i32
    return %c0_i32, %c0_i32_0 : i32, i32
  }
  func.func @transform_1(%arg0: i32) -> (i32, i32) {
    %c0_i32 = arith.constant 0 : i32
    %c0_i32_0 = arith.constant 0 : i32
    %c0_i32_1 = arith.constant 0 : i32
    return %c0_i32, %c0_i32_0 : i32, i32
  }
  func.func @transform_2(%arg0: i32) -> (i32, i32) {
    %c0_i32 = arith.constant 0 : i32
    %c0_i32_0 = arith.constant 0 : i32
    %c0_i32_1 = arith.constant 0 : i32
    return %c0_i32, %c0_i32_0 : i32, i32
  }
  func.func @transform_3(%arg0: i32) -> (i32, i32) {
    %c0_i32 = arith.constant 0 : i32
    %c0_i32_0 = arith.constant 0 : i32
    %c0_i32_1 = arith.constant 0 : i32
    return %c0_i32, %c0_i32_0 : i32, i32
  }
  func.func @transform_4(%arg0: i32) -> (i32, i32) {
    %c0_i32 = arith.constant 0 : i32
    %c0_i32_0 = arith.constant 0 : i32
    %c0_i32_1 = arith.constant 0 : i32
    return %c0_i32, %c0_i32_0 : i32, i32
  }
}

module attributes {stable_mosaic.version = 11 : i64} {
  func.func @kernel(%arg0: i32, %arg1: memref<128x1728xbf16, #tpu.memory_space<vmem>>, %arg2: memref<1728x128xbf16, #tpu.memory_space<vmem>>, %arg3: memref<1x128xf32, #tpu.memory_space<vmem>>, %arg4: memref<1x128xf32, #tpu.memory_space<vmem>>, %arg5: memref<128x10xbf16, #tpu.memory_space<vmem>>, %arg6: memref<1x10xf32, #tpu.memory_space<vmem>>, %arg7: memref<2x10xf32, #tpu.memory_space<vmem>>) attributes {dimension_semantics = [#tpu.dimension_semantics<arbitrary>], iteration_bounds = array<i64: 1>, scalar_prefetch = 0 : i64, scratch_operands = 0 : i64, tpu.core_type = #tpu.core_type<tc>, window_params = [{pipeline_mode = #tpu.pipeline_mode<synchronous>, transform_indices = @transform_0, window_bounds = array<i64: 128, 1728>}, {pipeline_mode = #tpu.pipeline_mode<synchronous>, transform_indices = @transform_1, window_bounds = array<i64: 1728, 128>}, {pipeline_mode = #tpu.pipeline_mode<synchronous>, transform_indices = @transform_2, window_bounds = array<i64: 1, 128>}, {pipeline_mode = #tpu.pipeline_mode<synchronous>, transform_indices = @transform_3, window_bounds = array<i64: 1, 128>}, {pipeline_mode = #tpu.pipeline_mode<synchronous>, transform_indices = @transform_4, window_bounds = array<i64: 128, 10>}, {pipeline_mode = #tpu.pipeline_mode<synchronous>, transform_indices = @transform_5, window_bounds = array<i64: 1, 10>}, {pipeline_mode = #tpu.pipeline_mode<synchronous>, transform_indices = @transform_6, window_bounds = array<i64: 2, 10>}]} {
    %c0 = arith.constant 0 : index
    %c0_0 = arith.constant 0 : index
    %0 = vector.load %arg1[%c0, %c0_0] : memref<128x1728xbf16, #tpu.memory_space<vmem>>, vector<128x1728xbf16>
    %c0_1 = arith.constant 0 : index
    %c0_2 = arith.constant 0 : index
    %1 = vector.load %arg2[%c0_1, %c0_2] : memref<1728x128xbf16, #tpu.memory_space<vmem>>, vector<1728x128xbf16>
    %cst = arith.constant dense<0.000000e+00> : vector<128x128xf32>
    %2 = tpu.matmul %0, %1, %cst {dimension_numbers = #tpu.dot_dimension_numbers<[1], [0], [0], [1], [0, 0, 1, 1], [], []>} : vector<128x1728xbf16>, vector<1728x128xbf16>, vector<128x128xf32> -> vector<128x128xf32>
    %cst_3 = arith.constant dense<0.000000e+00> : vector<128xf32>
    %3 = vector.multi_reduction <add>, %2, %cst_3 [0] : vector<128x128xf32> to vector<128xf32>
    %4 = vector.shape_cast %3 : vector<128xf32> to vector<1x128xf32>
    %5 = arith.mulf %2, %2 : vector<128x128xf32>
    %cst_4 = arith.constant dense<0.000000e+00> : vector<128xf32>
    %6 = vector.multi_reduction <add>, %5, %cst_4 [0] : vector<128x128xf32> to vector<128xf32>
    %7 = vector.shape_cast %6 : vector<128xf32> to vector<1x128xf32>
    %cst_5 = arith.constant 7.812500e-03 : f32
    %8 = vector.broadcast %cst_5 : f32 to vector<1x128xf32>
    %9 = arith.mulf %4, %8 : vector<1x128xf32>
    %cst_6 = arith.constant 7.812500e-03 : f32
    %10 = vector.broadcast %cst_6 : f32 to vector<1x128xf32>
    %11 = arith.mulf %7, %10 : vector<1x128xf32>
    %12 = arith.mulf %9, %9 : vector<1x128xf32>
    %13 = arith.subf %11, %12 : vector<1x128xf32>
    %cst_7 = arith.constant 0.000000e+00 : f32
    %14 = vector.broadcast %cst_7 : f32 to vector<1x128xf32>
    %15 = arith.maximumf %13, %14 : vector<1x128xf32>
    %c0_8 = arith.constant 0 : index
    %c0_9 = arith.constant 0 : index
    %16 = vector.load %arg3[%c0_8, %c0_9] : memref<1x128xf32, #tpu.memory_space<vmem>>, vector<1x128xf32>
    %cst_10 = arith.constant 9.99999974E-6 : f32
    %17 = vector.broadcast %cst_10 : f32 to vector<1x128xf32>
    %18 = arith.addf %15, %17 : vector<1x128xf32>
    %19 = math.rsqrt %18 : vector<1x128xf32>
    %20 = arith.mulf %16, %19 : vector<1x128xf32>
    %c0_11 = arith.constant 0 : index
    %c0_12 = arith.constant 0 : index
    %21 = vector.load %arg4[%c0_11, %c0_12] : memref<1x128xf32, #tpu.memory_space<vmem>>, vector<1x128xf32>
    %22 = arith.mulf %9, %20 : vector<1x128xf32>
    %23 = arith.subf %21, %22 : vector<1x128xf32>
    %24 = vector.broadcast %20 : vector<1x128xf32> to vector<128x128xf32>
    %25 = arith.mulf %2, %24 : vector<128x128xf32>
    %26 = vector.broadcast %23 : vector<1x128xf32> to vector<128x128xf32>
    %27 = arith.addf %25, %26 : vector<128x128xf32>
    %cst_13 = arith.constant 0.000000e+00 : f32
    %28 = vector.broadcast %cst_13 : f32 to vector<128x128xf32>
    %29 = arith.maximumf %27, %28 : vector<128x128xf32>
    %cst_14 = arith.constant 0xFF800000 : f32
    %30 = vector.broadcast %cst_14 : f32 to vector<16x128xf32>
    %31 = vector.extract_strided_slice %29 {offsets = [0, 0], sizes = [16, 128], strides = [1, 1]} : vector<128x128xf32> to vector<16x128xf32>
    %32 = arith.maximumf %30, %31 : vector<16x128xf32>
    %33 = vector.extract_strided_slice %29 {offsets = [16, 0], sizes = [16, 128], strides = [1, 1]} : vector<128x128xf32> to vector<16x128xf32>
    %34 = arith.maximumf %32, %33 : vector<16x128xf32>
    %35 = vector.extract_strided_slice %29 {offsets = [32, 0], sizes = [16, 128], strides = [1, 1]} : vector<128x128xf32> to vector<16x128xf32>
    %36 = arith.maximumf %34, %35 : vector<16x128xf32>
    %37 = vector.extract_strided_slice %29 {offsets = [48, 0], sizes = [16, 128], strides = [1, 1]} : vector<128x128xf32> to vector<16x128xf32>
    %38 = arith.maximumf %36, %37 : vector<16x128xf32>
    %39 = vector.extract_strided_slice %29 {offsets = [64, 0], sizes = [16, 128], strides = [1, 1]} : vector<128x128xf32> to vector<16x128xf32>
    %40 = arith.maximumf %38, %39 : vector<16x128xf32>
    %41 = vector.extract_strided_slice %29 {offsets = [80, 0], sizes = [16, 128], strides = [1, 1]} : vector<128x128xf32> to vector<16x128xf32>
    %42 = arith.maximumf %40, %41 : vector<16x128xf32>
    %43 = vector.extract_strided_slice %29 {offsets = [96, 0], sizes = [16, 128], strides = [1, 1]} : vector<128x128xf32> to vector<16x128xf32>
    %44 = arith.maximumf %42, %43 : vector<16x128xf32>
    %45 = vector.extract_strided_slice %29 {offsets = [112, 0], sizes = [16, 128], strides = [1, 1]} : vector<128x128xf32> to vector<16x128xf32>
    %46 = arith.maximumf %44, %45 : vector<16x128xf32>
    %47 = vector.shape_cast %46 : vector<16x128xf32> to vector<2x8x128xf32>
    %cst_15 = arith.constant dense<0.000000e+00> : vector<2x128xf32>
    %48 = vector.multi_reduction <add>, %47, %cst_15 [1] : vector<2x8x128xf32> to vector<2x128xf32>
    %cst_16 = arith.constant 1.250000e-01 : f32
    %49 = vector.broadcast %cst_16 : f32 to vector<2x128xf32>
    %50 = arith.mulf %48, %49 : vector<2x128xf32>
    %51 = arith.truncf %50 : vector<2x128xf32> to vector<2x128xbf16>
    %c0_17 = arith.constant 0 : index
    %c0_18 = arith.constant 0 : index
    %52 = vector.load %arg5[%c0_17, %c0_18] : memref<128x10xbf16, #tpu.memory_space<vmem>>, vector<128x10xbf16>
    %cst_19 = arith.constant dense<0.000000e+00> : vector<2x10xf32>
    %53 = tpu.matmul %51, %52, %cst_19 {dimension_numbers = #tpu.dot_dimension_numbers<[1], [0], [0], [1], [0, 0, 1, 1], [], []>} : vector<2x128xbf16>, vector<128x10xbf16>, vector<2x10xf32> -> vector<2x10xf32>
    %c0_20 = arith.constant 0 : index
    %c0_21 = arith.constant 0 : index
    %54 = vector.load %arg6[%c0_20, %c0_21] : memref<1x10xf32, #tpu.memory_space<vmem>>, vector<1x10xf32>
    %55 = vector.broadcast %54 : vector<1x10xf32> to vector<2x10xf32>
    %56 = arith.addf %53, %55 : vector<2x10xf32>
    %c0_22 = arith.constant 0 : index
    %c0_23 = arith.constant 0 : index
    %57 = vector.load %arg7[%c0_22, %c0_23] : memref<2x10xf32, #tpu.memory_space<vmem>>, vector<2x10xf32>
    tpu.vector_store %arg7[%c0_22, %c0_23], %56 {strides = array<i32>} : memref<2x10xf32, #tpu.memory_space<vmem>>, vector<2x10xf32>,
    return
  }
  func.func @transform_0(%arg0: i32) -> (i32, i32) {
    %c0_i32 = arith.constant 0 : i32
    %c0_i32_0 = arith.constant 0 : i32
    %c0_i32_1 = arith.constant 0 : i32
    return %c0_i32, %c0_i32_0 : i32, i32
  }
  func.func @transform_1(%arg0: i32) -> (i32, i32) {
    %c0_i32 = arith.constant 0 : i32
    %c0_i32_0 = arith.constant 0 : i32
    %c0_i32_1 = arith.constant 0 : i32
    return %c0_i32, %c0_i32_0 : i32, i32
  }
  func.func @transform_2(%arg0: i32) -> (i32, i32) {
    %c0_i32 = arith.constant 0 : i32
    %c0_i32_0 = arith.constant 0 : i32
    %c0_i32_1 = arith.constant 0 : i32
    return %c0_i32, %c0_i32_0 : i32, i32
  }
  func.func @transform_3(%arg0: i32) -> (i32, i32) {
    %c0_i32 = arith.constant 0 : i32
    %c0_i32_0 = arith.constant 0 : i32
    %c0_i32_1 = arith.constant 0 : i32
    return %c0_i32, %c0_i32_0 : i32, i32
  }
  func.func @transform_4(%arg0: i32) -> (i32, i32) {
    %c0_i32 = arith.constant 0 : i32
    %c0_i32_0 = arith.constant 0 : i32
    %c0_i32_1 = arith.constant 0 : i32
    return %c0_i32, %c0_i32_0 : i32, i32
  }
  func.func @transform_5(%arg0: i32) -> (i32, i32) {
    %c0_i32 = arith.constant 0 : i32
    %c0_i32_0 = arith.constant 0 : i32
    %c0_i32_1 = arith.constant 0 : i32
    return %c0_i32, %c0_i32_0 : i32, i32
  }
  func.func @transform_6(%arg0: i32) -> (i32, i32) {
    %c0_i32 = arith.constant 0 : i32
    %c0_i32_0 = arith.constant 0 : i32
    %c0_i32_1 = arith.constant 0 : i32
    return %c0_i32, %c0_i32_0 : i32, i32
  }
}

</mosaic_0001>

<bundles_post_ra>
// kernel: mul.4
= control target key start
LH: loop header
LB: loop body
LE: loop exit
PB: predicated region body
PF: predicated region fallthrough
CT: control target
= control target key end

     0   :  { %vm136_vm0 = vcmask 261120   ;;  %s544_s0 = inlined_call_operand.vmem [shape: f32[3,3,3,4,32], index: 0, kind: input, shape index: {}]   ;;  %s545_s1 = inlined_call_operand.vmem [shape: f32[108,32], index: 1, kind: output, shape index: {}]  }
   0x1   :  { %v293_v0 = vld [vmem:[%s544_s0 + $0x68] sm:$0xf]  ;;  %v294_v1 = vld [vmem:[%s544_s0 + $0x64] sm:$0xf]  ;;  %v295_v2 = vld [vmem:[%s544_s0 + $0x60] sm:$0xf] }
   0x2   :  { %8 = vst [vmem:[#allocation0 + $0xd0] sm:$0xf] %v293_v0  ;;  %13 = vst [vmem:[#allocation0 + $0xc8] sm:$0xf] %v294_v1  ;;  %v296_v3 = vld [vmem:[%s544_s0 + $0x5c] sm:$0xf] }
   0x3   :  { %18 = vst [vmem:[#allocation0 + $0xc0] sm:$0xf] %v295_v2  ;;  %v297_v4 = vld [vmem:[%s544_s0 + $0x58] sm:$0xf]  ;;  %v298_v5 = vld [vmem:[%s544_s0 + $0x54] sm:$0xf] }
   0x4   :  { %23 = vst [vmem:[#allocation0 + $0xb8] sm:$0xf] %v296_v3  ;;  %28 = vst [vmem:[#allocation0 + $0xb0] sm:$0xf] %v297_v4  ;;  %v299_v6 = vld [vmem:[%s544_s0 + $0x50] sm:$0xf] }
   0x5   :  { %33 = vst [vmem:[#allocation0 + $0xa8] sm:$0xf] %v298_v5  ;;  %v300_v7 = vld [vmem:[%s544_s0 + $0x4c] sm:$0xf]  ;;  %v301_v8 = vld [vmem:[%s544_s0 + $0x48] sm:$0xf] }
   0x6   :  { %38 = vst [vmem:[#allocation0 + $0xa0] sm:$0xf] %v299_v6  ;;  %43 = vst [vmem:[#allocation0 + $0x98] sm:$0xf] %v300_v7  ;;  %v302_v9 = vld [vmem:[%s544_s0 + $0x44] sm:$0xf] }
   0x7   :  { %48 = vst [vmem:[#allocation0 + $0x90] sm:$0xf] %v301_v8  ;;  %v303_v10 = vld [vmem:[%s544_s0 + $0x40] sm:$0xf]  ;;  %v304_v11 = vld [vmem:[%s544_s0 + $0x3c] sm:$0xf] }
   0x8   :  { %53 = vst [vmem:[#allocation0 + $0x88] sm:$0xf] %v302_v9  ;;  %58 = vst [vmem:[#allocation0 + $0x80] sm:$0xf] %v303_v10  ;;  %v305_v12 = vld [vmem:[%s544_s0 + $0x38] sm:$0xf] }
   0x9   :  { %63 = vst [vmem:[#allocation0 + $0x78] sm:$0xf] %v304_v11  ;;  %v306_v13 = vld [vmem:[%s544_s0 + $0x34] sm:$0xf]  ;;  %v307_v14 = vld [vmem:[%s544_s0 + $0x30] sm:$0xf] }
   0xa   :  { %68 = vst [vmem:[#allocation0 + $0x70] sm:$0xf] %v305_v12  ;;  %73 = vst [vmem:[#allocation0 + $0x68] sm:$0xf] %v306_v13  ;;  %v308_v15 = vld [vmem:[%s544_s0 + $0x2c] sm:$0xf] }
   0xb   :  { %78 = vst [vmem:[#allocation0 + $0x60] sm:$0xf] %v307_v14  ;;  %v309_v16 = vld [vmem:[%s544_s0 + $0x28] sm:$0xf]  ;;  %v310_v17 = vld [vmem:[%s544_s0 + $0x24] sm:$0xf] }
   0xc   :  { %83 = vst [vmem:[#allocation0 + $0x58] sm:$0xf] %v308_v15  ;;  %88 = vst [vmem:[#allocation0 + $0x50] sm:$0xf] %v309_v16  ;;  %v311_v18 = vld [vmem:[%s544_s0 + $0x20] sm:$0xf] }
   0xd   :  { %93 = vst [vmem:[#allocation0 + $0x48] sm:$0xf] %v310_v17  ;;  %v312_v19 = vld [vmem:[%s544_s0 + $0x1c] sm:$0xf]  ;;  %v313_v20 = vld [vmem:[%s544_s0 + $0x18] sm:$0xf] }
   0xe   :  { %98 = vst [vmem:[#allocation0 + $0x40] sm:$0xf] %v311_v18  ;;  %103 = vst [vmem:[#allocation0 + $0x38] sm:$0xf] %v312_v19  ;;  %v314_v21 = vld [vmem:[%s544_s0 + $0x14] sm:$0xf] }
   0xf   :  { %108 = vst [vmem:[#allocation0 + $0x30] sm:$0xf] %v313_v20  ;;  %v315_v22 = vld [vmem:[%s544_s0 + $0x10] sm:$0xf]  ;;  %v316_v23 = vld [vmem:[%s544_s0 + $0xc] sm:$0xf] }
  0x10   :  { %113 = vst [vmem:[#allocation0 + $0x28] sm:$0xf] %v314_v21  ;;  %118 = vst [vmem:[#allocation0 + $0x20] sm:$0xf] %v315_v22  ;;  %v317_v24 = vld [vmem:[%s544_s0 + $0x8] sm:$0xf] }
  0x11   :  { %123 = vst [vmem:[#allocation0 + $0x18] sm:$0xf] %v316_v23  ;;  %v318_v25 = vld [vmem:[%s544_s0 + $0x4] sm:$0xf]  ;;  %v133_v26 = vld [vmem:[%s544_s0] sm:$0xf] }
  0x12   :  { %128 = vst [vmem:[#allocation0 + $0x10] sm:$0xf] %v317_v24  ;;  %132 = vst [vmem:[#allocation0 + $0x8] sm:$0xf] %v318_v25  ;;  %v239_v27 = vld [vmem:[#allocation0 + $0xa8] sm:$0xf]  }
  0x13   :  { %134 = vst [vmem:[#allocation0] sm:$0xf] %v133_v26  ;;  %v244_v28 = vld [vmem:[#allocation0 + $0xb0] sm:$0xf]   ;;  %v229_v30 = vld [vmem:[#allocation0 + $0x98] sm:$0xf]  }
  0x14   :  { %v224_v29 = vld [vmem:[#allocation0 + $0x90] sm:$0xf]   ;;  %v234_v31 = vld [vmem:[#allocation0 + $0xa0] sm:$0xf]   ;;  %339 = vst.msk [vmem:[%s545_s1 + $0x54] sm:$0xf] %vm136_vm0, %v239_v27  }
  0x15   :  { %340 = vst.msk [vmem:[%s545_s1 + $0x58] sm:$0xf] %vm136_vm0, %v244_v28   ;;  %v209_v32 = vld [vmem:[#allocation0 + $0x78] sm:$0xf]   ;;  %v214_v33 = vld [vmem:[#allocation0 + $0x80] sm:$0xf]  }
  0x16   :  { %v219_v34 = vld [vmem:[#allocation0 + $0x88] sm:$0xf]   ;;  %336 = vst.msk [vmem:[%s545_s1 + $0x48] sm:$0xf] %vm136_vm0, %v224_v29   ;;  %337 = vst.msk [vmem:[%s545_s1 + $0x4c] sm:$0xf] %vm136_vm0, %v229_v30  }
  0x17   :  { %338 = vst.msk [vmem:[%s545_s1 + $0x50] sm:$0xf] %vm136_vm0, %v234_v31   ;;  %v194_v35 = vld [vmem:[#allocation0 + $0x60] sm:$0xf]   ;;  %v199_v36 = vld [vmem:[#allocation0 + $0x68] sm:$0xf]  }
  0x18   :  { %v204_v37 = vld [vmem:[#allocation0 + $0x70] sm:$0xf]   ;;  %333 = vst.msk [vmem:[%s545_s1 + $0x3c] sm:$0xf] %vm136_vm0, %v209_v32   ;;  %334 = vst.msk [vmem:[%s545_s1 + $0x40] sm:$0xf] %vm136_vm0, %v214_v33  }
  0x19   :  { %335 = vst.msk [vmem:[%s545_s1 + $0x44] sm:$0xf] %vm136_vm0, %v219_v34   ;;  %v179_v38 = vld [vmem:[#allocation0 + $0x48] sm:$0xf]   ;;  %v184_v39 = vld [vmem:[#allocation0 + $0x50] sm:$0xf]  }
  0x1a   :  { %v189_v40 = vld [vmem:[#allocation0 + $0x58] sm:$0xf]   ;;  %330 = vst.msk [vmem:[%s545_s1 + $0x30] sm:$0xf] %vm136_vm0, %v194_v35   ;;  %331 = vst.msk [vmem:[%s545_s1 + $0x34] sm:$0xf] %vm136_vm0, %v199_v36  }
  0x1b   :  { %332 = vst.msk [vmem:[%s545_s1 + $0x38] sm:$0xf] %vm136_vm0, %v204_v37   ;;  %v164_v41 = vld [vmem:[#allocation0 + $0x30] sm:$0xf]   ;;  %v169_v42 = vld [vmem:[#allocation0 + $0x38] sm:$0xf]  }
  0x1c   :  { %v174_v43 = vld [vmem:[#allocation0 + $0x40] sm:$0xf]   ;;  %327 = vst.msk [vmem:[%s545_s1 + $0x24] sm:$0xf] %vm136_vm0, %v179_v38   ;;  %328 = vst.msk [vmem:[%s545_s1 + $0x28] sm:$0xf] %vm136_vm0, %v184_v39  }
  0x1d   :  { %329 = vst.msk [vmem:[%s545_s1 + $0x2c] sm:$0xf] %vm136_vm0, %v189_v40   ;;  %v149_v44 = vld [vmem:[#allocation0 + $0x18] sm:$0xf]   ;;  %v154_v45 = vld [vmem:[#allocation0 + $0x20] sm:$0xf]  }
  0x1e   :  { %v159_v46 = vld [vmem:[#allocation0 + $0x28] sm:$0xf]   ;;  %324 = vst.msk [vmem:[%s545_s1 + $0x18] sm:$0xf] %vm136_vm0, %v164_v41   ;;  %325 = vst.msk [vmem:[%s545_s1 + $0x1c] sm:$0xf] %vm136_vm0, %v169_v42  }
  0x1f   :  { %326 = vst.msk [vmem:[%s545_s1 + $0x20] sm:$0xf] %vm136_vm0, %v174_v43   ;;  %v135_v47 = vld [vmem:[#allocation0] sm:$0xf]   ;;  %v139_v48 = vld [vmem:[#allocation0 + $0x8] sm:$0xf]  }
  0x20   :  { %v144_v49 = vld [vmem:[#allocation0 + $0x10] sm:$0xf]   ;;  %321 = vst.msk [vmem:[%s545_s1 + $0xc] sm:$0xf] %vm136_vm0, %v149_v44   ;;  %322 = vst.msk [vmem:[%s545_s1 + $0x10] sm:$0xf] %vm136_vm0, %v154_v45  }
  0x21   :  { %323 = vst.msk [vmem:[%s545_s1 + $0x14] sm:$0xf] %vm136_vm0, %v159_v46   ;;  %137 = vst.msk [vmem:[%s545_s1] sm:$0xf] %vm136_vm0, %v135_v47   ;;  %v249_v50 = vld [vmem:[#allocation0 + $0xb8] sm:$0xf]  }
  0x22   :  { %319 = vst.msk [vmem:[%s545_s1 + $0x4] sm:$0xf] %vm136_vm0, %v139_v48   ;;  %320 = vst.msk [vmem:[%s545_s1 + $0x8] sm:$0xf] %vm136_vm0, %v144_v49   ;;  %v254_v51 = vld [vmem:[#allocation0 + $0xc0] sm:$0xf]  }
  0x23   :  { %v259_v52 = vld [vmem:[#allocation0 + $0xc8] sm:$0xf]   ;;  %341 = vst.msk [vmem:[%s545_s1 + $0x5c] sm:$0xf] %vm136_vm0, %v249_v50   ;;  %342 = vst.msk [vmem:[%s545_s1 + $0x60] sm:$0xf] %vm136_vm0, %v254_v51  }
  0x24   :  { %343 = vst.msk [vmem:[%s545_s1 + $0x64] sm:$0xf] %vm136_vm0, %v259_v52   ;;  %v264_v53 = vld [vmem:[#allocation0 + $0xd0] sm:$0xf]  }
  0x25   :  { %344 = vst.msk [vmem:[%s545_s1 + $0x68] sm:$0xf] %vm136_vm0, %v264_v53  }

// kernel: cnn3d_forward.3
= control target key start
LH: loop header
LB: loop body
LE: loop exit
PB: predicated region body
PF: predicated region fallthrough
CT: control target
= control target key end

     0   :  { %v8304_v0 = vmov 0   ;;  %vm3178_vm0 = vcmask 392192   ;;  %s10400_s2 = inlined_call_operand.vmem [shape: f32[1,128], index: 2, kind: input, shape index: {}]   ;;  %s10401_s3 = inlined_call_operand.vmem [shape: f32[1,128], index: 3, kind: input, shape index: {}]   ;;  %s10402_s4 = inlined_call_operand.vmem [shape: f32[256,128], index: 4, kind: output, shape index: {}]   ;;  %s10403_s1 = inlined_call_operand.vmem [shape: bf16[432,128], index: 1, kind: input, shape index: {}]   ;;  %s10404_s0 = inlined_call_operand.vmem [shape: bf16[2048,432], index: 0, kind: input, shape index: {}]  }
   0x1   :  { %3563 = vmatprep.subr.bf16.mxu1 %v8304_v0  ;;  %v7475_v1 = vld [vmem:[%s10403_s1] sm:$0xff]   ;;  %4620 = vmatprep.subr.bf16.mxu0 %v8304_v0  ;;  %v7476_v2 = vld [vmem:[%s10403_s1 + $0x8] sm:$0xff]   ;;  %v7477_v4 = vld [vmem:[%s10403_s1 + $0x10] sm:$0xff]  }
   0x2   :  { %3564 = vmatpush1.bf16.msra.mxu1 %v7475_v1  ;;  %v7480_v3 = vld [vmem:[%s10403_s1 + $0x80] sm:$0xff]   ;;  %v7482_v5 = vld [vmem:[%s10403_s1 + $0x88] sm:$0xff]   ;;  %v7478_v6 = vld [vmem:[%s10403_s1 + $0x18] sm:$0xff]  }
   0x3   :  { %3565 = vmatprep.subr.bf16.mxu1 %v8304_v0  ;;  %4621 = vmatpush1.bf16.msra.mxu0 %v7480_v3  ;;  %v7484_v7 = vld [vmem:[%s10403_s1 + $0x90] sm:$0xff]   ;;  %v7479_v8 = vld [vmem:[%s10403_s1 + $0x20] sm:$0xff]   ;;  %v7486_v9 = vld [vmem:[%s10403_s1 + $0x98] sm:$0xff]  }
   0x4   :  { %4622 = vmatprep.subr.bf16.mxu0 %v8304_v0  ;;  %v7481_v10 = vld [vmem:[%s10403_s1 + $0x28] sm:$0xff]   ;;  %v7488_v11 = vld [vmem:[%s10403_s1 + $0xa0] sm:$0xff]   ;;  %v7483_v12 = vld [vmem:[%s10403_s1 + $0x30] sm:$0xff]  }
   0x5   :  { %v7490_v13 = vld [vmem:[%s10403_s1 + $0xa8] sm:$0xff]   ;;  %v7485_v14 = vld [vmem:[%s10403_s1 + $0x38] sm:$0xff]   ;;  %v7492_v15 = vld [vmem:[%s10403_s1 + $0xb0] sm:$0xff]  }
   0x6   :  { %3566 = vmatpush1.bf16.msra.mxu1 %v7476_v2  ;;  %v7503_v16 = vld [vmem:[%s10404_s0 + $0xc] ss:$16 sps:$4 sm:$0xff]   ;;  %v7507_v17 = vld [vmem:[%s10404_s0 + $0x4] ss:$16 sps:$4 sm:$0xff]   ;;  %v7501_v27 = vld [vmem:[%s10404_s0 + $0x8] ss:$16 sps:$4 sm:$0xff]  }
   0x7   :  { %3567 = vmatprep.subr.bf16.mxu1 %v8304_v0  ;;  %4623 = vmatpush1.bf16.msra.mxu0 %v7482_v5  ;;  %v7487_v18 = vld [vmem:[%s10403_s1 + $0x40] sm:$0xff]   ;;  %v7494_v19 = vld [vmem:[%s10403_s1 + $0xb8] sm:$0xff]   ;;  %v7489_v20 = vld [vmem:[%s10403_s1 + $0x48] sm:$0xff]  }
   0x8   :  { %4624 = vmatprep.subr.bf16.mxu0 %v8304_v0  ;;  %6990 = vmatprep.mubr.msk.bf16.mxu0 %vm3178_vm0, %v7503_v16  ;;  %v7496_v21 = vld [vmem:[%s10403_s1 + $0xc0] sm:$0xff]   ;;  %v7491_v22 = vld [vmem:[%s10403_s1 + $0x50] sm:$0xff]   ;;  %v7498_v23 = vld [vmem:[%s10403_s1 + $0xc8] sm:$0xff]  }
   0x9   :  { %3595 = vmatprep.mubr.bf16.mxu1 %v7507_v17  ;;  %v7493_v24 = vld [vmem:[%s10403_s1 + $0x58] sm:$0xff]   ;;  %v7500_v25 = vld [vmem:[%s10403_s1 + $0xd0] sm:$0xff]   ;;  %v7495_v26 = vld [vmem:[%s10403_s1 + $0x60] sm:$0xff]  }
   0xa   :  { %3568 = vmatpush1.bf16.msra.mxu1 %v7477_v4  ;;  %v7508_v28 = vld [vmem:[%s10404_s0 + $0x2c] ss:$16 sps:$4 sm:$0xff]   ;;  %v7499_v30 = vld [vmem:[%s10403_s1 + $0x70] sm:$0xff]   ;;  %v7510_v31 = vld [vmem:[%s10404_s0 + $0x28] ss:$16 sps:$4 sm:$0xff]  }
   0xb   :  { %3569 = vmatprep.subr.bf16.mxu1 %v8304_v0  ;;  %4625 = vmatpush1.bf16.msra.mxu0 %v7484_v7  ;;  %v7497_v29 = vld [vmem:[%s10403_s1 + $0x68] sm:$0xff]   ;;  %v7504_v33 = vld [vmem:[%s10403_s1 + $0x78] sm:$0xff]   ;;  %v7505_v34 = vld [vmem:[%s10404_s0] ss:$16 sps:$4 sm:$0xff]  }
   0xc   :  { %4626 = vmatprep.subr.bf16.mxu0 %v8304_v0  ;;  %v7514_v32 = vld [vmem:[%s10404_s0 + $0x4c] ss:$16 sps:$4 sm:$0xff]   ;;  %v7511_v35 = vld [vmem:[%s10404_s0 + $0x24] ss:$16 sps:$4 sm:$0xff]   ;;  %v7516_v36 = vld [vmem:[%s10404_s0 + $0x48] ss:$16 sps:$4 sm:$0xff]  }
   0xd   :  { %v7520_v37 = vld [vmem:[%s10404_s0 + $0x6c] ss:$16 sps:$4 sm:$0xff]   ;;  %v7513_v38 = vld [vmem:[%s10404_s0 + $0x20] ss:$16 sps:$4 sm:$0xff]   ;;  %v7517_v39 = vld [vmem:[%s10404_s0 + $0x44] ss:$16 sps:$4 sm:$0xff]  }
   0xe   :  { %3570 = vmatpush1.bf16.msra.mxu1 %v7478_v6  ;;  %v7522_v40 = vld [vmem:[%s10404_s0 + $0x68] ss:$16 sps:$4 sm:$0xff]   ;;  %v7526_v41 = vld [vmem:[%s10404_s0 + $0x8c] ss:$16 sps:$4 sm:$0xff]   ;;  %v7519_v42 = vld [vmem:[%s10404_s0 + $0x40] ss:$16 sps:$4 sm:$0xff]  }
   0xf   :  { %3571 = vmatprep.subr.bf16.mxu1 %v8304_v0  ;;  %4627 = vmatpush1.bf16.msra.mxu0 %v7486_v9  ;;  %v7523_v43 = vld [vmem:[%s10404_s0 + $0x64] ss:$16 sps:$4 sm:$0xff]   ;;  %v7528_v44 = vld [vmem:[%s10404_s0 + $0x88] ss:$16 sps:$4 sm:$0xff]   ;;  %v7532_v45 = vld [vmem:[%s10404_s0 + $0xac] ss:$16 sps:$4 sm:$0xff]  }
  0x10   :  { %4628 = vmatprep.subr.bf16.mxu0 %v8304_v0  ;;  %v7525_v46 = vld [vmem:[%s10404_s0 + $0x60] ss:$16 sps:$4 sm:$0xff]   ;;  %v7529_v47 = vld [vmem:[%s10404_s0 + $0x84] ss:$16 sps:$4 sm:$0xff]   ;;  %v7534_v48 = vld [vmem:[%s10404_s0 + $0xa8] ss:$16 sps:$4 sm:$0xff]  }
  0x11   :  { %v7538_v49 = vld [vmem:[%s10404_s0 + $0xcc] ss:$16 sps:$4 sm:$0xff]   ;;  %v7531_v50 = vld [vmem:[%s10404_s0 + $0x80] ss:$16 sps:$4 sm:$0xff]   ;;  %v7535_v51 = vld [vmem:[%s10404_s0 + $0xa4] ss:$16 sps:$4 sm:$0xff]  }
  0x12   :  { %3572 = vmatpush1.bf16.msra.mxu1 %v7479_v8  ;;  %v7540_v52 = vld [vmem:[%s10404_s0 + $0xc8] ss:$16 sps:$4 sm:$0xff]   ;;  %v7544_v53 = vld [vmem:[%s10404_s0 + $0xec] ss:$16 sps:$4 sm:$0xff]   ;;  %v7537_v54 = vld [vmem:[%s10404_s0 + $0xa0] ss:$16 sps:$4 sm:$0xff]  }
  0x13   :  { %3573 = vmatprep.subr.bf16.mxu1 %v8304_v0  ;;  %4629 = vmatpush1.bf16.msra.mxu0 %v7488_v11  ;;  %v7541_v55 = vld [vmem:[%s10404_s0 + $0xc4] ss:$16 sps:$4 sm:$0xff]   ;;  %v7546_v56 = vld [vmem:[%s10404_s0 + $0xe8] ss:$16 sps:$4 sm:$0xff]   ;;  %v7550_v57 = vld [vmem:[%s10404_s0 + $0x10c] ss:$16 sps:$4 sm:$0xff]  }
  0x14   :  { %4630 = vmatprep.subr.bf16.mxu0 %v8304_v0  ;;  %v7543_v58 = vld [vmem:[%s10404_s0 + $0xc0] ss:$16 sps:$4 sm:$0xff]   ;;  %v7547_v59 = vld [vmem:[%s10404_s0 + $0xe4] ss:$16 sps:$4 sm:$0xff]   ;;  %v7552_v60 = vld [vmem:[%s10404_s0 + $0x108] ss:$16 sps:$4 sm:$0xff]  }
  0x15   :  { %v7556_v61 = vld [vmem:[%s10404_s0 + $0x12c] ss:$16 sps:$4 sm:$0xff]   ;;  %v7549_v62 = vld [vmem:[%s10404_s0 + $0xe0] ss:$16 sps:$4 sm:$0xff]   ;;  %v7553_v63 = vld [vmem:[%s10404_s0 + $0x104] ss:$16 sps:$4 sm:$0xff]  }
  0x16   :  { %3574 = vmatpush1.bf16.msra.mxu1 %v7481_v10  ;;  %v7562_v1 = vld [vmem:[%s10404_s0 + $0x14c] ss:$16 sps:$4 sm:$0xff]   ;;  %v7555_v2 = vld [vmem:[%s10404_s0 + $0x100] ss:$16 sps:$4 sm:$0xff]   ;;  %v7559_v3 = vld [vmem:[%s10404_s0 + $0x124] ss:$16 sps:$4 sm:$0xff]  }
  0x17   :  { %3575 = vmatprep.subr.bf16.mxu1 %v8304_v0  ;;  %4631 = vmatpush1.bf16.msra.mxu0 %v7490_v13  ;;  %v7564_v4 = vld [vmem:[%s10404_s0 + $0x148] ss:$16 sps:$4 sm:$0xff]   ;;  %v7568_v5 = vld [vmem:[%s10404_s0 + $0x16c] ss:$16 sps:$4 sm:$0xff]   ;;  %v7561_v6 = vld [vmem:[%s10404_s0 + $0x120] ss:$16 sps:$4 sm:$0xff]  }
  0x18   :  { %4632 = vmatprep.subr.bf16.mxu0 %v8304_v0  ;;  %v7565_v7 = vld [vmem:[%s10404_s0 + $0x144] ss:$16 sps:$4 sm:$0xff]   ;;  %v7570_v8 = vld [vmem:[%s10404_s0 + $0x168] ss:$16 sps:$4 sm:$0xff]   ;;  %v7574_v9 = vld [vmem:[%s10404_s0 + $0x18c] ss:$16 sps:$4 sm:$0xff]  }
  0x19   :  { %v7567_v10 = vld [vmem:[%s10404_s0 + $0x140] ss:$16 sps:$4 sm:$0xff]   ;;  %v7571_v11 = vld [vmem:[%s10404_s0 + $0x164] ss:$16 sps:$4 sm:$0xff]   ;;  %v7580_v13 = vld [vmem:[%s10404_s0 + $0x1ac] ss:$16 sps:$4 sm:$0xff]  }
  0x1a   :  { %3576 = vmatpush1.bf16.msra.mxu1 %v7483_v12  ;;  %v7576_v12 = vld [vmem:[%s10404_s0 + $0x188] ss:$16 sps:$4 sm:$0xff]   ;;  %v7586_v17 = vld [vmem:[%s10404_s0 + $0x1cc] ss:$16 sps:$4 sm:$0xff]  }
  0x1b   :  { %3577 = vmatprep.subr.bf16.mxu1 %v8304_v0  ;;  %4633 = vmatpush1.bf16.msra.mxu0 %v7492_v15  ;;  %v7577_v15 = vld [vmem:[%s10404_s0 + $0x184] ss:$16 sps:$4 sm:$0xff]   ;;  %v7582_v16 = vld [vmem:[%s10404_s0 + $0x1a8] ss:$16 sps:$4 sm:$0xff]  }
  0x1c   :  { %4634 = vmatprep.subr.bf16.mxu0 %v8304_v0 }
  0x1e   :  { %3578 = vmatpush1.bf16.msra.mxu1 %v7485_v14  ;;  %v7573_v14 = vld [vmem:[%s10404_s0 + $0x160] ss:$16 sps:$4 sm:$0xff]  }
  0x1f   :  { %3579 = vmatprep.subr.bf16.mxu1 %v8304_v0  ;;  %4635 = vmatpush1.bf16.msra.mxu0 %v7494_v19  ;;  %v7583_v19 = vld [vmem:[%s10404_s0 + $0x1a4] ss:$16 sps:$4 sm:$0xff]  }
  0x20   :  { %4636 = vmatprep.subr.bf16.mxu0 %v8304_v0 }
  0x22   :  { %3580 = vmatpush1.bf16.msra.mxu1 %v7487_v18  ;;  %v7579_v18 = vld [vmem:[%s10404_s0 + $0x180] ss:$16 sps:$4 sm:$0xff]  }
  0x23   :  { %3581 = vmatprep.subr.bf16.mxu1 %v8304_v0  ;;  %4637 = vmatpush1.bf16.msra.mxu0 %v7496_v21  ;;  %v7592_v21 = vld [vmem:[%s10404_s0 + $0x1ec] ss:$16 sps:$4 sm:$0xff]  }
  0x24   :  { %4638 = vmatprep.subr.bf16.mxu0 %v8304_v0 }
  0x26   :  { %3582 = vmatpush1.bf16.msra.mxu1 %v7489_v20  ;;  %v7588_v20 = vld [vmem:[%s10404_s0 + $0x1c8] ss:$16 sps:$4 sm:$0xff]  }
  0x27   :  { %3583 = vmatprep.subr.bf16.mxu1 %v8304_v0  ;;  %4639 = vmatpush1.bf16.msra.mxu0 %v7498_v23  ;;  %v7589_v23 = vld [vmem:[%s10404_s0 + $0x1c4] ss:$16 sps:$4 sm:$0xff]  }
  0x28   :  { %4640 = vmatprep.subr.bf16.mxu0 %v8304_v0 }
  0x2a   :  { %3584 = vmatpush1.bf16.msra.mxu1 %v7491_v22  ;;  %v7585_v22 = vld [vmem:[%s10404_s0 + $0x1a0] ss:$16 sps:$4 sm:$0xff]  }
  0x2b   :  { %3585 = vmatprep.subr.bf16.mxu1 %v8304_v0  ;;  %4641 = vmatpush1.bf16.msra.mxu0 %v7500_v25  ;;  %v7598_v25 = vld [vmem:[%s10404_s0 + $0x20c] ss:$16 sps:$4 sm:$0xff]  }
  0x2e   :  { %3586 = vmatpush1.bf16.msra.mxu1 %v7493_v24  ;;  %4653 = vmatmul.mubr.bf16.vlgmr.msra.gmra.mrb[0].mxu0 %v7501_v27  ;;  %v7594_v24 = vld [vmem:[%s10404_s0 + $0x1e8] ss:$16 sps:$4 sm:$0xff]   ;;  %v7595_v27 = vld [vmem:[%s10404_s0 + $0x1e4] ss:$16 sps:$4 sm:$0xff]  }
  0x2f   :  { %3587 = vmatprep.subr.bf16.mxu1 %v8304_v0  ;;  %6991 = vmatprep.mubr.msk.bf16.mxu0 %vm3178_vm0, %v7508_v28  ;;  %v7600_v28 = vld [vmem:[%s10404_s0 + $0x208] ss:$16 sps:$4 sm:$0xff]  }
  0x32   :  { %3588 = vmatpush1.bf16.msra.mxu1 %v7495_v26  ;;  %v7591_v26 = vld [vmem:[%s10404_s0 + $0x1c0] ss:$16 sps:$4 sm:$0xff]  }
  0x33   :  { %3589 = vmatprep.subr.bf16.mxu1 %v8304_v0 }
  0x36   :  { %3590 = vmatpush1.bf16.msra.mxu1 %v7497_v29  ;;  %4661 = vmatmul.mubr.bf16.gmra.mrb[4].mxu0 %v7510_v31  ;;  %v7604_v29 = vld [vmem:[%s10404_s0 + $0x22c] ss:$16 sps:$4 sm:$0xff]   ;;  %v7601_v31 = vld [vmem:[%s10404_s0 + $0x204] ss:$16 sps:$4 sm:$0xff]  }
  0x37   :  { %3591 = vmatprep.subr.bf16.mxu1 %v8304_v0  ;;  %6992 = vmatprep.mubr.msk.bf16.mxu0 %vm3178_vm0, %v7514_v32  ;;  %v7606_v32 = vld [vmem:[%s10404_s0 + $0x228] ss:$16 sps:$4 sm:$0xff]  }
  0x3a   :  { %3592 = vmatpush1.bf16.msra.mxu1 %v7499_v30  ;;  %v7597_v30 = vld [vmem:[%s10404_s0 + $0x1e0] ss:$16 sps:$4 sm:$0xff]  }
  0x3b   :  { %3593 = vmatprep.subr.bf16.mxu1 %v8304_v0  ;;  %v7558_v0 = vld [vmem:[%s10404_s0 + $0x128] ss:$16 sps:$4 sm:$0xff]  }
  0x3e   :  { %3594 = vmatpush1.bf16.msra.mxu1 %v7504_v33  ;;  %4669 = vmatmul.mubr.bf16.gmra.mrb[8].mxu0 %v7516_v36  ;;  %v7610_v33 = vld [vmem:[%s10404_s0 + $0x24c] ss:$16 sps:$4 sm:$0xff]   ;;  %v7612_v36 = vld [vmem:[%s10404_s0 + $0x248] ss:$16 sps:$4 sm:$0xff]  }
  0x3f   :  { %6993 = vmatprep.mubr.msk.bf16.mxu0 %vm3178_vm0, %v7520_v37  ;;  %v7616_v37 = vld [vmem:[%s10404_s0 + $0x26c] ss:$16 sps:$4 sm:$0xff]  }
  0x41   :  { %3596 = vmatmul.mubr.bf16.vlgmr.msra.gmra.mrb[0].mxu1 %v7505_v34  ;;  %v7603_v34 = vld [vmem:[%s10404_s0 + $0x200] ss:$16 sps:$4 sm:$0xff]  }
  0x42   :  { %3603 = vmatprep.mubr.bf16.mxu1 %v7511_v35  ;;  %v7607_v35 = vld [vmem:[%s10404_s0 + $0x224] ss:$16 sps:$4 sm:$0xff]  }
  0x46   :  { %4677 = vmatmul.mubr.bf16.gmra.mrb[12].mxu0 %v7522_v40  ;;  %v7618_v40 = vld [vmem:[%s10404_s0 + $0x268] ss:$16 sps:$4 sm:$0xff]  }
  0x47   :  { %6994 = vmatprep.mubr.msk.bf16.mxu0 %vm3178_vm0, %v7526_v41  ;;  %v7622_v41 = vld [vmem:[%s10404_s0 + $0x28c] ss:$16 sps:$4 sm:$0xff]  }
  0x49   :  { %3604 = vmatmul.mubr.bf16.gmra.mrb[4].mxu1 %v7513_v38  ;;  %v7609_v38 = vld [vmem:[%s10404_s0 + $0x220] ss:$16 sps:$4 sm:$0xff]  }
  0x4a   :  { %3611 = vmatprep.mubr.bf16.mxu1 %v7517_v39  ;;  %v7613_v39 = vld [vmem:[%s10404_s0 + $0x244] ss:$16 sps:$4 sm:$0xff]  }
  0x4e   :  { %4685 = vmatmul.mubr.bf16.gmra.mrb[16].mxu0 %v7528_v44  ;;  %v7624_v44 = vld [vmem:[%s10404_s0 + $0x288] ss:$16 sps:$4 sm:$0xff]  }
  0x4f   :  { %6995 = vmatprep.mubr.msk.bf16.mxu0 %vm3178_vm0, %v7532_v45  ;;  %v7628_v45 = vld [vmem:[%s10404_s0 + $0x2ac] ss:$16 sps:$4 sm:$0xff]  }
  0x51   :  { %3612 = vmatmul.mubr.bf16.gmra.mrb[8].mxu1 %v7519_v42  ;;  %v7615_v42 = vld [vmem:[%s10404_s0 + $0x240] ss:$16 sps:$4 sm:$0xff]  }
  0x52   :  { %3619 = vmatprep.mubr.bf16.mxu1 %v7523_v43  ;;  %v7619_v43 = vld [vmem:[%s10404_s0 + $0x264] ss:$16 sps:$4 sm:$0xff]  }
  0x56   :  { %4693 = vmatmul.mubr.bf16.gmra.mrb[20].mxu0 %v7534_v48  ;;  %v7630_v48 = vld [vmem:[%s10404_s0 + $0x2a8] ss:$16 sps:$4 sm:$0xff]  }
  0x57   :  { %6996 = vmatprep.mubr.msk.bf16.mxu0 %vm3178_vm0, %v7538_v49  ;;  %v7634_v49 = vld [vmem:[%s10404_s0 + $0x2cc] ss:$16 sps:$4 sm:$0xff]  }
  0x59   :  { %3620 = vmatmul.mubr.bf16.gmra.mrb[12].mxu1 %v7525_v46  ;;  %v7621_v46 = vld [vmem:[%s10404_s0 + $0x260] ss:$16 sps:$4 sm:$0xff]  }
  0x5a   :  { %3627 = vmatprep.mubr.bf16.mxu1 %v7529_v47  ;;  %v7625_v47 = vld [vmem:[%s10404_s0 + $0x284] ss:$16 sps:$4 sm:$0xff]  }
  0x5e   :  { %4701 = vmatmul.mubr.bf16.gmra.mrb[24].mxu0 %v7540_v52  ;;  %v7636_v52 = vld [vmem:[%s10404_s0 + $0x2c8] ss:$16 sps:$4 sm:$0xff]  }
  0x5f   :  { %6997 = vmatprep.mubr.msk.bf16.mxu0 %vm3178_vm0, %v7544_v53  ;;  %v7640_v53 = vld [vmem:[%s10404_s0 + $0x2ec] ss:$16 sps:$4 sm:$0xff]  }
  0x61   :  { %3628 = vmatmul.mubr.bf16.gmra.mrb[16].mxu1 %v7531_v50  ;;  %v7627_v50 = vld [vmem:[%s10404_s0 + $0x280] ss:$16 sps:$4 sm:$0xff]  }
  0x62   :  { %3635 = vmatprep.mubr.bf16.mxu1 %v7535_v51  ;;  %v7631_v51 = vld [vmem:[%s10404_s0 + $0x2a4] ss:$16 sps:$4 sm:$0xff]  }
  0x66   :  { %4709 = vmatmul.mubr.bf16.gmra.mrb[28].mxu0 %v7546_v56  ;;  %v7642_v56 = vld [vmem:[%s10404_s0 + $0x2e8] ss:$16 sps:$4 sm:$0xff]  }
  0x67   :  { %6998 = vmatprep.mubr.msk.bf16.mxu0 %vm3178_vm0, %v7550_v57  ;;  %v7646_v57 = vld [vmem:[%s10404_s0 + $0x30c] ss:$16 sps:$4 sm:$0xff]  }
  0x69   :  { %3636 = vmatmul.mubr.bf16.gmra.mrb[20].mxu1 %v7537_v54  ;;  %v7633_v54 = vld [vmem:[%s10404_s0 + $0x2a0] ss:$16 sps:$4 sm:$0xff]  }
  0x6a   :  { %3643 = vmatprep.mubr.bf16.mxu1 %v7541_v55  ;;  %v7637_v55 = vld [vmem:[%s10404_s0 + $0x2c4] ss:$16 sps:$4 sm:$0xff]  }
  0x6e   :  { %4717 = vmatmul.mubr.bf16.gmra.mrb[32].mxu0 %v7552_v60  ;;  %v7648_v60 = vld [vmem:[%s10404_s0 + $0x308] ss:$16 sps:$4 sm:$0xff]  }
  0x6f   :  { %6999 = vmatprep.mubr.msk.bf16.mxu0 %vm3178_vm0, %v7556_v61  ;;  %v7652_v61 = vld [vmem:[%s10404_s0 + $0x32c] ss:$16 sps:$4 sm:$0xff]  }
  0x71   :  { %3644 = vmatmul.mubr.bf16.gmra.mrb[24].mxu1 %v7543_v58  ;;  %v7639_v58 = vld [vmem:[%s10404_s0 + $0x2c0] ss:$16 sps:$4 sm:$0xff]  }
  0x72   :  { %3651 = vmatprep.mubr.bf16.mxu1 %v7547_v59  ;;  %v7643_v59 = vld [vmem:[%s10404_s0 + $0x2e4] ss:$16 sps:$4 sm:$0xff]  }
  0x76   :  { %4725 = vmatmul.mubr.bf16.gmra.mrb[36].mxu0 %v7558_v0  ;;  %v7654_v0 = vld [vmem:[%s10404_s0 + $0x328] ss:$16 sps:$4 sm:$0xff]  }
  0x77   :  { %7000 = vmatprep.mubr.msk.bf16.mxu0 %vm3178_vm0, %v7562_v1  ;;  %v7658_v1 = vld [vmem:[%s10404_s0 + $0x34c] ss:$16 sps:$4 sm:$0xff]  }
  0x79   :  { %3652 = vmatmul.mubr.bf16.gmra.mrb[28].mxu1 %v7549_v62  ;;  %v7645_v62 = vld [vmem:[%s10404_s0 + $0x2e0] ss:$16 sps:$4 sm:$0xff]  }
  0x7a   :  { %3659 = vmatprep.mubr.bf16.mxu1 %v7553_v63  ;;  %v7649_v63 = vld [vmem:[%s10404_s0 + $0x304] ss:$16 sps:$4 sm:$0xff]  }
  0x7e   :  { %4733 = vmatmul.mubr.bf16.gmra.mrb[40].mxu0 %v7564_v4  ;;  %v7660_v4 = vld [vmem:[%s10404_s0 + $0x348] ss:$16 sps:$4 sm:$0xff]  }
  0x7f   :  { %7001 = vmatprep.mubr.msk.bf16.mxu0 %vm3178_vm0, %v7568_v5  ;;  %v7664_v5 = vld [vmem:[%s10404_s0 + $0x36c] ss:$16 sps:$4 sm:$0xff]  }
  0x81   :  { %3660 = vmatmul.mubr.bf16.gmra.mrb[32].mxu1 %v7555_v2  ;;  %v7651_v2 = vld [vmem:[%s10404_s0 + $0x300] ss:$16 sps:$4 sm:$0xff]  }
  0x82   :  { %3667 = vmatprep.mubr.bf16.mxu1 %v7559_v3  ;;  %v7655_v3 = vld [vmem:[%s10404_s0 + $0x324] ss:$16 sps:$4 sm:$0xff]  }
  0x86   :  { %4741 = vmatmul.mubr.bf16.gmra.mrb[44].mxu0 %v7570_v8  ;;  %v7661_v8 = vld [vmem:[%s10404_s0 + $0x344] ss:$16 sps:$4 sm:$0xff]  }
  0x87   :  { %7002 = vmatprep.mubr.msk.bf16.mxu0 %vm3178_vm0, %v7574_v9 }
  0x89   :  { %3668 = vmatmul.mubr.bf16.gmra.mrb[36].mxu1 %v7561_v6  ;;  %v7657_v6 = vld [vmem:[%s10404_s0 + $0x320] ss:$16 sps:$4 sm:$0xff]  }
  0x8a   :  { %3675 = vmatprep.mubr.bf16.mxu1 %v7565_v7 }
  0x8e   :  { %4749 = vmatmul.mubr.bf16.gmra.mrb[48].mxu0 %v7576_v12  ;;  %v7670_v12 = vld [vmem:[%s10404_s0 + $0x38c] ss:$16 sps:$4 sm:$0xff]  }
  0x8f   :  { %7003 = vmatprep.mubr.msk.bf16.mxu0 %vm3178_vm0, %v7580_v13 }
  0x91   :  { %3676 = vmatmul.mubr.bf16.gmra.mrb[40].mxu1 %v7567_v10  ;;  %v7666_v10 = vld [vmem:[%s10404_s0 + $0x368] ss:$16 sps:$4 sm:$0xff]  }
  0x92   :  { %3683 = vmatprep.mubr.bf16.mxu1 %v7571_v11 }
  0x96   :  { %4757 = vmatmul.mubr.bf16.gmra.mrb[52].mxu0 %v7582_v16  ;;  %v7667_v16 = vld [vmem:[%s10404_s0 + $0x364] ss:$16 sps:$4 sm:$0xff]  }
  0x97   :  { %7004 = vmatprep.mubr.msk.bf16.mxu0 %vm3178_vm0, %v7586_v17 }
  0x99   :  { %3684 = vmatmul.mubr.bf16.gmra.mrb[44].mxu1 %v7573_v14  ;;  %v7663_v14 = vld [vmem:[%s10404_s0 + $0x340] ss:$16 sps:$4 sm:$0xff]  }
  0x9a   :  { %3691 = vmatprep.mubr.bf16.mxu1 %v7577_v15 }
  0x9e   :  { %4765 = vmatmul.mubr.bf16.gmra.mrb[56].mxu0 %v7588_v20  ;;  %v7676_v20 = vld [vmem:[%s10404_s0 + $0x3ac] ss:$16 sps:$4 sm:$0xff]  }
  0x9f   :  { %7005 = vmatprep.mubr.msk.bf16.mxu0 %vm3178_vm0, %v7592_v21 }
  0xa1   :  { %3692 = vmatmul.mubr.bf16.gmra.mrb[48].mxu1 %v7579_v18  ;;  %v7672_v18 = vld [vmem:[%s10404_s0 + $0x388] ss:$16 sps:$4 sm:$0xff]  }
  0xa2   :  { %3699 = vmatprep.mubr.bf16.mxu1 %v7583_v19 }
  0xa6   :  { %4773 = vmatmul.mubr.bf16.gmra.mrb[60].mxu0 %v7594_v24 }
  0xa7   :  { %7006 = vmatprep.mubr.msk.bf16.mxu0 %vm3178_vm0, %v7598_v25  ;;  %v7669_v25 = vld [vmem:[%s10404_s0 + $0x360] ss:$16 sps:$4 sm:$0xff]  }
  0xa9   :  { %3700 = vmatmul.mubr.bf16.gmra.mrb[52].mxu1 %v7585_v22 }
  0xaa   :  { %3707 = vmatprep.mubr.bf16.mxu1 %v7589_v23 }
  0xae   :  { %4781 = vmatmul.mubr.bf16.gmra.mrb[64].mxu0 %v7600_v28  ;;  %v7673_v28 = vld [vmem:[%s10404_s0 + $0x384] ss:$16 sps:$4 sm:$0xff]  }
  0xaf   :  { %7007 = vmatprep.mubr.msk.bf16.mxu0 %vm3178_vm0, %v7604_v29 }
  0xb1   :  { %3708 = vmatmul.mubr.bf16.gmra.mrb[56].mxu1 %v7591_v26 }
  0xb2   :  { %3715 = vmatprep.mubr.bf16.mxu1 %v7595_v27 }
  0xb6   :  { %4789 = vmatmul.mubr.bf16.gmra.mrb[68].mxu0 %v7606_v32 }
  0xb7   :  { %7008 = vmatprep.mubr.msk.bf16.mxu0 %vm3178_vm0, %v7610_v33 }
  0xb9   :  { %3716 = vmatmul.mubr.bf16.gmra.mrb[60].mxu1 %v7597_v30  ;;  %v7678_v30 = vld [vmem:[%s10404_s0 + $0x3a8] ss:$16 sps:$4 sm:$0xff]  }
  0xba   :  { %3723 = vmatprep.mubr.bf16.mxu1 %v7601_v31 }
  0xbe   :  { %4797 = vmatmul.mubr.bf16.gmra.mrb[72].mxu0 %v7612_v36 }
  0xbf   :  { %7009 = vmatprep.mubr.msk.bf16.mxu0 %vm3178_vm0, %v7616_v37 }
  0xc1   :  { %3724 = vmatmul.mubr.bf16.gmra.mrb[64].mxu1 %v7603_v34  ;;  %v7682_v34 = vld [vmem:[%s10404_s0 + $0x3cc] ss:$16 sps:$4 sm:$0xff]  }
  0xc2   :  { %3731 = vmatprep.mubr.bf16.mxu1 %v7607_v35 }
  0xc6   :  { %4805 = vmatmul.mubr.bf16.gmra.mrb[76].mxu0 %v7618_v40 }
  0xc7   :  { %7010 = vmatprep.mubr.msk.bf16.mxu0 %vm3178_vm0, %v7622_v41 }
  0xc9   :  { %3732 = vmatmul.mubr.bf16.gmra.mrb[68].mxu1 %v7609_v38 }
  0xca   :  { %3739 = vmatprep.mubr.bf16.mxu1 %v7613_v39  ;;  %v7675_v39 = vld [vmem:[%s10404_s0 + $0x380] ss:$16 sps:$4 sm:$0xff]  }
  0xce   :  { %4813 = vmatmul.mubr.bf16.gmra.mrb[80].mxu0 %v7624_v44  ;;  %v7684_v44 = vld [vmem:[%s10404_s0 + $0x3c8] ss:$16 sps:$4 sm:$0xff]  }
  0xcf   :  { %7011 = vmatprep.mubr.msk.bf16.mxu0 %vm3178_vm0, %v7628_v45 }
  0xd1   :  { %3740 = vmatmul.mubr.bf16.gmra.mrb[72].mxu1 %v7615_v42  ;;  %v7679_v42 = vld [vmem:[%s10404_s0 + $0x3a4] ss:$16 sps:$4 sm:$0xff]  }
  0xd2   :  { %3747 = vmatprep.mubr.bf16.mxu1 %v7619_v43 }
  0xd6   :  { %4821 = vmatmul.mubr.bf16.gmra.mrb[84].mxu0 %v7630_v48  ;;  %v7688_v48 = vld [vmem:[%s10404_s0 + $0x3ec] ss:$16 sps:$4 sm:$0xff]  }
  0xd7   :  { %7012 = vmatprep.mubr.msk.bf16.mxu0 %vm3178_vm0, %v7634_v49 }
  0xd9   :  { %3748 = vmatmul.mubr.bf16.gmra.mrb[76].mxu1 %v7621_v46 }
  0xda   :  { %3755 = vmatprep.mubr.bf16.mxu1 %v7625_v47 }
  0xde   :  { %4829 = vmatmul.mubr.bf16.gmra.mrb[88].mxu0 %v7636_v52 }
  0xdf   :  { %7013 = vmatprep.mubr.msk.bf16.mxu0 %vm3178_vm0, %v7640_v53  ;;  %v7681_v53 = vld [vmem:[%s10404_s0 + $0x3a0] ss:$16 sps:$4 sm:$0xff]  }
  0xe1   :  { %3756 = vmatmul.mubr.bf16.gmra.mrb[80].mxu1 %v7627_v50 }
  0xe2   :  { %3763 = vmatprep.mubr.bf16.mxu1 %v7631_v51 }
  0xe6   :  { %4837 = vmatmul.mubr.bf16.gmra.mrb[92].mxu0 %v7642_v56  ;;  %v7685_v56 = vld [vmem:[%s10404_s0 + $0x3c4] ss:$16 sps:$4 sm:$0xff]  }
  0xe7   :  { %7014 = vmatprep.mubr.msk.bf16.mxu0 %vm3178_vm0, %v7646_v57 }
  0xe9   :  { %3764 = vmatmul.mubr.bf16.gmra.mrb[84].mxu1 %v7633_v54 }
  0xea   :  { %3771 = vmatprep.mubr.bf16.mxu1 %v7637_v55 }
  0xee   :  { %4845 = vmatmul.mubr.bf16.gmra.mrb[96].mxu0 %v7648_v60 }
  0xef   :  { %7015 = vmatprep.mubr.msk.bf16.mxu0 %vm3178_vm0, %v7652_v61 }
  0xf1   :  { %3772 = vmatmul.mubr.bf16.gmra.mrb[88].mxu1 %v7639_v58  ;;  %v7690_v58 = vld [vmem:[%s10404_s0 + $0x3e8] ss:$16 sps:$4 sm:$0xff]  }
  0xf2   :  { %3779 = vmatprep.mubr.bf16.mxu1 %v7643_v59 }
  0xf6   :  { %4853 = vmatmul.mubr.bf16.gmra.mrb[100].mxu0 %v7654_v0 }
  0xf7   :  { %7016 = vmatprep.mubr.msk.bf16.mxu0 %vm3178_vm0, %v7658_v1 }
  0xf9   :  { %3780 = vmatmul.mubr.bf16.gmra.mrb[92].mxu1 %v7645_v62  ;;  %v7694_v62 = vld [vmem:[%s10404_s0 + $0x40c] ss:$16 sps:$4 sm:$0xff]  }
  0xfa   :  { %3787 = vmatprep.mubr.bf16.mxu1 %v7649_v63 }
  0xfe   :  { %4861 = vmatmul.mubr.bf16.gmra.mrb[104].mxu0 %v7660_v4 }
  0xff   :  { %7017 = vmatprep.mubr.msk.bf16.mxu0 %vm3178_vm0, %v7664_v5 }
 0x101   :  { %3788 = vmatmul.mubr.bf16.gmra.mrb[96].mxu1 %v7651_v2  ;;  %v4654_v7 = vpop.f32.mrb[0].mxu0 }
 0x102   :  { %3795 = vmatprep.mubr.bf16.mxu1 %v7655_v3  ;;  %v4656_v9 = vpop.f32.mrb[1].mxu0  ;;  %v7687_v3 = vld [vmem:[%s10404_s0 + $0x3c0] ss:$16 sps:$4 sm:$0xff]  }
 0x103   :  { %v4657_v11 = vpop.f32.mrb[2].mxu0 }
 0x104   :  { %v4659_v13 = vpop.f32.mrb[3].mxu0 }
 0x106   :  { %4869 = vmatmul.mubr.bf16.gmra.mrb[108].mxu0 %v7666_v10 }
 0x107   :  { %7018 = vmatprep.mubr.msk.bf16.mxu0 %vm3178_vm0, %v7670_v12  ;;  %v7700_v12 = vld [vmem:[%s10404_s0 + $0x42c] ss:$16 sps:$4 sm:$0xff]  }
 0x109   :  { %3796 = vmatmul.mubr.bf16.gmra.mrb[100].mxu1 %v7657_v6  ;;  %v4662_v15 = vpop.f32.mrb[4].mxu0  ;;  %v7691_v6 = vld [vmem:[%s10404_s0 + $0x3e4] ss:$16 sps:$4 sm:$0xff]  }
 0x10a   :  { %3803 = vmatprep.mubr.bf16.mxu1 %v7661_v8  ;;  %v4664_v17 = vpop.f32.mrb[5].mxu0  ;;  %v7696_v8 = vld [vmem:[%s10404_s0 + $0x408] ss:$16 sps:$4 sm:$0xff]  }
 0x10b   :  { %v4665_v19 = vpop.f32.mrb[6].mxu0  ;;  %v7693_v17 = vld [vmem:[%s10404_s0 + $0x3e0] ss:$16 sps:$4 sm:$0xff]  }
 0x10c   :  { %v4667_v21 = vpop.f32.mrb[7].mxu0 }
 0x10e   :  { %4877 = vmatmul.mubr.bf16.gmra.mrb[112].mxu0 %v7672_v18 }
 0x10f   :  { %7019 = vmatprep.mubr.msk.bf16.mxu0 %vm3178_vm0, %v7676_v20  ;;  %v7697_v20 = vld [vmem:[%s10404_s0 + $0x404] ss:$16 sps:$4 sm:$0xff]  }
 0x111   :  { %3804 = vmatmul.mubr.bf16.gmra.mrb[104].mxu1 %v7663_v14  ;;  %v4670_v26 = vpop.f32.mrb[8].mxu0 }
 0x112   :  { %3811 = vmatprep.mubr.bf16.mxu1 %v7667_v16  ;;  %v4672_v29 = vpop.f32.mrb[9].mxu0 }
 0x113   :  { %v4673_v33 = vpop.f32.mrb[10].mxu0 }
 0x114   :  { %v3597_v22 = vpop.f32.mrb[0].mxu1  ;;  %v4675_v35 = vpop.f32.mrb[11].mxu0 }
 0x115   :  { %v4655_v23 = vadd.f32 %v4654_v7, %v3597_v22  ;;  %v3599_v24 = vpop.f32.mrb[1].mxu1  ;;  %v7702_v22 = vld [vmem:[%s10404_s0 + $0x428] ss:$16 sps:$4 sm:$0xff]  }
 0x116   :  { %v3600_v27 = vpop.f32.mrb[2].mxu1  ;;  %4885 = vmatmul.mubr.bf16.gmra.mrb[116].mxu0 %v7678_v30 }
 0x117   :  { %5677 = vst [vmem:[#allocation2] sm:$0xff] %v4655_v23  ;;  %v4658_v31 = vadd.f32 %v4657_v11, %v3600_v27  ;;  %v3602_v32 = vpop.f32.mrb[3].mxu1  ;;  %7020 = vmatprep.mubr.msk.bf16.mxu0 %vm3178_vm0, %v7682_v34  ;;  %v7703_v34 = vld [vmem:[%s10404_s0 + $0x424] ss:$16 sps:$4 sm:$0xff]  }
 0x119   :  { %5678 = vst [vmem:[#allocation2 + $0x8] sm:$0xff] %v4658_v31  ;;  %3812 = vmatmul.mubr.bf16.gmra.mrb[108].mxu1 %v7669_v25  ;;  %v4678_v40 = vpop.f32.mrb[12].mxu0  ;;  %v7699_v31 = vld [vmem:[%s10404_s0 + $0x400] ss:$16 sps:$4 sm:$0xff]  }
 0x11a   :  { %3819 = vmatprep.mubr.bf16.mxu1 %v7673_v28  ;;  %v4680_v43 = vpop.f32.mrb[13].mxu0 }
 0x11b   :  { %v4681_v47 = vpop.f32.mrb[14].mxu0 }
 0x11c   :  { %v3605_v36 = vpop.f32.mrb[4].mxu1  ;;  %v4683_v49 = vpop.f32.mrb[15].mxu0 }
 0x11d   :  { %v4663_v37 = vadd.f32 %v4662_v15, %v3605_v36  ;;  %v3607_v38 = vpop.f32.mrb[5].mxu1  ;;  %v7708_v36 = vld [vmem:[%s10404_s0 + $0x448] ss:$16 sps:$4 sm:$0xff]  }
 0x11e   :  { %v3608_v41 = vpop.f32.mrb[6].mxu1  ;;  %4893 = vmatmul.mubr.bf16.gmra.mrb[120].mxu0 %v7684_v44 }
 0x11f   :  { %5679 = vst [vmem:[#allocation2 + $0x10] sm:$0xff] %v4663_v37  ;;  %v4666_v45 = vadd.f32 %v4665_v19, %v3608_v41  ;;  %v3610_v46 = vpop.f32.mrb[7].mxu1  ;;  %7021 = vmatprep.mubr.msk.bf16.mxu0 %vm3178_vm0, %v7688_v48  ;;  %v7709_v48 = vld [vmem:[%s10404_s0 + $0x444] ss:$16 sps:$4 sm:$0xff]  }
 0x121   :  { %5680 = vst [vmem:[#allocation2 + $0x18] sm:$0xff] %v4666_v45  ;;  %3820 = vmatmul.mubr.bf16.gmra.mrb[112].mxu1 %v7675_v39  ;;  %v4686_v54 = vpop.f32.mrb[16].mxu0  ;;  %v7705_v45 = vld [vmem:[%s10404_s0 + $0x420] ss:$16 sps:$4 sm:$0xff]  }
 0x122   :  { %3827 = vmatprep.mubr.bf16.mxu1 %v7679_v42  ;;  %v4688_v57 = vpop.f32.mrb[17].mxu0 }
 0x123   :  { %v4689_v61 = vpop.f32.mrb[18].mxu0 }
 0x124   :  { %v3613_v50 = vpop.f32.mrb[8].mxu1  ;;  %v4691_v63 = vpop.f32.mrb[19].mxu0 }
 0x125   :  { %v4671_v51 = vadd.f32 %v4670_v26, %v3613_v50  ;;  %v3615_v52 = vpop.f32.mrb[9].mxu1  ;;  %v7706_v26 = vld [vmem:[%s10404_s0 + $0x44c] ss:$16 sps:$4 sm:$0xff]   ;;  %v7714_v50 = vld [vmem:[%s10404_s0 + $0x468] ss:$16 sps:$4 sm:$0xff]  }
 0x126   :  { %v3616_v55 = vpop.f32.mrb[10].mxu1  ;;  %4901 = vmatmul.mubr.bf16.gmra.mrb[124].mxu0 %v7690_v58 }
 0x127   :  { %5681 = vst [vmem:[#allocation2 + $0x20] sm:$0xff] %v4671_v51  ;;  %v4674_v59 = vadd.f32 %v4673_v33, %v3616_v55  ;;  %v3618_v60 = vpop.f32.mrb[11].mxu1  ;;  %7022 = vmatprep.mubr.msk.bf16.mxu0 %vm3178_vm0, %v7694_v62  ;;  %v7715_v62 = vld [vmem:[%s10404_s0 + $0x464] ss:$16 sps:$4 sm:$0xff]  }
 0x129   :  { %5682 = vst [vmem:[#allocation2 + $0x28] sm:$0xff] %v4674_v59  ;;  %3828 = vmatmul.mubr.bf16.gmra.mrb[116].mxu1 %v7681_v53  ;;  %v4694_v4 = vpop.f32.mrb[20].mxu0  ;;  %v7711_v59 = vld [vmem:[%s10404_s0 + $0x440] ss:$16 sps:$4 sm:$0xff]  }
 0x12a   :  { %3835 = vmatprep.mubr.bf16.mxu1 %v7685_v56  ;;  %v4696_v7 = vpop.f32.mrb[21].mxu0 }
 0x12b   :  { %v4697_v11 = vpop.f32.mrb[22].mxu0 }
 0x12c   :  { %v3621_v0 = vpop.f32.mrb[12].mxu1  ;;  %v4699_v13 = vpop.f32.mrb[23].mxu0 }
 0x12d   :  { %v4679_v1 = vadd.f32 %v4678_v40, %v3621_v0  ;;  %v3623_v2 = vpop.f32.mrb[13].mxu1  ;;  %v7712_v40 = vld [vmem:[%s10404_s0 + $0x46c] ss:$16 sps:$4 sm:$0xff]   ;;  %v7720_v0 = vld [vmem:[%s10404_s0 + $0x488] ss:$16 sps:$4 sm:$0xff]  }
 0x12e   :  { %v3624_v5 = vpop.f32.mrb[14].mxu1  ;;  %4909 = vmatmul.mubr.bf16.gmra.mrb[128].mxu0 %v7696_v8 }
 0x12f   :  { %5683 = vst [vmem:[#allocation2 + $0x30] sm:$0xff] %v4679_v1  ;;  %v4682_v9 = vadd.f32 %v4681_v47, %v3624_v5  ;;  %v3626_v10 = vpop.f32.mrb[15].mxu1  ;;  %7023 = vmatprep.mubr.msk.bf16.mxu0 %vm3178_vm0, %v7700_v12  ;;  %v7721_v12 = vld [vmem:[%s10404_s0 + $0x484] ss:$16 sps:$4 sm:$0xff]  }
 0x131   :  { %5684 = vst [vmem:[#allocation2 + $0x38] sm:$0xff] %v4682_v9  ;;  %3836 = vmatmul.mubr.bf16.gmra.mrb[120].mxu1 %v7687_v3  ;;  %v4702_v18 = vpop.f32.mrb[24].mxu0  ;;  %v7717_v9 = vld [vmem:[%s10404_s0 + $0x460] ss:$16 sps:$4 sm:$0xff]  }
 0x132   :  { %3843 = vmatprep.mubr.bf16.mxu1 %v7691_v6  ;;  %v4704_v21 = vpop.f32.mrb[25].mxu0 }
 0x133   :  { %v4705_v25 = vpop.f32.mrb[26].mxu0 }
 0x134   :  { %v3629_v14 = vpop.f32.mrb[16].mxu1  ;;  %v4707_v27 = vpop.f32.mrb[27].mxu0 }
 0x135   :  { %v4687_v15 = vadd.f32 %v4686_v54, %v3629_v14  ;;  %v3631_v16 = vpop.f32.mrb[17].mxu1  ;;  %v7718_v54 = vld [vmem:[%s10404_s0 + $0x48c] ss:$16 sps:$4 sm:$0xff]   ;;  %v7726_v14 = vld [vmem:[%s10404_s0 + $0x4a8] ss:$16 sps:$4 sm:$0xff]  }
 0x136   :  { %v3632_v19 = vpop.f32.mrb[18].mxu1  ;;  %4917 = vmatmul.mubr.bf16.gmra.mrb[132].mxu0 %v7702_v22 }
 0x137   :  { %5685 = vst [vmem:[#allocation2 + $0x40] sm:$0xff] %v4687_v15  ;;  %v4690_v23 = vadd.f32 %v4689_v61, %v3632_v19  ;;  %v3634_v24 = vpop.f32.mrb[19].mxu1  ;;  %7024 = vmatprep.mubr.msk.bf16.mxu0 %vm3178_vm0, %v7706_v26  ;;  %v7727_v26 = vld [vmem:[%s10404_s0 + $0x4a4] ss:$16 sps:$4 sm:$0xff]  }
 0x139   :  { %5686 = vst [vmem:[#allocation2 + $0x48] sm:$0xff] %v4690_v23  ;;  %3844 = vmatmul.mubr.bf16.gmra.mrb[124].mxu1 %v7693_v17  ;;  %v4710_v32 = vpop.f32.mrb[28].mxu0  ;;  %v7723_v23 = vld [vmem:[%s10404_s0 + $0x480] ss:$16 sps:$4 sm:$0xff]  }
 0x13a   :  { %3851 = vmatprep.mubr.bf16.mxu1 %v7697_v20  ;;  %v4712_v35 = vpop.f32.mrb[29].mxu0 }
 0x13b   :  { %v4713_v39 = vpop.f32.mrb[30].mxu0 }
 0x13c   :  { %v3637_v28 = vpop.f32.mrb[20].mxu1  ;;  %v4715_v41 = vpop.f32.mrb[31].mxu0 }
 0x13d   :  { %v4695_v29 = vadd.f32 %v4694_v4, %v3637_v28  ;;  %v3639_v30 = vpop.f32.mrb[21].mxu1  ;;  %v7724_v4 = vld [vmem:[%s10404_s0 + $0x4ac] ss:$16 sps:$4 sm:$0xff]   ;;  %v7732_v28 = vld [vmem:[%s10404_s0 + $0x4c8] ss:$16 sps:$4 sm:$0xff]  }
 0x13e   :  { %v3640_v33 = vpop.f32.mrb[22].mxu1  ;;  %4925 = vmatmul.mubr.bf16.gmra.mrb[136].mxu0 %v7708_v36 }
 0x13f   :  { %5687 = vst [vmem:[#allocation2 + $0x50] sm:$0xff] %v4695_v29  ;;  %v4698_v37 = vadd.f32 %v4697_v11, %v3640_v33  ;;  %v3642_v38 = vpop.f32.mrb[23].mxu1  ;;  %7025 = vmatprep.mubr.msk.bf16.mxu0 %vm3178_vm0, %v7712_v40  ;;  %v7733_v40 = vld [vmem:[%s10404_s0 + $0x4c4] ss:$16 sps:$4 sm:$0xff]  }
 0x141   :  { %5688 = vst [vmem:[#allocation2 + $0x58] sm:$0xff] %v4698_v37  ;;  %3852 = vmatmul.mubr.bf16.gmra.mrb[128].mxu1 %v7699_v31  ;;  %v4718_v46 = vpop.f32.mrb[32].mxu0  ;;  %v7729_v37 = vld [vmem:[%s10404_s0 + $0x4a0] ss:$16 sps:$4 sm:$0xff]  }
 0x142   :  { %3859 = vmatprep.mubr.bf16.mxu1 %v7703_v34  ;;  %v4720_v49 = vpop.f32.mrb[33].mxu0 }
 0x143   :  { %v4721_v53 = vpop.f32.mrb[34].mxu0 }
 0x144   :  { %v3645_v42 = vpop.f32.mrb[24].mxu1  ;;  %v4723_v55 = vpop.f32.mrb[35].mxu0 }
 0x145   :  { %v4703_v43 = vadd.f32 %v4702_v18, %v3645_v42  ;;  %v3647_v44 = vpop.f32.mrb[25].mxu1  ;;  %v7730_v18 = vld [vmem:[%s10404_s0 + $0x4cc] ss:$16 sps:$4 sm:$0xff]   ;;  %v7738_v42 = vld [vmem:[%s10404_s0 + $0x4e8] ss:$16 sps:$4 sm:$0xff]  }
 0x146   :  { %v3648_v47 = vpop.f32.mrb[26].mxu1  ;;  %4933 = vmatmul.mubr.bf16.gmra.mrb[140].mxu0 %v7714_v50 }
 0x147   :  { %5689 = vst [vmem:[#allocation2 + $0x60] sm:$0xff] %v4703_v43  ;;  %v4706_v51 = vadd.f32 %v4705_v25, %v3648_v47  ;;  %v3650_v52 = vpop.f32.mrb[27].mxu1  ;;  %7026 = vmatprep.mubr.msk.bf16.mxu0 %vm3178_vm0, %v7718_v54  ;;  %v7739_v54 = vld [vmem:[%s10404_s0 + $0x4e4] ss:$16 sps:$4 sm:$0xff]  }
 0x149   :  { %5690 = vst [vmem:[#allocation2 + $0x68] sm:$0xff] %v4706_v51  ;;  %3860 = vmatmul.mubr.bf16.gmra.mrb[132].mxu1 %v7705_v45  ;;  %v4726_v60 = vpop.f32.mrb[36].mxu0  ;;  %v7735_v51 = vld [vmem:[%s10404_s0 + $0x4c0] ss:$16 sps:$4 sm:$0xff]  }
 0x14a   :  { %3867 = vmatprep.mubr.bf16.mxu1 %v7709_v48  ;;  %v4728_v63 = vpop.f32.mrb[37].mxu0 }
 0x14b   :  { %v4729_v3 = vpop.f32.mrb[38].mxu0 }
 0x14c   :  { %v3653_v56 = vpop.f32.mrb[28].mxu1  ;;  %v4731_v5 = vpop.f32.mrb[39].mxu0 }
 0x14d   :  { %v4711_v57 = vadd.f32 %v4710_v32, %v3653_v56  ;;  %v3655_v58 = vpop.f32.mrb[29].mxu1  ;;  %v7736_v32 = vld [vmem:[%s10404_s0 + $0x4ec] ss:$16 sps:$4 sm:$0xff]   ;;  %v7744_v56 = vld [vmem:[%s10404_s0 + $0x508] ss:$16 sps:$4 sm:$0xff]  }
 0x14e   :  { %v3656_v61 = vpop.f32.mrb[30].mxu1  ;;  %4941 = vmatmul.mubr.bf16.gmra.mrb[144].mxu0 %v7720_v0 }
 0x14f   :  { %5691 = vst [vmem:[#allocation2 + $0x70] sm:$0xff] %v4711_v57  ;;  %v4714_v1 = vadd.f32 %v4713_v39, %v3656_v61  ;;  %v3658_v2 = vpop.f32.mrb[31].mxu1  ;;  %7027 = vmatprep.mubr.msk.bf16.mxu0 %vm3178_vm0, %v7724_v4  ;;  %v7745_v4 = vld [vmem:[%s10404_s0 + $0x504] ss:$16 sps:$4 sm:$0xff]  }
 0x151   :  { %5692 = vst [vmem:[#allocation2 + $0x78] sm:$0xff] %v4714_v1  ;;  %3868 = vmatmul.mubr.bf16.gmra.mrb[136].mxu1 %v7711_v59  ;;  %v4734_v10 = vpop.f32.mrb[40].mxu0  ;;  %v7741_v1 = vld [vmem:[%s10404_s0 + $0x4e0] ss:$16 sps:$4 sm:$0xff]  }
 0x152   :  { %3875 = vmatprep.mubr.bf16.mxu1 %v7715_v62  ;;  %v4736_v13 = vpop.f32.mrb[41].mxu0 }
 0x153   :  { %v4737_v17 = vpop.f32.mrb[42].mxu0 }
 0x154   :  { %v3661_v6 = vpop.f32.mrb[32].mxu1  ;;  %v4739_v19 = vpop.f32.mrb[43].mxu0 }
 0x155   :  { %v4719_v7 = vadd.f32 %v4718_v46, %v3661_v6  ;;  %v3663_v8 = vpop.f32.mrb[33].mxu1  ;;  %v7742_v46 = vld [vmem:[%s10404_s0 + $0x50c] ss:$16 sps:$4 sm:$0xff]   ;;  %v7750_v6 = vld [vmem:[%s10404_s0 + $0x528] ss:$16 sps:$4 sm:$0xff]  }
 0x156   :  { %v3664_v11 = vpop.f32.mrb[34].mxu1  ;;  %4949 = vmatmul.mubr.bf16.gmra.mrb[148].mxu0 %v7726_v14 }
 0x157   :  { %5693 = vst [vmem:[#allocation2 + $0x80] sm:$0xff] %v4719_v7  ;;  %v4722_v15 = vadd.f32 %v4721_v53, %v3664_v11  ;;  %v3666_v16 = vpop.f32.mrb[35].mxu1  ;;  %7028 = vmatprep.mubr.msk.bf16.mxu0 %vm3178_vm0, %v7730_v18  ;;  %v7751_v18 = vld [vmem:[%s10404_s0 + $0x524] ss:$16 sps:$4 sm:$0xff]  }
 0x159   :  { %5694 = vst [vmem:[#allocation2 + $0x88] sm:$0xff] %v4722_v15  ;;  %3876 = vmatmul.mubr.bf16.gmra.mrb[140].mxu1 %v7717_v9  ;;  %v4742_v24 = vpop.f32.mrb[44].mxu0  ;;  %v7747_v15 = vld [vmem:[%s10404_s0 + $0x500] ss:$16 sps:$4 sm:$0xff]  }
 0x15a   :  { %3883 = vmatprep.mubr.bf16.mxu1 %v7721_v12  ;;  %v4744_v27 = vpop.f32.mrb[45].mxu0 }
 0x15b   :  { %v4745_v31 = vpop.f32.mrb[46].mxu0 }
 0x15c   :  { %v3669_v20 = vpop.f32.mrb[36].mxu1  ;;  %v4747_v33 = vpop.f32.mrb[47].mxu0 }
 0x15d   :  { %v4727_v21 = vadd.f32 %v4726_v60, %v3669_v20  ;;  %v3671_v22 = vpop.f32.mrb[37].mxu1  ;;  %v7748_v60 = vld [vmem:[%s10404_s0 + $0x52c] ss:$16 sps:$4 sm:$0xff]   ;;  %v7756_v20 = vld [vmem:[%s10404_s0 + $0x548] ss:$16 sps:$4 sm:$0xff]  }
 0x15e   :  { %v3672_v25 = vpop.f32.mrb[38].mxu1  ;;  %4957 = vmatmul.mubr.bf16.gmra.mrb[152].mxu0 %v7732_v28 }
 0x15f   :  { %5695 = vst [vmem:[#allocation2 + $0x90] sm:$0xff] %v4727_v21  ;;  %v4730_v29 = vadd.f32 %v4729_v3, %v3672_v25  ;;  %v3674_v30 = vpop.f32.mrb[39].mxu1  ;;  %7029 = vmatprep.mubr.msk.bf16.mxu0 %vm3178_vm0, %v7736_v32  ;;  %v7757_v32 = vld [vmem:[%s10404_s0 + $0x544] ss:$16 sps:$4 sm:$0xff]  }
 0x161   :  { %5696 = vst [vmem:[#allocation2 + $0x98] sm:$0xff] %v4730_v29  ;;  %3884 = vmatmul.mubr.bf16.gmra.mrb[144].mxu1 %v7723_v23  ;;  %v4750_v38 = vpop.f32.mrb[48].mxu0  ;;  %v7753_v29 = vld [vmem:[%s10404_s0 + $0x520] ss:$16 sps:$4 sm:$0xff]  }
 0x162   :  { %3891 = vmatprep.mubr.bf16.mxu1 %v7727_v26  ;;  %v4752_v41 = vpop.f32.mrb[49].mxu0 }
 0x163   :  { %v4753_v45 = vpop.f32.mrb[50].mxu0 }
 0x164   :  { %v3677_v34 = vpop.f32.mrb[40].mxu1  ;;  %v4755_v47 = vpop.f32.mrb[51].mxu0 }
 0x165   :  { %v4735_v35 = vadd.f32 %v4734_v10, %v3677_v34  ;;  %v3679_v36 = vpop.f32.mrb[41].mxu1  ;;  %v7754_v10 = vld [vmem:[%s10404_s0 + $0x54c] ss:$16 sps:$4 sm:$0xff]   ;;  %v7762_v34 = vld [vmem:[%s10404_s0 + $0x568] ss:$16 sps:$4 sm:$0xff]  }
 0x166   :  { %v3680_v39 = vpop.f32.mrb[42].mxu1  ;;  %4965 = vmatmul.mubr.bf16.gmra.mrb[156].mxu0 %v7738_v42 }
 0x167   :  { %5697 = vst [vmem:[#allocation2 + $0xa0] sm:$0xff] %v4735_v35  ;;  %v4738_v43 = vadd.f32 %v4737_v17, %v3680_v39  ;;  %v3682_v44 = vpop.f32.mrb[43].mxu1  ;;  %7030 = vmatprep.mubr.msk.bf16.mxu0 %vm3178_vm0, %v7742_v46  ;;  %v7763_v46 = vld [vmem:[%s10404_s0 + $0x564] ss:$16 sps:$4 sm:$0xff]  }
 0x169   :  { %5698 = vst [vmem:[#allocation2 + $0xa8] sm:$0xff] %v4738_v43  ;;  %3892 = vmatmul.mubr.bf16.gmra.mrb[148].mxu1 %v7729_v37  ;;  %v4758_v52 = vpop.f32.mrb[52].mxu0  ;;  %v7759_v43 = vld [vmem:[%s10404_s0 + $0x540] ss:$16 sps:$4 sm:$0xff]  }
 0x16a   :  { %3899 = vmatprep.mubr.bf16.mxu1 %v7733_v40  ;;  %v4760_v55 = vpop.f32.mrb[53].mxu0 }
 0x16b   :  { %v4761_v59 = vpop.f32.mrb[54].mxu0 }
 0x16c   :  { %v3685_v48 = vpop.f32.mrb[44].mxu1  ;;  %v4763_v61 = vpop.f32.mrb[55].mxu0 }
 0x16d   :  { %v4743_v49 = vadd.f32 %v4742_v24, %v3685_v48  ;;  %v3687_v50 = vpop.f32.mrb[45].mxu1  ;;  %v7760_v24 = vld [vmem:[%s10404_s0 + $0x56c] ss:$16 sps:$4 sm:$0xff]   ;;  %v7768_v48 = vld [vmem:[%s10404_s0 + $0x588] ss:$16 sps:$4 sm:$0xff]  }
 0x16e   :  { %v3688_v53 = vpop.f32.mrb[46].mxu1  ;;  %4973 = vmatmul.mubr.bf16.gmra.mrb[160].mxu0 %v7744_v56 }
 0x16f   :  { %5699 = vst [vmem:[#allocation2 + $0xb0] sm:$0xff] %v4743_v49  ;;  %v4746_v57 = vadd.f32 %v4745_v31, %v3688_v53  ;;  %v3690_v58 = vpop.f32.mrb[47].mxu1  ;;  %7031 = vmatprep.mubr.msk.bf16.mxu0 %vm3178_vm0, %v7748_v60  ;;  %v7769_v60 = vld [vmem:[%s10404_s0 + $0x584] ss:$16 sps:$4 sm:$0xff]  }
 0x171   :  { %5700 = vst [vmem:[#allocation2 + $0xb8] sm:$0xff] %v4746_v57  ;;  %3900 = vmatmul.mubr.bf16.gmra.mrb[152].mxu1 %v7735_v51  ;;  %v4766_v2 = vpop.f32.mrb[56].mxu0  ;;  %v7765_v57 = vld [vmem:[%s10404_s0 + $0x560] ss:$16 sps:$4 sm:$0xff]  }
 0x172   :  { %3907 = vmatprep.mubr.bf16.mxu1 %v7739_v54  ;;  %v4768_v5 = vpop.f32.mrb[57].mxu0 }
 0x173   :  { %v4769_v9 = vpop.f32.mrb[58].mxu0 }
 0x174   :  { %v3693_v62 = vpop.f32.mrb[48].mxu1  ;;  %v4771_v11 = vpop.f32.mrb[59].mxu0 }
 0x175   :  { %v4751_v63 = vadd.f32 %v4750_v38, %v3693_v62  ;;  %v3695_v0 = vpop.f32.mrb[49].mxu1  ;;  %v7766_v38 = vld [vmem:[%s10404_s0 + $0x58c] ss:$16 sps:$4 sm:$0xff]   ;;  %v7774_v62 = vld [vmem:[%s10404_s0 + $0x5a8] ss:$16 sps:$4 sm:$0xff]  }
 0x176   :  { %v3696_v3 = vpop.f32.mrb[50].mxu1  ;;  %4981 = vmatmul.mubr.bf16.gmra.mrb[164].mxu0 %v7750_v6 }
 0x177   :  { %5701 = vst [vmem:[#allocation2 + $0xc0] sm:$0xff] %v4751_v63  ;;  %v4754_v7 = vadd.f32 %v4753_v45, %v3696_v3  ;;  %v3698_v8 = vpop.f32.mrb[51].mxu1  ;;  %7032 = vmatprep.mubr.msk.bf16.mxu0 %vm3178_vm0, %v7754_v10  ;;  %v7775_v10 = vld [vmem:[%s10404_s0 + $0x5a4] ss:$16 sps:$4 sm:$0xff]  }
 0x179   :  { %5702 = vst [vmem:[#allocation2 + $0xc8] sm:$0xff] %v4754_v7  ;;  %3908 = vmatmul.mubr.bf16.gmra.mrb[156].mxu1 %v7741_v1  ;;  %v4774_v16 = vpop.f32.mrb[60].mxu0  ;;  %v7771_v7 = vld [vmem:[%s10404_s0 + $0x580] ss:$16 sps:$4 sm:$0xff]  }
 0x17a   :  { %3915 = vmatprep.mubr.bf16.mxu1 %v7745_v4  ;;  %v4776_v19 = vpop.f32.mrb[61].mxu0 }
 0x17b   :  { %v4777_v23 = vpop.f32.mrb[62].mxu0 }
 0x17c   :  { %v3701_v12 = vpop.f32.mrb[52].mxu1  ;;  %v4779_v25 = vpop.f32.mrb[63].mxu0 }
 0x17d   :  { %v4759_v13 = vadd.f32 %v4758_v52, %v3701_v12  ;;  %v3703_v14 = vpop.f32.mrb[53].mxu1  ;;  %v7772_v52 = vld [vmem:[%s10404_s0 + $0x5ac] ss:$16 sps:$4 sm:$0xff]   ;;  %v7780_v12 = vld [vmem:[%s10404_s0 + $0x5c8] ss:$16 sps:$4 sm:$0xff]  }
 0x17e   :  { %v3704_v17 = vpop.f32.mrb[54].mxu1  ;;  %4989 = vmatmul.mubr.bf16.gmra.mrb[168].mxu0 %v7756_v20 }
 0x17f   :  { %5703 = vst [vmem:[#allocation2 + $0xd0] sm:$0xff] %v4759_v13  ;;  %v4762_v21 = vadd.f32 %v4761_v59, %v3704_v17  ;;  %v3706_v22 = vpop.f32.mrb[55].mxu1  ;;  %7033 = vmatprep.mubr.msk.bf16.mxu0 %vm3178_vm0, %v7760_v24  ;;  %v7781_v24 = vld [vmem:[%s10404_s0 + $0x5c4] ss:$16 sps:$4 sm:$0xff]  }
 0x181   :  { %5704 = vst [vmem:[#allocation2 + $0xd8] sm:$0xff] %v4762_v21  ;;  %3916 = vmatmul.mubr.bf16.gmra.mrb[160].mxu1 %v7747_v15  ;;  %v4782_v30 = vpop.f32.mrb[64].mxu0  ;;  %v7777_v21 = vld [vmem:[%s10404_s0 + $0x5a0] ss:$16 sps:$4 sm:$0xff]  }
 0x182   :  { %3923 = vmatprep.mubr.bf16.mxu1 %v7751_v18  ;;  %v4784_v33 = vpop.f32.mrb[65].mxu0 }
 0x183   :  { %v4785_v37 = vpop.f32.mrb[66].mxu0 }
 0x184   :  { %v3709_v26 = vpop.f32.mrb[56].mxu1  ;;  %v4787_v39 = vpop.f32.mrb[67].mxu0 }
 0x185   :  { %v4767_v27 = vadd.f32 %v4766_v2, %v3709_v26  ;;  %v3711_v28 = vpop.f32.mrb[57].mxu1  ;;  %v7778_v2 = vld [vmem:[%s10404_s0 + $0x5cc] ss:$16 sps:$4 sm:$0xff]   ;;  %v7786_v26 = vld [vmem:[%s10404_s0 + $0x5e8] ss:$16 sps:$4 sm:$0xff]  }
 0x186   :  { %v3712_v31 = vpop.f32.mrb[58].mxu1  ;;  %4997 = vmatmul.mubr.bf16.gmra.mrb[172].mxu0 %v7762_v34 }
 0x187   :  { %5705 = vst [vmem:[#allocation2 + $0xe0] sm:$0xff] %v4767_v27  ;;  %v4770_v35 = vadd.f32 %v4769_v9, %v3712_v31  ;;  %v3714_v36 = vpop.f32.mrb[59].mxu1  ;;  %7034 = vmatprep.mubr.msk.bf16.mxu0 %vm3178_vm0, %v7766_v38  ;;  %v7787_v38 = vld [vmem:[%s10404_s0 + $0x5e4] ss:$16 sps:$4 sm:$0xff]  }
 0x189   :  { %5706 = vst [vmem:[#allocation2 + $0xe8] sm:$0xff] %v4770_v35  ;;  %3924 = vmatmul.mubr.bf16.gmra.mrb[164].mxu1 %v7753_v29  ;;  %v4790_v44 = vpop.f32.mrb[68].mxu0  ;;  %v7783_v35 = vld [vmem:[%s10404_s0 + $0x5c0] ss:$16 sps:$4 sm:$0xff]  }
 0x18a   :  { %3931 = vmatprep.mubr.bf16.mxu1 %v7757_v32  ;;  %v4792_v47 = vpop.f32.mrb[69].mxu0 }
 0x18b   :  { %v4793_v51 = vpop.f32.mrb[70].mxu0 }
 0x18c   :  { %v3717_v40 = vpop.f32.mrb[60].mxu1  ;;  %v4795_v53 = vpop.f32.mrb[71].mxu0 }
 0x18d   :  { %v4775_v41 = vadd.f32 %v4774_v16, %v3717_v40  ;;  %v3719_v42 = vpop.f32.mrb[61].mxu1  ;;  %v7784_v16 = vld [vmem:[%s10404_s0 + $0x5ec] ss:$16 sps:$4 sm:$0xff]   ;;  %v7792_v40 = vld [vmem:[%s10404_s0 + $0x608] ss:$16 sps:$4 sm:$0xff]  }
 0x18e   :  { %v3720_v45 = vpop.f32.mrb[62].mxu1  ;;  %5005 = vmatmul.mubr.bf16.gmra.mrb[176].mxu0 %v7768_v48 }
 0x18f   :  { %5707 = vst [vmem:[#allocation2 + $0xf0] sm:$0xff] %v4775_v41  ;;  %v4778_v49 = vadd.f32 %v4777_v23, %v3720_v45  ;;  %v3722_v50 = vpop.f32.mrb[63].mxu1  ;;  %7035 = vmatprep.mubr.msk.bf16.mxu0 %vm3178_vm0, %v7772_v52  ;;  %v7793_v52 = vld [vmem:[%s10404_s0 + $0x604] ss:$16 sps:$4 sm:$0xff]  }
 0x191   :  { %5708 = vst [vmem:[#allocation2 + $0xf8] sm:$0xff] %v4778_v49  ;;  %3932 = vmatmul.mubr.bf16.gmra.mrb[168].mxu1 %v7759_v43  ;;  %v4798_v58 = vpop.f32.mrb[72].mxu0  ;;  %v7789_v49 = vld [vmem:[%s10404_s0 + $0x5e0] ss:$16 sps:$4 sm:$0xff]  }
 0x192   :  { %3939 = vmatprep.mubr.bf16.mxu1 %v7763_v46  ;;  %v4800_v61 = vpop.f32.mrb[73].mxu0 }
 0x193   :  { %v4801_v1 = vpop.f32.mrb[74].mxu0 }
 0x194   :  { %v3725_v54 = vpop.f32.mrb[64].mxu1  ;;  %v4803_v3 = vpop.f32.mrb[75].mxu0 }
 0x195   :  { %v4783_v55 = vadd.f32 %v4782_v30, %v3725_v54  ;;  %v3727_v56 = vpop.f32.mrb[65].mxu1  ;;  %v7790_v30 = vld [vmem:[%s10404_s0 + $0x60c] ss:$16 sps:$4 sm:$0xff]   ;;  %v7798_v54 = vld [vmem:[%s10404_s0 + $0x628] ss:$16 sps:$4 sm:$0xff]  }
 0x196   :  { %v3728_v59 = vpop.f32.mrb[66].mxu1  ;;  %5013 = vmatmul.mubr.bf16.gmra.mrb[180].mxu0 %v7774_v62 }
 0x197   :  { %5709 = vst [vmem:[#allocation2 + $0x100] sm:$0xff] %v4783_v55  ;;  %v4786_v63 = vadd.f32 %v4785_v37, %v3728_v59  ;;  %v3730_v0 = vpop.f32.mrb[67].mxu1  ;;  %7036 = vmatprep.mubr.msk.bf16.mxu0 %vm3178_vm0, %v7778_v2  ;;  %v7799_v2 = vld [vmem:[%s10404_s0 + $0x624] ss:$16 sps:$4 sm:$0xff]  }
 0x199   :  { %5710 = vst [vmem:[#allocation2 + $0x108] sm:$0xff] %v4786_v63  ;;  %3940 = vmatmul.mubr.bf16.gmra.mrb[172].mxu1 %v7765_v57  ;;  %v4806_v8 = vpop.f32.mrb[76].mxu0  ;;  %v7795_v63 = vld [vmem:[%s10404_s0 + $0x600] ss:$16 sps:$4 sm:$0xff]  }
 0x19a   :  { %3947 = vmatprep.mubr.bf16.mxu1 %v7769_v60  ;;  %v4808_v11 = vpop.f32.mrb[77].mxu0 }
 0x19b   :  { %v4809_v15 = vpop.f32.mrb[78].mxu0 }
 0x19c   :  { %v3733_v4 = vpop.f32.mrb[68].mxu1  ;;  %v4811_v17 = vpop.f32.mrb[79].mxu0 }
 0x19d   :  { %v4791_v5 = vadd.f32 %v4790_v44, %v3733_v4  ;;  %v3735_v6 = vpop.f32.mrb[69].mxu1  ;;  %v7796_v44 = vld [vmem:[%s10404_s0 + $0x62c] ss:$16 sps:$4 sm:$0xff]   ;;  %v7804_v4 = vld [vmem:[%s10404_s0 + $0x648] ss:$16 sps:$4 sm:$0xff]  }
 0x19e   :  { %v3736_v9 = vpop.f32.mrb[70].mxu1  ;;  %5021 = vmatmul.mubr.bf16.gmra.mrb[184].mxu0 %v7780_v12 }
 0x19f   :  { %5711 = vst [vmem:[#allocation2 + $0x110] sm:$0xff] %v4791_v5  ;;  %v4794_v13 = vadd.f32 %v4793_v51, %v3736_v9  ;;  %v3738_v14 = vpop.f32.mrb[71].mxu1  ;;  %7037 = vmatprep.mubr.msk.bf16.mxu0 %vm3178_vm0, %v7784_v16  ;;  %v7805_v16 = vld [vmem:[%s10404_s0 + $0x644] ss:$16 sps:$4 sm:$0xff]  }
 0x1a1   :  { %5712 = vst [vmem:[#allocation2 + $0x118] sm:$0xff] %v4794_v13  ;;  %3948 = vmatmul.mubr.bf16.gmra.mrb[176].mxu1 %v7771_v7  ;;  %v4814_v22 = vpop.f32.mrb[80].mxu0  ;;  %v7801_v13 = vld [vmem:[%s10404_s0 + $0x620] ss:$16 sps:$4 sm:$0xff]  }
 0x1a2   :  { %3955 = vmatprep.mubr.bf16.mxu1 %v7775_v10  ;;  %v4816_v25 = vpop.f32.mrb[81].mxu0 }
 0x1a3   :  { %v4817_v29 = vpop.f32.mrb[82].mxu0 }
 0x1a4   :  { %v3741_v18 = vpop.f32.mrb[72].mxu1  ;;  %v4819_v31 = vpop.f32.mrb[83].mxu0 }
 0x1a5   :  { %v4799_v19 = vadd.f32 %v4798_v58, %v3741_v18  ;;  %v3743_v20 = vpop.f32.mrb[73].mxu1  ;;  %v7802_v58 = vld [vmem:[%s10404_s0 + $0x64c] ss:$16 sps:$4 sm:$0xff]   ;;  %v7810_v18 = vld [vmem:[%s10404_s0 + $0x668] ss:$16 sps:$4 sm:$0xff]  }
 0x1a6   :  { %v3744_v23 = vpop.f32.mrb[74].mxu1  ;;  %5029 = vmatmul.mubr.bf16.gmra.mrb[188].mxu0 %v7786_v26 }
 0x1a7   :  { %5713 = vst [vmem:[#allocation2 + $0x120] sm:$0xff] %v4799_v19  ;;  %v4802_v27 = vadd.f32 %v4801_v1, %v3744_v23  ;;  %v3746_v28 = vpop.f32.mrb[75].mxu1  ;;  %7038 = vmatprep.mubr.msk.bf16.mxu0 %vm3178_vm0, %v7790_v30  ;;  %v7811_v30 = vld [vmem:[%s10404_s0 + $0x664] ss:$16 sps:$4 sm:$0xff]  }
 0x1a9   :  { %5714 = vst [vmem:[#allocation2 + $0x128] sm:$0xff] %v4802_v27  ;;  %3956 = vmatmul.mubr.bf16.gmra.mrb[180].mxu1 %v7777_v21  ;;  %v4822_v36 = vpop.f32.mrb[84].mxu0  ;;  %v7807_v27 = vld [vmem:[%s10404_s0 + $0x640] ss:$16 sps:$4 sm:$0xff]  }
 0x1aa   :  { %3963 = vmatprep.mubr.bf16.mxu1 %v7781_v24  ;;  %v4824_v39 = vpop.f32.mrb[85].mxu0 }
 0x1ab   :  { %v4825_v43 = vpop.f32.mrb[86].mxu0 }
 0x1ac   :  { %v3749_v32 = vpop.f32.mrb[76].mxu1  ;;  %v4827_v45 = vpop.f32.mrb[87].mxu0 }
 0x1ad   :  { %v4807_v33 = vadd.f32 %v4806_v8, %v3749_v32  ;;  %v3751_v34 = vpop.f32.mrb[77].mxu1  ;;  %v7808_v8 = vld [vmem:[%s10404_s0 + $0x66c] ss:$16 sps:$4 sm:$0xff]   ;;  %v7816_v32 = vld [vmem:[%s10404_s0 + $0x688] ss:$16 sps:$4 sm:$0xff]  }
 0x1ae   :  { %v3752_v37 = vpop.f32.mrb[78].mxu1  ;;  %5037 = vmatmul.mubr.bf16.gmra.mrb[192].mxu0 %v7792_v40 }
 0x1af   :  { %5715 = vst [vmem:[#allocation2 + $0x130] sm:$0xff] %v4807_v33  ;;  %v4810_v41 = vadd.f32 %v4809_v15, %v3752_v37  ;;  %v3754_v42 = vpop.f32.mrb[79].mxu1  ;;  %7039 = vmatprep.mubr.msk.bf16.mxu0 %vm3178_vm0, %v7796_v44  ;;  %v7817_v44 = vld [vmem:[%s10404_s0 + $0x684] ss:$16 sps:$4 sm:$0xff]  }
 0x1b1   :  { %5716 = vst [vmem:[#allocation2 + $0x138] sm:$0xff] %v4810_v41  ;;  %3964 = vmatmul.mubr.bf16.gmra.mrb[184].mxu1 %v7783_v35  ;;  %v4830_v50 = vpop.f32.mrb[88].mxu0  ;;  %v7813_v41 = vld [vmem:[%s10404_s0 + $0x660] ss:$16 sps:$4 sm:$0xff]  }
 0x1b2   :  { %3971 = vmatprep.mubr.bf16.mxu1 %v7787_v38  ;;  %v4832_v53 = vpop.f32.mrb[89].mxu0 }
 0x1b3   :  { %v4833_v57 = vpop.f32.mrb[90].mxu0 }
 0x1b4   :  { %v3757_v46 = vpop.f32.mrb[80].mxu1  ;;  %v4835_v59 = vpop.f32.mrb[91].mxu0 }
 0x1b5   :  { %v4815_v47 = vadd.f32 %v4814_v22, %v3757_v46  ;;  %v3759_v48 = vpop.f32.mrb[81].mxu1  ;;  %v7814_v22 = vld [vmem:[%s10404_s0 + $0x68c] ss:$16 sps:$4 sm:$0xff]   ;;  %v7822_v46 = vld [vmem:[%s10404_s0 + $0x6a8] ss:$16 sps:$4 sm:$0xff]  }
 0x1b6   :  { %v3760_v51 = vpop.f32.mrb[82].mxu1  ;;  %5045 = vmatmul.mubr.bf16.gmra.mrb[196].mxu0 %v7798_v54 }
 0x1b7   :  { %5717 = vst [vmem:[#allocation2 + $0x140] sm:$0xff] %v4815_v47  ;;  %v4818_v55 = vadd.f32 %v4817_v29, %v3760_v51  ;;  %v3762_v56 = vpop.f32.mrb[83].mxu1  ;;  %7040 = vmatprep.mubr.msk.bf16.mxu0 %vm3178_vm0, %v7802_v58  ;;  %v7823_v58 = vld [vmem:[%s10404_s0 + $0x6a4] ss:$16 sps:$4 sm:$0xff]  }
 0x1b9   :  { %5718 = vst [vmem:[#allocation2 + $0x148] sm:$0xff] %v4818_v55  ;;  %3972 = vmatmul.mubr.bf16.gmra.mrb[188].mxu1 %v7789_v49  ;;  %v4838_v0 = vpop.f32.mrb[92].mxu0  ;;  %v7819_v55 = vld [vmem:[%s10404_s0 + $0x680] ss:$16 sps:$4 sm:$0xff]  }
 0x1ba   :  { %3979 = vmatprep.mubr.bf16.mxu1 %v7793_v52  ;;  %v4840_v3 = vpop.f32.mrb[93].mxu0 }
 0x1bb   :  { %v4841_v7 = vpop.f32.mrb[94].mxu0 }
 0x1bc   :  { %v3765_v60 = vpop.f32.mrb[84].mxu1  ;;  %v4843_v9 = vpop.f32.mrb[95].mxu0 }
 0x1bd   :  { %v4823_v61 = vadd.f32 %v4822_v36, %v3765_v60  ;;  %v3767_v62 = vpop.f32.mrb[85].mxu1  ;;  %v7820_v36 = vld [vmem:[%s10404_s0 + $0x6ac] ss:$16 sps:$4 sm:$0xff]   ;;  %v7828_v60 = vld [vmem:[%s10404_s0 + $0x6c8] ss:$16 sps:$4 sm:$0xff]  }
 0x1be   :  { %v3768_v1 = vpop.f32.mrb[86].mxu1  ;;  %5053 = vmatmul.mubr.bf16.gmra.mrb[200].mxu0 %v7804_v4 }
 0x1bf   :  { %5719 = vst [vmem:[#allocation2 + $0x150] sm:$0xff] %v4823_v61  ;;  %v4826_v5 = vadd.f32 %v4825_v43, %v3768_v1  ;;  %v3770_v6 = vpop.f32.mrb[87].mxu1  ;;  %7041 = vmatprep.mubr.msk.bf16.mxu0 %vm3178_vm0, %v7808_v8  ;;  %v7829_v8 = vld [vmem:[%s10404_s0 + $0x6c4] ss:$16 sps:$4 sm:$0xff]  }
 0x1c1   :  { %5720 = vst [vmem:[#allocation2 + $0x158] sm:$0xff] %v4826_v5  ;;  %3980 = vmatmul.mubr.bf16.gmra.mrb[192].mxu1 %v7795_v63  ;;  %v4846_v14 = vpop.f32.mrb[96].mxu0  ;;  %v7825_v5 = vld [vmem:[%s10404_s0 + $0x6a0] ss:$16 sps:$4 sm:$0xff]  }
 0x1c2   :  { %3987 = vmatprep.mubr.bf16.mxu1 %v7799_v2  ;;  %v4848_v17 = vpop.f32.mrb[97].mxu0 }
 0x1c3   :  { %v4849_v21 = vpop.f32.mrb[98].mxu0 }
 0x1c4   :  { %v3773_v10 = vpop.f32.mrb[88].mxu1  ;;  %v4851_v23 = vpop.f32.mrb[99].mxu0 }
 0x1c5   :  { %v4831_v11 = vadd.f32 %v4830_v50, %v3773_v10  ;;  %v3775_v12 = vpop.f32.mrb[89].mxu1  ;;  %v7826_v50 = vld [vmem:[%s10404_s0 + $0x6cc] ss:$16 sps:$4 sm:$0xff]   ;;  %v7834_v10 = vld [vmem:[%s10404_s0 + $0x6e8] ss:$16 sps:$4 sm:$0xff]  }
 0x1c6   :  { %v3776_v15 = vpop.f32.mrb[90].mxu1  ;;  %5061 = vmatmul.mubr.bf16.gmra.mrb[204].mxu0 %v7810_v18 }
 0x1c7   :  { %5721 = vst [vmem:[#allocation2 + $0x160] sm:$0xff] %v4831_v11  ;;  %v4834_v19 = vadd.f32 %v4833_v57, %v3776_v15  ;;  %v3778_v20 = vpop.f32.mrb[91].mxu1  ;;  %7042 = vmatprep.mubr.msk.bf16.mxu0 %vm3178_vm0, %v7814_v22  ;;  %v7835_v22 = vld [vmem:[%s10404_s0 + $0x6e4] ss:$16 sps:$4 sm:$0xff]  }
 0x1c9   :  { %5722 = vst [vmem:[#allocation2 + $0x168] sm:$0xff] %v4834_v19  ;;  %3988 = vmatmul.mubr.bf16.gmra.mrb[196].mxu1 %v7801_v13  ;;  %v4854_v28 = vpop.f32.mrb[100].mxu0  ;;  %v7831_v19 = vld [vmem:[%s10404_s0 + $0x6c0] ss:$16 sps:$4 sm:$0xff]  }
 0x1ca   :  { %3995 = vmatprep.mubr.bf16.mxu1 %v7805_v16  ;;  %v4856_v31 = vpop.f32.mrb[101].mxu0 }
 0x1cb   :  { %v4857_v35 = vpop.f32.mrb[102].mxu0 }
 0x1cc   :  { %v3781_v24 = vpop.f32.mrb[92].mxu1  ;;  %v4859_v37 = vpop.f32.mrb[103].mxu0 }
 0x1cd   :  { %v4839_v25 = vadd.f32 %v4838_v0, %v3781_v24  ;;  %v3783_v26 = vpop.f32.mrb[93].mxu1  ;;  %v7832_v0 = vld [vmem:[%s10404_s0 + $0x6ec] ss:$16 sps:$4 sm:$0xff]   ;;  %v7840_v24 = vld [vmem:[%s10404_s0 + $0x708] ss:$16 sps:$4 sm:$0xff]  }
 0x1ce   :  { %v3784_v29 = vpop.f32.mrb[94].mxu1  ;;  %5069 = vmatmul.mubr.bf16.gmra.mrb[208].mxu0 %v7816_v32 }
 0x1cf   :  { %5723 = vst [vmem:[#allocation2 + $0x170] sm:$0xff] %v4839_v25  ;;  %v4842_v33 = vadd.f32 %v4841_v7, %v3784_v29  ;;  %v3786_v34 = vpop.f32.mrb[95].mxu1  ;;  %7043 = vmatprep.mubr.msk.bf16.mxu0 %vm3178_vm0, %v7820_v36  ;;  %v7841_v36 = vld [vmem:[%s10404_s0 + $0x704] ss:$16 sps:$4 sm:$0xff]  }
 0x1d1   :  { %5724 = vst [vmem:[#allocation2 + $0x178] sm:$0xff] %v4842_v33  ;;  %3996 = vmatmul.mubr.bf16.gmra.mrb[200].mxu1 %v7807_v27  ;;  %v4862_v42 = vpop.f32.mrb[104].mxu0  ;;  %v7837_v33 = vld [vmem:[%s10404_s0 + $0x6e0] ss:$16 sps:$4 sm:$0xff]  }
 0x1d2   :  { %4003 = vmatprep.mubr.bf16.mxu1 %v7811_v30  ;;  %v4864_v45 = vpop.f32.mrb[105].mxu0 }
 0x1d3   :  { %v4865_v49 = vpop.f32.mrb[106].mxu0 }
 0x1d4   :  { %v3789_v38 = vpop.f32.mrb[96].mxu1  ;;  %v4867_v51 = vpop.f32.mrb[107].mxu0 }
 0x1d5   :  { %v4847_v39 = vadd.f32 %v4846_v14, %v3789_v38  ;;  %v3791_v40 = vpop.f32.mrb[97].mxu1  ;;  %v7838_v14 = vld [vmem:[%s10404_s0 + $0x70c] ss:$16 sps:$4 sm:$0xff]   ;;  %v7846_v38 = vld [vmem:[%s10404_s0 + $0x728] ss:$16 sps:$4 sm:$0xff]  }
 0x1d6   :  { %v3792_v43 = vpop.f32.mrb[98].mxu1  ;;  %5077 = vmatmul.mubr.bf16.gmra.mrb[212].mxu0 %v7822_v46 }
 0x1d7   :  { %5725 = vst [vmem:[#allocation2 + $0x180] sm:$0xff] %v4847_v39  ;;  %v4850_v47 = vadd.f32 %v4849_v21, %v3792_v43  ;;  %v3794_v48 = vpop.f32.mrb[99].mxu1  ;;  %7044 = vmatprep.mubr.msk.bf16.mxu0 %vm3178_vm0, %v7826_v50  ;;  %v7847_v50 = vld [vmem:[%s10404_s0 + $0x724] ss:$16 sps:$4 sm:$0xff]  }
 0x1d9   :  { %5726 = vst [vmem:[#allocation2 + $0x188] sm:$0xff] %v4850_v47  ;;  %4004 = vmatmul.mubr.bf16.gmra.mrb[204].mxu1 %v7813_v41  ;;  %v4870_v56 = vpop.f32.mrb[108].mxu0  ;;  %v7843_v47 = vld [vmem:[%s10404_s0 + $0x700] ss:$16 sps:$4 sm:$0xff]  }
 0x1da   :  { %4011 = vmatprep.mubr.bf16.mxu1 %v7817_v44  ;;  %v4872_v59 = vpop.f32.mrb[109].mxu0 }
 0x1db   :  { %v4873_v63 = vpop.f32.mrb[110].mxu0 }
 0x1dc   :  { %v3797_v52 = vpop.f32.mrb[100].mxu1  ;;  %v4875_v1 = vpop.f32.mrb[111].mxu0 }
 0x1dd   :  { %v4855_v53 = vadd.f32 %v4854_v28, %v3797_v52  ;;  %v3799_v54 = vpop.f32.mrb[101].mxu1  ;;  %v7844_v28 = vld [vmem:[%s10404_s0 + $0x72c] ss:$16 sps:$4 sm:$0xff]   ;;  %v7852_v52 = vld [vmem:[%s10404_s0 + $0x748] ss:$16 sps:$4 sm:$0xff]  }
 0x1de   :  { %v3800_v57 = vpop.f32.mrb[102].mxu1  ;;  %5085 = vmatmul.mubr.bf16.gmra.mrb[216].mxu0 %v7828_v60 }
 0x1df   :  { %5727 = vst [vmem:[#allocation2 + $0x190] sm:$0xff] %v4855_v53  ;;  %v4858_v61 = vadd.f32 %v4857_v35, %v3800_v57  ;;  %v3802_v62 = vpop.f32.mrb[103].mxu1  ;;  %7045 = vmatprep.mubr.msk.bf16.mxu0 %vm3178_vm0, %v7832_v0  ;;  %v7853_v0 = vld [vmem:[%s10404_s0 + $0x744] ss:$16 sps:$4 sm:$0xff]  }
 0x1e1   :  { %5728 = vst [vmem:[#allocation2 + $0x198] sm:$0xff] %v4858_v61  ;;  %4012 = vmatmul.mubr.bf16.gmra.mrb[208].mxu1 %v7819_v55  ;;  %v4878_v6 = vpop.f32.mrb[112].mxu0  ;;  %v7849_v61 = vld [vmem:[%s10404_s0 + $0x720] ss:$16 sps:$4 sm:$0xff]  }
 0x1e2   :  { %4019 = vmatprep.mubr.bf16.mxu1 %v7823_v58  ;;  %v4880_v9 = vpop.f32.mrb[113].mxu0 }
 0x1e3   :  { %v4881_v13 = vpop.f32.mrb[114].mxu0 }
 0x1e4   :  { %v3805_v2 = vpop.f32.mrb[104].mxu1  ;;  %v4883_v15 = vpop.f32.mrb[115].mxu0 }
 0x1e5   :  { %v4863_v3 = vadd.f32 %v4862_v42, %v3805_v2  ;;  %v3807_v4 = vpop.f32.mrb[105].mxu1  ;;  %v7850_v42 = vld [vmem:[%s10404_s0 + $0x74c] ss:$16 sps:$4 sm:$0xff]   ;;  %v7858_v2 = vld [vmem:[%s10404_s0 + $0x768] ss:$16 sps:$4 sm:$0xff]  }
 0x1e6   :  { %v3808_v7 = vpop.f32.mrb[106].mxu1  ;;  %5093 = vmatmul.mubr.bf16.gmra.mrb[220].mxu0 %v7834_v10 }
 0x1e7   :  { %5729 = vst [vmem:[#allocation2 + $0x1a0] sm:$0xff] %v4863_v3  ;;  %v4866_v11 = vadd.f32 %v4865_v49, %v3808_v7  ;;  %v3810_v12 = vpop.f32.mrb[107].mxu1  ;;  %7046 = vmatprep.mubr.msk.bf16.mxu0 %vm3178_vm0, %v7838_v14  ;;  %v7859_v14 = vld [vmem:[%s10404_s0 + $0x764] ss:$16 sps:$4 sm:$0xff]  }
 0x1e9   :  { %5730 = vst [vmem:[#allocation2 + $0x1a8] sm:$0xff] %v4866_v11  ;;  %4020 = vmatmul.mubr.bf16.gmra.mrb[212].mxu1 %v7825_v5  ;;  %v4886_v20 = vpop.f32.mrb[116].mxu0  ;;  %v7855_v11 = vld [vmem:[%s10404_s0 + $0x740] ss:$16 sps:$4 sm:$0xff]  }
 0x1ea   :  { %4027 = vmatprep.mubr.bf16.mxu1 %v7829_v8  ;;  %v4888_v23 = vpop.f32.mrb[117].mxu0 }
 0x1eb   :  { %v4889_v27 = vpop.f32.mrb[118].mxu0 }
 0x1ec   :  { %v3813_v16 = vpop.f32.mrb[108].mxu1  ;;  %v4891_v29 = vpop.f32.mrb[119].mxu0 }
 0x1ed   :  { %v4871_v17 = vadd.f32 %v4870_v56, %v3813_v16  ;;  %v3815_v18 = vpop.f32.mrb[109].mxu1  ;;  %v7856_v56 = vld [vmem:[%s10404_s0 + $0x76c] ss:$16 sps:$4 sm:$0xff]   ;;  %v7864_v16 = vld [vmem:[%s10404_s0 + $0x788] ss:$16 sps:$4 sm:$0xff]  }
 0x1ee   :  { %v3816_v21 = vpop.f32.mrb[110].mxu1  ;;  %5101 = vmatmul.mubr.bf16.gmra.mrb[224].mxu0 %v7840_v24 }
 0x1ef   :  { %5731 = vst [vmem:[#allocation2 + $0x1b0] sm:$0xff] %v4871_v17  ;;  %v4874_v25 = vadd.f32 %v4873_v63, %v3816_v21  ;;  %v3818_v26 = vpop.f32.mrb[111].mxu1  ;;  %7047 = vmatprep.mubr.msk.bf16.mxu0 %vm3178_vm0, %v7844_v28  ;;  %v7865_v28 = vld [vmem:[%s10404_s0 + $0x784] ss:$16 sps:$4 sm:$0xff]  }
 0x1f1   :  { %5732 = vst [vmem:[#allocation2 + $0x1b8] sm:$0xff] %v4874_v25  ;;  %4028 = vmatmul.mubr.bf16.gmra.mrb[216].mxu1 %v7831_v19  ;;  %v4894_v34 = vpop.f32.mrb[120].mxu0  ;;  %v7861_v25 = vld [vmem:[%s10404_s0 + $0x760] ss:$16 sps:$4 sm:$0xff]  }
 0x1f2   :  { %4035 = vmatprep.mubr.bf16.mxu1 %v7835_v22  ;;  %v4896_v37 = vpop.f32.mrb[121].mxu0 }
 0x1f3   :  { %v4897_v41 = vpop.f32.mrb[122].mxu0 }
 0x1f4   :  { %v3821_v30 = vpop.f32.mrb[112].mxu1  ;;  %v4899_v43 = vpop.f32.mrb[123].mxu0 }
 0x1f5   :  { %v4879_v31 = vadd.f32 %v4878_v6, %v3821_v30  ;;  %v3823_v32 = vpop.f32.mrb[113].mxu1  ;;  %v7862_v6 = vld [vmem:[%s10404_s0 + $0x78c] ss:$16 sps:$4 sm:$0xff]   ;;  %v7870_v30 = vld [vmem:[%s10404_s0 + $0x7a8] ss:$16 sps:$4 sm:$0xff]  }
 0x1f6   :  { %v3824_v35 = vpop.f32.mrb[114].mxu1  ;;  %5109 = vmatmul.mubr.bf16.gmra.mrb[228].mxu0 %v7846_v38 }
 0x1f7   :  { %5733 = vst [vmem:[#allocation2 + $0x1c0] sm:$0xff] %v4879_v31  ;;  %v4882_v39 = vadd.f32 %v4881_v13, %v3824_v35  ;;  %v3826_v40 = vpop.f32.mrb[115].mxu1  ;;  %7048 = vmatprep.mubr.msk.bf16.mxu0 %vm3178_vm0, %v7850_v42  ;;  %v7871_v42 = vld [vmem:[%s10404_s0 + $0x7a4] ss:$16 sps:$4 sm:$0xff]  }
 0x1f9   :  { %5734 = vst [vmem:[#allocation2 + $0x1c8] sm:$0xff] %v4882_v39  ;;  %4036 = vmatmul.mubr.bf16.gmra.mrb[220].mxu1 %v7837_v33  ;;  %v4902_v48 = vpop.f32.mrb[124].mxu0  ;;  %v7867_v39 = vld [vmem:[%s10404_s0 + $0x780] ss:$16 sps:$4 sm:$0xff]  }
 0x1fa   :  { %4043 = vmatprep.mubr.bf16.mxu1 %v7841_v36  ;;  %v4904_v51 = vpop.f32.mrb[125].mxu0 }
 0x1fb   :  { %v4905_v55 = vpop.f32.mrb[126].mxu0 }
 0x1fc   :  { %v3829_v44 = vpop.f32.mrb[116].mxu1  ;;  %v4907_v57 = vpop.f32.mrb[127].mxu0 }
 0x1fd   :  { %v4887_v45 = vadd.f32 %v4886_v20, %v3829_v44  ;;  %v3831_v46 = vpop.f32.mrb[117].mxu1  ;;  %v7868_v20 = vld [vmem:[%s10404_s0 + $0x7ac] ss:$16 sps:$4 sm:$0xff]   ;;  %v7876_v44 = vld [vmem:[%s10404_s0 + $0x7c8] ss:$16 sps:$4 sm:$0xff]  }
 0x1fe   :  { %v3832_v49 = vpop.f32.mrb[118].mxu1  ;;  %5117 = vmatmul.mubr.bf16.gmra.mrb[232].mxu0 %v7852_v52 }
 0x1ff   :  { %5735 = vst [vmem:[#allocation2 + $0x1d0] sm:$0xff] %v4887_v45  ;;  %v4890_v53 = vadd.f32 %v4889_v27, %v3832_v49  ;;  %v3834_v54 = vpop.f32.mrb[119].mxu1  ;;  %7049 = vmatprep.mubr.msk.bf16.mxu0 %vm3178_vm0, %v7856_v56  ;;  %v7877_v56 = vld [vmem:[%s10404_s0 + $0x7c4] ss:$16 sps:$4 sm:$0xff]  }
 0x201   :  { %5736 = vst [vmem:[#allocation2 + $0x1d8] sm:$0xff] %v4890_v53  ;;  %4044 = vmatmul.mubr.bf16.gmra.mrb[224].mxu1 %v7843_v47  ;;  %v4910_v62 = vpop.f32.mrb[128].mxu0  ;;  %v7873_v53 = vld [vmem:[%s10404_s0 + $0x7a0] ss:$16 sps:$4 sm:$0xff]  }
 0x202   :  { %4051 = vmatprep.mubr.bf16.mxu1 %v7847_v50  ;;  %v4912_v1 = vpop.f32.mrb[129].mxu0 }
 0x203   :  { %v4913_v5 = vpop.f32.mrb[130].mxu0 }
 0x204   :  { %v3837_v58 = vpop.f32.mrb[120].mxu1  ;;  %v4915_v7 = vpop.f32.mrb[131].mxu0 }
 0x205   :  { %v4895_v59 = vadd.f32 %v4894_v34, %v3837_v58  ;;  %v3839_v60 = vpop.f32.mrb[121].mxu1  ;;  %v7874_v34 = vld [vmem:[%s10404_s0 + $0x7cc] ss:$16 sps:$4 sm:$0xff]   ;;  %v7882_v58 = vld [vmem:[%s10404_s0 + $0x7e8] ss:$16 sps:$4 sm:$0xff]  }
 0x206   :  { %v3840_v63 = vpop.f32.mrb[122].mxu1  ;;  %5125 = vmatmul.mubr.bf16.gmra.mrb[236].mxu0 %v7858_v2 }
 0x207   :  { %5737 = vst [vmem:[#allocation2 + $0x1e0] sm:$0xff] %v4895_v59  ;;  %v4898_v3 = vadd.f32 %v4897_v41, %v3840_v63  ;;  %v3842_v4 = vpop.f32.mrb[123].mxu1  ;;  %7050 = vmatprep.mubr.msk.bf16.mxu0 %vm3178_vm0, %v7862_v6  ;;  %v7883_v6 = vld [vmem:[%s10404_s0 + $0x7e4] ss:$16 sps:$4 sm:$0xff]  }
 0x209   :  { %5738 = vst [vmem:[#allocation2 + $0x1e8] sm:$0xff] %v4898_v3  ;;  %4052 = vmatmul.mubr.bf16.gmra.mrb[228].mxu1 %v7849_v61  ;;  %v4918_v12 = vpop.f32.mrb[132].mxu0  ;;  %v7879_v3 = vld [vmem:[%s10404_s0 + $0x7c0] ss:$16 sps:$4 sm:$0xff]  }
 0x20a   :  { %4059 = vmatprep.mubr.bf16.mxu1 %v7853_v0  ;;  %v4920_v15 = vpop.f32.mrb[133].mxu0 }
 0x20b   :  { %v4921_v19 = vpop.f32.mrb[134].mxu0 }
 0x20c   :  { %v3845_v8 = vpop.f32.mrb[124].mxu1  ;;  %v4923_v21 = vpop.f32.mrb[135].mxu0 }
 0x20d   :  { %v4903_v9 = vadd.f32 %v4902_v48, %v3845_v8  ;;  %v3847_v10 = vpop.f32.mrb[125].mxu1  ;;  %v7880_v48 = vld [vmem:[%s10404_s0 + $0x7ec] ss:$16 sps:$4 sm:$0xff]   ;;  %v7886_v8 = vld [vmem:[%s10404_s0 + $0x808] ss:$16 sps:$4 sm:$0xff]  }
 0x20e   :  { %v3848_v13 = vpop.f32.mrb[126].mxu1  ;;  %5133 = vmatmul.mubr.bf16.gmra.mrb[240].mxu0 %v7864_v16 }
 0x20f   :  { %5739 = vst [vmem:[#allocation2 + $0x1f0] sm:$0xff] %v4903_v9  ;;  %v4906_v17 = vadd.f32 %v4905_v55, %v3848_v13  ;;  %v3850_v18 = vpop.f32.mrb[127].mxu1  ;;  %7051 = vmatprep.mubr.msk.bf16.mxu0 %vm3178_vm0, %v7868_v20  ;;  %v7891_v20 = vld [vmem:[%s10404_s0 + $0x804] ss:$16 sps:$4 sm:$0xff]  }
 0x211   :  { %5740 = vst [vmem:[#allocation2 + $0x1f8] sm:$0xff] %v4906_v17  ;;  %4060 = vmatmul.mubr.bf16.gmra.mrb[232].mxu1 %v7855_v11  ;;  %v4926_v26 = vpop.f32.mrb[136].mxu0  ;;  %v7885_v17 = vld [vmem:[%s10404_s0 + $0x7e0] ss:$16 sps:$4 sm:$0xff]  }
 0x212   :  { %4067 = vmatprep.mubr.bf16.mxu1 %v7859_v14  ;;  %v4928_v29 = vpop.f32.mrb[137].mxu0 }
 0x213   :  { %v4929_v33 = vpop.f32.mrb[138].mxu0 }
 0x214   :  { %v3853_v22 = vpop.f32.mrb[128].mxu1  ;;  %v4931_v35 = vpop.f32.mrb[139].mxu0 }
 0x215   :  { %v4911_v23 = vadd.f32 %v4910_v62, %v3853_v22  ;;  %v3855_v24 = vpop.f32.mrb[129].mxu1  ;;  %v7888_v62 = vld [vmem:[%s10404_s0 + $0x80c] ss:$16 sps:$4 sm:$0xff]   ;;  %v7892_v22 = vld [vmem:[%s10404_s0 + $0x828] ss:$16 sps:$4 sm:$0xff]  }
 0x216   :  { %v3856_v27 = vpop.f32.mrb[130].mxu1  ;;  %5141 = vmatmul.mubr.bf16.gmra.mrb[244].mxu0 %v7870_v30 }
 0x217   :  { %5741 = vst [vmem:[#allocation2 + $0x200] sm:$0xff] %v4911_v23  ;;  %v4914_v31 = vadd.f32 %v4913_v5, %v3856_v27  ;;  %v3858_v32 = vpop.f32.mrb[131].mxu1  ;;  %7052 = vmatprep.mubr.msk.bf16.mxu0 %vm3178_vm0, %v7874_v34  ;;  %v7897_v34 = vld [vmem:[%s10404_s0 + $0x824] ss:$16 sps:$4 sm:$0xff]  }
 0x219   :  { %5742 = vst [vmem:[#allocation2 + $0x208] sm:$0xff] %v4914_v31  ;;  %4068 = vmatmul.mubr.bf16.gmra.mrb[236].mxu1 %v7861_v25  ;;  %v4934_v40 = vpop.f32.mrb[140].mxu0  ;;  %v7889_v31 = vld [vmem:[%s10404_s0 + $0x800] ss:$16 sps:$4 sm:$0xff]  }
 0x21a   :  { %4075 = vmatprep.mubr.bf16.mxu1 %v7865_v28  ;;  %v4936_v43 = vpop.f32.mrb[141].mxu0 }
 0x21b   :  { %v4937_v47 = vpop.f32.mrb[142].mxu0 }
 0x21c   :  { %v3861_v36 = vpop.f32.mrb[132].mxu1  ;;  %v4939_v49 = vpop.f32.mrb[143].mxu0 }
 0x21d   :  { %v4919_v37 = vadd.f32 %v4918_v12, %v3861_v36  ;;  %v3863_v38 = vpop.f32.mrb[133].mxu1  ;;  %v7894_v12 = vld [vmem:[%s10404_s0 + $0x82c] ss:$16 sps:$4 sm:$0xff]   ;;  %v7898_v36 = vld [vmem:[%s10404_s0 + $0x848] ss:$16 sps:$4 sm:$0xff]  }
 0x21e   :  { %v3864_v41 = vpop.f32.mrb[134].mxu1  ;;  %5149 = vmatmul.mubr.bf16.gmra.mrb[248].mxu0 %v7876_v44 }
 0x21f   :  { %5743 = vst [vmem:[#allocation2 + $0x210] sm:$0xff] %v4919_v37  ;;  %v4922_v45 = vadd.f32 %v4921_v19, %v3864_v41  ;;  %v3866_v46 = vpop.f32.mrb[135].mxu1  ;;  %7053 = vmatprep.mubr.msk.bf16.mxu0 %vm3178_vm0, %v7880_v48  ;;  %v7903_v48 = vld [vmem:[%s10404_s0 + $0x844] ss:$16 sps:$4 sm:$0xff]  }
 0x221   :  { %5744 = vst [vmem:[#allocation2 + $0x218] sm:$0xff] %v4922_v45  ;;  %4076 = vmatmul.mubr.bf16.gmra.mrb[240].mxu1 %v7867_v39  ;;  %v4942_v54 = vpop.f32.mrb[144].mxu0  ;;  %v7895_v45 = vld [vmem:[%s10404_s0 + $0x820] ss:$16 sps:$4 sm:$0xff]  }
 0x222   :  { %4083 = vmatprep.mubr.bf16.mxu1 %v7871_v42  ;;  %v4944_v57 = vpop.f32.mrb[145].mxu0 }
 0x223   :  { %v4945_v61 = vpop.f32.mrb[146].mxu0 }
 0x224   :  { %v3869_v50 = vpop.f32.mrb[136].mxu1  ;;  %v4947_v63 = vpop.f32.mrb[147].mxu0 }
 0x225   :  { %v4927_v51 = vadd.f32 %v4926_v26, %v3869_v50  ;;  %v3871_v52 = vpop.f32.mrb[137].mxu1  ;;  %v7900_v26 = vld [vmem:[%s10404_s0 + $0x84c] ss:$16 sps:$4 sm:$0xff]   ;;  %v7904_v50 = vld [vmem:[%s10404_s0 + $0x868] ss:$16 sps:$4 sm:$0xff]  }
 0x226   :  { %v3872_v55 = vpop.f32.mrb[138].mxu1  ;;  %5157 = vmatmul.mubr.bf16.gmra.mrb[252].mxu0 %v7882_v58 }
 0x227   :  { %5745 = vst [vmem:[#allocation2 + $0x220] sm:$0xff] %v4927_v51  ;;  %v4930_v59 = vadd.f32 %v4929_v33, %v3872_v55  ;;  %v3874_v60 = vpop.f32.mrb[139].mxu1  ;;  %7054 = vmatprep.mubr.msk.bf16.mxu0 %vm3178_vm0, %v7888_v62  ;;  %v7909_v62 = vld [vmem:[%s10404_s0 + $0x864] ss:$16 sps:$4 sm:$0xff]  }
 0x229   :  { %5746 = vst [vmem:[#allocation2 + $0x228] sm:$0xff] %v4930_v59  ;;  %4084 = vmatmul.mubr.bf16.gmra.mrb[244].mxu1 %v7873_v53  ;;  %v4950_v4 = vpop.f32.mrb[148].mxu0  ;;  %v7901_v59 = vld [vmem:[%s10404_s0 + $0x840] ss:$16 sps:$4 sm:$0xff]  }
 0x22a   :  { %4091 = vmatprep.mubr.bf16.mxu1 %v7877_v56  ;;  %v4952_v7 = vpop.f32.mrb[149].mxu0 }
 0x22b   :  { %v4953_v11 = vpop.f32.mrb[150].mxu0 }
 0x22c   :  { %v3877_v0 = vpop.f32.mrb[140].mxu1  ;;  %v4955_v13 = vpop.f32.mrb[151].mxu0 }
 0x22d   :  { %v4935_v1 = vadd.f32 %v4934_v40, %v3877_v0  ;;  %v3879_v2 = vpop.f32.mrb[141].mxu1  ;;  %v7906_v40 = vld [vmem:[%s10404_s0 + $0x86c] ss:$16 sps:$4 sm:$0xff]   ;;  %v7910_v0 = vld [vmem:[%s10404_s0 + $0x888] ss:$16 sps:$4 sm:$0xff]  }
 0x22e   :  { %v3880_v5 = vpop.f32.mrb[142].mxu1  ;;  %5165 = vmatmul.mubr.bf16.gmra.mrb[0].mxu0 %v7886_v8 }
 0x22f   :  { %5747 = vst [vmem:[#allocation2 + $0x230] sm:$0xff] %v4935_v1  ;;  %v4938_v9 = vadd.f32 %v4937_v47, %v3880_v5  ;;  %v3882_v10 = vpop.f32.mrb[143].mxu1  ;;  %7055 = vmatprep.mubr.msk.bf16.mxu0 %vm3178_vm0, %v7894_v12  ;;  %v7915_v12 = vld [vmem:[%s10404_s0 + $0x884] ss:$16 sps:$4 sm:$0xff]  }
 0x231   :  { %5748 = vst [vmem:[#allocation2 + $0x238] sm:$0xff] %v4938_v9  ;;  %4092 = vmatmul.mubr.bf16.gmra.mrb[248].mxu1 %v7879_v3  ;;  %v4958_v18 = vpop.f32.mrb[152].mxu0  ;;  %v7907_v9 = vld [vmem:[%s10404_s0 + $0x860] ss:$16 sps:$4 sm:$0xff]  }
 0x232   :  { %4099 = vmatprep.mubr.bf16.mxu1 %v7883_v6  ;;  %v4960_v21 = vpop.f32.mrb[153].mxu0 }
 0x233   :  { %v4961_v25 = vpop.f32.mrb[154].mxu0 }
 0x234   :  { %v3885_v14 = vpop.f32.mrb[144].mxu1  ;;  %v4963_v27 = vpop.f32.mrb[155].mxu0 }
 0x235   :  { %v4943_v15 = vadd.f32 %v4942_v54, %v3885_v14  ;;  %v3887_v16 = vpop.f32.mrb[145].mxu1  ;;  %v7912_v54 = vld [vmem:[%s10404_s0 + $0x88c] ss:$16 sps:$4 sm:$0xff]   ;;  %v7916_v14 = vld [vmem:[%s10404_s0 + $0x8a8] ss:$16 sps:$4 sm:$0xff]  }
 0x236   :  { %v3888_v19 = vpop.f32.mrb[146].mxu1  ;;  %5173 = vmatmul.mubr.bf16.gmra.mrb[4].mxu0 %v7892_v22 }
 0x237   :  { %5749 = vst [vmem:[#allocation2 + $0x240] sm:$0xff] %v4943_v15  ;;  %v4946_v23 = vadd.f32 %v4945_v61, %v3888_v19  ;;  %v3890_v24 = vpop.f32.mrb[147].mxu1  ;;  %7056 = vmatprep.mubr.msk.bf16.mxu0 %vm3178_vm0, %v7900_v26  ;;  %v7921_v26 = vld [vmem:[%s10404_s0 + $0x8a4] ss:$16 sps:$4 sm:$0xff]  }
 0x239   :  { %5750 = vst [vmem:[#allocation2 + $0x248] sm:$0xff] %v4946_v23  ;;  %4100 = vmatmul.mubr.bf16.gmra.mrb[252].mxu1 %v7885_v17  ;;  %v4966_v32 = vpop.f32.mrb[156].mxu0  ;;  %v7913_v23 = vld [vmem:[%s10404_s0 + $0x880] ss:$16 sps:$4 sm:$0xff]  }
 0x23a   :  { %4107 = vmatprep.mubr.bf16.mxu1 %v7891_v20  ;;  %v4968_v35 = vpop.f32.mrb[157].mxu0 }
 0x23b   :  { %v4969_v39 = vpop.f32.mrb[158].mxu0 }
 0x23c   :  { %v3893_v28 = vpop.f32.mrb[148].mxu1  ;;  %v4971_v41 = vpop.f32.mrb[159].mxu0 }
 0x23d   :  { %v4951_v29 = vadd.f32 %v4950_v4, %v3893_v28  ;;  %v3895_v30 = vpop.f32.mrb[149].mxu1  ;;  %v7918_v4 = vld [vmem:[%s10404_s0 + $0x8ac] ss:$16 sps:$4 sm:$0xff]   ;;  %v7922_v28 = vld [vmem:[%s10404_s0 + $0x8c8] ss:$16 sps:$4 sm:$0xff]  }
 0x23e   :  { %v3896_v33 = vpop.f32.mrb[150].mxu1  ;;  %5181 = vmatmul.mubr.bf16.gmra.mrb[8].mxu0 %v7898_v36 }
 0x23f   :  { %5751 = vst [vmem:[#allocation2 + $0x250] sm:$0xff] %v4951_v29  ;;  %v4954_v37 = vadd.f32 %v4953_v11, %v3896_v33  ;;  %v3898_v38 = vpop.f32.mrb[151].mxu1  ;;  %7057 = vmatprep.mubr.msk.bf16.mxu0 %vm3178_vm0, %v7906_v40  ;;  %v7927_v40 = vld [vmem:[%s10404_s0 + $0x8c4] ss:$16 sps:$4 sm:$0xff]  }
 0x241   :  { %5752 = vst [vmem:[#allocation2 + $0x258] sm:$0xff] %v4954_v37  ;;  %4108 = vmatmul.mubr.bf16.gmra.mrb[148].mxu1 %v7889_v31  ;;  %v4974_v46 = vpop.f32.mrb[160].mxu0  ;;  %v7919_v37 = vld [vmem:[%s10404_s0 + $0x8a0] ss:$16 sps:$4 sm:$0xff]  }
 0x242   :  { %4115 = vmatprep.mubr.bf16.mxu1 %v7897_v34  ;;  %v4976_v49 = vpop.f32.mrb[161].mxu0 }
 0x243   :  { %v4977_v53 = vpop.f32.mrb[162].mxu0 }
 0x244   :  { %v3901_v42 = vpop.f32.mrb[152].mxu1  ;;  %v4979_v55 = vpop.f32.mrb[163].mxu0 }
 0x245   :  { %v4959_v43 = vadd.f32 %v4958_v18, %v3901_v42  ;;  %v3903_v44 = vpop.f32.mrb[153].mxu1  ;;  %v7924_v18 = vld [vmem:[%s10404_s0 + $0x8cc] ss:$16 sps:$4 sm:$0xff]   ;;  %v7928_v42 = vld [vmem:[%s10404_s0 + $0x8e8] ss:$16 sps:$4 sm:$0xff]  }
 0x246   :  { %v3904_v47 = vpop.f32.mrb[154].mxu1  ;;  %5189 = vmatmul.mubr.bf16.gmra.mrb[12].mxu0 %v7904_v50 }
 0x247   :  { %5753 = vst [vmem:[#allocation2 + $0x260] sm:$0xff] %v4959_v43  ;;  %v4962_v51 = vadd.f32 %v4961_v25, %v3904_v47  ;;  %v3906_v52 = vpop.f32.mrb[155].mxu1  ;;  %7058 = vmatprep.mubr.msk.bf16.mxu0 %vm3178_vm0, %v7912_v54  ;;  %v7933_v54 = vld [vmem:[%s10404_s0 + $0x8e4] ss:$16 sps:$4 sm:$0xff]  }
 0x249   :  { %5754 = vst [vmem:[#allocation2 + $0x268] sm:$0xff] %v4962_v51  ;;  %4116 = vmatmul.mubr.bf16.gmra.mrb[152].mxu1 %v7895_v45  ;;  %v4982_v60 = vpop.f32.mrb[164].mxu0  ;;  %v7925_v51 = vld [vmem:[%s10404_s0 + $0x8c0] ss:$16 sps:$4 sm:$0xff]  }
 0x24a   :  { %4123 = vmatprep.mubr.bf16.mxu1 %v7903_v48  ;;  %v4984_v63 = vpop.f32.mrb[165].mxu0 }
 0x24b   :  { %v4985_v3 = vpop.f32.mrb[166].mxu0 }
 0x24c   :  { %v3909_v56 = vpop.f32.mrb[156].mxu1  ;;  %v4987_v5 = vpop.f32.mrb[167].mxu0 }
 0x24d   :  { %v4967_v57 = vadd.f32 %v4966_v32, %v3909_v56  ;;  %v3911_v58 = vpop.f32.mrb[157].mxu1  ;;  %v7930_v32 = vld [vmem:[%s10404_s0 + $0x8ec] ss:$16 sps:$4 sm:$0xff]   ;;  %v7934_v56 = vld [vmem:[%s10404_s0 + $0x908] ss:$16 sps:$4 sm:$0xff]  }
 0x24e   :  { %v3912_v61 = vpop.f32.mrb[158].mxu1  ;;  %5197 = vmatmul.mubr.bf16.gmra.mrb[16].mxu0 %v7910_v0 }
 0x24f   :  { %5755 = vst [vmem:[#allocation2 + $0x270] sm:$0xff] %v4967_v57  ;;  %v4970_v1 = vadd.f32 %v4969_v39, %v3912_v61  ;;  %v3914_v2 = vpop.f32.mrb[159].mxu1  ;;  %7059 = vmatprep.mubr.msk.bf16.mxu0 %vm3178_vm0, %v7918_v4  ;;  %v7939_v4 = vld [vmem:[%s10404_s0 + $0x904] ss:$16 sps:$4 sm:$0xff]  }
 0x251   :  { %5756 = vst [vmem:[#allocation2 + $0x278] sm:$0xff] %v4970_v1  ;;  %4124 = vmatmul.mubr.bf16.gmra.mrb[156].mxu1 %v7901_v59  ;;  %v4990_v10 = vpop.f32.mrb[168].mxu0  ;;  %v7931_v1 = vld [vmem:[%s10404_s0 + $0x8e0] ss:$16 sps:$4 sm:$0xff]  }
 0x252   :  { %4131 = vmatprep.mubr.bf16.mxu1 %v7909_v62  ;;  %v4992_v13 = vpop.f32.mrb[169].mxu0 }
 0x253   :  { %v4993_v17 = vpop.f32.mrb[170].mxu0 }
 0x254   :  { %v3917_v6 = vpop.f32.mrb[160].mxu1  ;;  %v4995_v19 = vpop.f32.mrb[171].mxu0 }
 0x255   :  { %v4975_v7 = vadd.f32 %v4974_v46, %v3917_v6  ;;  %v3919_v8 = vpop.f32.mrb[161].mxu1  ;;  %v7936_v46 = vld [vmem:[%s10404_s0 + $0x90c] ss:$16 sps:$4 sm:$0xff]   ;;  %v7940_v6 = vld [vmem:[%s10404_s0 + $0x928] ss:$16 sps:$4 sm:$0xff]  }
 0x256   :  { %v3920_v11 = vpop.f32.mrb[162].mxu1  ;;  %5205 = vmatmul.mubr.bf16.gmra.mrb[20].mxu0 %v7916_v14 }
 0x257   :  { %5757 = vst [vmem:[#allocation2 + $0x280] sm:$0xff] %v4975_v7  ;;  %v4978_v15 = vadd.f32 %v4977_v53, %v3920_v11  ;;  %v3922_v16 = vpop.f32.mrb[163].mxu1  ;;  %7060 = vmatprep.mubr.msk.bf16.mxu0 %vm3178_vm0, %v7924_v18  ;;  %v7945_v18 = vld [vmem:[%s10404_s0 + $0x924] ss:$16 sps:$4 sm:$0xff]  }
 0x259   :  { %5758 = vst [vmem:[#allocation2 + $0x288] sm:$0xff] %v4978_v15  ;;  %4132 = vmatmul.mubr.bf16.gmra.mrb[160].mxu1 %v7907_v9  ;;  %v4998_v24 = vpop.f32.mrb[172].mxu0  ;;  %v7937_v15 = vld [vmem:[%s10404_s0 + $0x900] ss:$16 sps:$4 sm:$0xff]  }
 0x25a   :  { %4139 = vmatprep.mubr.bf16.mxu1 %v7915_v12  ;;  %v5000_v27 = vpop.f32.mrb[173].mxu0 }
 0x25b   :  { %v5001_v31 = vpop.f32.mrb[174].mxu0 }
 0x25c   :  { %v3925_v20 = vpop.f32.mrb[164].mxu1  ;;  %v5003_v33 = vpop.f32.mrb[175].mxu0 }
 0x25d   :  { %v4983_v21 = vadd.f32 %v4982_v60, %v3925_v20  ;;  %v3927_v22 = vpop.f32.mrb[165].mxu1  ;;  %v7942_v60 = vld [vmem:[%s10404_s0 + $0x92c] ss:$16 sps:$4 sm:$0xff]   ;;  %v7946_v20 = vld [vmem:[%s10404_s0 + $0x948] ss:$16 sps:$4 sm:$0xff]  }
 0x25e   :  { %v3928_v25 = vpop.f32.mrb[166].mxu1  ;;  %5213 = vmatmul.mubr.bf16.gmra.mrb[24].mxu0 %v7922_v28 }
 0x25f   :  { %5759 = vst [vmem:[#allocation2 + $0x290] sm:$0xff] %v4983_v21  ;;  %v4986_v29 = vadd.f32 %v4985_v3, %v3928_v25  ;;  %v3930_v30 = vpop.f32.mrb[167].mxu1  ;;  %7061 = vmatprep.mubr.msk.bf16.mxu0 %vm3178_vm0, %v7930_v32  ;;  %v7951_v32 = vld [vmem:[%s10404_s0 + $0x944] ss:$16 sps:$4 sm:$0xff]  }
 0x261   :  { %5760 = vst [vmem:[#allocation2 + $0x298] sm:$0xff] %v4986_v29  ;;  %4140 = vmatmul.mubr.bf16.gmra.mrb[164].mxu1 %v7913_v23  ;;  %v5006_v38 = vpop.f32.mrb[176].mxu0  ;;  %v7943_v29 = vld [vmem:[%s10404_s0 + $0x920] ss:$16 sps:$4 sm:$0xff]  }
 0x262   :  { %4147 = vmatprep.mubr.bf16.mxu1 %v7921_v26  ;;  %v5008_v41 = vpop.f32.mrb[177].mxu0 }
 0x263   :  { %v5009_v45 = vpop.f32.mrb[178].mxu0 }
 0x264   :  { %v3933_v34 = vpop.f32.mrb[168].mxu1  ;;  %v5011_v47 = vpop.f32.mrb[179].mxu0 }
 0x265   :  { %v4991_v35 = vadd.f32 %v4990_v10, %v3933_v34  ;;  %v3935_v36 = vpop.f32.mrb[169].mxu1  ;;  %v7948_v10 = vld [vmem:[%s10404_s0 + $0x94c] ss:$16 sps:$4 sm:$0xff]   ;;  %v7952_v34 = vld [vmem:[%s10404_s0 + $0x968] ss:$16 sps:$4 sm:$0xff]  }
 0x266   :  { %v3936_v39 = vpop.f32.mrb[170].mxu1  ;;  %5221 = vmatmul.mubr.bf16.gmra.mrb[28].mxu0 %v7928_v42 }
 0x267   :  { %5761 = vst [vmem:[#allocation2 + $0x2a0] sm:$0xff] %v4991_v35  ;;  %v4994_v43 = vadd.f32 %v4993_v17, %v3936_v39  ;;  %v3938_v44 = vpop.f32.mrb[171].mxu1  ;;  %7062 = vmatprep.mubr.msk.bf16.mxu0 %vm3178_vm0, %v7936_v46  ;;  %v7957_v46 = vld [vmem:[%s10404_s0 + $0x964] ss:$16 sps:$4 sm:$0xff]  }
 0x269   :  { %5762 = vst [vmem:[#allocation2 + $0x2a8] sm:$0xff] %v4994_v43  ;;  %4148 = vmatmul.mubr.bf16.gmra.mrb[168].mxu1 %v7919_v37  ;;  %v5014_v52 = vpop.f32.mrb[180].mxu0  ;;  %v7949_v43 = vld [vmem:[%s10404_s0 + $0x940] ss:$16 sps:$4 sm:$0xff]  }
 0x26a   :  { %4155 = vmatprep.mubr.bf16.mxu1 %v7927_v40  ;;  %v5016_v55 = vpop.f32.mrb[181].mxu0 }
 0x26b   :  { %v5017_v59 = vpop.f32.mrb[182].mxu0 }
 0x26c   :  { %v3941_v48 = vpop.f32.mrb[172].mxu1  ;;  %v5019_v61 = vpop.f32.mrb[183].mxu0 }
 0x26d   :  { %v4999_v49 = vadd.f32 %v4998_v24, %v3941_v48  ;;  %v3943_v50 = vpop.f32.mrb[173].mxu1  ;;  %v7954_v24 = vld [vmem:[%s10404_s0 + $0x96c] ss:$16 sps:$4 sm:$0xff]   ;;  %v7958_v48 = vld [vmem:[%s10404_s0 + $0x988] ss:$16 sps:$4 sm:$0xff]  }
 0x26e   :  { %v3944_v53 = vpop.f32.mrb[174].mxu1  ;;  %5229 = vmatmul.mubr.bf16.gmra.mrb[32].mxu0 %v7934_v56 }
 0x26f   :  { %5763 = vst [vmem:[#allocation2 + $0x2b0] sm:$0xff] %v4999_v49  ;;  %v5002_v57 = vadd.f32 %v5001_v31, %v3944_v53  ;;  %v3946_v58 = vpop.f32.mrb[175].mxu1  ;;  %7063 = vmatprep.mubr.msk.bf16.mxu0 %vm3178_vm0, %v7942_v60  ;;  %v7963_v60 = vld [vmem:[%s10404_s0 + $0x984] ss:$16 sps:$4 sm:$0xff]  }
 0x271   :  { %5764 = vst [vmem:[#allocation2 + $0x2b8] sm:$0xff] %v5002_v57  ;;  %4156 = vmatmul.mubr.bf16.gmra.mrb[172].mxu1 %v7925_v51  ;;  %v5022_v2 = vpop.f32.mrb[184].mxu0  ;;  %v7955_v57 = vld [vmem:[%s10404_s0 + $0x960] ss:$16 sps:$4 sm:$0xff]  }
 0x272   :  { %4163 = vmatprep.mubr.bf16.mxu1 %v7933_v54  ;;  %v5024_v5 = vpop.f32.mrb[185].mxu0 }
 0x273   :  { %v5025_v9 = vpop.f32.mrb[186].mxu0 }
 0x274   :  { %v3949_v62 = vpop.f32.mrb[176].mxu1  ;;  %v5027_v11 = vpop.f32.mrb[187].mxu0 }
 0x275   :  { %v5007_v63 = vadd.f32 %v5006_v38, %v3949_v62  ;;  %v3951_v0 = vpop.f32.mrb[177].mxu1  ;;  %v7960_v38 = vld [vmem:[%s10404_s0 + $0x98c] ss:$16 sps:$4 sm:$0xff]   ;;  %v7964_v62 = vld [vmem:[%s10404_s0 + $0x9a8] ss:$16 sps:$4 sm:$0xff]  }
 0x276   :  { %v3952_v3 = vpop.f32.mrb[178].mxu1  ;;  %5237 = vmatmul.mubr.bf16.gmra.mrb[36].mxu0 %v7940_v6 }
 0x277   :  { %5765 = vst [vmem:[#allocation2 + $0x2c0] sm:$0xff] %v5007_v63  ;;  %v5010_v7 = vadd.f32 %v5009_v45, %v3952_v3  ;;  %v3954_v8 = vpop.f32.mrb[179].mxu1  ;;  %7064 = vmatprep.mubr.msk.bf16.mxu0 %vm3178_vm0, %v7948_v10  ;;  %v7969_v10 = vld [vmem:[%s10404_s0 + $0x9a4] ss:$16 sps:$4 sm:$0xff]  }
 0x279   :  { %5766 = vst [vmem:[#allocation2 + $0x2c8] sm:$0xff] %v5010_v7  ;;  %4164 = vmatmul.mubr.bf16.gmra.mrb[176].mxu1 %v7931_v1  ;;  %v5030_v16 = vpop.f32.mrb[188].mxu0  ;;  %v7961_v7 = vld [vmem:[%s10404_s0 + $0x980] ss:$16 sps:$4 sm:$0xff]  }
 0x27a   :  { %4171 = vmatprep.mubr.bf16.mxu1 %v7939_v4  ;;  %v5032_v19 = vpop.f32.mrb[189].mxu0 }
 0x27b   :  { %v5033_v23 = vpop.f32.mrb[190].mxu0 }
 0x27c   :  { %v3957_v12 = vpop.f32.mrb[180].mxu1  ;;  %v5035_v25 = vpop.f32.mrb[191].mxu0 }
 0x27d   :  { %v5015_v13 = vadd.f32 %v5014_v52, %v3957_v12  ;;  %v3959_v14 = vpop.f32.mrb[181].mxu1  ;;  %v7966_v52 = vld [vmem:[%s10404_s0 + $0x9ac] ss:$16 sps:$4 sm:$0xff]   ;;  %v7970_v12 = vld [vmem:[%s10404_s0 + $0x9c8] ss:$16 sps:$4 sm:$0xff]  }
 0x27e   :  { %v3960_v17 = vpop.f32.mrb[182].mxu1  ;;  %5245 = vmatmul.mubr.bf16.gmra.mrb[40].mxu0 %v7946_v20 }
 0x27f   :  { %5767 = vst [vmem:[#allocation2 + $0x2d0] sm:$0xff] %v5015_v13  ;;  %v5018_v21 = vadd.f32 %v5017_v59, %v3960_v17  ;;  %v3962_v22 = vpop.f32.mrb[183].mxu1  ;;  %7065 = vmatprep.mubr.msk.bf16.mxu0 %vm3178_vm0, %v7954_v24  ;;  %v7975_v24 = vld [vmem:[%s10404_s0 + $0x9c4] ss:$16 sps:$4 sm:$0xff]  }
 0x281   :  { %5768 = vst [vmem:[#allocation2 + $0x2d8] sm:$0xff] %v5018_v21  ;;  %4172 = vmatmul.mubr.bf16.gmra.mrb[180].mxu1 %v7937_v15  ;;  %v5038_v30 = vpop.f32.mrb[192].mxu0  ;;  %v7967_v21 = vld [vmem:[%s10404_s0 + $0x9a0] ss:$16 sps:$4 sm:$0xff]  }
 0x282   :  { %4179 = vmatprep.mubr.bf16.mxu1 %v7945_v18  ;;  %v5040_v33 = vpop.f32.mrb[193].mxu0 }
 0x283   :  { %v5041_v37 = vpop.f32.mrb[194].mxu0 }
 0x284   :  { %v3965_v26 = vpop.f32.mrb[184].mxu1  ;;  %v5043_v39 = vpop.f32.mrb[195].mxu0 }
 0x285   :  { %v5023_v27 = vadd.f32 %v5022_v2, %v3965_v26  ;;  %v3967_v28 = vpop.f32.mrb[185].mxu1  ;;  %v7972_v2 = vld [vmem:[%s10404_s0 + $0x9cc] ss:$16 sps:$4 sm:$0xff]   ;;  %v7976_v26 = vld [vmem:[%s10404_s0 + $0x9e8] ss:$16 sps:$4 sm:$0xff]  }
 0x286   :  { %v3968_v31 = vpop.f32.mrb[186].mxu1  ;;  %5253 = vmatmul.mubr.bf16.gmra.mrb[44].mxu0 %v7952_v34 }
 0x287   :  { %5769 = vst [vmem:[#allocation2 + $0x2e0] sm:$0xff] %v5023_v27  ;;  %v5026_v35 = vadd.f32 %v5025_v9, %v3968_v31  ;;  %v3970_v36 = vpop.f32.mrb[187].mxu1  ;;  %7066 = vmatprep.mubr.msk.bf16.mxu0 %vm3178_vm0, %v7960_v38  ;;  %v7981_v38 = vld [vmem:[%s10404_s0 + $0x9e4] ss:$16 sps:$4 sm:$0xff]  }
 0x289   :  { %5770 = vst [vmem:[#allocation2 + $0x2e8] sm:$0xff] %v5026_v35  ;;  %4180 = vmatmul.mubr.bf16.gmra.mrb[184].mxu1 %v7943_v29  ;;  %v5046_v44 = vpop.f32.mrb[196].mxu0  ;;  %v7973_v35 = vld [vmem:[%s10404_s0 + $0x9c0] ss:$16 sps:$4 sm:$0xff]  }
 0x28a   :  { %4187 = vmatprep.mubr.bf16.mxu1 %v7951_v32  ;;  %v5048_v47 = vpop.f32.mrb[197].mxu0 }
 0x28b   :  { %v5049_v51 = vpop.f32.mrb[198].mxu0 }
 0x28c   :  { %v3973_v40 = vpop.f32.mrb[188].mxu1  ;;  %v5051_v53 = vpop.f32.mrb[199].mxu0 }
 0x28d   :  { %v5031_v41 = vadd.f32 %v5030_v16, %v3973_v40  ;;  %v3975_v42 = vpop.f32.mrb[189].mxu1  ;;  %v7978_v16 = vld [vmem:[%s10404_s0 + $0x9ec] ss:$16 sps:$4 sm:$0xff]   ;;  %v7982_v40 = vld [vmem:[%s10404_s0 + $0xa08] ss:$16 sps:$4 sm:$0xff]  }
 0x28e   :  { %v3976_v45 = vpop.f32.mrb[190].mxu1  ;;  %5261 = vmatmul.mubr.bf16.gmra.mrb[48].mxu0 %v7958_v48 }
 0x28f   :  { %5771 = vst [vmem:[#allocation2 + $0x2f0] sm:$0xff] %v5031_v41  ;;  %v5034_v49 = vadd.f32 %v5033_v23, %v3976_v45  ;;  %v3978_v50 = vpop.f32.mrb[191].mxu1  ;;  %7067 = vmatprep.mubr.msk.bf16.mxu0 %vm3178_vm0, %v7966_v52  ;;  %v7987_v52 = vld [vmem:[%s10404_s0 + $0xa04] ss:$16 sps:$4 sm:$0xff]  }
 0x291   :  { %5772 = vst [vmem:[#allocation2 + $0x2f8] sm:$0xff] %v5034_v49  ;;  %4188 = vmatmul.mubr.bf16.gmra.mrb[188].mxu1 %v7949_v43  ;;  %v5054_v58 = vpop.f32.mrb[200].mxu0  ;;  %v7979_v49 = vld [vmem:[%s10404_s0 + $0x9e0] ss:$16 sps:$4 sm:$0xff]  }
 0x292   :  { %4195 = vmatprep.mubr.bf16.mxu1 %v7957_v46  ;;  %v5056_v61 = vpop.f32.mrb[201].mxu0 }
 0x293   :  { %v5057_v1 = vpop.f32.mrb[202].mxu0 }
 0x294   :  { %v3981_v54 = vpop.f32.mrb[192].mxu1  ;;  %v5059_v3 = vpop.f32.mrb[203].mxu0 }
 0x295   :  { %v5039_v55 = vadd.f32 %v5038_v30, %v3981_v54  ;;  %v3983_v56 = vpop.f32.mrb[193].mxu1  ;;  %v7984_v30 = vld [vmem:[%s10404_s0 + $0xa0c] ss:$16 sps:$4 sm:$0xff]   ;;  %v7988_v54 = vld [vmem:[%s10404_s0 + $0xa28] ss:$16 sps:$4 sm:$0xff]  }
 0x296   :  { %v3984_v59 = vpop.f32.mrb[194].mxu1  ;;  %5269 = vmatmul.mubr.bf16.gmra.mrb[52].mxu0 %v7964_v62 }
 0x297   :  { %5773 = vst [vmem:[#allocation2 + $0x300] sm:$0xff] %v5039_v55  ;;  %v5042_v63 = vadd.f32 %v5041_v37, %v3984_v59  ;;  %v3986_v0 = vpop.f32.mrb[195].mxu1  ;;  %7068 = vmatprep.mubr.msk.bf16.mxu0 %vm3178_vm0, %v7972_v2  ;;  %v7993_v2 = vld [vmem:[%s10404_s0 + $0xa24] ss:$16 sps:$4 sm:$0xff]  }
 0x299   :  { %5774 = vst [vmem:[#allocation2 + $0x308] sm:$0xff] %v5042_v63  ;;  %4196 = vmatmul.mubr.bf16.gmra.mrb[192].mxu1 %v7955_v57  ;;  %v5062_v8 = vpop.f32.mrb[204].mxu0  ;;  %v7985_v63 = vld [vmem:[%s10404_s0 + $0xa00] ss:$16 sps:$4 sm:$0xff]  }
 0x29a   :  { %4203 = vmatprep.mubr.bf16.mxu1 %v7963_v60  ;;  %v5064_v11 = vpop.f32.mrb[205].mxu0 }
 0x29b   :  { %v5065_v15 = vpop.f32.mrb[206].mxu0 }
 0x29c   :  { %v3989_v4 = vpop.f32.mrb[196].mxu1  ;;  %v5067_v17 = vpop.f32.mrb[207].mxu0 }
 0x29d   :  { %v5047_v5 = vadd.f32 %v5046_v44, %v3989_v4  ;;  %v3991_v6 = vpop.f32.mrb[197].mxu1  ;;  %v7990_v44 = vld [vmem:[%s10404_s0 + $0xa2c] ss:$16 sps:$4 sm:$0xff]   ;;  %v7994_v4 = vld [vmem:[%s10404_s0 + $0xa48] ss:$16 sps:$4 sm:$0xff]  }
 0x29e   :  { %v3992_v9 = vpop.f32.mrb[198].mxu1  ;;  %5277 = vmatmul.mubr.bf16.gmra.mrb[56].mxu0 %v7970_v12 }
 0x29f   :  { %5775 = vst [vmem:[#allocation2 + $0x310] sm:$0xff] %v5047_v5  ;;  %v5050_v13 = vadd.f32 %v5049_v51, %v3992_v9  ;;  %v3994_v14 = vpop.f32.mrb[199].mxu1  ;;  %7069 = vmatprep.mubr.msk.bf16.mxu0 %vm3178_vm0, %v7978_v16  ;;  %v7999_v16 = vld [vmem:[%s10404_s0 + $0xa44] ss:$16 sps:$4 sm:$0xff]  }
 0x2a1   :  { %5776 = vst [vmem:[#allocation2 + $0x318] sm:$0xff] %v5050_v13  ;;  %4204 = vmatmul.mubr.bf16.gmra.mrb[196].mxu1 %v7961_v7  ;;  %v5070_v22 = vpop.f32.mrb[208].mxu0  ;;  %v7991_v13 = vld [vmem:[%s10404_s0 + $0xa20] ss:$16 sps:$4 sm:$0xff]  }
 0x2a2   :  { %4211 = vmatprep.mubr.bf16.mxu1 %v7969_v10  ;;  %v5072_v25 = vpop.f32.mrb[209].mxu0 }
 0x2a3   :  { %v5073_v29 = vpop.f32.mrb[210].mxu0 }
 0x2a4   :  { %v3997_v18 = vpop.f32.mrb[200].mxu1  ;;  %v5075_v31 = vpop.f32.mrb[211].mxu0 }
 0x2a5   :  { %v5055_v19 = vadd.f32 %v5054_v58, %v3997_v18  ;;  %v3999_v20 = vpop.f32.mrb[201].mxu1  ;;  %v7996_v58 = vld [vmem:[%s10404_s0 + $0xa4c] ss:$16 sps:$4 sm:$0xff]   ;;  %v8000_v18 = vld [vmem:[%s10404_s0 + $0xa68] ss:$16 sps:$4 sm:$0xff]  }
 0x2a6   :  { %v4000_v23 = vpop.f32.mrb[202].mxu1  ;;  %5285 = vmatmul.mubr.bf16.gmra.mrb[60].mxu0 %v7976_v26 }
 0x2a7   :  { %5777 = vst [vmem:[#allocation2 + $0x320] sm:$0xff] %v5055_v19  ;;  %v5058_v27 = vadd.f32 %v5057_v1, %v4000_v23  ;;  %v4002_v28 = vpop.f32.mrb[203].mxu1  ;;  %7070 = vmatprep.mubr.msk.bf16.mxu0 %vm3178_vm0, %v7984_v30  ;;  %v8005_v30 = vld [vmem:[%s10404_s0 + $0xa64] ss:$16 sps:$4 sm:$0xff]  }
 0x2a9   :  { %5778 = vst [vmem:[#allocation2 + $0x328] sm:$0xff] %v5058_v27  ;;  %4212 = vmatmul.mubr.bf16.gmra.mrb[200].mxu1 %v7967_v21  ;;  %v5078_v36 = vpop.f32.mrb[212].mxu0  ;;  %v7997_v27 = vld [vmem:[%s10404_s0 + $0xa40] ss:$16 sps:$4 sm:$0xff]  }
 0x2aa   :  { %4219 = vmatprep.mubr.bf16.mxu1 %v7975_v24  ;;  %v5080_v39 = vpop.f32.mrb[213].mxu0 }
 0x2ab   :  { %v5081_v43 = vpop.f32.mrb[214].mxu0 }
 0x2ac   :  { %v4005_v32 = vpop.f32.mrb[204].mxu1  ;;  %v5083_v45 = vpop.f32.mrb[215].mxu0 }
 0x2ad   :  { %v5063_v33 = vadd.f32 %v5062_v8, %v4005_v32  ;;  %v4007_v34 = vpop.f32.mrb[205].mxu1  ;;  %v8002_v8 = vld [vmem:[%s10404_s0 + $0xa6c] ss:$16 sps:$4 sm:$0xff]   ;;  %v8006_v32 = vld [vmem:[%s10404_s0 + $0xa88] ss:$16 sps:$4 sm:$0xff]  }
 0x2ae   :  { %v4008_v37 = vpop.f32.mrb[206].mxu1  ;;  %5293 = vmatmul.mubr.bf16.gmra.mrb[64].mxu0 %v7982_v40 }
 0x2af   :  { %5779 = vst [vmem:[#allocation2 + $0x330] sm:$0xff] %v5063_v33  ;;  %v5066_v41 = vadd.f32 %v5065_v15, %v4008_v37  ;;  %v4010_v42 = vpop.f32.mrb[207].mxu1  ;;  %7071 = vmatprep.mubr.msk.bf16.mxu0 %vm3178_vm0, %v7990_v44  ;;  %v8011_v44 = vld [vmem:[%s10404_s0 + $0xa84] ss:$16 sps:$4 sm:$0xff]  }
 0x2b1   :  { %5780 = vst [vmem:[#allocation2 + $0x338] sm:$0xff] %v5066_v41  ;;  %4220 = vmatmul.mubr.bf16.gmra.mrb[204].mxu1 %v7973_v35  ;;  %v5086_v50 = vpop.f32.mrb[216].mxu0  ;;  %v8003_v41 = vld [vmem:[%s10404_s0 + $0xa60] ss:$16 sps:$4 sm:$0xff]  }
 0x2b2   :  { %4227 = vmatprep.mubr.bf16.mxu1 %v7981_v38  ;;  %v5088_v53 = vpop.f32.mrb[217].mxu0 }
 0x2b3   :  { %v5089_v57 = vpop.f32.mrb[218].mxu0 }
 0x2b4   :  { %v4013_v46 = vpop.f32.mrb[208].mxu1  ;;  %v5091_v59 = vpop.f32.mrb[219].mxu0 }
 0x2b5   :  { %v5071_v47 = vadd.f32 %v5070_v22, %v4013_v46  ;;  %v4015_v48 = vpop.f32.mrb[209].mxu1  ;;  %v8008_v22 = vld [vmem:[%s10404_s0 + $0xa8c] ss:$16 sps:$4 sm:$0xff]   ;;  %v8012_v46 = vld [vmem:[%s10404_s0 + $0xaa8] ss:$16 sps:$4 sm:$0xff]  }
 0x2b6   :  { %v4016_v51 = vpop.f32.mrb[210].mxu1  ;;  %5301 = vmatmul.mubr.bf16.gmra.mrb[68].mxu0 %v7988_v54 }
 0x2b7   :  { %5781 = vst [vmem:[#allocation2 + $0x340] sm:$0xff] %v5071_v47  ;;  %v5074_v55 = vadd.f32 %v5073_v29, %v4016_v51  ;;  %v4018_v56 = vpop.f32.mrb[211].mxu1  ;;  %7072 = vmatprep.mubr.msk.bf16.mxu0 %vm3178_vm0, %v7996_v58  ;;  %v8017_v58 = vld [vmem:[%s10404_s0 + $0xaa4] ss:$16 sps:$4 sm:$0xff]  }
 0x2b9   :  { %5782 = vst [vmem:[#allocation2 + $0x348] sm:$0xff] %v5074_v55  ;;  %4228 = vmatmul.mubr.bf16.gmra.mrb[208].mxu1 %v7979_v49  ;;  %v5094_v0 = vpop.f32.mrb[220].mxu0  ;;  %v8009_v55 = vld [vmem:[%s10404_s0 + $0xa80] ss:$16 sps:$4 sm:$0xff]  }
 0x2ba   :  { %4235 = vmatprep.mubr.bf16.mxu1 %v7987_v52  ;;  %v5096_v3 = vpop.f32.mrb[221].mxu0 }
 0x2bb   :  { %v5097_v7 = vpop.f32.mrb[222].mxu0 }
 0x2bc   :  { %v4021_v60 = vpop.f32.mrb[212].mxu1  ;;  %v5099_v9 = vpop.f32.mrb[223].mxu0 }
 0x2bd   :  { %v5079_v61 = vadd.f32 %v5078_v36, %v4021_v60  ;;  %v4023_v62 = vpop.f32.mrb[213].mxu1  ;;  %v8014_v36 = vld [vmem:[%s10404_s0 + $0xaac] ss:$16 sps:$4 sm:$0xff]   ;;  %v8018_v60 = vld [vmem:[%s10404_s0 + $0xac8] ss:$16 sps:$4 sm:$0xff]  }
 0x2be   :  { %v4024_v1 = vpop.f32.mrb[214].mxu1  ;;  %5309 = vmatmul.mubr.bf16.gmra.mrb[72].mxu0 %v7994_v4 }
 0x2bf   :  { %5783 = vst [vmem:[#allocation2 + $0x350] sm:$0xff] %v5079_v61  ;;  %v5082_v5 = vadd.f32 %v5081_v43, %v4024_v1  ;;  %v4026_v6 = vpop.f32.mrb[215].mxu1  ;;  %7073 = vmatprep.mubr.msk.bf16.mxu0 %vm3178_vm0, %v8002_v8  ;;  %v8023_v8 = vld [vmem:[%s10404_s0 + $0xac4] ss:$16 sps:$4 sm:$0xff]  }
 0x2c1   :  { %5784 = vst [vmem:[#allocation2 + $0x358] sm:$0xff] %v5082_v5  ;;  %4236 = vmatmul.mubr.bf16.gmra.mrb[212].mxu1 %v7985_v63  ;;  %v5102_v14 = vpop.f32.mrb[224].mxu0  ;;  %v8015_v5 = vld [vmem:[%s10404_s0 + $0xaa0] ss:$16 sps:$4 sm:$0xff]  }
 0x2c2   :  { %4243 = vmatprep.mubr.bf16.mxu1 %v7993_v2  ;;  %v5104_v17 = vpop.f32.mrb[225].mxu0 }
 0x2c3   :  { %v5105_v21 = vpop.f32.mrb[226].mxu0 }
 0x2c4   :  { %v4029_v10 = vpop.f32.mrb[216].mxu1  ;;  %v5107_v23 = vpop.f32.mrb[227].mxu0 }
 0x2c5   :  { %v5087_v11 = vadd.f32 %v5086_v50, %v4029_v10  ;;  %v4031_v12 = vpop.f32.mrb[217].mxu1  ;;  %v8020_v50 = vld [vmem:[%s10404_s0 + $0xacc] ss:$16 sps:$4 sm:$0xff]   ;;  %v8024_v10 = vld [vmem:[%s10404_s0 + $0xae8] ss:$16 sps:$4 sm:$0xff]  }
 0x2c6   :  { %v4032_v15 = vpop.f32.mrb[218].mxu1  ;;  %5317 = vmatmul.mubr.bf16.gmra.mrb[76].mxu0 %v8000_v18 }
 0x2c7   :  { %5785 = vst [vmem:[#allocation2 + $0x360] sm:$0xff] %v5087_v11  ;;  %v5090_v19 = vadd.f32 %v5089_v57, %v4032_v15  ;;  %v4034_v20 = vpop.f32.mrb[219].mxu1  ;;  %7074 = vmatprep.mubr.msk.bf16.mxu0 %vm3178_vm0, %v8008_v22  ;;  %v8029_v22 = vld [vmem:[%s10404_s0 + $0xae4] ss:$16 sps:$4 sm:$0xff]  }
 0x2c9   :  { %5786 = vst [vmem:[#allocation2 + $0x368] sm:$0xff] %v5090_v19  ;;  %4244 = vmatmul.mubr.bf16.gmra.mrb[216].mxu1 %v7991_v13  ;;  %v5110_v28 = vpop.f32.mrb[228].mxu0  ;;  %v8021_v19 = vld [vmem:[%s10404_s0 + $0xac0] ss:$16 sps:$4 sm:$0xff]  }
 0x2ca   :  { %4251 = vmatprep.mubr.bf16.mxu1 %v7999_v16  ;;  %v5112_v31 = vpop.f32.mrb[229].mxu0 }
 0x2cb   :  { %v5113_v35 = vpop.f32.mrb[230].mxu0 }
 0x2cc   :  { %v4037_v24 = vpop.f32.mrb[220].mxu1  ;;  %v5115_v37 = vpop.f32.mrb[231].mxu0 }
 0x2cd   :  { %v5095_v25 = vadd.f32 %v5094_v0, %v4037_v24  ;;  %v4039_v26 = vpop.f32.mrb[221].mxu1  ;;  %v8026_v0 = vld [vmem:[%s10404_s0 + $0xaec] ss:$16 sps:$4 sm:$0xff]   ;;  %v8030_v24 = vld [vmem:[%s10404_s0 + $0xb08] ss:$16 sps:$4 sm:$0xff]  }
 0x2ce   :  { %v4040_v29 = vpop.f32.mrb[222].mxu1  ;;  %5325 = vmatmul.mubr.bf16.gmra.mrb[80].mxu0 %v8006_v32 }
 0x2cf   :  { %5787 = vst [vmem:[#allocation2 + $0x370] sm:$0xff] %v5095_v25  ;;  %v5098_v33 = vadd.f32 %v5097_v7, %v4040_v29  ;;  %v4042_v34 = vpop.f32.mrb[223].mxu1  ;;  %7075 = vmatprep.mubr.msk.bf16.mxu0 %vm3178_vm0, %v8014_v36  ;;  %v8035_v36 = vld [vmem:[%s10404_s0 + $0xb04] ss:$16 sps:$4 sm:$0xff]  }
 0x2d1   :  { %5788 = vst [vmem:[#allocation2 + $0x378] sm:$0xff] %v5098_v33  ;;  %4252 = vmatmul.mubr.bf16.gmra.mrb[220].mxu1 %v7997_v27  ;;  %v5118_v42 = vpop.f32.mrb[232].mxu0  ;;  %v8027_v33 = vld [vmem:[%s10404_s0 + $0xae0] ss:$16 sps:$4 sm:$0xff]  }
 0x2d2   :  { %4259 = vmatprep.mubr.bf16.mxu1 %v8005_v30  ;;  %v5120_v45 = vpop.f32.mrb[233].mxu0 }
 0x2d3   :  { %v5121_v49 = vpop.f32.mrb[234].mxu0 }
 0x2d4   :  { %v4045_v38 = vpop.f32.mrb[224].mxu1  ;;  %v5123_v51 = vpop.f32.mrb[235].mxu0 }
 0x2d5   :  { %v5103_v39 = vadd.f32 %v5102_v14, %v4045_v38  ;;  %v4047_v40 = vpop.f32.mrb[225].mxu1  ;;  %v8032_v14 = vld [vmem:[%s10404_s0 + $0xb0c] ss:$16 sps:$4 sm:$0xff]   ;;  %v8036_v38 = vld [vmem:[%s10404_s0 + $0xb28] ss:$16 sps:$4 sm:$0xff]  }
 0x2d6   :  { %v4048_v43 = vpop.f32.mrb[226].mxu1  ;;  %5333 = vmatmul.mubr.bf16.gmra.mrb[84].mxu0 %v8012_v46 }
 0x2d7   :  { %5789 = vst [vmem:[#allocation2 + $0x380] sm:$0xff] %v5103_v39  ;;  %v5106_v47 = vadd.f32 %v5105_v21, %v4048_v43  ;;  %v4050_v48 = vpop.f32.mrb[227].mxu1  ;;  %7076 = vmatprep.mubr.msk.bf16.mxu0 %vm3178_vm0, %v8020_v50  ;;  %v8041_v50 = vld [vmem:[%s10404_s0 + $0xb24] ss:$16 sps:$4 sm:$0xff]  }
 0x2d9   :  { %5790 = vst [vmem:[#allocation2 + $0x388] sm:$0xff] %v5106_v47  ;;  %4260 = vmatmul.mubr.bf16.gmra.mrb[224].mxu1 %v8003_v41  ;;  %v5126_v56 = vpop.f32.mrb[236].mxu0  ;;  %v8033_v47 = vld [vmem:[%s10404_s0 + $0xb00] ss:$16 sps:$4 sm:$0xff]  }
 0x2da   :  { %4267 = vmatprep.mubr.bf16.mxu1 %v8011_v44  ;;  %v5128_v59 = vpop.f32.mrb[237].mxu0 }
 0x2db   :  { %v5129_v63 = vpop.f32.mrb[238].mxu0 }
 0x2dc   :  { %v4053_v52 = vpop.f32.mrb[228].mxu1  ;;  %v5131_v1 = vpop.f32.mrb[239].mxu0 }
 0x2dd   :  { %v5111_v53 = vadd.f32 %v5110_v28, %v4053_v52  ;;  %v4055_v54 = vpop.f32.mrb[229].mxu1  ;;  %v8038_v28 = vld [vmem:[%s10404_s0 + $0xb2c] ss:$16 sps:$4 sm:$0xff]   ;;  %v8042_v52 = vld [vmem:[%s10404_s0 + $0xb48] ss:$16 sps:$4 sm:$0xff]  }
 0x2de   :  { %v4056_v57 = vpop.f32.mrb[230].mxu1  ;;  %5341 = vmatmul.mubr.bf16.gmra.mrb[88].mxu0 %v8018_v60 }
 0x2df   :  { %5791 = vst [vmem:[#allocation2 + $0x390] sm:$0xff] %v5111_v53  ;;  %v5114_v61 = vadd.f32 %v5113_v35, %v4056_v57  ;;  %v4058_v62 = vpop.f32.mrb[231].mxu1  ;;  %7077 = vmatprep.mubr.msk.bf16.mxu0 %vm3178_vm0, %v8026_v0  ;;  %v8047_v0 = vld [vmem:[%s10404_s0 + $0xb44] ss:$16 sps:$4 sm:$0xff]  }
 0x2e1   :  { %5792 = vst [vmem:[#allocation2 + $0x398] sm:$0xff] %v5114_v61  ;;  %4268 = vmatmul.mubr.bf16.gmra.mrb[228].mxu1 %v8009_v55  ;;  %v5134_v6 = vpop.f32.mrb[240].mxu0  ;;  %v8039_v61 = vld [vmem:[%s10404_s0 + $0xb20] ss:$16 sps:$4 sm:$0xff]  }
 0x2e2   :  { %4275 = vmatprep.mubr.bf16.mxu1 %v8017_v58  ;;  %v5136_v9 = vpop.f32.mrb[241].mxu0 }
 0x2e3   :  { %v5137_v13 = vpop.f32.mrb[242].mxu0 }
 0x2e4   :  { %v4061_v2 = vpop.f32.mrb[232].mxu1  ;;  %v5139_v15 = vpop.f32.mrb[243].mxu0 }
 0x2e5   :  { %v5119_v3 = vadd.f32 %v5118_v42, %v4061_v2  ;;  %v4063_v4 = vpop.f32.mrb[233].mxu1  ;;  %v8044_v42 = vld [vmem:[%s10404_s0 + $0xb4c] ss:$16 sps:$4 sm:$0xff]   ;;  %v8048_v2 = vld [vmem:[%s10404_s0 + $0xb68] ss:$16 sps:$4 sm:$0xff]  }
 0x2e6   :  { %v4064_v7 = vpop.f32.mrb[234].mxu1  ;;  %5349 = vmatmul.mubr.bf16.gmra.mrb[92].mxu0 %v8024_v10 }
 0x2e7   :  { %5793 = vst [vmem:[#allocation2 + $0x3a0] sm:$0xff] %v5119_v3  ;;  %v5122_v11 = vadd.f32 %v5121_v49, %v4064_v7  ;;  %v4066_v12 = vpop.f32.mrb[235].mxu1  ;;  %7078 = vmatprep.mubr.msk.bf16.mxu0 %vm3178_vm0, %v8032_v14  ;;  %v8053_v14 = vld [vmem:[%s10404_s0 + $0xb64] ss:$16 sps:$4 sm:$0xff]  }
 0x2e9   :  { %5794 = vst [vmem:[#allocation2 + $0x3a8] sm:$0xff] %v5122_v11  ;;  %4276 = vmatmul.mubr.bf16.gmra.mrb[232].mxu1 %v8015_v5  ;;  %v5142_v20 = vpop.f32.mrb[244].mxu0  ;;  %v8045_v11 = vld [vmem:[%s10404_s0 + $0xb40] ss:$16 sps:$4 sm:$0xff]  }
 0x2ea   :  { %4283 = vmatprep.mubr.bf16.mxu1 %v8023_v8  ;;  %v5144_v23 = vpop.f32.mrb[245].mxu0 }
 0x2eb   :  { %v5145_v27 = vpop.f32.mrb[246].mxu0 }
 0x2ec   :  { %v4069_v16 = vpop.f32.mrb[236].mxu1  ;;  %v5147_v29 = vpop.f32.mrb[247].mxu0 }
 0x2ed   :  { %v5127_v17 = vadd.f32 %v5126_v56, %v4069_v16  ;;  %v4071_v18 = vpop.f32.mrb[237].mxu1  ;;  %v8050_v56 = vld [vmem:[%s10404_s0 + $0xb6c] ss:$16 sps:$4 sm:$0xff]   ;;  %v8054_v16 = vld [vmem:[%s10404_s0 + $0xb88] ss:$16 sps:$4 sm:$0xff]  }
 0x2ee   :  { %v4072_v21 = vpop.f32.mrb[238].mxu1  ;;  %5357 = vmatmul.mubr.bf16.gmra.mrb[96].mxu0 %v8030_v24 }
 0x2ef   :  { %5795 = vst [vmem:[#allocation2 + $0x3b0] sm:$0xff] %v5127_v17  ;;  %v5130_v25 = vadd.f32 %v5129_v63, %v4072_v21  ;;  %v4074_v26 = vpop.f32.mrb[239].mxu1  ;;  %7079 = vmatprep.mubr.msk.bf16.mxu0 %vm3178_vm0, %v8038_v28  ;;  %v8059_v28 = vld [vmem:[%s10404_s0 + $0xb84] ss:$16 sps:$4 sm:$0xff]  }
 0x2f1   :  { %5796 = vst [vmem:[#allocation2 + $0x3b8] sm:$0xff] %v5130_v25  ;;  %4284 = vmatmul.mubr.bf16.gmra.mrb[236].mxu1 %v8021_v19  ;;  %v5150_v34 = vpop.f32.mrb[248].mxu0  ;;  %v8051_v25 = vld [vmem:[%s10404_s0 + $0xb60] ss:$16 sps:$4 sm:$0xff]  }
 0x2f2   :  { %4291 = vmatprep.mubr.bf16.mxu1 %v8029_v22  ;;  %v5152_v37 = vpop.f32.mrb[249].mxu0 }
 0x2f3   :  { %v5153_v41 = vpop.f32.mrb[250].mxu0 }
 0x2f4   :  { %v4077_v30 = vpop.f32.mrb[240].mxu1  ;;  %v5155_v43 = vpop.f32.mrb[251].mxu0 }
 0x2f5   :  { %v5135_v31 = vadd.f32 %v5134_v6, %v4077_v30  ;;  %v4079_v32 = vpop.f32.mrb[241].mxu1  ;;  %v8056_v6 = vld [vmem:[%s10404_s0 + $0xb8c] ss:$16 sps:$4 sm:$0xff]   ;;  %v8060_v30 = vld [vmem:[%s10404_s0 + $0xba8] ss:$16 sps:$4 sm:$0xff]  }
 0x2f6   :  { %v4080_v35 = vpop.f32.mrb[242].mxu1  ;;  %5365 = vmatmul.mubr.bf16.gmra.mrb[100].mxu0 %v8036_v38 }
 0x2f7   :  { %5797 = vst [vmem:[#allocation2 + $0x3c0] sm:$0xff] %v5135_v31  ;;  %v5138_v39 = vadd.f32 %v5137_v13, %v4080_v35  ;;  %v4082_v40 = vpop.f32.mrb[243].mxu1  ;;  %7080 = vmatprep.mubr.msk.bf16.mxu0 %vm3178_vm0, %v8044_v42  ;;  %v8065_v42 = vld [vmem:[%s10404_s0 + $0xba4] ss:$16 sps:$4 sm:$0xff]  }
 0x2f9   :  { %5798 = vst [vmem:[#allocation2 + $0x3c8] sm:$0xff] %v5138_v39  ;;  %4292 = vmatmul.mubr.bf16.gmra.mrb[240].mxu1 %v8027_v33  ;;  %v5158_v48 = vpop.f32.mrb[252].mxu0  ;;  %v8057_v39 = vld [vmem:[%s10404_s0 + $0xb80] ss:$16 sps:$4 sm:$0xff]  }
 0x2fa   :  { %4299 = vmatprep.mubr.bf16.mxu1 %v8035_v36  ;;  %v5160_v51 = vpop.f32.mrb[253].mxu0 }
 0x2fb   :  { %v5161_v55 = vpop.f32.mrb[254].mxu0 }
 0x2fc   :  { %v4085_v44 = vpop.f32.mrb[244].mxu1  ;;  %v5163_v57 = vpop.f32.mrb[255].mxu0 }
 0x2fd   :  { %v5143_v45 = vadd.f32 %v5142_v20, %v4085_v44  ;;  %v4087_v46 = vpop.f32.mrb[245].mxu1  ;;  %v8062_v20 = vld [vmem:[%s10404_s0 + $0xbac] ss:$16 sps:$4 sm:$0xff]   ;;  %v8066_v44 = vld [vmem:[%s10404_s0 + $0xbc8] ss:$16 sps:$4 sm:$0xff]  }
 0x2fe   :  { %v4088_v49 = vpop.f32.mrb[246].mxu1  ;;  %5373 = vmatmul.mubr.bf16.gmra.mrb[104].mxu0 %v8042_v52 }
 0x2ff   :  { %5799 = vst [vmem:[#allocation2 + $0x3d0] sm:$0xff] %v5143_v45  ;;  %v5146_v53 = vadd.f32 %v5145_v27, %v4088_v49  ;;  %v4090_v54 = vpop.f32.mrb[247].mxu1  ;;  %7081 = vmatprep.mubr.msk.bf16.mxu0 %vm3178_vm0, %v8050_v56  ;;  %v8071_v56 = vld [vmem:[%s10404_s0 + $0xbc4] ss:$16 sps:$4 sm:$0xff]  }
 0x301   :  { %5800 = vst [vmem:[#allocation2 + $0x3d8] sm:$0xff] %v5146_v53  ;;  %4300 = vmatmul.mubr.bf16.gmra.mrb[244].mxu1 %v8033_v47  ;;  %v5166_v62 = vpop.f32.mrb[0].mxu0  ;;  %v8063_v53 = vld [vmem:[%s10404_s0 + $0xba0] ss:$16 sps:$4 sm:$0xff]  }
 0x302   :  { %4307 = vmatprep.mubr.bf16.mxu1 %v8041_v50  ;;  %v5168_v1 = vpop.f32.mrb[1].mxu0 }
 0x303   :  { %v5169_v5 = vpop.f32.mrb[2].mxu0 }
 0x304   :  { %v4093_v58 = vpop.f32.mrb[248].mxu1  ;;  %v5171_v7 = vpop.f32.mrb[3].mxu0 }
 0x305   :  { %v5151_v59 = vadd.f32 %v5150_v34, %v4093_v58  ;;  %v4095_v60 = vpop.f32.mrb[249].mxu1  ;;  %v8068_v34 = vld [vmem:[%s10404_s0 + $0xbcc] ss:$16 sps:$4 sm:$0xff]   ;;  %v8072_v58 = vld [vmem:[%s10404_s0 + $0xbe8] ss:$16 sps:$4 sm:$0xff]  }
 0x306   :  { %v4096_v63 = vpop.f32.mrb[250].mxu1  ;;  %5381 = vmatmul.mubr.bf16.gmra.mrb[108].mxu0 %v8048_v2 }
 0x307   :  { %5801 = vst [vmem:[#allocation2 + $0x3e0] sm:$0xff] %v5151_v59  ;;  %v5154_v3 = vadd.f32 %v5153_v41, %v4096_v63  ;;  %v4098_v4 = vpop.f32.mrb[251].mxu1  ;;  %7082 = vmatprep.mubr.msk.bf16.mxu0 %vm3178_vm0, %v8056_v6  ;;  %v8077_v6 = vld [vmem:[%s10404_s0 + $0xbe4] ss:$16 sps:$4 sm:$0xff]  }
 0x309   :  { %5802 = vst [vmem:[#allocation2 + $0x3e8] sm:$0xff] %v5154_v3  ;;  %4308 = vmatmul.mubr.bf16.gmra.mrb[248].mxu1 %v8039_v61  ;;  %v5174_v12 = vpop.f32.mrb[4].mxu0  ;;  %v8069_v3 = vld [vmem:[%s10404_s0 + $0xbc0] ss:$16 sps:$4 sm:$0xff]  }
 0x30a   :  { %4315 = vmatprep.mubr.bf16.mxu1 %v8047_v0  ;;  %v5176_v15 = vpop.f32.mrb[5].mxu0 }
 0x30b   :  { %v5177_v19 = vpop.f32.mrb[6].mxu0 }
 0x30c   :  { %v4101_v8 = vpop.f32.mrb[252].mxu1  ;;  %v5179_v21 = vpop.f32.mrb[7].mxu0 }
 0x30d   :  { %v5159_v9 = vadd.f32 %v5158_v48, %v4101_v8  ;;  %v4103_v10 = vpop.f32.mrb[253].mxu1  ;;  %v8074_v48 = vld [vmem:[%s10404_s0 + $0xbec] ss:$16 sps:$4 sm:$0xff]   ;;  %v8078_v8 = vld [vmem:[%s10404_s0 + $0xc08] ss:$16 sps:$4 sm:$0xff]  }
 0x30e   :  { %v4104_v13 = vpop.f32.mrb[254].mxu1  ;;  %5389 = vmatmul.mubr.bf16.gmra.mrb[112].mxu0 %v8054_v16 }
 0x30f   :  { %5803 = vst [vmem:[#allocation2 + $0x3f0] sm:$0xff] %v5159_v9  ;;  %v5162_v17 = vadd.f32 %v5161_v55, %v4104_v13  ;;  %v4106_v18 = vpop.f32.mrb[255].mxu1  ;;  %7083 = vmatprep.mubr.msk.bf16.mxu0 %vm3178_vm0, %v8062_v20  ;;  %v8083_v20 = vld [vmem:[%s10404_s0 + $0xc04] ss:$16 sps:$4 sm:$0xff]  }
 0x311   :  { %5804 = vst [vmem:[#allocation2 + $0x3f8] sm:$0xff] %v5162_v17  ;;  %4316 = vmatmul.mubr.bf16.gmra.mrb[252].mxu1 %v8045_v11  ;;  %v5182_v26 = vpop.f32.mrb[8].mxu0  ;;  %v8075_v17 = vld [vmem:[%s10404_s0 + $0xbe0] ss:$16 sps:$4 sm:$0xff]  }
 0x312   :  { %4323 = vmatprep.mubr.bf16.mxu1 %v8053_v14  ;;  %v5184_v29 = vpop.f32.mrb[9].mxu0 }
 0x313   :  { %v5185_v33 = vpop.f32.mrb[10].mxu0 }
 0x314   :  { %v4109_v22 = vpop.f32.mrb[148].mxu1  ;;  %v5187_v35 = vpop.f32.mrb[11].mxu0 }
 0x315   :  { %v5167_v23 = vadd.f32 %v5166_v62, %v4109_v22  ;;  %v4111_v24 = vpop.f32.mrb[149].mxu1  ;;  %v8080_v62 = vld [vmem:[%s10404_s0 + $0xc0c] ss:$16 sps:$4 sm:$0xff]   ;;  %v8084_v22 = vld [vmem:[%s10404_s0 + $0xc28] ss:$16 sps:$4 sm:$0xff]  }
 0x316   :  { %v4112_v27 = vpop.f32.mrb[150].mxu1  ;;  %5397 = vmatmul.mubr.bf16.gmra.mrb[116].mxu0 %v8060_v30 }
 0x317   :  { %5805 = vst [vmem:[#allocation2 + $0x400] sm:$0xff] %v5167_v23  ;;  %v5170_v31 = vadd.f32 %v5169_v5, %v4112_v27  ;;  %v4114_v32 = vpop.f32.mrb[151].mxu1  ;;  %7084 = vmatprep.mubr.msk.bf16.mxu0 %vm3178_vm0, %v8068_v34  ;;  %v8089_v34 = vld [vmem:[%s10404_s0 + $0xc24] ss:$16 sps:$4 sm:$0xff]  }
 0x319   :  { %5806 = vst [vmem:[#allocation2 + $0x408] sm:$0xff] %v5170_v31  ;;  %4324 = vmatmul.mubr.bf16.gmra.mrb[148].mxu1 %v8051_v25  ;;  %v5190_v40 = vpop.f32.mrb[12].mxu0  ;;  %v8081_v31 = vld [vmem:[%s10404_s0 + $0xc00] ss:$16 sps:$4 sm:$0xff]  }
 0x31a   :  { %4331 = vmatprep.mubr.bf16.mxu1 %v8059_v28  ;;  %v5192_v43 = vpop.f32.mrb[13].mxu0 }
 0x31b   :  { %v5193_v47 = vpop.f32.mrb[14].mxu0 }
 0x31c   :  { %v4117_v36 = vpop.f32.mrb[152].mxu1  ;;  %v5195_v49 = vpop.f32.mrb[15].mxu0 }
 0x31d   :  { %v5175_v37 = vadd.f32 %v5174_v12, %v4117_v36  ;;  %v4119_v38 = vpop.f32.mrb[153].mxu1  ;;  %v8086_v12 = vld [vmem:[%s10404_s0 + $0xc2c] ss:$16 sps:$4 sm:$0xff]   ;;  %v8090_v36 = vld [vmem:[%s10404_s0 + $0xc48] ss:$16 sps:$4 sm:$0xff]  }
 0x31e   :  { %v4120_v41 = vpop.f32.mrb[154].mxu1  ;;  %5405 = vmatmul.mubr.bf16.gmra.mrb[120].mxu0 %v8066_v44 }
 0x31f   :  { %5807 = vst [vmem:[#allocation2 + $0x410] sm:$0xff] %v5175_v37  ;;  %v5178_v45 = vadd.f32 %v5177_v19, %v4120_v41  ;;  %v4122_v46 = vpop.f32.mrb[155].mxu1  ;;  %7085 = vmatprep.mubr.msk.bf16.mxu0 %vm3178_vm0, %v8074_v48  ;;  %v8095_v48 = vld [vmem:[%s10404_s0 + $0xc44] ss:$16 sps:$4 sm:$0xff]  }
 0x321   :  { %5808 = vst [vmem:[#allocation2 + $0x418] sm:$0xff] %v5178_v45  ;;  %4332 = vmatmul.mubr.bf16.gmra.mrb[152].mxu1 %v8057_v39  ;;  %v5198_v54 = vpop.f32.mrb[16].mxu0  ;;  %v8087_v45 = vld [vmem:[%s10404_s0 + $0xc20] ss:$16 sps:$4 sm:$0xff]  }
 0x322   :  { %4339 = vmatprep.mubr.bf16.mxu1 %v8065_v42  ;;  %v5200_v57 = vpop.f32.mrb[17].mxu0 }
 0x323   :  { %v5201_v61 = vpop.f32.mrb[18].mxu0 }
 0x324   :  { %v4125_v50 = vpop.f32.mrb[156].mxu1  ;;  %v5203_v63 = vpop.f32.mrb[19].mxu0 }
 0x325   :  { %v5183_v51 = vadd.f32 %v5182_v26, %v4125_v50  ;;  %v4127_v52 = vpop.f32.mrb[157].mxu1  ;;  %v8092_v26 = vld [vmem:[%s10404_s0 + $0xc4c] ss:$16 sps:$4 sm:$0xff]   ;;  %v8096_v50 = vld [vmem:[%s10404_s0 + $0xc68] ss:$16 sps:$4 sm:$0xff]  }
 0x326   :  { %v4128_v55 = vpop.f32.mrb[158].mxu1  ;;  %5413 = vmatmul.mubr.bf16.gmra.mrb[124].mxu0 %v8072_v58 }
 0x327   :  { %5809 = vst [vmem:[#allocation2 + $0x420] sm:$0xff] %v5183_v51  ;;  %v5186_v59 = vadd.f32 %v5185_v33, %v4128_v55  ;;  %v4130_v60 = vpop.f32.mrb[159].mxu1  ;;  %7086 = vmatprep.mubr.msk.bf16.mxu0 %vm3178_vm0, %v8080_v62  ;;  %v8101_v62 = vld [vmem:[%s10404_s0 + $0xc64] ss:$16 sps:$4 sm:$0xff]  }
 0x329   :  { %5810 = vst [vmem:[#allocation2 + $0x428] sm:$0xff] %v5186_v59  ;;  %4340 = vmatmul.mubr.bf16.gmra.mrb[156].mxu1 %v8063_v53  ;;  %v5206_v4 = vpop.f32.mrb[20].mxu0  ;;  %v8093_v59 = vld [vmem:[%s10404_s0 + $0xc40] ss:$16 sps:$4 sm:$0xff]  }
 0x32a   :  { %4347 = vmatprep.mubr.bf16.mxu1 %v8071_v56  ;;  %v5208_v7 = vpop.f32.mrb[21].mxu0 }
 0x32b   :  { %v5209_v11 = vpop.f32.mrb[22].mxu0 }
 0x32c   :  { %v4133_v0 = vpop.f32.mrb[160].mxu1  ;;  %v5211_v13 = vpop.f32.mrb[23].mxu0 }
 0x32d   :  { %v5191_v1 = vadd.f32 %v5190_v40, %v4133_v0  ;;  %v4135_v2 = vpop.f32.mrb[161].mxu1  ;;  %v8098_v40 = vld [vmem:[%s10404_s0 + $0xc6c] ss:$16 sps:$4 sm:$0xff]   ;;  %v8102_v0 = vld [vmem:[%s10404_s0 + $0xc88] ss:$16 sps:$4 sm:$0xff]  }
 0x32e   :  { %v4136_v5 = vpop.f32.mrb[162].mxu1  ;;  %5421 = vmatmul.mubr.bf16.gmra.mrb[128].mxu0 %v8078_v8 }
 0x32f   :  { %5811 = vst [vmem:[#allocation2 + $0x430] sm:$0xff] %v5191_v1  ;;  %v5194_v9 = vadd.f32 %v5193_v47, %v4136_v5  ;;  %v4138_v10 = vpop.f32.mrb[163].mxu1  ;;  %7087 = vmatprep.mubr.msk.bf16.mxu0 %vm3178_vm0, %v8086_v12  ;;  %v8107_v12 = vld [vmem:[%s10404_s0 + $0xc84] ss:$16 sps:$4 sm:$0xff]  }
 0x331   :  { %5812 = vst [vmem:[#allocation2 + $0x438] sm:$0xff] %v5194_v9  ;;  %4348 = vmatmul.mubr.bf16.gmra.mrb[160].mxu1 %v8069_v3  ;;  %v5214_v18 = vpop.f32.mrb[24].mxu0  ;;  %v8099_v9 = vld [vmem:[%s10404_s0 + $0xc60] ss:$16 sps:$4 sm:$0xff]  }
 0x332   :  { %4355 = vmatprep.mubr.bf16.mxu1 %v8077_v6  ;;  %v5216_v21 = vpop.f32.mrb[25].mxu0 }
 0x333   :  { %v5217_v25 = vpop.f32.mrb[26].mxu0 }
 0x334   :  { %v4141_v14 = vpop.f32.mrb[164].mxu1  ;;  %v5219_v27 = vpop.f32.mrb[27].mxu0 }
 0x335   :  { %v5199_v15 = vadd.f32 %v5198_v54, %v4141_v14  ;;  %v4143_v16 = vpop.f32.mrb[165].mxu1  ;;  %v8104_v54 = vld [vmem:[%s10404_s0 + $0xc8c] ss:$16 sps:$4 sm:$0xff]   ;;  %v8108_v14 = vld [vmem:[%s10404_s0 + $0xca8] ss:$16 sps:$4 sm:$0xff]  }
 0x336   :  { %v4144_v19 = vpop.f32.mrb[166].mxu1  ;;  %5429 = vmatmul.mubr.bf16.gmra.mrb[132].mxu0 %v8084_v22 }
 0x337   :  { %5813 = vst [vmem:[#allocation2 + $0x440] sm:$0xff] %v5199_v15  ;;  %v5202_v23 = vadd.f32 %v5201_v61, %v4144_v19  ;;  %v4146_v24 = vpop.f32.mrb[167].mxu1  ;;  %7088 = vmatprep.mubr.msk.bf16.mxu0 %vm3178_vm0, %v8092_v26  ;;  %v8113_v26 = vld [vmem:[%s10404_s0 + $0xca4] ss:$16 sps:$4 sm:$0xff]  }
 0x339   :  { %5814 = vst [vmem:[#allocation2 + $0x448] sm:$0xff] %v5202_v23  ;;  %4356 = vmatmul.mubr.bf16.gmra.mrb[164].mxu1 %v8075_v17  ;;  %v5222_v32 = vpop.f32.mrb[28].mxu0  ;;  %v8105_v23 = vld [vmem:[%s10404_s0 + $0xc80] ss:$16 sps:$4 sm:$0xff]  }
 0x33a   :  { %4363 = vmatprep.mubr.bf16.mxu1 %v8083_v20  ;;  %v5224_v35 = vpop.f32.mrb[29].mxu0 }
 0x33b   :  { %v5225_v39 = vpop.f32.mrb[30].mxu0 }
 0x33c   :  { %v4149_v28 = vpop.f32.mrb[168].mxu1  ;;  %v5227_v41 = vpop.f32.mrb[31].mxu0 }
 0x33d   :  { %v5207_v29 = vadd.f32 %v5206_v4, %v4149_v28  ;;  %v4151_v30 = vpop.f32.mrb[169].mxu1  ;;  %v8110_v4 = vld [vmem:[%s10404_s0 + $0xcac] ss:$16 sps:$4 sm:$0xff]   ;;  %v8114_v28 = vld [vmem:[%s10404_s0 + $0xcc8] ss:$16 sps:$4 sm:$0xff]  }
 0x33e   :  { %v4152_v33 = vpop.f32.mrb[170].mxu1  ;;  %5437 = vmatmul.mubr.bf16.gmra.mrb[136].mxu0 %v8090_v36 }
 0x33f   :  { %5815 = vst [vmem:[#allocation2 + $0x450] sm:$0xff] %v5207_v29  ;;  %v5210_v37 = vadd.f32 %v5209_v11, %v4152_v33  ;;  %v4154_v38 = vpop.f32.mrb[171].mxu1  ;;  %7089 = vmatprep.mubr.msk.bf16.mxu0 %vm3178_vm0, %v8098_v40  ;;  %v8119_v40 = vld [vmem:[%s10404_s0 + $0xcc4] ss:$16 sps:$4 sm:$0xff]  }
 0x341   :  { %5816 = vst [vmem:[#allocation2 + $0x458] sm:$0xff] %v5210_v37  ;;  %4364 = vmatmul.mubr.bf16.gmra.mrb[168].mxu1 %v8081_v31  ;;  %v5230_v46 = vpop.f32.mrb[32].mxu0  ;;  %v8111_v37 = vld [vmem:[%s10404_s0 + $0xca0] ss:$16 sps:$4 sm:$0xff]  }
 0x342   :  { %4371 = vmatprep.mubr.bf16.mxu1 %v8089_v34  ;;  %v5232_v49 = vpop.f32.mrb[33].mxu0 }
 0x343   :  { %v5233_v53 = vpop.f32.mrb[34].mxu0 }
 0x344   :  { %v4157_v42 = vpop.f32.mrb[172].mxu1  ;;  %v5235_v55 = vpop.f32.mrb[35].mxu0 }
 0x345   :  { %v5215_v43 = vadd.f32 %v5214_v18, %v4157_v42  ;;  %v4159_v44 = vpop.f32.mrb[173].mxu1  ;;  %v8116_v18 = vld [vmem:[%s10404_s0 + $0xccc] ss:$16 sps:$4 sm:$0xff]   ;;  %v8120_v42 = vld [vmem:[%s10404_s0 + $0xce8] ss:$16 sps:$4 sm:$0xff]  }
 0x346   :  { %v4160_v47 = vpop.f32.mrb[174].mxu1  ;;  %5445 = vmatmul.mubr.bf16.gmra.mrb[140].mxu0 %v8096_v50 }
 0x347   :  { %5817 = vst [vmem:[#allocation2 + $0x460] sm:$0xff] %v5215_v43  ;;  %v5218_v51 = vadd.f32 %v5217_v25, %v4160_v47  ;;  %v4162_v52 = vpop.f32.mrb[175].mxu1  ;;  %7090 = vmatprep.mubr.msk.bf16.mxu0 %vm3178_vm0, %v8104_v54  ;;  %v8125_v54 = vld [vmem:[%s10404_s0 + $0xce4] ss:$16 sps:$4 sm:$0xff]  }
 0x349   :  { %5818 = vst [vmem:[#allocation2 + $0x468] sm:$0xff] %v5218_v51  ;;  %4372 = vmatmul.mubr.bf16.gmra.mrb[172].mxu1 %v8087_v45  ;;  %v5238_v60 = vpop.f32.mrb[36].mxu0  ;;  %v8117_v51 = vld [vmem:[%s10404_s0 + $0xcc0] ss:$16 sps:$4 sm:$0xff]  }
 0x34a   :  { %4379 = vmatprep.mubr.bf16.mxu1 %v8095_v48  ;;  %v5240_v63 = vpop.f32.mrb[37].mxu0 }
 0x34b   :  { %v5241_v3 = vpop.f32.mrb[38].mxu0 }
 0x34c   :  { %v4165_v56 = vpop.f32.mrb[176].mxu1  ;;  %v5243_v5 = vpop.f32.mrb[39].mxu0 }
 0x34d   :  { %v5223_v57 = vadd.f32 %v5222_v32, %v4165_v56  ;;  %v4167_v58 = vpop.f32.mrb[177].mxu1  ;;  %v8122_v32 = vld [vmem:[%s10404_s0 + $0xcec] ss:$16 sps:$4 sm:$0xff]   ;;  %v8126_v56 = vld [vmem:[%s10404_s0 + $0xd08] ss:$16 sps:$4 sm:$0xff]  }
 0x34e   :  { %v4168_v61 = vpop.f32.mrb[178].mxu1  ;;  %5453 = vmatmul.mubr.bf16.gmra.mrb[144].mxu0 %v8102_v0 }
 0x34f   :  { %5819 = vst [vmem:[#allocation2 + $0x470] sm:$0xff] %v5223_v57  ;;  %v5226_v1 = vadd.f32 %v5225_v39, %v4168_v61  ;;  %v4170_v2 = vpop.f32.mrb[179].mxu1  ;;  %7091 = vmatprep.mubr.msk.bf16.mxu0 %vm3178_vm0, %v8110_v4  ;;  %v8131_v4 = vld [vmem:[%s10404_s0 + $0xd04] ss:$16 sps:$4 sm:$0xff]  }
 0x351   :  { %5820 = vst [vmem:[#allocation2 + $0x478] sm:$0xff] %v5226_v1  ;;  %4380 = vmatmul.mubr.bf16.gmra.mrb[176].mxu1 %v8093_v59  ;;  %v5246_v10 = vpop.f32.mrb[40].mxu0  ;;  %v8123_v1 = vld [vmem:[%s10404_s0 + $0xce0] ss:$16 sps:$4 sm:$0xff]  }
 0x352   :  { %4387 = vmatprep.mubr.bf16.mxu1 %v8101_v62  ;;  %v5248_v13 = vpop.f32.mrb[41].mxu0 }
 0x353   :  { %v5249_v17 = vpop.f32.mrb[42].mxu0 }
 0x354   :  { %v4173_v6 = vpop.f32.mrb[180].mxu1  ;;  %v5251_v19 = vpop.f32.mrb[43].mxu0 }
 0x355   :  { %v5231_v7 = vadd.f32 %v5230_v46, %v4173_v6  ;;  %v4175_v8 = vpop.f32.mrb[181].mxu1  ;;  %v8128_v46 = vld [vmem:[%s10404_s0 + $0xd0c] ss:$16 sps:$4 sm:$0xff]   ;;  %v8132_v6 = vld [vmem:[%s10404_s0 + $0xd28] ss:$16 sps:$4 sm:$0xff]  }
 0x356   :  { %v4176_v11 = vpop.f32.mrb[182].mxu1  ;;  %5461 = vmatmul.mubr.bf16.gmra.mrb[148].mxu0 %v8108_v14 }
 0x357   :  { %5821 = vst [vmem:[#allocation2 + $0x480] sm:$0xff] %v5231_v7  ;;  %v5234_v15 = vadd.f32 %v5233_v53, %v4176_v11  ;;  %v4178_v16 = vpop.f32.mrb[183].mxu1  ;;  %7092 = vmatprep.mubr.msk.bf16.mxu0 %vm3178_vm0, %v8116_v18  ;;  %v8137_v18 = vld [vmem:[%s10404_s0 + $0xd24] ss:$16 sps:$4 sm:$0xff]  }
 0x359   :  { %5822 = vst [vmem:[#allocation2 + $0x488] sm:$0xff] %v5234_v15  ;;  %4388 = vmatmul.mubr.bf16.gmra.mrb[180].mxu1 %v8099_v9  ;;  %v5254_v24 = vpop.f32.mrb[44].mxu0  ;;  %v8129_v15 = vld [vmem:[%s10404_s0 + $0xd00] ss:$16 sps:$4 sm:$0xff]  }
 0x35a   :  { %4395 = vmatprep.mubr.bf16.mxu1 %v8107_v12  ;;  %v5256_v27 = vpop.f32.mrb[45].mxu0 }
 0x35b   :  { %v5257_v31 = vpop.f32.mrb[46].mxu0 }
 0x35c   :  { %v4181_v20 = vpop.f32.mrb[184].mxu1  ;;  %v5259_v33 = vpop.f32.mrb[47].mxu0 }
 0x35d   :  { %v5239_v21 = vadd.f32 %v5238_v60, %v4181_v20  ;;  %v4183_v22 = vpop.f32.mrb[185].mxu1  ;;  %v8134_v60 = vld [vmem:[%s10404_s0 + $0xd2c] ss:$16 sps:$4 sm:$0xff]   ;;  %v8138_v20 = vld [vmem:[%s10404_s0 + $0xd48] ss:$16 sps:$4 sm:$0xff]  }
 0x35e   :  { %v4184_v25 = vpop.f32.mrb[186].mxu1  ;;  %5469 = vmatmul.mubr.bf16.gmra.mrb[152].mxu0 %v8114_v28 }
 0x35f   :  { %5823 = vst [vmem:[#allocation2 + $0x490] sm:$0xff] %v5239_v21  ;;  %v5242_v29 = vadd.f32 %v5241_v3, %v4184_v25  ;;  %v4186_v30 = vpop.f32.mrb[187].mxu1  ;;  %7093 = vmatprep.mubr.msk.bf16.mxu0 %vm3178_vm0, %v8122_v32  ;;  %v8143_v32 = vld [vmem:[%s10404_s0 + $0xd44] ss:$16 sps:$4 sm:$0xff]  }
 0x361   :  { %5824 = vst [vmem:[#allocation2 + $0x498] sm:$0xff] %v5242_v29  ;;  %4396 = vmatmul.mubr.bf16.gmra.mrb[184].mxu1 %v8105_v23  ;;  %v5262_v38 = vpop.f32.mrb[48].mxu0  ;;  %v8135_v29 = vld [vmem:[%s10404_s0 + $0xd20] ss:$16 sps:$4 sm:$0xff]  }
 0x362   :  { %4403 = vmatprep.mubr.bf16.mxu1 %v8113_v26  ;;  %v5264_v41 = vpop.f32.mrb[49].mxu0 }
 0x363   :  { %v5265_v45 = vpop.f32.mrb[50].mxu0 }
 0x364   :  { %v4189_v34 = vpop.f32.mrb[188].mxu1  ;;  %v5267_v47 = vpop.f32.mrb[51].mxu0 }
 0x365   :  { %v5247_v35 = vadd.f32 %v5246_v10, %v4189_v34  ;;  %v4191_v36 = vpop.f32.mrb[189].mxu1  ;;  %v8140_v10 = vld [vmem:[%s10404_s0 + $0xd4c] ss:$16 sps:$4 sm:$0xff]   ;;  %v8144_v34 = vld [vmem:[%s10404_s0 + $0xd68] ss:$16 sps:$4 sm:$0xff]  }
 0x366   :  { %v4192_v39 = vpop.f32.mrb[190].mxu1  ;;  %5477 = vmatmul.mubr.bf16.gmra.mrb[156].mxu0 %v8120_v42 }
 0x367   :  { %5825 = vst [vmem:[#allocation2 + $0x4a0] sm:$0xff] %v5247_v35  ;;  %v5250_v43 = vadd.f32 %v5249_v17, %v4192_v39  ;;  %v4194_v44 = vpop.f32.mrb[191].mxu1  ;;  %7094 = vmatprep.mubr.msk.bf16.mxu0 %vm3178_vm0, %v8128_v46  ;;  %v8149_v46 = vld [vmem:[%s10404_s0 + $0xd64] ss:$16 sps:$4 sm:$0xff]  }
 0x369   :  { %5826 = vst [vmem:[#allocation2 + $0x4a8] sm:$0xff] %v5250_v43  ;;  %4404 = vmatmul.mubr.bf16.gmra.mrb[188].mxu1 %v8111_v37  ;;  %v5270_v52 = vpop.f32.mrb[52].mxu0  ;;  %v8141_v43 = vld [vmem:[%s10404_s0 + $0xd40] ss:$16 sps:$4 sm:$0xff]  }
 0x36a   :  { %4411 = vmatprep.mubr.bf16.mxu1 %v8119_v40  ;;  %v5272_v55 = vpop.f32.mrb[53].mxu0 }
 0x36b   :  { %v5273_v59 = vpop.f32.mrb[54].mxu0 }
 0x36c   :  { %v4197_v48 = vpop.f32.mrb[192].mxu1  ;;  %v5275_v61 = vpop.f32.mrb[55].mxu0 }
 0x36d   :  { %v5255_v49 = vadd.f32 %v5254_v24, %v4197_v48  ;;  %v4199_v50 = vpop.f32.mrb[193].mxu1  ;;  %v8146_v24 = vld [vmem:[%s10404_s0 + $0xd6c] ss:$16 sps:$4 sm:$0xff]   ;;  %v8150_v48 = vld [vmem:[%s10404_s0 + $0xd88] ss:$16 sps:$4 sm:$0xff]  }
 0x36e   :  { %v4200_v53 = vpop.f32.mrb[194].mxu1  ;;  %5485 = vmatmul.mubr.bf16.gmra.mrb[160].mxu0 %v8126_v56 }
 0x36f   :  { %5827 = vst [vmem:[#allocation2 + $0x4b0] sm:$0xff] %v5255_v49  ;;  %v5258_v57 = vadd.f32 %v5257_v31, %v4200_v53  ;;  %v4202_v58 = vpop.f32.mrb[195].mxu1  ;;  %7095 = vmatprep.mubr.msk.bf16.mxu0 %vm3178_vm0, %v8134_v60  ;;  %v8155_v60 = vld [vmem:[%s10404_s0 + $0xd84] ss:$16 sps:$4 sm:$0xff]  }
 0x371   :  { %5828 = vst [vmem:[#allocation2 + $0x4b8] sm:$0xff] %v5258_v57  ;;  %4412 = vmatmul.mubr.bf16.gmra.mrb[192].mxu1 %v8117_v51  ;;  %v5278_v2 = vpop.f32.mrb[56].mxu0  ;;  %v8147_v57 = vld [vmem:[%s10404_s0 + $0xd60] ss:$16 sps:$4 sm:$0xff]  }
 0x372   :  { %4419 = vmatprep.mubr.bf16.mxu1 %v8125_v54  ;;  %v5280_v5 = vpop.f32.mrb[57].mxu0 }
 0x373   :  { %v5281_v9 = vpop.f32.mrb[58].mxu0 }
 0x374   :  { %v4205_v62 = vpop.f32.mrb[196].mxu1  ;;  %v5283_v11 = vpop.f32.mrb[59].mxu0 }
 0x375   :  { %v5263_v63 = vadd.f32 %v5262_v38, %v4205_v62  ;;  %v4207_v0 = vpop.f32.mrb[197].mxu1  ;;  %v8152_v38 = vld [vmem:[%s10404_s0 + $0xd8c] ss:$16 sps:$4 sm:$0xff]   ;;  %v8156_v62 = vld [vmem:[%s10404_s0 + $0xda8] ss:$16 sps:$4 sm:$0xff]  }
 0x376   :  { %v4208_v3 = vpop.f32.mrb[198].mxu1  ;;  %5493 = vmatmul.mubr.bf16.gmra.mrb[164].mxu0 %v8132_v6 }
 0x377   :  { %5829 = vst [vmem:[#allocation2 + $0x4c0] sm:$0xff] %v5263_v63  ;;  %v5266_v7 = vadd.f32 %v5265_v45, %v4208_v3  ;;  %v4210_v8 = vpop.f32.mrb[199].mxu1  ;;  %7096 = vmatprep.mubr.msk.bf16.mxu0 %vm3178_vm0, %v8140_v10  ;;  %v8161_v10 = vld [vmem:[%s10404_s0 + $0xda4] ss:$16 sps:$4 sm:$0xff]  }
 0x379   :  { %5830 = vst [vmem:[#allocation2 + $0x4c8] sm:$0xff] %v5266_v7  ;;  %4420 = vmatmul.mubr.bf16.gmra.mrb[196].mxu1 %v8123_v1  ;;  %v5286_v16 = vpop.f32.mrb[60].mxu0  ;;  %v8153_v7 = vld [vmem:[%s10404_s0 + $0xd80] ss:$16 sps:$4 sm:$0xff]  }
 0x37a   :  { %4427 = vmatprep.mubr.bf16.mxu1 %v8131_v4  ;;  %v5288_v19 = vpop.f32.mrb[61].mxu0 }
 0x37b   :  { %v5289_v23 = vpop.f32.mrb[62].mxu0 }
 0x37c   :  { %v4213_v12 = vpop.f32.mrb[200].mxu1  ;;  %v5291_v25 = vpop.f32.mrb[63].mxu0 }
 0x37d   :  { %v5271_v13 = vadd.f32 %v5270_v52, %v4213_v12  ;;  %v4215_v14 = vpop.f32.mrb[201].mxu1  ;;  %v8158_v52 = vld [vmem:[%s10404_s0 + $0xdac] ss:$16 sps:$4 sm:$0xff]   ;;  %v8162_v12 = vld [vmem:[%s10404_s0 + $0xdc8] ss:$16 sps:$4 sm:$0xff]  }
 0x37e   :  { %v4216_v17 = vpop.f32.mrb[202].mxu1  ;;  %5501 = vmatmul.mubr.bf16.gmra.mrb[168].mxu0 %v8138_v20 }
 0x37f   :  { %5831 = vst [vmem:[#allocation2 + $0x4d0] sm:$0xff] %v5271_v13  ;;  %v5274_v21 = vadd.f32 %v5273_v59, %v4216_v17  ;;  %v4218_v22 = vpop.f32.mrb[203].mxu1  ;;  %7097 = vmatprep.mubr.msk.bf16.mxu0 %vm3178_vm0, %v8146_v24  ;;  %v8167_v24 = vld [vmem:[%s10404_s0 + $0xdc4] ss:$16 sps:$4 sm:$0xff]  }
 0x381   :  { %5832 = vst [vmem:[#allocation2 + $0x4d8] sm:$0xff] %v5274_v21  ;;  %4428 = vmatmul.mubr.bf16.gmra.mrb[200].mxu1 %v8129_v15  ;;  %v5294_v30 = vpop.f32.mrb[64].mxu0  ;;  %v8159_v21 = vld [vmem:[%s10404_s0 + $0xda0] ss:$16 sps:$4 sm:$0xff]  }
 0x382   :  { %4435 = vmatprep.mubr.bf16.mxu1 %v8137_v18  ;;  %v5296_v33 = vpop.f32.mrb[65].mxu0 }
 0x383   :  { %v5297_v37 = vpop.f32.mrb[66].mxu0 }
 0x384   :  { %v4221_v26 = vpop.f32.mrb[204].mxu1  ;;  %v5299_v39 = vpop.f32.mrb[67].mxu0 }
 0x385   :  { %v5279_v27 = vadd.f32 %v5278_v2, %v4221_v26  ;;  %v4223_v28 = vpop.f32.mrb[205].mxu1  ;;  %v8164_v2 = vld [vmem:[%s10404_s0 + $0xdcc] ss:$16 sps:$4 sm:$0xff]   ;;  %v8168_v26 = vld [vmem:[%s10404_s0 + $0xde8] ss:$16 sps:$4 sm:$0xff]  }
 0x386   :  { %v4224_v31 = vpop.f32.mrb[206].mxu1  ;;  %5509 = vmatmul.mubr.bf16.gmra.mrb[172].mxu0 %v8144_v34 }
 0x387   :  { %5833 = vst [vmem:[#allocation2 + $0x4e0] sm:$0xff] %v5279_v27  ;;  %v5282_v35 = vadd.f32 %v5281_v9, %v4224_v31  ;;  %v4226_v36 = vpop.f32.mrb[207].mxu1  ;;  %7098 = vmatprep.mubr.msk.bf16.mxu0 %vm3178_vm0, %v8152_v38  ;;  %v8173_v38 = vld [vmem:[%s10404_s0 + $0xde4] ss:$16 sps:$4 sm:$0xff]  }
 0x389   :  { %5834 = vst [vmem:[#allocation2 + $0x4e8] sm:$0xff] %v5282_v35  ;;  %4436 = vmatmul.mubr.bf16.gmra.mrb[204].mxu1 %v8135_v29  ;;  %v5302_v44 = vpop.f32.mrb[68].mxu0  ;;  %v8165_v35 = vld [vmem:[%s10404_s0 + $0xdc0] ss:$16 sps:$4 sm:$0xff]  }
 0x38a   :  { %4443 = vmatprep.mubr.bf16.mxu1 %v8143_v32  ;;  %v5304_v47 = vpop.f32.mrb[69].mxu0 }
 0x38b   :  { %v5305_v51 = vpop.f32.mrb[70].mxu0 }
 0x38c   :  { %v4229_v40 = vpop.f32.mrb[208].mxu1  ;;  %v5307_v53 = vpop.f32.mrb[71].mxu0 }
 0x38d   :  { %v5287_v41 = vadd.f32 %v5286_v16, %v4229_v40  ;;  %v4231_v42 = vpop.f32.mrb[209].mxu1  ;;  %v8170_v16 = vld [vmem:[%s10404_s0 + $0xdec] ss:$16 sps:$4 sm:$0xff]   ;;  %v8174_v40 = vld [vmem:[%s10404_s0 + $0xe08] ss:$16 sps:$4 sm:$0xff]  }
 0x38e   :  { %v4232_v45 = vpop.f32.mrb[210].mxu1  ;;  %5517 = vmatmul.mubr.bf16.gmra.mrb[176].mxu0 %v8150_v48 }
 0x38f   :  { %5835 = vst [vmem:[#allocation2 + $0x4f0] sm:$0xff] %v5287_v41  ;;  %v5290_v49 = vadd.f32 %v5289_v23, %v4232_v45  ;;  %v4234_v50 = vpop.f32.mrb[211].mxu1  ;;  %7099 = vmatprep.mubr.msk.bf16.mxu0 %vm3178_vm0, %v8158_v52  ;;  %v8179_v52 = vld [vmem:[%s10404_s0 + $0xe04] ss:$16 sps:$4 sm:$0xff]  }
 0x391   :  { %5836 = vst [vmem:[#allocation2 + $0x4f8] sm:$0xff] %v5290_v49  ;;  %4444 = vmatmul.mubr.bf16.gmra.mrb[208].mxu1 %v8141_v43  ;;  %v5310_v58 = vpop.f32.mrb[72].mxu0  ;;  %v8171_v49 = vld [vmem:[%s10404_s0 + $0xde0] ss:$16 sps:$4 sm:$0xff]  }
 0x392   :  { %4451 = vmatprep.mubr.bf16.mxu1 %v8149_v46  ;;  %v5312_v61 = vpop.f32.mrb[73].mxu0 }
 0x393   :  { %v5313_v1 = vpop.f32.mrb[74].mxu0 }
 0x394   :  { %v4237_v54 = vpop.f32.mrb[212].mxu1  ;;  %v5315_v3 = vpop.f32.mrb[75].mxu0 }
 0x395   :  { %v5295_v55 = vadd.f32 %v5294_v30, %v4237_v54  ;;  %v4239_v56 = vpop.f32.mrb[213].mxu1  ;;  %v8176_v30 = vld [vmem:[%s10404_s0 + $0xe0c] ss:$16 sps:$4 sm:$0xff]   ;;  %v8180_v54 = vld [vmem:[%s10404_s0 + $0xe28] ss:$16 sps:$4 sm:$0xff]  }
 0x396   :  { %v4240_v59 = vpop.f32.mrb[214].mxu1  ;;  %5525 = vmatmul.mubr.bf16.gmra.mrb[180].mxu0 %v8156_v62 }
 0x397   :  { %5837 = vst [vmem:[#allocation2 + $0x500] sm:$0xff] %v5295_v55  ;;  %v5298_v63 = vadd.f32 %v5297_v37, %v4240_v59  ;;  %v4242_v0 = vpop.f32.mrb[215].mxu1  ;;  %7100 = vmatprep.mubr.msk.bf16.mxu0 %vm3178_vm0, %v8164_v2  ;;  %v8185_v2 = vld [vmem:[%s10404_s0 + $0xe24] ss:$16 sps:$4 sm:$0xff]  }
 0x399   :  { %5838 = vst [vmem:[#allocation2 + $0x508] sm:$0xff] %v5298_v63  ;;  %4452 = vmatmul.mubr.bf16.gmra.mrb[212].mxu1 %v8147_v57  ;;  %v5318_v8 = vpop.f32.mrb[76].mxu0  ;;  %v8177_v63 = vld [vmem:[%s10404_s0 + $0xe00] ss:$16 sps:$4 sm:$0xff]  }
 0x39a   :  { %4459 = vmatprep.mubr.bf16.mxu1 %v8155_v60  ;;  %v5320_v11 = vpop.f32.mrb[77].mxu0 }
 0x39b   :  { %v5321_v15 = vpop.f32.mrb[78].mxu0 }
 0x39c   :  { %v4245_v4 = vpop.f32.mrb[216].mxu1  ;;  %v5323_v17 = vpop.f32.mrb[79].mxu0 }
 0x39d   :  { %v5303_v5 = vadd.f32 %v5302_v44, %v4245_v4  ;;  %v4247_v6 = vpop.f32.mrb[217].mxu1  ;;  %v8182_v44 = vld [vmem:[%s10404_s0 + $0xe2c] ss:$16 sps:$4 sm:$0xff]   ;;  %v8186_v4 = vld [vmem:[%s10404_s0 + $0xe48] ss:$16 sps:$4 sm:$0xff]  }
 0x39e   :  { %v4248_v9 = vpop.f32.mrb[218].mxu1  ;;  %5533 = vmatmul.mubr.bf16.gmra.mrb[184].mxu0 %v8162_v12 }
 0x39f   :  { %5839 = vst [vmem:[#allocation2 + $0x510] sm:$0xff] %v5303_v5  ;;  %v5306_v13 = vadd.f32 %v5305_v51, %v4248_v9  ;;  %v4250_v14 = vpop.f32.mrb[219].mxu1  ;;  %7101 = vmatprep.mubr.msk.bf16.mxu0 %vm3178_vm0, %v8170_v16  ;;  %v8191_v16 = vld [vmem:[%s10404_s0 + $0xe44] ss:$16 sps:$4 sm:$0xff]  }
 0x3a1   :  { %5840 = vst [vmem:[#allocation2 + $0x518] sm:$0xff] %v5306_v13  ;;  %4460 = vmatmul.mubr.bf16.gmra.mrb[216].mxu1 %v8153_v7  ;;  %v5326_v22 = vpop.f32.mrb[80].mxu0  ;;  %v8183_v13 = vld [vmem:[%s10404_s0 + $0xe20] ss:$16 sps:$4 sm:$0xff]  }
 0x3a2   :  { %4467 = vmatprep.mubr.bf16.mxu1 %v8161_v10  ;;  %v5328_v25 = vpop.f32.mrb[81].mxu0 }
 0x3a3   :  { %v5329_v29 = vpop.f32.mrb[82].mxu0 }
 0x3a4   :  { %v4253_v18 = vpop.f32.mrb[220].mxu1  ;;  %v5331_v31 = vpop.f32.mrb[83].mxu0 }
 0x3a5   :  { %v5311_v19 = vadd.f32 %v5310_v58, %v4253_v18  ;;  %v4255_v20 = vpop.f32.mrb[221].mxu1  ;;  %v8188_v58 = vld [vmem:[%s10404_s0 + $0xe4c] ss:$16 sps:$4 sm:$0xff]   ;;  %v8192_v18 = vld [vmem:[%s10404_s0 + $0xe68] ss:$16 sps:$4 sm:$0xff]  }
 0x3a6   :  { %v4256_v23 = vpop.f32.mrb[222].mxu1  ;;  %5541 = vmatmul.mubr.bf16.gmra.mrb[188].mxu0 %v8168_v26 }
 0x3a7   :  { %5841 = vst [vmem:[#allocation2 + $0x520] sm:$0xff] %v5311_v19  ;;  %v5314_v27 = vadd.f32 %v5313_v1, %v4256_v23  ;;  %v4258_v28 = vpop.f32.mrb[223].mxu1  ;;  %7102 = vmatprep.mubr.msk.bf16.mxu0 %vm3178_vm0, %v8176_v30  ;;  %v8197_v30 = vld [vmem:[%s10404_s0 + $0xe64] ss:$16 sps:$4 sm:$0xff]  }
 0x3a9   :  { %5842 = vst [vmem:[#allocation2 + $0x528] sm:$0xff] %v5314_v27  ;;  %4468 = vmatmul.mubr.bf16.gmra.mrb[220].mxu1 %v8159_v21  ;;  %v5334_v36 = vpop.f32.mrb[84].mxu0  ;;  %v8189_v27 = vld [vmem:[%s10404_s0 + $0xe40] ss:$16 sps:$4 sm:$0xff]  }
 0x3aa   :  { %4475 = vmatprep.mubr.bf16.mxu1 %v8167_v24  ;;  %v5336_v39 = vpop.f32.mrb[85].mxu0 }
 0x3ab   :  { %v5337_v43 = vpop.f32.mrb[86].mxu0 }
 0x3ac   :  { %v4261_v32 = vpop.f32.mrb[224].mxu1  ;;  %v5339_v45 = vpop.f32.mrb[87].mxu0 }
 0x3ad   :  { %v5319_v33 = vadd.f32 %v5318_v8, %v4261_v32  ;;  %v4263_v34 = vpop.f32.mrb[225].mxu1  ;;  %v8194_v8 = vld [vmem:[%s10404_s0 + $0xe6c] ss:$16 sps:$4 sm:$0xff]   ;;  %v8198_v32 = vld [vmem:[%s10404_s0 + $0xe88] ss:$16 sps:$4 sm:$0xff]  }
 0x3ae   :  { %v4264_v37 = vpop.f32.mrb[226].mxu1  ;;  %5549 = vmatmul.mubr.bf16.gmra.mrb[192].mxu0 %v8174_v40 }
 0x3af   :  { %5843 = vst [vmem:[#allocation2 + $0x530] sm:$0xff] %v5319_v33  ;;  %v5322_v41 = vadd.f32 %v5321_v15, %v4264_v37  ;;  %v4266_v42 = vpop.f32.mrb[227].mxu1  ;;  %7103 = vmatprep.mubr.msk.bf16.mxu0 %vm3178_vm0, %v8182_v44  ;;  %v8203_v44 = vld [vmem:[%s10404_s0 + $0xe84] ss:$16 sps:$4 sm:$0xff]  }
 0x3b1   :  { %5844 = vst [vmem:[#allocation2 + $0x538] sm:$0xff] %v5322_v41  ;;  %4476 = vmatmul.mubr.bf16.gmra.mrb[224].mxu1 %v8165_v35  ;;  %v5342_v50 = vpop.f32.mrb[88].mxu0  ;;  %v8195_v41 = vld [vmem:[%s10404_s0 + $0xe60] ss:$16 sps:$4 sm:$0xff]  }
 0x3b2   :  { %4483 = vmatprep.mubr.bf16.mxu1 %v8173_v38  ;;  %v5344_v53 = vpop.f32.mrb[89].mxu0 }
 0x3b3   :  { %v5345_v57 = vpop.f32.mrb[90].mxu0 }
 0x3b4   :  { %v4269_v46 = vpop.f32.mrb[228].mxu1  ;;  %v5347_v59 = vpop.f32.mrb[91].mxu0 }
 0x3b5   :  { %v5327_v47 = vadd.f32 %v5326_v22, %v4269_v46  ;;  %v4271_v48 = vpop.f32.mrb[229].mxu1  ;;  %v8200_v22 = vld [vmem:[%s10404_s0 + $0xe8c] ss:$16 sps:$4 sm:$0xff]   ;;  %v8204_v46 = vld [vmem:[%s10404_s0 + $0xea8] ss:$16 sps:$4 sm:$0xff]  }
 0x3b6   :  { %v4272_v51 = vpop.f32.mrb[230].mxu1  ;;  %5557 = vmatmul.mubr.bf16.gmra.mrb[196].mxu0 %v8180_v54 }
 0x3b7   :  { %5845 = vst [vmem:[#allocation2 + $0x540] sm:$0xff] %v5327_v47  ;;  %v5330_v55 = vadd.f32 %v5329_v29, %v4272_v51  ;;  %v4274_v56 = vpop.f32.mrb[231].mxu1  ;;  %7104 = vmatprep.mubr.msk.bf16.mxu0 %vm3178_vm0, %v8188_v58  ;;  %v8209_v58 = vld [vmem:[%s10404_s0 + $0xea4] ss:$16 sps:$4 sm:$0xff]  }
 0x3b9   :  { %5846 = vst [vmem:[#allocation2 + $0x548] sm:$0xff] %v5330_v55  ;;  %4484 = vmatmul.mubr.bf16.gmra.mrb[228].mxu1 %v8171_v49  ;;  %v5350_v0 = vpop.f32.mrb[92].mxu0  ;;  %v8201_v55 = vld [vmem:[%s10404_s0 + $0xe80] ss:$16 sps:$4 sm:$0xff]  }
 0x3ba   :  { %4491 = vmatprep.mubr.bf16.mxu1 %v8179_v52  ;;  %v5352_v3 = vpop.f32.mrb[93].mxu0 }
 0x3bb   :  { %v5353_v7 = vpop.f32.mrb[94].mxu0 }
 0x3bc   :  { %v4277_v60 = vpop.f32.mrb[232].mxu1  ;;  %v5355_v9 = vpop.f32.mrb[95].mxu0 }
 0x3bd   :  { %v5335_v61 = vadd.f32 %v5334_v36, %v4277_v60  ;;  %v4279_v62 = vpop.f32.mrb[233].mxu1  ;;  %v8206_v36 = vld [vmem:[%s10404_s0 + $0xeac] ss:$16 sps:$4 sm:$0xff]   ;;  %v8210_v60 = vld [vmem:[%s10404_s0 + $0xec8] ss:$16 sps:$4 sm:$0xff]  }
 0x3be   :  { %v4280_v1 = vpop.f32.mrb[234].mxu1  ;;  %5565 = vmatmul.mubr.bf16.gmra.mrb[200].mxu0 %v8186_v4 }
 0x3bf   :  { %5847 = vst [vmem:[#allocation2 + $0x550] sm:$0xff] %v5335_v61  ;;  %v5338_v5 = vadd.f32 %v5337_v43, %v4280_v1  ;;  %v4282_v6 = vpop.f32.mrb[235].mxu1  ;;  %7105 = vmatprep.mubr.msk.bf16.mxu0 %vm3178_vm0, %v8194_v8  ;;  %v8215_v8 = vld [vmem:[%s10404_s0 + $0xec4] ss:$16 sps:$4 sm:$0xff]  }
 0x3c1   :  { %5848 = vst [vmem:[#allocation2 + $0x558] sm:$0xff] %v5338_v5  ;;  %4492 = vmatmul.mubr.bf16.gmra.mrb[232].mxu1 %v8177_v63  ;;  %v5358_v14 = vpop.f32.mrb[96].mxu0  ;;  %v8207_v5 = vld [vmem:[%s10404_s0 + $0xea0] ss:$16 sps:$4 sm:$0xff]  }
 0x3c2   :  { %4499 = vmatprep.mubr.bf16.mxu1 %v8185_v2  ;;  %v5360_v17 = vpop.f32.mrb[97].mxu0 }
 0x3c3   :  { %v5361_v21 = vpop.f32.mrb[98].mxu0 }
 0x3c4   :  { %v4285_v10 = vpop.f32.mrb[236].mxu1  ;;  %v5363_v23 = vpop.f32.mrb[99].mxu0 }
 0x3c5   :  { %v5343_v11 = vadd.f32 %v5342_v50, %v4285_v10  ;;  %v4287_v12 = vpop.f32.mrb[237].mxu1  ;;  %v8212_v50 = vld [vmem:[%s10404_s0 + $0xecc] ss:$16 sps:$4 sm:$0xff]   ;;  %v8216_v10 = vld [vmem:[%s10404_s0 + $0xee8] ss:$16 sps:$4 sm:$0xff]  }
 0x3c6   :  { %v4288_v15 = vpop.f32.mrb[238].mxu1  ;;  %5573 = vmatmul.mubr.bf16.gmra.mrb[204].mxu0 %v8192_v18 }
 0x3c7   :  { %5849 = vst [vmem:[#allocation2 + $0x560] sm:$0xff] %v5343_v11  ;;  %v5346_v19 = vadd.f32 %v5345_v57, %v4288_v15  ;;  %v4290_v20 = vpop.f32.mrb[239].mxu1  ;;  %7106 = vmatprep.mubr.msk.bf16.mxu0 %vm3178_vm0, %v8200_v22  ;;  %v8221_v22 = vld [vmem:[%s10404_s0 + $0xee4] ss:$16 sps:$4 sm:$0xff]  }
 0x3c9   :  { %5850 = vst [vmem:[#allocation2 + $0x568] sm:$0xff] %v5346_v19  ;;  %4500 = vmatmul.mubr.bf16.gmra.mrb[236].mxu1 %v8183_v13  ;;  %v5366_v28 = vpop.f32.mrb[100].mxu0  ;;  %v8213_v19 = vld [vmem:[%s10404_s0 + $0xec0] ss:$16 sps:$4 sm:$0xff]  }
 0x3ca   :  { %4507 = vmatprep.mubr.bf16.mxu1 %v8191_v16  ;;  %v5368_v31 = vpop.f32.mrb[101].mxu0 }
 0x3cb   :  { %v5369_v35 = vpop.f32.mrb[102].mxu0 }
 0x3cc   :  { %v4293_v24 = vpop.f32.mrb[240].mxu1  ;;  %v5371_v37 = vpop.f32.mrb[103].mxu0 }
 0x3cd   :  { %v5351_v25 = vadd.f32 %v5350_v0, %v4293_v24  ;;  %v4295_v26 = vpop.f32.mrb[241].mxu1  ;;  %v8218_v0 = vld [vmem:[%s10404_s0 + $0xeec] ss:$16 sps:$4 sm:$0xff]   ;;  %v8222_v24 = vld [vmem:[%s10404_s0 + $0xf08] ss:$16 sps:$4 sm:$0xff]  }
 0x3ce   :  { %v4296_v29 = vpop.f32.mrb[242].mxu1  ;;  %5581 = vmatmul.mubr.bf16.gmra.mrb[208].mxu0 %v8198_v32 }
 0x3cf   :  { %5851 = vst [vmem:[#allocation2 + $0x570] sm:$0xff] %v5351_v25  ;;  %v5354_v33 = vadd.f32 %v5353_v7, %v4296_v29  ;;  %v4298_v34 = vpop.f32.mrb[243].mxu1  ;;  %7107 = vmatprep.mubr.msk.bf16.mxu0 %vm3178_vm0, %v8206_v36  ;;  %v8227_v36 = vld [vmem:[%s10404_s0 + $0xf04] ss:$16 sps:$4 sm:$0xff]  }
 0x3d1   :  { %5852 = vst [vmem:[#allocation2 + $0x578] sm:$0xff] %v5354_v33  ;;  %4508 = vmatmul.mubr.bf16.gmra.mrb[240].mxu1 %v8189_v27  ;;  %v5374_v42 = vpop.f32.mrb[104].mxu0  ;;  %v8219_v33 = vld [vmem:[%s10404_s0 + $0xee0] ss:$16 sps:$4 sm:$0xff]  }
 0x3d2   :  { %4515 = vmatprep.mubr.bf16.mxu1 %v8197_v30  ;;  %v5376_v45 = vpop.f32.mrb[105].mxu0 }
 0x3d3   :  { %v5377_v49 = vpop.f32.mrb[106].mxu0 }
 0x3d4   :  { %v4301_v38 = vpop.f32.mrb[244].mxu1  ;;  %v5379_v51 = vpop.f32.mrb[107].mxu0 }
 0x3d5   :  { %v5359_v39 = vadd.f32 %v5358_v14, %v4301_v38  ;;  %v4303_v40 = vpop.f32.mrb[245].mxu1  ;;  %v8224_v14 = vld [vmem:[%s10404_s0 + $0xf0c] ss:$16 sps:$4 sm:$0xff]   ;;  %v8228_v38 = vld [vmem:[%s10404_s0 + $0xf28] ss:$16 sps:$4 sm:$0xff]  }
 0x3d6   :  { %v4304_v43 = vpop.f32.mrb[246].mxu1  ;;  %5589 = vmatmul.mubr.bf16.gmra.mrb[212].mxu0 %v8204_v46 }
 0x3d7   :  { %5853 = vst [vmem:[#allocation2 + $0x580] sm:$0xff] %v5359_v39  ;;  %v5362_v47 = vadd.f32 %v5361_v21, %v4304_v43  ;;  %v4306_v48 = vpop.f32.mrb[247].mxu1  ;;  %7108 = vmatprep.mubr.msk.bf16.mxu0 %vm3178_vm0, %v8212_v50  ;;  %v8233_v50 = vld [vmem:[%s10404_s0 + $0xf24] ss:$16 sps:$4 sm:$0xff]  }
 0x3d9   :  { %5854 = vst [vmem:[#allocation2 + $0x588] sm:$0xff] %v5362_v47  ;;  %4516 = vmatmul.mubr.bf16.gmra.mrb[244].mxu1 %v8195_v41  ;;  %v5382_v56 = vpop.f32.mrb[108].mxu0  ;;  %v8225_v47 = vld [vmem:[%s10404_s0 + $0xf00] ss:$16 sps:$4 sm:$0xff]  }
 0x3da   :  { %4523 = vmatprep.mubr.bf16.mxu1 %v8203_v44  ;;  %v5384_v59 = vpop.f32.mrb[109].mxu0 }
 0x3db   :  { %v5385_v63 = vpop.f32.mrb[110].mxu0 }
 0x3dc   :  { %v4309_v52 = vpop.f32.mrb[248].mxu1  ;;  %v5387_v1 = vpop.f32.mrb[111].mxu0 }
 0x3dd   :  { %v5367_v53 = vadd.f32 %v5366_v28, %v4309_v52  ;;  %v4311_v54 = vpop.f32.mrb[249].mxu1  ;;  %v8230_v28 = vld [vmem:[%s10404_s0 + $0xf2c] ss:$16 sps:$4 sm:$0xff]   ;;  %v8234_v52 = vld [vmem:[%s10404_s0 + $0xf48] ss:$16 sps:$4 sm:$0xff]  }
 0x3de   :  { %v4312_v57 = vpop.f32.mrb[250].mxu1  ;;  %5597 = vmatmul.mubr.bf16.gmra.mrb[216].mxu0 %v8210_v60 }
 0x3df   :  { %5855 = vst [vmem:[#allocation2 + $0x590] sm:$0xff] %v5367_v53  ;;  %v5370_v61 = vadd.f32 %v5369_v35, %v4312_v57  ;;  %v4314_v62 = vpop.f32.mrb[251].mxu1  ;;  %7109 = vmatprep.mubr.msk.bf16.mxu0 %vm3178_vm0, %v8218_v0  ;;  %v8239_v0 = vld [vmem:[%s10404_s0 + $0xf44] ss:$16 sps:$4 sm:$0xff]  }
 0x3e1   :  { %5856 = vst [vmem:[#allocation2 + $0x598] sm:$0xff] %v5370_v61  ;;  %4524 = vmatmul.mubr.bf16.gmra.mrb[248].mxu1 %v8201_v55  ;;  %v5390_v6 = vpop.f32.mrb[112].mxu0  ;;  %v8231_v61 = vld [vmem:[%s10404_s0 + $0xf20] ss:$16 sps:$4 sm:$0xff]  }
 0x3e2   :  { %4531 = vmatprep.mubr.bf16.mxu1 %v8209_v58  ;;  %v5392_v9 = vpop.f32.mrb[113].mxu0 }
 0x3e3   :  { %v5393_v13 = vpop.f32.mrb[114].mxu0 }
 0x3e4   :  { %v4317_v2 = vpop.f32.mrb[252].mxu1  ;;  %v5395_v15 = vpop.f32.mrb[115].mxu0 }
 0x3e5   :  { %v5375_v3 = vadd.f32 %v5374_v42, %v4317_v2  ;;  %v4319_v4 = vpop.f32.mrb[253].mxu1  ;;  %v8236_v42 = vld [vmem:[%s10404_s0 + $0xf4c] ss:$16 sps:$4 sm:$0xff]   ;;  %v8240_v2 = vld [vmem:[%s10404_s0 + $0xf68] ss:$16 sps:$4 sm:$0xff]  }
 0x3e6   :  { %v4320_v7 = vpop.f32.mrb[254].mxu1  ;;  %5605 = vmatmul.mubr.bf16.gmra.mrb[220].mxu0 %v8216_v10 }
 0x3e7   :  { %5857 = vst [vmem:[#allocation2 + $0x5a0] sm:$0xff] %v5375_v3  ;;  %v5378_v11 = vadd.f32 %v5377_v49, %v4320_v7  ;;  %v4322_v12 = vpop.f32.mrb[255].mxu1  ;;  %7110 = vmatprep.mubr.msk.bf16.mxu0 %vm3178_vm0, %v8224_v14  ;;  %v8245_v14 = vld [vmem:[%s10404_s0 + $0xf64] ss:$16 sps:$4 sm:$0xff]  }
 0x3e9   :  { %5858 = vst [vmem:[#allocation2 + $0x5a8] sm:$0xff] %v5378_v11  ;;  %4532 = vmatmul.mubr.bf16.gmra.mrb[252].mxu1 %v8207_v5  ;;  %v5398_v20 = vpop.f32.mrb[116].mxu0  ;;  %v8237_v11 = vld [vmem:[%s10404_s0 + $0xf40] ss:$16 sps:$4 sm:$0xff]  }
 0x3ea   :  { %4539 = vmatprep.mubr.bf16.mxu1 %v8215_v8  ;;  %v5400_v23 = vpop.f32.mrb[117].mxu0 }
 0x3eb   :  { %v5401_v27 = vpop.f32.mrb[118].mxu0 }
 0x3ec   :  { %v4325_v16 = vpop.f32.mrb[148].mxu1  ;;  %v5403_v29 = vpop.f32.mrb[119].mxu0 }
 0x3ed   :  { %v5383_v17 = vadd.f32 %v5382_v56, %v4325_v16  ;;  %v4327_v18 = vpop.f32.mrb[149].mxu1  ;;  %v8242_v56 = vld [vmem:[%s10404_s0 + $0xf6c] ss:$16 sps:$4 sm:$0xff]   ;;  %v8246_v16 = vld [vmem:[%s10404_s0 + $0xf88] ss:$16 sps:$4 sm:$0xff]  }
 0x3ee   :  { %v4328_v21 = vpop.f32.mrb[150].mxu1  ;;  %5613 = vmatmul.mubr.bf16.gmra.mrb[224].mxu0 %v8222_v24 }
 0x3ef   :  { %5859 = vst [vmem:[#allocation2 + $0x5b0] sm:$0xff] %v5383_v17  ;;  %v5386_v25 = vadd.f32 %v5385_v63, %v4328_v21  ;;  %v4330_v26 = vpop.f32.mrb[151].mxu1  ;;  %7111 = vmatprep.mubr.msk.bf16.mxu0 %vm3178_vm0, %v8230_v28  ;;  %v8251_v28 = vld [vmem:[%s10404_s0 + $0xf84] ss:$16 sps:$4 sm:$0xff]  }
 0x3f1   :  { %5860 = vst [vmem:[#allocation2 + $0x5b8] sm:$0xff] %v5386_v25  ;;  %4540 = vmatmul.mubr.bf16.gmra.mrb[148].mxu1 %v8213_v19  ;;  %v5406_v34 = vpop.f32.mrb[120].mxu0  ;;  %v8243_v25 = vld [vmem:[%s10404_s0 + $0xf60] ss:$16 sps:$4 sm:$0xff]  }
 0x3f2   :  { %4547 = vmatprep.mubr.bf16.mxu1 %v8221_v22  ;;  %v5408_v37 = vpop.f32.mrb[121].mxu0 }
 0x3f3   :  { %v5409_v41 = vpop.f32.mrb[122].mxu0 }
 0x3f4   :  { %v4333_v30 = vpop.f32.mrb[152].mxu1  ;;  %v5411_v43 = vpop.f32.mrb[123].mxu0 }
 0x3f5   :  { %v5391_v31 = vadd.f32 %v5390_v6, %v4333_v30  ;;  %v4335_v32 = vpop.f32.mrb[153].mxu1  ;;  %v8248_v6 = vld [vmem:[%s10404_s0 + $0xf8c] ss:$16 sps:$4 sm:$0xff]   ;;  %v8252_v30 = vld [vmem:[%s10404_s0 + $0xfa8] ss:$16 sps:$4 sm:$0xff]  }
 0x3f6   :  { %v4336_v35 = vpop.f32.mrb[154].mxu1  ;;  %5621 = vmatmul.mubr.bf16.gmra.mrb[228].mxu0 %v8228_v38 }
 0x3f7   :  { %5861 = vst [vmem:[#allocation2 + $0x5c0] sm:$0xff] %v5391_v31  ;;  %v5394_v39 = vadd.f32 %v5393_v13, %v4336_v35  ;;  %v4338_v40 = vpop.f32.mrb[155].mxu1  ;;  %7112 = vmatprep.mubr.msk.bf16.mxu0 %vm3178_vm0, %v8236_v42  ;;  %v8257_v42 = vld [vmem:[%s10404_s0 + $0xfa4] ss:$16 sps:$4 sm:$0xff]  }
 0x3f9   :  { %5862 = vst [vmem:[#allocation2 + $0x5c8] sm:$0xff] %v5394_v39  ;;  %4548 = vmatmul.mubr.bf16.gmra.mrb[152].mxu1 %v8219_v33  ;;  %v5414_v48 = vpop.f32.mrb[124].mxu0  ;;  %v8249_v39 = vld [vmem:[%s10404_s0 + $0xf80] ss:$16 sps:$4 sm:$0xff]  }
 0x3fa   :  { %4555 = vmatprep.mubr.bf16.mxu1 %v8227_v36  ;;  %v5416_v51 = vpop.f32.mrb[125].mxu0 }
 0x3fb   :  { %v5417_v55 = vpop.f32.mrb[126].mxu0 }
 0x3fc   :  { %v4341_v44 = vpop.f32.mrb[156].mxu1  ;;  %v5419_v57 = vpop.f32.mrb[127].mxu0 }
 0x3fd   :  { %v5399_v45 = vadd.f32 %v5398_v20, %v4341_v44  ;;  %v4343_v46 = vpop.f32.mrb[157].mxu1  ;;  %v8254_v20 = vld [vmem:[%s10404_s0 + $0xfac] ss:$16 sps:$4 sm:$0xff]   ;;  %v8258_v44 = vld [vmem:[%s10404_s0 + $0xfc8] ss:$16 sps:$4 sm:$0xff]  }
 0x3fe   :  { %v4344_v49 = vpop.f32.mrb[158].mxu1  ;;  %5629 = vmatmul.mubr.bf16.gmra.mrb[232].mxu0 %v8234_v52 }
 0x3ff   :  { %5863 = vst [vmem:[#allocation2 + $0x5d0] sm:$0xff] %v5399_v45  ;;  %v5402_v53 = vadd.f32 %v5401_v27, %v4344_v49  ;;  %v4346_v54 = vpop.f32.mrb[159].mxu1  ;;  %7113 = vmatprep.mubr.msk.bf16.mxu0 %vm3178_vm0, %v8242_v56  ;;  %v8263_v56 = vld [vmem:[%s10404_s0 + $0xfc4] ss:$16 sps:$4 sm:$0xff]  }
 0x401   :  { %5864 = vst [vmem:[#allocation2 + $0x5d8] sm:$0xff] %v5402_v53  ;;  %4556 = vmatmul.mubr.bf16.gmra.mrb[156].mxu1 %v8225_v47  ;;  %v5422_v62 = vpop.f32.mrb[128].mxu0  ;;  %v8255_v53 = vld [vmem:[%s10404_s0 + $0xfa0] ss:$16 sps:$4 sm:$0xff]  }
 0x402   :  { %4563 = vmatprep.mubr.bf16.mxu1 %v8233_v50  ;;  %v5424_v1 = vpop.f32.mrb[129].mxu0 }
 0x403   :  { %v5425_v5 = vpop.f32.mrb[130].mxu0 }
 0x404   :  { %v4349_v58 = vpop.f32.mrb[160].mxu1  ;;  %v5427_v7 = vpop.f32.mrb[131].mxu0 }
 0x405   :  { %v5407_v59 = vadd.f32 %v5406_v34, %v4349_v58  ;;  %v4351_v60 = vpop.f32.mrb[161].mxu1  ;;  %v8260_v34 = vld [vmem:[%s10404_s0 + $0xfcc] ss:$16 sps:$4 sm:$0xff]   ;;  %v8264_v58 = vld [vmem:[%s10404_s0 + $0xfe8] ss:$16 sps:$4 sm:$0xff]  }
 0x406   :  { %v4352_v63 = vpop.f32.mrb[162].mxu1  ;;  %5637 = vmatmul.mubr.bf16.gmra.mrb[236].mxu0 %v8240_v2  ;;  %v8261_v2 = vld [vmem:[%s10404_s0 + $0xfc0] ss:$16 sps:$4 sm:$0xff]  }
 0x407   :  { %5865 = vst [vmem:[#allocation2 + $0x5e0] sm:$0xff] %v5407_v59  ;;  %v5410_v3 = vadd.f32 %v5409_v41, %v4352_v63  ;;  %v4354_v4 = vpop.f32.mrb[163].mxu1  ;;  %7114 = vmatprep.mubr.msk.bf16.mxu0 %vm3178_vm0, %v8248_v6 }
 0x409   :  { %5866 = vst [vmem:[#allocation2 + $0x5e8] sm:$0xff] %v5410_v3  ;;  %4564 = vmatmul.mubr.bf16.gmra.mrb[160].mxu1 %v8231_v61  ;;  %v5430_v12 = vpop.f32.mrb[132].mxu0 }
 0x40a   :  { %4571 = vmatprep.mubr.bf16.mxu1 %v8239_v0  ;;  %v5432_v15 = vpop.f32.mrb[133].mxu0 }
 0x40b   :  { %v5433_v19 = vpop.f32.mrb[134].mxu0 }
 0x40c   :  { %v4357_v8 = vpop.f32.mrb[164].mxu1  ;;  %v5435_v21 = vpop.f32.mrb[135].mxu0 }
 0x40d   :  { %v5415_v9 = vadd.f32 %v5414_v48, %v4357_v8  ;;  %v4359_v10 = vpop.f32.mrb[165].mxu1  ;;  %v8266_v48 = vld [vmem:[%s10404_s0 + $0xfec] ss:$16 sps:$4 sm:$0xff]  }
 0x40e   :  { %v4360_v13 = vpop.f32.mrb[166].mxu1  ;;  %5645 = vmatmul.mubr.bf16.gmra.mrb[240].mxu0 %v8246_v16 }
 0x40f   :  { %5867 = vst [vmem:[#allocation2 + $0x5f0] sm:$0xff] %v5415_v9  ;;  %v5418_v17 = vadd.f32 %v5417_v55, %v4360_v13  ;;  %v4362_v18 = vpop.f32.mrb[167].mxu1  ;;  %7115 = vmatprep.mubr.msk.bf16.mxu0 %vm3178_vm0, %v8254_v20 }
 0x411   :  { %5868 = vst [vmem:[#allocation2 + $0x5f8] sm:$0xff] %v5418_v17  ;;  %4572 = vmatmul.mubr.bf16.gmra.mrb[164].mxu1 %v8237_v11  ;;  %v5438_v26 = vpop.f32.mrb[136].mxu0 }
 0x412   :  { %4579 = vmatprep.mubr.bf16.mxu1 %v8245_v14  ;;  %v5440_v29 = vpop.f32.mrb[137].mxu0  ;;  %v8267_v14 = vld [vmem:[%s10404_s0 + $0xfe0] ss:$16 sps:$4 sm:$0xff]  }
 0x413   :  { %v5441_v33 = vpop.f32.mrb[138].mxu0 }
 0x414   :  { %v4365_v22 = vpop.f32.mrb[168].mxu1  ;;  %v5443_v35 = vpop.f32.mrb[139].mxu0 }
 0x415   :  { %v5423_v23 = vadd.f32 %v5422_v62, %v4365_v22  ;;  %v4367_v24 = vpop.f32.mrb[169].mxu1 }
 0x416   :  { %v4368_v27 = vpop.f32.mrb[170].mxu1  ;;  %5653 = vmatmul.mubr.bf16.gmra.mrb[244].mxu0 %v8252_v30 }
 0x417   :  { %5869 = vst [vmem:[#allocation2 + $0x600] sm:$0xff] %v5423_v23  ;;  %v5426_v31 = vadd.f32 %v5425_v5, %v4368_v27  ;;  %v4370_v32 = vpop.f32.mrb[171].mxu1  ;;  %7116 = vmatprep.mubr.msk.bf16.mxu0 %vm3178_vm0, %v8260_v34  ;;  %v8269_v5 = vld [vmem:[%s10404_s0 + $0xfe4] ss:$16 sps:$4 sm:$0xff]   ;;  %s10109_s0 = smov 0  }
 0x419   :  { %5870 = vst [vmem:[#allocation2 + $0x608] sm:$0xff] %v5426_v31  ;;  %4580 = vmatmul.mubr.bf16.gmra.mrb[168].mxu1 %v8243_v25  ;;  %v5446_v40 = vpop.f32.mrb[140].mxu0 }
 0x41a   :  { %4587 = vmatprep.mubr.bf16.mxu1 %v8251_v28  ;;  %v5448_v43 = vpop.f32.mrb[141].mxu0 }
 0x41b   :  { %v5449_v47 = vpop.f32.mrb[142].mxu0 }
 0x41c   :  { %v4373_v36 = vpop.f32.mrb[172].mxu1  ;;  %v5451_v49 = vpop.f32.mrb[143].mxu0 }
 0x41d   :  { %v5431_v37 = vadd.f32 %v5430_v12, %v4373_v36  ;;  %v4375_v38 = vpop.f32.mrb[173].mxu1 }
 0x41e   :  { %v4376_v41 = vpop.f32.mrb[174].mxu1  ;;  %5661 = vmatmul.mubr.bf16.gmra.mrb[248].mxu0 %v8258_v44 }
 0x41f   :  { %5871 = vst [vmem:[#allocation2 + $0x610] sm:$0xff] %v5431_v37  ;;  %v5434_v45 = vadd.f32 %v5433_v19, %v4376_v41  ;;  %v4378_v46 = vpop.f32.mrb[175].mxu1  ;;  %7117 = vmatprep.mubr.msk.bf16.mxu0 %vm3178_vm0, %v8266_v48 }
 0x421   :  { %5872 = vst [vmem:[#allocation2 + $0x618] sm:$0xff] %v5434_v45  ;;  %4588 = vmatmul.mubr.bf16.gmra.mrb[172].mxu1 %v8249_v39  ;;  %v5454_v54 = vpop.f32.mrb[144].mxu0 }
 0x422   :  { %4595 = vmatprep.mubr.bf16.mxu1 %v8257_v42  ;;  %v5456_v57 = vpop.f32.mrb[145].mxu0 }
 0x423   :  { %v5457_v61 = vpop.f32.mrb[146].mxu0 }
 0x424   :  { %v4381_v50 = vpop.f32.mrb[176].mxu1  ;;  %v5459_v62 = vpop.f32.mrb[147].mxu0 }
 0x425   :  { %v5439_v51 = vadd.f32 %v5438_v26, %v4381_v50  ;;  %v4383_v52 = vpop.f32.mrb[177].mxu1 }
 0x426   :  { %v4384_v55 = vpop.f32.mrb[178].mxu1  ;;  %5669 = vmatmul.mubr.bf16.gmra.mrb[252].mxu0 %v8264_v58 }
 0x427   :  { %5873 = vst [vmem:[#allocation2 + $0x620] sm:$0xff] %v5439_v51  ;;  %v5442_v59 = vadd.f32 %v5441_v33, %v4384_v55  ;;  %v4386_v60 = vpop.f32.mrb[179].mxu1 }
 0x429   :  { %5874 = vst [vmem:[#allocation2 + $0x628] sm:$0xff] %v5442_v59  ;;  %4596 = vmatmul.mubr.bf16.gmra.mrb[176].mxu1 %v8255_v53  ;;  %v5462_v3 = vpop.f32.mrb[148].mxu0 }
 0x42a   :  { %4603 = vmatprep.mubr.bf16.mxu1 %v8263_v56  ;;  %v5464_v6 = vpop.f32.mrb[149].mxu0 }
 0x42b   :  { %v5465_v9 = vpop.f32.mrb[150].mxu0 }
 0x42c   :  { %v4389_v63 = vpop.f32.mrb[180].mxu1  ;;  %v5467_v10 = vpop.f32.mrb[151].mxu0 }
 0x42d   :  { %v5447_v0 = vadd.f32 %v5446_v40, %v4389_v63  ;;  %v4391_v1 = vpop.f32.mrb[181].mxu1 }
 0x42e   :  { %v4392_v4 = vpop.f32.mrb[182].mxu1 }
 0x42f   :  { %5875 = vst [vmem:[#allocation2 + $0x630] sm:$0xff] %v5447_v0  ;;  %v5450_v7 = vadd.f32 %v5449_v47, %v4392_v4  ;;  %v4394_v8 = vpop.f32.mrb[183].mxu1 }
 0x431   :  { %5876 = vst [vmem:[#allocation2 + $0x638] sm:$0xff] %v5450_v7  ;;  %4604 = vmatmul.mubr.bf16.gmra.mrb[180].mxu1 %v8261_v2  ;;  %v5470_v15 = vpop.f32.mrb[152].mxu0 }
 0x432   :  { %4611 = vmatprep.mubr.bf16.mxu1 %v8269_v5  ;;  %v5472_v17 = vpop.f32.mrb[153].mxu0 }
 0x433   :  { %v5473_v20 = vpop.f32.mrb[154].mxu0 }
 0x434   :  { %v4397_v11 = vpop.f32.mrb[184].mxu1  ;;  %v5475_v21 = vpop.f32.mrb[155].mxu0 }
 0x435   :  { %v5455_v12 = vadd.f32 %v5454_v54, %v4397_v11  ;;  %v4399_v13 = vpop.f32.mrb[185].mxu1 }
 0x436   :  { %v4400_v16 = vpop.f32.mrb[186].mxu1 }
 0x437   :  { %5877 = vst [vmem:[#allocation2 + $0x640] sm:$0xff] %v5455_v12  ;;  %v5458_v18 = vadd.f32 %v5457_v61, %v4400_v16  ;;  %v4402_v19 = vpop.f32.mrb[187].mxu1 }
 0x439   :  { %5878 = vst [vmem:[#allocation2 + $0x648] sm:$0xff] %v5458_v18  ;;  %4612 = vmatmul.mubr.bf16.gmra.mrb[184].mxu1 %v8267_v14  ;;  %v5478_v25 = vpop.f32.mrb[156].mxu0 }
 0x43a   :  { %v5480_v27 = vpop.f32.mrb[157].mxu0 }
 0x43b   :  { %v5481_v30 = vpop.f32.mrb[158].mxu0 }
 0x43c   :  { %v4405_v22 = vpop.f32.mrb[188].mxu1  ;;  %v5483_v31 = vpop.f32.mrb[159].mxu0 }
 0x43d   :  { %v5463_v23 = vadd.f32 %v5462_v3, %v4405_v22  ;;  %v4407_v24 = vpop.f32.mrb[189].mxu1 }
 0x43e   :  { %v4408_v26 = vpop.f32.mrb[190].mxu1 }
 0x43f   :  { %5879 = vst [vmem:[#allocation2 + $0x650] sm:$0xff] %v5463_v23  ;;  %v5466_v28 = vadd.f32 %v5465_v9, %v4408_v26  ;;  %v4410_v29 = vpop.f32.mrb[191].mxu1 }
 0x441   :  { %5880 = vst [vmem:[#allocation2 + $0x658] sm:$0xff] %v5466_v28  ;;  %v5486_v35 = vpop.f32.mrb[160].mxu0 }
 0x442   :  { %v5488_v37 = vpop.f32.mrb[161].mxu0 }
 0x443   :  { %v5489_v40 = vpop.f32.mrb[162].mxu0 }
 0x444   :  { %v4413_v32 = vpop.f32.mrb[192].mxu1  ;;  %v5491_v41 = vpop.f32.mrb[163].mxu0 }
 0x445   :  { %v5471_v33 = vadd.f32 %v5470_v15, %v4413_v32  ;;  %v4415_v34 = vpop.f32.mrb[193].mxu1 }
 0x446   :  { %v4416_v36 = vpop.f32.mrb[194].mxu1 }
 0x447   :  { %5881 = vst [vmem:[#allocation2 + $0x660] sm:$0xff] %v5471_v33  ;;  %v5474_v38 = vadd.f32 %v5473_v20, %v4416_v36  ;;  %v4418_v39 = vpop.f32.mrb[195].mxu1 }
 0x449   :  { %5882 = vst [vmem:[#allocation2 + $0x668] sm:$0xff] %v5474_v38  ;;  %v5494_v45 = vpop.f32.mrb[164].mxu0 }
 0x44a   :  { %v5496_v47 = vpop.f32.mrb[165].mxu0 }
 0x44b   :  { %v5497_v50 = vpop.f32.mrb[166].mxu0 }
 0x44c   :  { %v4421_v42 = vpop.f32.mrb[196].mxu1  ;;  %v5499_v51 = vpop.f32.mrb[167].mxu0 }
 0x44d   :  { %v5479_v43 = vadd.f32 %v5478_v25, %v4421_v42  ;;  %v4423_v44 = vpop.f32.mrb[197].mxu1 }
 0x44e   :  { %v4424_v46 = vpop.f32.mrb[198].mxu1 }
 0x44f   :  { %5883 = vst [vmem:[#allocation2 + $0x670] sm:$0xff] %v5479_v43  ;;  %v5482_v48 = vadd.f32 %v5481_v30, %v4424_v46  ;;  %v4426_v49 = vpop.f32.mrb[199].mxu1 }
 0x451   :  { %5884 = vst [vmem:[#allocation2 + $0x678] sm:$0xff] %v5482_v48  ;;  %v5502_v55 = vpop.f32.mrb[168].mxu0 }
 0x452   :  { %v5504_v57 = vpop.f32.mrb[169].mxu0 }
 0x453   :  { %v5505_v60 = vpop.f32.mrb[170].mxu0 }
 0x454   :  { %v4429_v52 = vpop.f32.mrb[200].mxu1  ;;  %v5507_v61 = vpop.f32.mrb[171].mxu0 }
 0x455   :  { %v5487_v53 = vadd.f32 %v5486_v35, %v4429_v52  ;;  %v4431_v54 = vpop.f32.mrb[201].mxu1 }
 0x456   :  { %v4432_v56 = vpop.f32.mrb[202].mxu1 }
 0x457   :  { %5885 = vst [vmem:[#allocation2 + $0x680] sm:$0xff] %v5487_v53  ;;  %v5490_v58 = vadd.f32 %v5489_v40, %v4432_v56  ;;  %v4434_v59 = vpop.f32.mrb[203].mxu1 }
 0x459   :  { %5886 = vst [vmem:[#allocation2 + $0x688] sm:$0xff] %v5490_v58  ;;  %v5510_v1 = vpop.f32.mrb[172].mxu0 }
 0x45a   :  { %v5512_v3 = vpop.f32.mrb[173].mxu0 }
 0x45b   :  { %v5513_v6 = vpop.f32.mrb[174].mxu0 }
 0x45c   :  { %v4437_v62 = vpop.f32.mrb[204].mxu1  ;;  %v5515_v7 = vpop.f32.mrb[175].mxu0 }
 0x45d   :  { %v5495_v63 = vadd.f32 %v5494_v45, %v4437_v62  ;;  %v4439_v0 = vpop.f32.mrb[205].mxu1 }
 0x45e   :  { %v4440_v2 = vpop.f32.mrb[206].mxu1 }
 0x45f   :  { %5887 = vst [vmem:[#allocation2 + $0x690] sm:$0xff] %v5495_v63  ;;  %v5498_v4 = vadd.f32 %v5497_v50, %v4440_v2  ;;  %v4442_v5 = vpop.f32.mrb[207].mxu1 }
 0x461   :  { %5888 = vst [vmem:[#allocation2 + $0x698] sm:$0xff] %v5498_v4  ;;  %v5518_v11 = vpop.f32.mrb[176].mxu0 }
 0x462   :  { %v5520_v13 = vpop.f32.mrb[177].mxu0 }
 0x463   :  { %v5521_v16 = vpop.f32.mrb[178].mxu0 }
 0x464   :  { %v4445_v8 = vpop.f32.mrb[208].mxu1  ;;  %v5523_v17 = vpop.f32.mrb[179].mxu0 }
 0x465   :  { %v5503_v9 = vadd.f32 %v5502_v55, %v4445_v8  ;;  %v4447_v10 = vpop.f32.mrb[209].mxu1 }
 0x466   :  { %v4448_v12 = vpop.f32.mrb[210].mxu1 }
 0x467   :  { %5889 = vst [vmem:[#allocation2 + $0x6a0] sm:$0xff] %v5503_v9  ;;  %v5506_v14 = vadd.f32 %v5505_v60, %v4448_v12  ;;  %v4450_v15 = vpop.f32.mrb[211].mxu1 }
 0x469   :  { %5890 = vst [vmem:[#allocation2 + $0x6a8] sm:$0xff] %v5506_v14  ;;  %v5526_v21 = vpop.f32.mrb[180].mxu0 }
 0x46a   :  { %v5528_v23 = vpop.f32.mrb[181].mxu0 }
 0x46b   :  { %v5529_v26 = vpop.f32.mrb[182].mxu0 }
 0x46c   :  { %v4453_v18 = vpop.f32.mrb[212].mxu1  ;;  %v5531_v27 = vpop.f32.mrb[183].mxu0 }
 0x46d   :  { %v5511_v19 = vadd.f32 %v5510_v1, %v4453_v18  ;;  %v4455_v20 = vpop.f32.mrb[213].mxu1 }
 0x46e   :  { %v4456_v22 = vpop.f32.mrb[214].mxu1 }
 0x46f   :  { %5891 = vst [vmem:[#allocation2 + $0x6b0] sm:$0xff] %v5511_v19  ;;  %v5514_v24 = vadd.f32 %v5513_v6, %v4456_v22  ;;  %v4458_v25 = vpop.f32.mrb[215].mxu1 }
 0x471   :  { %5892 = vst [vmem:[#allocation2 + $0x6b8] sm:$0xff] %v5514_v24  ;;  %v5534_v31 = vpop.f32.mrb[184].mxu0 }
 0x472   :  { %v5536_v33 = vpop.f32.mrb[185].mxu0 }
 0x473   :  { %v5537_v36 = vpop.f32.mrb[186].mxu0 }
 0x474   :  { %v4461_v28 = vpop.f32.mrb[216].mxu1  ;;  %v5539_v37 = vpop.f32.mrb[187].mxu0 }
 0x475   :  { %v5519_v29 = vadd.f32 %v5518_v11, %v4461_v28  ;;  %v4463_v30 = vpop.f32.mrb[217].mxu1 }
 0x476   :  { %v4464_v32 = vpop.f32.mrb[218].mxu1 }
 0x477   :  { %5893 = vst [vmem:[#allocation2 + $0x6c0] sm:$0xff] %v5519_v29  ;;  %v5522_v34 = vadd.f32 %v5521_v16, %v4464_v32  ;;  %v4466_v35 = vpop.f32.mrb[219].mxu1 }
 0x479   :  { %5894 = vst [vmem:[#allocation2 + $0x6c8] sm:$0xff] %v5522_v34  ;;  %v5542_v41 = vpop.f32.mrb[188].mxu0 }
 0x47a   :  { %v5544_v43 = vpop.f32.mrb[189].mxu0 }
 0x47b   :  { %v5545_v46 = vpop.f32.mrb[190].mxu0 }
 0x47c   :  { %v4469_v38 = vpop.f32.mrb[220].mxu1  ;;  %v5547_v47 = vpop.f32.mrb[191].mxu0 }
 0x47d   :  { %v5527_v39 = vadd.f32 %v5526_v21, %v4469_v38  ;;  %v4471_v40 = vpop.f32.mrb[221].mxu1 }
 0x47e   :  { %v4472_v42 = vpop.f32.mrb[222].mxu1 }
 0x47f   :  { %5895 = vst [vmem:[#allocation2 + $0x6d0] sm:$0xff] %v5527_v39  ;;  %v5530_v44 = vadd.f32 %v5529_v26, %v4472_v42  ;;  %v4474_v45 = vpop.f32.mrb[223].mxu1 }
 0x481   :  { %5896 = vst [vmem:[#allocation2 + $0x6d8] sm:$0xff] %v5530_v44  ;;  %v5550_v51 = vpop.f32.mrb[192].mxu0 }
 0x482   :  { %v5552_v53 = vpop.f32.mrb[193].mxu0 }
 0x483   :  { %v5553_v56 = vpop.f32.mrb[194].mxu0 }
 0x484   :  { %v4477_v48 = vpop.f32.mrb[224].mxu1  ;;  %v5555_v57 = vpop.f32.mrb[195].mxu0 }
 0x485   :  { %v5535_v49 = vadd.f32 %v5534_v31, %v4477_v48  ;;  %v4479_v50 = vpop.f32.mrb[225].mxu1 }
 0x486   :  { %v4480_v52 = vpop.f32.mrb[226].mxu1 }
 0x487   :  { %5897 = vst [vmem:[#allocation2 + $0x6e0] sm:$0xff] %v5535_v49  ;;  %v5538_v54 = vadd.f32 %v5537_v36, %v4480_v52  ;;  %v4482_v55 = vpop.f32.mrb[227].mxu1 }
 0x489   :  { %5898 = vst [vmem:[#allocation2 + $0x6e8] sm:$0xff] %v5538_v54  ;;  %v5558_v61 = vpop.f32.mrb[196].mxu0 }
 0x48a   :  { %v5560_v63 = vpop.f32.mrb[197].mxu0 }
 0x48b   :  { %v5561_v2 = vpop.f32.mrb[198].mxu0 }
 0x48c   :  { %v4485_v58 = vpop.f32.mrb[228].mxu1  ;;  %v5563_v3 = vpop.f32.mrb[199].mxu0 }
 0x48d   :  { %v5543_v59 = vadd.f32 %v5542_v41, %v4485_v58  ;;  %v4487_v60 = vpop.f32.mrb[229].mxu1 }
 0x48e   :  { %v4488_v62 = vpop.f32.mrb[230].mxu1 }
 0x48f   :  { %5899 = vst [vmem:[#allocation2 + $0x6f0] sm:$0xff] %v5543_v59  ;;  %v5546_v0 = vadd.f32 %v5545_v46, %v4488_v62  ;;  %v4490_v1 = vpop.f32.mrb[231].mxu1 }
 0x491   :  { %5900 = vst [vmem:[#allocation2 + $0x6f8] sm:$0xff] %v5546_v0  ;;  %v5566_v7 = vpop.f32.mrb[200].mxu0 }
 0x492   :  { %v5568_v9 = vpop.f32.mrb[201].mxu0 }
 0x493   :  { %v5569_v12 = vpop.f32.mrb[202].mxu0 }
 0x494   :  { %v4493_v4 = vpop.f32.mrb[232].mxu1  ;;  %v5571_v13 = vpop.f32.mrb[203].mxu0 }
 0x495   :  { %v5551_v5 = vadd.f32 %v5550_v51, %v4493_v4  ;;  %v4495_v6 = vpop.f32.mrb[233].mxu1 }
 0x496   :  { %v4496_v8 = vpop.f32.mrb[234].mxu1 }
 0x497   :  { %5901 = vst [vmem:[#allocation2 + $0x700] sm:$0xff] %v5551_v5  ;;  %v5554_v10 = vadd.f32 %v5553_v56, %v4496_v8  ;;  %v4498_v11 = vpop.f32.mrb[235].mxu1 }
 0x499   :  { %5902 = vst [vmem:[#allocation2 + $0x708] sm:$0xff] %v5554_v10  ;;  %v5574_v17 = vpop.f32.mrb[204].mxu0 }
 0x49a   :  { %v5576_v19 = vpop.f32.mrb[205].mxu0 }
 0x49b   :  { %v5577_v22 = vpop.f32.mrb[206].mxu0 }
 0x49c   :  { %v4501_v14 = vpop.f32.mrb[236].mxu1  ;;  %v5579_v23 = vpop.f32.mrb[207].mxu0 }
 0x49d   :  { %v5559_v15 = vadd.f32 %v5558_v61, %v4501_v14  ;;  %v4503_v16 = vpop.f32.mrb[237].mxu1 }
 0x49e   :  { %v4504_v18 = vpop.f32.mrb[238].mxu1 }
 0x49f   :  { %5903 = vst [vmem:[#allocation2 + $0x710] sm:$0xff] %v5559_v15  ;;  %v5562_v20 = vadd.f32 %v5561_v2, %v4504_v18  ;;  %v4506_v21 = vpop.f32.mrb[239].mxu1 }
 0x4a1   :  { %5904 = vst [vmem:[#allocation2 + $0x718] sm:$0xff] %v5562_v20  ;;  %v5582_v27 = vpop.f32.mrb[208].mxu0 }
 0x4a2   :  { %v5584_v29 = vpop.f32.mrb[209].mxu0 }
 0x4a3   :  { %v5585_v32 = vpop.f32.mrb[210].mxu0 }
 0x4a4   :  { %v4509_v24 = vpop.f32.mrb[240].mxu1  ;;  %v5587_v33 = vpop.f32.mrb[211].mxu0 }
 0x4a5   :  { %v5567_v25 = vadd.f32 %v5566_v7, %v4509_v24  ;;  %v4511_v26 = vpop.f32.mrb[241].mxu1 }
 0x4a6   :  { %v4512_v28 = vpop.f32.mrb[242].mxu1 }
 0x4a7   :  { %5905 = vst [vmem:[#allocation2 + $0x720] sm:$0xff] %v5567_v25  ;;  %v5570_v30 = vadd.f32 %v5569_v12, %v4512_v28  ;;  %v4514_v31 = vpop.f32.mrb[243].mxu1 }
 0x4a9   :  { %5906 = vst [vmem:[#allocation2 + $0x728] sm:$0xff] %v5570_v30  ;;  %v5590_v37 = vpop.f32.mrb[212].mxu0 }
 0x4aa   :  { %v5592_v39 = vpop.f32.mrb[213].mxu0 }
 0x4ab   :  { %v5593_v42 = vpop.f32.mrb[214].mxu0 }
 0x4ac   :  { %v4517_v34 = vpop.f32.mrb[244].mxu1  ;;  %v5595_v43 = vpop.f32.mrb[215].mxu0 }
 0x4ad   :  { %v5575_v35 = vadd.f32 %v5574_v17, %v4517_v34  ;;  %v4519_v36 = vpop.f32.mrb[245].mxu1 }
 0x4ae   :  { %v4520_v38 = vpop.f32.mrb[246].mxu1 }
 0x4af   :  { %5907 = vst [vmem:[#allocation2 + $0x730] sm:$0xff] %v5575_v35  ;;  %v5578_v40 = vadd.f32 %v5577_v22, %v4520_v38  ;;  %v4522_v41 = vpop.f32.mrb[247].mxu1 }
 0x4b1   :  { %5908 = vst [vmem:[#allocation2 + $0x738] sm:$0xff] %v5578_v40  ;;  %v5598_v47 = vpop.f32.mrb[216].mxu0 }
 0x4b2   :  { %v5600_v49 = vpop.f32.mrb[217].mxu0 }
 0x4b3   :  { %v5601_v52 = vpop.f32.mrb[218].mxu0 }
 0x4b4   :  { %v4525_v44 = vpop.f32.mrb[248].mxu1  ;;  %v5603_v53 = vpop.f32.mrb[219].mxu0 }
 0x4b5   :  { %v5583_v45 = vadd.f32 %v5582_v27, %v4525_v44  ;;  %v4527_v46 = vpop.f32.mrb[249].mxu1 }
 0x4b6   :  { %v4528_v48 = vpop.f32.mrb[250].mxu1 }
 0x4b7   :  { %5909 = vst [vmem:[#allocation2 + $0x740] sm:$0xff] %v5583_v45  ;;  %v5586_v50 = vadd.f32 %v5585_v32, %v4528_v48  ;;  %v4530_v51 = vpop.f32.mrb[251].mxu1 }
 0x4b9   :  { %5910 = vst [vmem:[#allocation2 + $0x748] sm:$0xff] %v5586_v50  ;;  %v5606_v57 = vpop.f32.mrb[220].mxu0 }
 0x4ba   :  { %v5608_v59 = vpop.f32.mrb[221].mxu0 }
 0x4bb   :  { %v5609_v62 = vpop.f32.mrb[222].mxu0 }
 0x4bc   :  { %v4533_v54 = vpop.f32.mrb[252].mxu1  ;;  %v5611_v63 = vpop.f32.mrb[223].mxu0 }
 0x4bd   :  { %v5591_v55 = vadd.f32 %v5590_v37, %v4533_v54  ;;  %v4535_v56 = vpop.f32.mrb[253].mxu1 }
 0x4be   :  { %v4536_v58 = vpop.f32.mrb[254].mxu1 }
 0x4bf   :  { %5911 = vst [vmem:[#allocation2 + $0x750] sm:$0xff] %v5591_v55  ;;  %v5594_v60 = vadd.f32 %v5593_v42, %v4536_v58  ;;  %v4538_v61 = vpop.f32.mrb[255].mxu1 }
 0x4c1   :  { %5912 = vst [vmem:[#allocation2 + $0x758] sm:$0xff] %v5594_v60  ;;  %v5614_v3 = vpop.f32.mrb[224].mxu0 }
 0x4c2   :  { %v5616_v5 = vpop.f32.mrb[225].mxu0 }
 0x4c3   :  { %v5617_v8 = vpop.f32.mrb[226].mxu0 }
 0x4c4   :  { %v4541_v0 = vpop.f32.mrb[148].mxu1  ;;  %v5619_v9 = vpop.f32.mrb[227].mxu0 }
 0x4c5   :  { %v5599_v1 = vadd.f32 %v5598_v47, %v4541_v0  ;;  %v4543_v2 = vpop.f32.mrb[149].mxu1 }
 0x4c6   :  { %v4544_v4 = vpop.f32.mrb[150].mxu1 }
 0x4c7   :  { %5913 = vst [vmem:[#allocation2 + $0x760] sm:$0xff] %v5599_v1  ;;  %v5602_v6 = vadd.f32 %v5601_v52, %v4544_v4  ;;  %v4546_v7 = vpop.f32.mrb[151].mxu1 }
 0x4c9   :  { %5914 = vst [vmem:[#allocation2 + $0x768] sm:$0xff] %v5602_v6  ;;  %v5622_v13 = vpop.f32.mrb[228].mxu0 }
 0x4ca   :  { %v5624_v15 = vpop.f32.mrb[229].mxu0 }
 0x4cb   :  { %v5625_v18 = vpop.f32.mrb[230].mxu0 }
 0x4cc   :  { %v4549_v10 = vpop.f32.mrb[152].mxu1  ;;  %v5627_v19 = vpop.f32.mrb[231].mxu0 }
 0x4cd   :  { %v5607_v11 = vadd.f32 %v5606_v57, %v4549_v10  ;;  %v4551_v12 = vpop.f32.mrb[153].mxu1 }
 0x4ce   :  { %v4552_v14 = vpop.f32.mrb[154].mxu1 }
 0x4cf   :  { %5915 = vst [vmem:[#allocation2 + $0x770] sm:$0xff] %v5607_v11  ;;  %v5610_v16 = vadd.f32 %v5609_v62, %v4552_v14  ;;  %v4554_v17 = vpop.f32.mrb[155].mxu1 }
 0x4d1   :  { %5916 = vst [vmem:[#allocation2 + $0x778] sm:$0xff] %v5610_v16  ;;  %v5630_v23 = vpop.f32.mrb[232].mxu0 }
 0x4d2   :  { %v5632_v25 = vpop.f32.mrb[233].mxu0 }
 0x4d3   :  { %v5633_v28 = vpop.f32.mrb[234].mxu0 }
 0x4d4   :  { %v4557_v20 = vpop.f32.mrb[156].mxu1  ;;  %v5635_v29 = vpop.f32.mrb[235].mxu0 }
 0x4d5   :  { %v5615_v21 = vadd.f32 %v5614_v3, %v4557_v20  ;;  %v4559_v22 = vpop.f32.mrb[157].mxu1  ;;  %v10107_v29 = vmov 0.0  }
 0x4d6   :  { %v4560_v24 = vpop.f32.mrb[158].mxu1 }
 0x4d7   :  { %5917 = vst [vmem:[#allocation2 + $0x780] sm:$0xff] %v5615_v21  ;;  %v5618_v26 = vadd.f32 %v5617_v8, %v4560_v24  ;;  %v4562_v27 = vpop.f32.mrb[159].mxu1 }
 0x4d9   :  { %5918 = vst [vmem:[#allocation2 + $0x788] sm:$0xff] %v5618_v26  ;;  %v5638_v33 = vpop.f32.mrb[236].mxu0 }
 0x4da   :  { %v5640_v35 = vpop.f32.mrb[237].mxu0 }
 0x4db   :  { %v5641_v38 = vpop.f32.mrb[238].mxu0 }
 0x4dc   :  { %v4565_v30 = vpop.f32.mrb[160].mxu1  ;;  %v5643_v39 = vpop.f32.mrb[239].mxu0 }
 0x4dd   :  { %v5623_v31 = vadd.f32 %v5622_v13, %v4565_v30  ;;  %v4567_v32 = vpop.f32.mrb[161].mxu1 }
 0x4de   :  { %v4568_v34 = vpop.f32.mrb[162].mxu1 }
 0x4df   :  { %5919 = vst [vmem:[#allocation2 + $0x790] sm:$0xff] %v5623_v31  ;;  %v5626_v36 = vadd.f32 %v5625_v18, %v4568_v34  ;;  %v4570_v37 = vpop.f32.mrb[163].mxu1 }
 0x4e1   :  { %5920 = vst [vmem:[#allocation2 + $0x798] sm:$0xff] %v5626_v36  ;;  %v5646_v43 = vpop.f32.mrb[240].mxu0 }
 0x4e2   :  { %v5648_v45 = vpop.f32.mrb[241].mxu0 }
 0x4e3   :  { %v5649_v48 = vpop.f32.mrb[242].mxu0 }
 0x4e4   :  { %v4573_v40 = vpop.f32.mrb[164].mxu1  ;;  %v5651_v49 = vpop.f32.mrb[243].mxu0 }
 0x4e5   :  { %v5631_v41 = vadd.f32 %v5630_v23, %v4573_v40  ;;  %v4575_v42 = vpop.f32.mrb[165].mxu1 }
 0x4e6   :  { %v4576_v44 = vpop.f32.mrb[166].mxu1 }
 0x4e7   :  { %5921 = vst [vmem:[#allocation2 + $0x7a0] sm:$0xff] %v5631_v41  ;;  %v5634_v46 = vadd.f32 %v5633_v28, %v4576_v44  ;;  %v4578_v47 = vpop.f32.mrb[167].mxu1  ;;  %v10105_v28 = vmov 0.0  }
 0x4e9   :  { %5922 = vst [vmem:[#allocation2 + $0x7a8] sm:$0xff] %v5634_v46  ;;  %v5654_v53 = vpop.f32.mrb[244].mxu0 }
 0x4ea   :  { %v5656_v55 = vpop.f32.mrb[245].mxu0 }
 0x4eb   :  { %v5657_v58 = vpop.f32.mrb[246].mxu0 }
 0x4ec   :  { %v4581_v50 = vpop.f32.mrb[168].mxu1  ;;  %v5659_v59 = vpop.f32.mrb[247].mxu0 }
 0x4ed   :  { %v5639_v51 = vadd.f32 %v5638_v33, %v4581_v50  ;;  %v4583_v52 = vpop.f32.mrb[169].mxu1 }
 0x4ee   :  { %v4584_v54 = vpop.f32.mrb[170].mxu1 }
 0x4ef   :  { %5923 = vst [vmem:[#allocation2 + $0x7b0] sm:$0xff] %v5639_v51  ;;  %v5642_v56 = vadd.f32 %v5641_v38, %v4584_v54  ;;  %v4586_v57 = vpop.f32.mrb[171].mxu1 }
 0x4f1   :  { %5924 = vst [vmem:[#allocation2 + $0x7b8] sm:$0xff] %v5642_v56  ;;  %v5662_v63 = vpop.f32.mrb[248].mxu0 }
 0x4f2   :  { %v5664_v1 = vpop.f32.mrb[249].mxu0 }
 0x4f3   :  { %v5665_v4 = vpop.f32.mrb[250].mxu0 }
 0x4f4   :  { %v4589_v60 = vpop.f32.mrb[172].mxu1  ;;  %v5667_v5 = vpop.f32.mrb[251].mxu0 }
 0x4f5   :  { %v5647_v61 = vadd.f32 %v5646_v43, %v4589_v60  ;;  %v4591_v62 = vpop.f32.mrb[173].mxu1 }
 0x4f6   :  { %v4592_v0 = vpop.f32.mrb[174].mxu1 }
 0x4f7   :  { %5925 = vst [vmem:[#allocation2 + $0x7c0] sm:$0xff] %v5647_v61  ;;  %v5650_v2 = vadd.f32 %v5649_v48, %v4592_v0  ;;  %v4594_v3 = vpop.f32.mrb[175].mxu1 }
 0x4f9   :  { %5926 = vst [vmem:[#allocation2 + $0x7c8] sm:$0xff] %v5650_v2  ;;  %v5670_v9 = vpop.f32.mrb[252].mxu0 }
 0x4fa   :  { %v5672_v11 = vpop.f32.mrb[253].mxu0 }
 0x4fb   :  { %v5673_v14 = vpop.f32.mrb[254].mxu0 }
 0x4fc   :  { %v4597_v6 = vpop.f32.mrb[176].mxu1  ;;  %v5675_v15 = vpop.f32.mrb[255].mxu0 }
 0x4fd   :  { %v5655_v7 = vadd.f32 %v5654_v53, %v4597_v6  ;;  %v4599_v8 = vpop.f32.mrb[177].mxu1 }
 0x4fe   :  { %v4600_v10 = vpop.f32.mrb[178].mxu1 }
 0x4ff   :  { %5927 = vst [vmem:[#allocation2 + $0x7d0] sm:$0xff] %v5655_v7  ;;  %v5658_v12 = vadd.f32 %v5657_v58, %v4600_v10  ;;  %v4602_v13 = vpop.f32.mrb[179].mxu1 }
 0x501   :  { %5928 = vst [vmem:[#allocation2 + $0x7d8] sm:$0xff] %v5658_v12 }
 0x504   :  { %v4605_v16 = vpop.f32.mrb[180].mxu1 }
 0x505   :  { %v5663_v17 = vadd.f32 %v5662_v63, %v4605_v16  ;;  %v4607_v18 = vpop.f32.mrb[181].mxu1 }
 0x506   :  { %v4608_v19 = vpop.f32.mrb[182].mxu1 }
 0x507   :  { %5929 = vst [vmem:[#allocation2 + $0x7e0] sm:$0xff] %v5663_v17  ;;  %v5666_v20 = vadd.f32 %v5665_v4, %v4608_v19  ;;  %v4610_v21 = vpop.f32.mrb[183].mxu1 }
 0x509   :  { %5930 = vst [vmem:[#allocation2 + $0x7e8] sm:$0xff] %v5666_v20 }
 0x50c   :  { %v4613_v22 = vpop.f32.mrb[184].mxu1 }
 0x50d   :  { %v5671_v23 = vadd.f32 %v5670_v9, %v4613_v22  ;;  %v4615_v24 = vpop.f32.mrb[185].mxu1 }
 0x50e   :  { %v4616_v25 = vpop.f32.mrb[186].mxu1 }
 0x50f   :  { %5931 = vst [vmem:[#allocation2 + $0x7f0] sm:$0xff] %v5671_v23  ;;  %v5674_v26 = vadd.f32 %v5673_v14, %v4616_v25  ;;  %v4618_v27 = vpop.f32.mrb[187].mxu1 }
 0x511   :  { %5932 = vst [vmem:[#allocation2 + $0x7f8] sm:$0xff] %v5674_v26 }
 0x512 LB: > { %s7118_s15 = sshll.u32 %s8298_s0, 7  ;;  %s5938_s0 = sadd.s32 1, %s8298_s0   ;;  %s8298_s0 = sphi %s10109_s0, %s5938_s0   ;;  %v8294_v29 = vphi %v10107_v29, %v10406_v29   ;;  %v8290_v28 = vphi %v10105_v28, %v10405_v28  }
 0x513   : > { %s10121_s16 = scalar_lea.vmem [#allocation2], %s7118_s15  ;;  %p5935_p0 = scmp.ge.s32.totalorder %s5938_s0, 16  }
 0x514   :  { %s8305_s17 = smov (%p5935_p0), 64   ;;  %s8306_s18 = smov (%p5935_p0), 32  }
 0x515   :  { %s8307_s19 = smov (%p5935_p0), 96   ;;  %s10163_s24 = smov (%p5935_p0), 0  }
 0x518   : > { %v5943_v30 = vld [vmem:[%s10121_s16] sm:$0xff]  ;;  %v5944_v31 = vld [vmem:[%s10121_s16 + $0x8] sm:$0xff]  ;;  %v5945_v32 = vld [vmem:[%s10121_s16 + $0x10] sm:$0xff] }
 0x519   : > { %v5946_v33 = vld [vmem:[%s10121_s16 + $0x18] sm:$0xff]  ;;  %v5959_v34 = vadd.f32 %v5944_v31, %v5943_v30  ;;  %v5981_v35 = vmul.f32 %v5943_v30, %v5943_v30  ;;  %v5982_v36 = vmul.f32 %v5944_v31, %v5944_v31  ;;  %v5983_v37 = vmul.f32 %v5945_v32, %v5945_v32  ;;  %v5947_v38 = vld [vmem:[%s10121_s16 + $0x20] sm:$0xff]  ;;  %v5948_v42 = vld [vmem:[%s10121_s16 + $0x28] sm:$0xff] }
 0x51a   : > { %v5984_v40 = vmul.f32 %v5946_v33, %v5946_v33  ;;  %v5985_v44 = vmul.f32 %v5947_v38, %v5947_v38  ;;  %v5949_v46 = vld [vmem:[%s10121_s16 + $0x30] sm:$0xff]  ;;  %v5986_v48 = vmul.f32 %v5948_v42, %v5948_v42  ;;  %v5950_v50 = vld [vmem:[%s10121_s16 + $0x38] sm:$0xff]  ;;  %v5951_v54 = vld [vmem:[%s10121_s16 + $0x40] sm:$0xff] }
 0x51b   : > { %v5960_v39 = vadd.f32 %v5959_v34, %v5945_v32  ;;  %v5997_v41 = vadd.f32 %v5982_v36, %v5981_v35  ;;  %v5987_v52 = vmul.f32 %v5949_v46, %v5949_v46  ;;  %v5988_v56 = vmul.f32 %v5950_v50, %v5950_v50  ;;  %v5952_v58 = vld [vmem:[%s10121_s16 + $0x48] sm:$0xff]  ;;  %v5953_v62 = vld [vmem:[%s10121_s16 + $0x50] sm:$0xff]  ;;  %v5954_v2 = vld [vmem:[%s10121_s16 + $0x58] sm:$0xff] }
 0x51c   : > { %v5989_v60 = vmul.f32 %v5951_v54, %v5951_v54  ;;  %v5990_v0 = vmul.f32 %v5952_v58, %v5952_v58  ;;  %v5991_v4 = vmul.f32 %v5953_v62, %v5953_v62  ;;  %v5955_v6 = vld [vmem:[%s10121_s16 + $0x60] sm:$0xff]  ;;  %v5992_v8 = vmul.f32 %v5954_v2, %v5954_v2  ;;  %v5956_v10 = vld [vmem:[%s10121_s16 + $0x68] sm:$0xff]  ;;  %v5957_v14 = vld [vmem:[%s10121_s16 + $0x70] sm:$0xff] }
 0x51d   : > { %v5961_v43 = vadd.f32 %v5960_v39, %v5946_v33  ;;  %v5998_v45 = vadd.f32 %v5997_v41, %v5983_v37  ;;  %v5993_v12 = vmul.f32 %v5955_v6, %v5955_v6  ;;  %v5994_v16 = vmul.f32 %v5956_v10, %v5956_v10  ;;  %v5958_v18 = vld [vmem:[%s10121_s16 + $0x78] sm:$0xff] }
 0x51e   : > { %v5995_v20 = vmul.f32 %v5957_v14, %v5957_v14  ;;  %v5996_v23 = vmul.f32 %v5958_v18, %v5958_v18 }
 0x51f   : > { %v5962_v47 = vadd.f32 %v5961_v43, %v5947_v38  ;;  %v5999_v49 = vadd.f32 %v5998_v45, %v5984_v40 }
 0x521   : > { %v5963_v51 = vadd.f32 %v5962_v47, %v5948_v42  ;;  %v6000_v53 = vadd.f32 %v5999_v49, %v5985_v44 }
 0x523   : > { %v5964_v55 = vadd.f32 %v5963_v51, %v5949_v46  ;;  %v6001_v57 = vadd.f32 %v6000_v53, %v5986_v48 }
 0x525   : > { %v5965_v59 = vadd.f32 %v5964_v55, %v5950_v50  ;;  %v6002_v61 = vadd.f32 %v6001_v57, %v5987_v52 }
 0x527   : > { %v5966_v63 = vadd.f32 %v5965_v59, %v5951_v54  ;;  %v6003_v1 = vadd.f32 %v6002_v61, %v5988_v56 }
 0x529   : > { %v5967_v3 = vadd.f32 %v5966_v63, %v5952_v58  ;;  %v6004_v5 = vadd.f32 %v6003_v1, %v5989_v60  ;;  %v6042_v60 = vld [vmem:[%s10400_s2] sm:$0x1] (%p5935_p0) }
 0x52a   :  { %v10156_v63 = vld [vmem:[%s10401_s3] sm:$0x1] (%p5935_p0) }
 0x52b   : > { %v5968_v7 = vadd.f32 %v5967_v3, %v5953_v62  ;;  %v6005_v9 = vadd.f32 %v6004_v5, %v5990_v0 }
 0x52d   : > { %v5969_v11 = vadd.f32 %v5968_v7, %v5954_v2  ;;  %v6006_v13 = vadd.f32 %v6005_v9, %v5991_v4 }
 0x52f   : > { %v5970_v15 = vadd.f32 %v5969_v11, %v5955_v6  ;;  %v6007_v17 = vadd.f32 %v6006_v13, %v5992_v8 }
 0x531   : > { %v5971_v19 = vadd.f32 %v5970_v15, %v5956_v10  ;;  %v6008_v21 = vadd.f32 %v6007_v17, %v5993_v12 }
 0x533   : > { %v5972_v22 = vadd.f32 %v5971_v19, %v5957_v14  ;;  %v6009_v24 = vadd.f32 %v6008_v21, %v5994_v16 }
 0x535   : > { %v5973_v25 = vadd.f32 %v5972_v22, %v5958_v18  ;;  %v6010_v26 = vadd.f32 %v6009_v24, %v5995_v20 }
 0x537   : > { %v5974_v27 = vrot.slane %v5973_v25, 4  ;;  %v6011_v30 = vadd.f32 %v6010_v26, %v5996_v23 }
 0x539   : > { %v5975_v31 = vadd.f32 %v5974_v27, %v5973_v25  ;;  %v6012_v32 = vrot.slane %v6011_v30, 4 }
 0x53b   : > { %v5976_v33 = vrot.slane %v5975_v31, 2  ;;  %v6013_v34 = vadd.f32 %v6012_v32, %v6011_v30 }
 0x53d   : > { %v5977_v35 = vadd.f32 %v5976_v33, %v5975_v31  ;;  %v6014_v36 = vrot.slane %v6013_v34, 2 }
 0x53f   : > { %v5978_v37 = vrot.slane %v5977_v35, 1  ;;  %v6015_v38 = vadd.f32 %v6014_v36, %v6013_v34 }
 0x541   : > { %v5979_v39 = vadd.f32 %v5978_v37, %v5977_v35  ;;  %v6016_v40 = vrot.slane %v6015_v38, 1  ;;  %5937 = sbr.rel (!%p5935_p0) target bundleno = 1298 (0x512), region = 60 }
 0x543   : > { %v5980_v41 = vadd.f32 %v8294_v29, %v5979_v39   ;;  %v6017_v42 = vadd.f32 %v6016_v40, %v6015_v38 }
 0x545   : > { %v6018_v43 = vadd.f32 %v8290_v28, %v6017_v42   ;;  %v10406_v29 = vmov %v5980_v41  ;;  %6025 = vrot.lane.b32.xlu1 (%p5935_p0), %v5980_v41, %s8305_s17  ;;  %6019 = vrot.lane.b32.xlu0 (%p5935_p0), %v5980_v41, %s8306_s18 }
 0x547   : > { %v10405_v28 = vmov %v6018_v43 }
 0x549   :  { %6028 = vrot.lane.b32.xlu1 %v6018_v43, %s8305_s17  ;;  %6022 = vrot.lane.b32.xlu0 %v6018_v43, %s8306_s18 }
 0x54d   :  { %6034 = vrot.lane.b32.xlu1 %v6018_v43, %s8307_s19  ;;  %6031 = vrot.lane.b32.xlu0 %v5980_v41, %s8307_s19 }
 0x5b7   :  { %v6026_v29 = vpop.permute.xlu1 %6025  ;;  %v6020_v44 = vpop.permute.xlu0 %6019 }
 0x5b8   :  { %v6021_v45 = vadd.f32 %v6020_v44, %v5980_v41 }
 0x5ba   :  { %v6027_v50 = vadd.f32 %v6026_v29, %v6021_v45 }
 0x5bb   :  { %v6029_v46 = vpop.permute.xlu1 %6028  ;;  %v6023_v47 = vpop.permute.xlu0 %6022 }
 0x5bc   :  { %v6024_v48 = vadd.f32 %v6023_v47, %v6018_v43 }
 0x5be   :  { %v6030_v49 = vadd.f32 %v6029_v46, %v6024_v48 }
 0x5bf   :  { %v6035_v51 = vpop.permute.xlu1 %6034  ;;  %v6032_v52 = vpop.permute.xlu0 %6031 }
 0x5c0   :  { %v6036_v53 = vadd.f32 %v6035_v51, %v6030_v49  ;;  %v6033_v28 = vadd.f32 %v6032_v52, %v6027_v50 }
 0x5c2   :  { %v6037_v54 = vmul.f32 0.00012207031, %v6033_v28  ;;  %v6038_v55 = vmul.f32 0.00012207031, %v6036_v53 }
 0x5c4   :  { %v6039_v56 = vmul.f32 %v6037_v54, %v6037_v54 }
 0x5c6   :  { %v6040_v57 = vsub.f32 %v6038_v55, %v6039_v56 }
 0x5c8   :  { %v6041_v58 = vmax.f32 %v6040_v57, 0.0 }
 0x5ca   :  { %v6043_v59 = vadd.f32 1e-05, %v6041_v58 }
 0x5cc   :  { %8270 = vrsqrt.f32 %v6043_v59 }
 0x5d6   :  { %v8271_v61 = vpop.eup %8270 }
 0x5d7   :  { %v10151_v62 = vmul.f32 %v8271_v61, %v6042_v60 }
 0x5d9   :  { %v10159_v0 = vmul.f32 %v10151_v62, %v6037_v54 }
 0x5db   :  { %v6048_v1 = vsub.f32 %v10156_v63, %v10159_v0 }
 0x5dc LB: > { %v6066_v2 = vlaneseq  ;;  %s7119_s2 = sshll.u32 %s8302_s24, 6  ;;  %s6054_s24 = sadd.s32 1, %s8302_s24   ;;  %s8302_s24 = sphi %s10163_s24, %s6054_s24  }
 0x5dd   : > { %s10171_s3 = scalar_lea.vmem [#allocation2], %s7119_s2  ;;  %s10263_s27 = scalar_lea.vmem %s10402_s4, %s7119_s2 }
 0x5de   : > { %v6067_v3 = vshrl.u32 %v6066_v2, 7  ;;  %v6057_v4 = vld [vmem:[%s10171_s3] sm:$0xff]  ;;  %v6058_v27 = vld [vmem:[%s10171_s3 + $0x8] sm:$0xff]  ;;  %p6051_p1 = scmp.ge.s32.totalorder %s6054_s24, 4  }
 0x5df   : > { %v7121_v6 = vld [vmem:[%s10171_s3 + $0x100] sm:$0xff]  ;;  %v7122_v30 = vld [vmem:[%s10171_s3 + $0x108] sm:$0xff] }
 0x5e0   : > { %v6068_v5 = vsub.s32 0, %v6067_v3  ;;  %v7130_v7 = vld [vmem:[%s10171_s3 + $0x200] sm:$0xff]  ;;  %v7131_v35 = vld [vmem:[%s10171_s3 + $0x208] sm:$0xff]  ;;  %v6059_v3 = vld [vmem:[%s10171_s3 + $0x10] sm:$0xff] }
 0x5e1   : > { %v7139_v8 = vld [vmem:[%s10171_s3 + $0x300] sm:$0xff]  ;;  %v7140_v36 = vld [vmem:[%s10171_s3 + $0x308] sm:$0xff] }
 0x5e2   : > { %v7148_v9 = vld [vmem:[%s10171_s3 + $0x400] sm:$0xff]  ;;  %v10179_v10 = vrot.slane %v10151_v62, %v6068_v5  ;;  %v10184_v11 = vrot.slane %v6048_v1, %v6068_v5  ;;  %v7149_v37 = vld [vmem:[%s10171_s3 + $0x408] sm:$0xff] }
 0x5e3   : > { %v7157_v12 = vld [vmem:[%s10171_s3 + $0x500] sm:$0xff]  ;;  %v7158_v42 = vld [vmem:[%s10171_s3 + $0x508] sm:$0xff] }
 0x5e4   : > { %v7166_v13 = vld [vmem:[%s10171_s3 + $0x600] sm:$0xff]  ;;  %v6071_v15 = vmul.f32 %v10179_v10, %v6057_v4  ;;  %v6111_v16 = vmul.f32 %v7121_v6, %v10179_v10  ;;  %v6153_v17 = vmul.f32 %v7130_v7, %v10179_v10  ;;  %v6195_v18 = vmul.f32 %v7139_v8, %v10179_v10  ;;  %v7167_v43 = vld [vmem:[%s10171_s3 + $0x608] sm:$0xff]  ;;  %v7123_v4 = vld [vmem:[%s10171_s3 + $0x110] sm:$0xff] }
 0x5e5   : > { %v7175_v14 = vld [vmem:[%s10171_s3 + $0x700] sm:$0xff]  ;;  %v6237_v19 = vmul.f32 %v7148_v9, %v10179_v10  ;;  %v6279_v20 = vmul.f32 %v7157_v12, %v10179_v10  ;;  %v6321_v21 = vmul.f32 %v7166_v13, %v10179_v10  ;;  %v6072_v48 = vmul.f32 %v10179_v10, %v6058_v27  ;;  %v7176_v2 = vld [vmem:[%s10171_s3 + $0x708] sm:$0xff]  ;;  %v7132_v9 = vld [vmem:[%s10171_s3 + $0x210] sm:$0xff] }
 0x5e6   : > { %v6363_v22 = vmul.f32 %v7175_v14, %v10179_v10  ;;  %v6085_v23 = vadd.f32 %v10184_v11, %v6071_v15  ;;  %v6119_v24 = vadd.f32 %v6111_v16, %v10184_v11  ;;  %v6161_v25 = vadd.f32 %v6153_v17, %v10184_v11  ;;  %v7141_v12 = vld [vmem:[%s10171_s3 + $0x310] sm:$0xff] }
 0x5e7   : > { %v6203_v26 = vadd.f32 %v6195_v18, %v10184_v11  ;;  %v6245_v31 = vadd.f32 %v6237_v19, %v10184_v11  ;;  %v6287_v32 = vadd.f32 %v6279_v20, %v10184_v11  ;;  %v10206_v33 = vadd.f32 %v6321_v21, %v10184_v11  ;;  %v7150_v13 = vld [vmem:[%s10171_s3 + $0x410] sm:$0xff] }
 0x5e8   : > { %v10209_v34 = vadd.f32 %v6363_v22, %v10184_v11  ;;  %v6093_v38 = vmax.f32 %v6085_v23, 0.0  ;;  %v6127_v39 = vmax.f32 %v6119_v24, 0.0  ;;  %v6169_v40 = vmax.f32 %v6161_v25, 0.0 }
 0x5e9   : > { %v6211_v41 = vmax.f32 %v6203_v26, 0.0  ;;  %v6253_v29 = vmax.f32 %v6245_v31, 0.0  ;;  %v6295_v44 = vmax.f32 %v6287_v32, 0.0  ;;  %v6337_v45 = vmax.f32 %v10206_v33, 0.0 }
 0x5ea   : > { %v6379_v46 = vmax.f32 %v10209_v34, 0.0  ;;  %v6135_v47 = vmax.f32 %v6093_v38, %v6127_v39  ;;  %v6112_v49 = vmul.f32 %v7122_v30, %v10179_v10  ;;  %v6154_v50 = vmul.f32 %v7131_v35, %v10179_v10 }
 0x5eb   : > { %v6196_v51 = vmul.f32 %v7140_v36, %v10179_v10  ;;  %v6238_v52 = vmul.f32 %v7149_v37, %v10179_v10  ;;  %v6280_v53 = vmul.f32 %v7158_v42, %v10179_v10  ;;  %v6322_v28 = vmul.f32 %v7167_v43, %v10179_v10  ;;  %v7159_v36 = vld [vmem:[%s10171_s3 + $0x510] sm:$0xff]  ;;  %v6060_v43 = vld [vmem:[%s10171_s3 + $0x18] sm:$0xff] }
 0x5ec   : > { %v6177_v54 = vmax.f32 %v6135_v47, %v6169_v40  ;;  %v6086_v55 = vadd.f32 %v10184_v11, %v6072_v48  ;;  %v6120_v56 = vadd.f32 %v6112_v49, %v10184_v11  ;;  %v6162_v57 = vadd.f32 %v6154_v50, %v10184_v11  ;;  %v7168_v37 = vld [vmem:[%s10171_s3 + $0x610] sm:$0xff]  ;;  %v7133_v50 = vld [vmem:[%s10171_s3 + $0x218] sm:$0xff] }
 0x5ed   : > { %v6204_v58 = vadd.f32 %v6196_v51, %v10184_v11  ;;  %v6246_v59 = vadd.f32 %v6238_v52, %v10184_v11  ;;  %v6288_v60 = vadd.f32 %v6280_v53, %v10184_v11  ;;  %v10232_v61 = vadd.f32 %v6322_v28, %v10184_v11  ;;  %v7177_v42 = vld [vmem:[%s10171_s3 + $0x710] sm:$0xff] }
 0x5ee   : > { %v6219_v5 = vmax.f32 %v6177_v54, %v6211_v41  ;;  %v6094_v6 = vmax.f32 %v6086_v55, 0.0  ;;  %v6128_v7 = vmax.f32 %v6120_v56, 0.0  ;;  %v6170_v8 = vmax.f32 %v6162_v57, 0.0 }
 0x5ef   : > { %v6212_v14 = vmax.f32 %v6204_v58, 0.0  ;;  %v6254_v15 = vmax.f32 %v6246_v59, 0.0  ;;  %v6296_v16 = vmax.f32 %v6288_v60, 0.0  ;;  %v6338_v17 = vmax.f32 %v10232_v61, 0.0 }
 0x5f0   : > { %v6261_v18 = vmax.f32 %v6219_v5, %v6253_v29  ;;  %v6136_v19 = vmax.f32 %v6094_v6, %v6128_v7  ;;  %v6364_v20 = vmul.f32 %v7176_v2, %v10179_v10  ;;  %v6073_v21 = vmul.f32 %v10179_v10, %v6059_v3  ;;  %v7124_v29 = vld [vmem:[%s10171_s3 + $0x118] sm:$0xff] }
 0x5f1   : > { %v6113_v22 = vmul.f32 %v7123_v4, %v10179_v10  ;;  %v6155_v23 = vmul.f32 %v7132_v9, %v10179_v10  ;;  %v6197_v24 = vmul.f32 %v7141_v12, %v10179_v10  ;;  %v6239_v25 = vmul.f32 %v7150_v13, %v10179_v10  ;;  %v7142_v4 = vld [vmem:[%s10171_s3 + $0x318] sm:$0xff] }
 0x5f2   : > { %v6303_v26 = vmax.f32 %v6261_v18, %v6295_v44  ;;  %v6178_v27 = vmax.f32 %v6136_v19, %v6170_v8  ;;  %v6372_v30 = vadd.f32 %v6364_v20, %v10184_v11  ;;  %v6087_v31 = vadd.f32 %v10184_v11, %v6073_v21  ;;  %v7151_v5 = vld [vmem:[%s10171_s3 + $0x418] sm:$0xff]  ;;  %v6061_v20 = vld [vmem:[%s10171_s3 + $0x20] sm:$0xff] }
 0x5f3   : > { %v6121_v32 = vadd.f32 %v6113_v22, %v10184_v11  ;;  %v6163_v33 = vadd.f32 %v6155_v23, %v10184_v11  ;;  %v6205_v34 = vadd.f32 %v6197_v24, %v10184_v11  ;;  %v6247_v35 = vadd.f32 %v6239_v25, %v10184_v11  ;;  %v7160_v12 = vld [vmem:[%s10171_s3 + $0x518] sm:$0xff] }
 0x5f4   : > { %v6345_v38 = vmax.f32 %v6303_v26, %v6337_v45  ;;  %v6220_v39 = vmax.f32 %v6178_v27, %v6212_v14  ;;  %v6380_v40 = vmax.f32 %v6372_v30, 0.0  ;;  %v6095_v41 = vmax.f32 %v6087_v31, 0.0  ;;  %v7169_v13 = vld [vmem:[%s10171_s3 + $0x618] sm:$0xff] }
 0x5f5   : > { %v6129_v44 = vmax.f32 %v6121_v32, 0.0  ;;  %v6171_v47 = vmax.f32 %v6163_v33, 0.0  ;;  %v6213_v48 = vmax.f32 %v6205_v34, 0.0  ;;  %v6255_v49 = vmax.f32 %v6247_v35, 0.0  ;;  %v7178_v19 = vld [vmem:[%s10171_s3 + $0x718] sm:$0xff]  ;;  %v7125_v34 = vld [vmem:[%s10171_s3 + $0x120] sm:$0xff] }
 0x5f6   : > { %v6387_v51 = vmax.f32 %v6345_v38, %v6379_v46  ;;  %v6262_v45 = vmax.f32 %v6220_v39, %v6254_v15  ;;  %v6281_v52 = vmul.f32 %v7159_v36, %v10179_v10  ;;  %v6323_v53 = vmul.f32 %v7168_v37, %v10179_v10  ;;  %v7134_v39 = vld [vmem:[%s10171_s3 + $0x220] sm:$0xff] }
 0x5f7   : > { %v6137_v28 = vmax.f32 %v6095_v41, %v6129_v44  ;;  %v6365_v54 = vmul.f32 %v7177_v42, %v10179_v10  ;;  %v6074_v55 = vmul.f32 %v10179_v10, %v6060_v43  ;;  %v6114_v56 = vmul.f32 %v7124_v29, %v10179_v10  ;;  %v7143_v29 = vld [vmem:[%s10171_s3 + $0x320] sm:$0xff] }
 0x5f8   : > { %6396 = vst [vmem:[%s10263_s27] sm:$0xff] %v6387_v51  ;;  %v6304_v57 = vmax.f32 %v6262_v45, %v6296_v16  ;;  %v6289_v46 = vadd.f32 %v6281_v52, %v10184_v11  ;;  %v6331_v58 = vadd.f32 %v6323_v53, %v10184_v11  ;;  %v6156_v59 = vmul.f32 %v7133_v50, %v10179_v10  ;;  %v7152_v44 = vld [vmem:[%s10171_s3 + $0x420] sm:$0xff] }
 0x5f9   : > { %v6179_v60 = vmax.f32 %v6137_v28, %v6171_v47  ;;  %v6373_v61 = vadd.f32 %v6365_v54, %v10184_v11  ;;  %v6088_v2 = vadd.f32 %v10184_v11, %v6074_v55  ;;  %v6122_v3 = vadd.f32 %v6114_v56, %v10184_v11  ;;  %v7161_v51 = vld [vmem:[%s10171_s3 + $0x520] sm:$0xff] }
 0x5fa   : > { %v6346_v6 = vmax.f32 %v6304_v57, %v6338_v17  ;;  %v6297_v7 = vmax.f32 %v6289_v46, 0.0  ;;  %v6339_v8 = vmax.f32 %v6331_v58, 0.0  ;;  %v6164_v9 = vadd.f32 %v6156_v59, %v10184_v11  ;;  %v7170_v45 = vld [vmem:[%s10171_s3 + $0x620] sm:$0xff] }
 0x5fb   : > { %v6221_v14 = vmax.f32 %v6179_v60, %v6213_v48  ;;  %v6381_v15 = vmax.f32 %v6373_v61, 0.0  ;;  %v6096_v16 = vmax.f32 %v6088_v2, 0.0  ;;  %v6130_v18 = vmax.f32 %v6122_v3, 0.0  ;;  %v7179_v55 = vld [vmem:[%s10171_s3 + $0x720] sm:$0xff] }
 0x5fc   : > { %v6388_v21 = vmax.f32 %v6346_v6, %v6380_v40  ;;  %v6172_v22 = vmax.f32 %v6164_v9, 0.0  ;;  %v6198_v23 = vmul.f32 %v7142_v4, %v10179_v10  ;;  %v6240_v17 = vmul.f32 %v7151_v5, %v10179_v10 }
 0x5fd   : > { %v6263_v24 = vmax.f32 %v6221_v14, %v6255_v49  ;;  %v6138_v25 = vmax.f32 %v6096_v16, %v6130_v18  ;;  %v6282_v26 = vmul.f32 %v7160_v12, %v10179_v10  ;;  %v6324_v27 = vmul.f32 %v7169_v13, %v10179_v10  ;;  %v7126_v14 = vld [vmem:[%s10171_s3 + $0x128] sm:$0xff] }
 0x5fe   : > { %6397 = vst [vmem:[%s10263_s27 + $0x8] sm:$0xff] %v6388_v21  ;;  %v6206_v30 = vadd.f32 %v6198_v23, %v10184_v11  ;;  %v6248_v31 = vadd.f32 %v6240_v17, %v10184_v11  ;;  %v6366_v32 = vmul.f32 %v7178_v19, %v10179_v10  ;;  %v6075_v33 = vmul.f32 %v10179_v10, %v6061_v20  ;;  %v7144_v20 = vld [vmem:[%s10171_s3 + $0x328] sm:$0xff] }
 0x5ff   : > { %v6305_v35 = vmax.f32 %v6263_v24, %v6297_v7  ;;  %v6180_v36 = vmax.f32 %v6138_v25, %v6172_v22  ;;  %v6290_v37 = vadd.f32 %v6282_v26, %v10184_v11  ;;  %v6332_v38 = vadd.f32 %v6324_v27, %v10184_v11  ;;  %v6062_v7 = vld [vmem:[%s10171_s3 + $0x28] sm:$0xff] }
 0x600   : > { %v6214_v40 = vmax.f32 %v6206_v30, 0.0  ;;  %v6256_v41 = vmax.f32 %v6248_v31, 0.0  ;;  %v6374_v42 = vadd.f32 %v6366_v32, %v10184_v11  ;;  %v6089_v43 = vadd.f32 %v10184_v11, %v6075_v33  ;;  %v7153_v21 = vld [vmem:[%s10171_s3 + $0x428] sm:$0xff] }
 0x601   : > { %v6347_v47 = vmax.f32 %v6305_v35, %v6339_v8  ;;  %v6298_v48 = vmax.f32 %v6290_v37, 0.0  ;;  %v6340_v49 = vmax.f32 %v6332_v38, 0.0  ;;  %v6115_v50 = vmul.f32 %v7125_v34, %v10179_v10  ;;  %v7162_v25 = vld [vmem:[%s10171_s3 + $0x528] sm:$0xff] }
 0x602   : > { %v6222_v52 = vmax.f32 %v6180_v36, %v6214_v40  ;;  %v6382_v53 = vmax.f32 %v6374_v42, 0.0  ;;  %v6097_v28 = vmax.f32 %v6089_v43, 0.0  ;;  %v6157_v54 = vmul.f32 %v7134_v39, %v10179_v10  ;;  %v7171_v32 = vld [vmem:[%s10171_s3 + $0x628] sm:$0xff] }
 0x603   : > { %v6389_v56 = vmax.f32 %v6347_v47, %v6381_v15  ;;  %v6123_v57 = vadd.f32 %v6115_v50, %v10184_v11  ;;  %v6199_v46 = vmul.f32 %v7143_v29, %v10179_v10  ;;  %v6241_v58 = vmul.f32 %v7152_v44, %v10179_v10  ;;  %v7135_v15 = vld [vmem:[%s10171_s3 + $0x228] sm:$0xff]  ;;  %v6063_v47 = vld [vmem:[%s10171_s3 + $0x30] sm:$0xff] }
 0x604   : > { %v6264_v59 = vmax.f32 %v6222_v52, %v6256_v41  ;;  %v6165_v60 = vadd.f32 %v6157_v54, %v10184_v11  ;;  %v6283_v61 = vmul.f32 %v7161_v51, %v10179_v10  ;;  %v6325_v2 = vmul.f32 %v7170_v45, %v10179_v10  ;;  %v7180_v41 = vld [vmem:[%s10171_s3 + $0x728] sm:$0xff]  ;;  %v7127_v45 = vld [vmem:[%s10171_s3 + $0x130] sm:$0xff] }
 0x605   : > { %6398 = vst [vmem:[%s10263_s27 + $0x10] sm:$0xff] %v6389_v56  ;;  %v6131_v3 = vmax.f32 %v6123_v57, 0.0  ;;  %v6207_v4 = vadd.f32 %v6199_v46, %v10184_v11  ;;  %v6249_v5 = vadd.f32 %v6241_v58, %v10184_v11  ;;  %v6367_v6 = vmul.f32 %v7179_v55, %v10179_v10  ;;  %v7136_v52 = vld [vmem:[%s10171_s3 + $0x230] sm:$0xff] }
 0x606   : > { %v6306_v8 = vmax.f32 %v6264_v59, %v6298_v48  ;;  %v6173_v9 = vmax.f32 %v6165_v60, 0.0  ;;  %v6291_v12 = vadd.f32 %v6283_v61, %v10184_v11  ;;  %v6333_v13 = vadd.f32 %v6325_v2, %v10184_v11  ;;  %v7145_v56 = vld [vmem:[%s10171_s3 + $0x330] sm:$0xff] }
 0x607   : > { %v6139_v16 = vmax.f32 %v6097_v28, %v6131_v3  ;;  %v6215_v18 = vmax.f32 %v6207_v4, 0.0  ;;  %v6257_v19 = vmax.f32 %v6249_v5, 0.0  ;;  %v6375_v17 = vadd.f32 %v6367_v6, %v10184_v11  ;;  %v7154_v60 = vld [vmem:[%s10171_s3 + $0x430] sm:$0xff] }
 0x608   : > { %v6348_v22 = vmax.f32 %v6306_v8, %v6340_v49  ;;  %v6299_v23 = vmax.f32 %v6291_v12, 0.0  ;;  %v6076_v24 = vmul.f32 %v10179_v10, %v6062_v7  ;;  %v6341_v27 = vmax.f32 %v6333_v13, 0.0 }
 0x609   : > { %v6181_v26 = vmax.f32 %v6139_v16, %v6173_v9  ;;  %v6116_v30 = vmul.f32 %v7126_v14, %v10179_v10  ;;  %v6158_v31 = vmul.f32 %v7135_v15, %v10179_v10  ;;  %v6200_v35 = vmul.f32 %v7144_v20, %v10179_v10  ;;  %v7163_v9 = vld [vmem:[%s10171_s3 + $0x530] sm:$0xff] }
 0x60a   : > { %v6390_v33 = vmax.f32 %v6348_v22, %v6382_v53  ;;  %v6090_v34 = vadd.f32 %v10184_v11, %v6076_v24  ;;  %v6242_v36 = vmul.f32 %v7153_v21, %v10179_v10  ;;  %v6284_v40 = vmul.f32 %v7162_v25, %v10179_v10  ;;  %v7172_v16 = vld [vmem:[%s10171_s3 + $0x630] sm:$0xff] }
 0x60b   : > { %v6223_v37 = vmax.f32 %v6181_v26, %v6215_v18  ;;  %v6124_v38 = vadd.f32 %v6116_v30, %v10184_v11  ;;  %v6166_v39 = vadd.f32 %v6158_v31, %v10184_v11  ;;  %v6208_v43 = vadd.f32 %v6200_v35, %v10184_v11  ;;  %v7181_v18 = vld [vmem:[%s10171_s3 + $0x730] sm:$0xff] }
 0x60c   : > { %6399 = vst [vmem:[%s10263_s27 + $0x18] sm:$0xff] %v6390_v33  ;;  %v6098_v42 = vmax.f32 %v6090_v34, 0.0  ;;  %v6250_v29 = vadd.f32 %v6242_v36, %v10184_v11  ;;  %v6326_v44 = vmul.f32 %v7171_v32, %v10179_v10  ;;  %v6292_v51 = vadd.f32 %v6284_v40, %v10184_v11  ;;  %v7137_v34 = vld [vmem:[%s10171_s3 + $0x238] sm:$0xff] }
 0x60d   : > { %v6265_v48 = vmax.f32 %v6223_v37, %v6257_v19  ;;  %v6132_v49 = vmax.f32 %v6124_v38, 0.0  ;;  %v6174_v50 = vmax.f32 %v6166_v39, 0.0  ;;  %v6383_v53 = vmax.f32 %v6375_v17, 0.0 }
 0x60e   : > { %v6216_v28 = vmax.f32 %v6208_v43, 0.0  ;;  %v6334_v54 = vadd.f32 %v6326_v44, %v10184_v11  ;;  %v6368_v55 = vmul.f32 %v7180_v41, %v10179_v10  ;;  %v6258_v58 = vmax.f32 %v6250_v29, 0.0  ;;  %v7146_v43 = vld [vmem:[%s10171_s3 + $0x338] sm:$0xff] }
 0x60f   : > { %v6307_v57 = vmax.f32 %v6265_v48, %v6299_v23  ;;  %v6140_v46 = vmax.f32 %v6098_v42, %v6132_v49  ;;  %v6077_v59 = vmul.f32 %v10179_v10, %v6063_v47  ;;  %v6300_v61 = vmax.f32 %v6292_v51, 0.0  ;;  %v6064_v23 = vld [vmem:[%s10171_s3 + $0x38] sm:$0xff] }
 0x610   : > { %v6376_v2 = vadd.f32 %v6368_v55, %v10184_v11  ;;  %v6117_v3 = vmul.f32 %v7127_v45, %v10179_v10  ;;  %v6159_v4 = vmul.f32 %v7136_v52, %v10179_v10  ;;  %v6201_v8 = vmul.f32 %v7145_v56, %v10179_v10  ;;  %v7155_v49 = vld [vmem:[%s10171_s3 + $0x438] sm:$0xff] }
 0x611   : > { %v6349_v5 = vmax.f32 %v6307_v57, %v6341_v27  ;;  %v6182_v6 = vmax.f32 %v6140_v46, %v6174_v50  ;;  %v6091_v7 = vadd.f32 %v10184_v11, %v6077_v59  ;;  %v6342_v12 = vmax.f32 %v6334_v54, 0.0  ;;  %v7128_v27 = vld [vmem:[%s10171_s3 + $0x138] sm:$0xff] }
 0x612   : > { %v6125_v13 = vadd.f32 %v6117_v3, %v10184_v11  ;;  %v6167_v14 = vadd.f32 %v6159_v4, %v10184_v11  ;;  %v6243_v15 = vmul.f32 %v7154_v60, %v10179_v10  ;;  %v6209_v22 = vadd.f32 %v6201_v8, %v10184_v11  ;;  %v7164_v50 = vld [vmem:[%s10171_s3 + $0x538] sm:$0xff] }
 0x613   : > { %v6391_v19 = vmax.f32 %v6349_v5, %v6383_v53  ;;  %v6224_v20 = vmax.f32 %v6182_v6, %v6216_v28  ;;  %v6099_v21 = vmax.f32 %v6091_v7, 0.0  ;;  %v6285_v26 = vmul.f32 %v7163_v9, %v10179_v10  ;;  %v7173_v28 = vld [vmem:[%s10171_s3 + $0x638] sm:$0xff] }
 0x614   : > { %v6133_v17 = vmax.f32 %v6125_v13, 0.0  ;;  %v6175_v24 = vmax.f32 %v6167_v14, 0.0  ;;  %v6251_v25 = vadd.f32 %v6243_v15, %v10184_v11  ;;  %v6384_v31 = vmax.f32 %v6376_v2, 0.0  ;;  %v7182_v46 = vld [vmem:[%s10171_s3 + $0x738] sm:$0xff] }
 0x615   : > { %6400 = vst [vmem:[%s10263_s27 + $0x20] sm:$0xff] %v6391_v19  ;;  %v6266_v30 = vmax.f32 %v6224_v20, %v6258_v58  ;;  %v6327_v32 = vmul.f32 %v7172_v16, %v10179_v10  ;;  %v6369_v33 = vmul.f32 %v7181_v18, %v10179_v10  ;;  %v6217_v36 = vmax.f32 %v6209_v22, 0.0 }
 0x616   : > { %v6141_v35 = vmax.f32 %v6099_v21, %v6133_v17  ;;  %v6293_v37 = vadd.f32 %v6285_v26, %v10184_v11  ;;  %v6078_v38 = vmul.f32 %v10179_v10, %v6064_v23  ;;  %v6259_v40 = vmax.f32 %v6251_v25, 0.0 }
 0x617   : > { %v6308_v39 = vmax.f32 %v6266_v30, %v6300_v61  ;;  %v6335_v41 = vadd.f32 %v6327_v32, %v10184_v11  ;;  %v6118_v42 = vmul.f32 %v7128_v27, %v10179_v10  ;;  %v6377_v44 = vadd.f32 %v6369_v33, %v10184_v11 }
 0x618   : > { %v6183_v29 = vmax.f32 %v6141_v35, %v6175_v24  ;;  %v6092_v47 = vadd.f32 %v10184_v11, %v6078_v38  ;;  %v6160_v48 = vmul.f32 %v7137_v34, %v10179_v10  ;;  %v6301_v45 = vmax.f32 %v6293_v37, 0.0 }
 0x619   : > { %v6350_v51 = vmax.f32 %v6308_v39, %v6342_v12  ;;  %v6343_v52 = vmax.f32 %v6335_v41, 0.0  ;;  %v6126_v53 = vadd.f32 %v6118_v42, %v10184_v11  ;;  %v6202_v57 = vmul.f32 %v7146_v43, %v10179_v10 }
 0x61a   : > { %v6225_v54 = vmax.f32 %v6183_v29, %v6217_v36  ;;  %v6100_v55 = vmax.f32 %v6092_v47, 0.0  ;;  %v6168_v56 = vadd.f32 %v6160_v48, %v10184_v11  ;;  %v6244_v60 = vmul.f32 %v7155_v49, %v10179_v10 }
 0x61b   : > { %v6392_v58 = vmax.f32 %v6350_v51, %v6384_v31  ;;  %v6134_v59 = vmax.f32 %v6126_v53, 0.0  ;;  %v6286_v61 = vmul.f32 %v7164_v50, %v10179_v10  ;;  %v6210_v4 = vadd.f32 %v6202_v57, %v10184_v11 }
 0x61c   : > { %v6267_v2 = vmax.f32 %v6225_v54, %v6259_v40  ;;  %v6176_v3 = vmax.f32 %v6168_v56, 0.0  ;;  %v6328_v5 = vmul.f32 %v7173_v28, %v10179_v10  ;;  %v6252_v7 = vadd.f32 %v6244_v60, %v10184_v11 }
 0x61d   : > { %6401 = vst [vmem:[%s10263_s27 + $0x28] sm:$0xff] %v6392_v58  ;;  %v6142_v6 = vmax.f32 %v6100_v55, %v6134_v59  ;;  %v6294_v8 = vadd.f32 %v6286_v61, %v10184_v11  ;;  %v6370_v9 = vmul.f32 %v7182_v46, %v10179_v10  ;;  %v6385_v13 = vmax.f32 %v6377_v44, 0.0 }
 0x61e   : > { %v6309_v12 = vmax.f32 %v6267_v2, %v6301_v45  ;;  %v6218_v14 = vmax.f32 %v6210_v4, 0.0  ;;  %v6260_v16 = vmax.f32 %v6252_v7, 0.0  ;;  %v6336_v18 = vadd.f32 %v6328_v5, %v10184_v11 }
 0x61f   : > { %v6184_v15 = vmax.f32 %v6142_v6, %v6176_v3  ;;  %v6378_v19 = vadd.f32 %v6370_v9, %v10184_v11  ;;  %v6302_v22 = vmax.f32 %v6294_v8, 0.0 }
 0x620   : > { %v6351_v20 = vmax.f32 %v6309_v12, %v6343_v52  ;;  %v6344_v24 = vmax.f32 %v6336_v18, 0.0 }
 0x621   : > { %v6226_v21 = vmax.f32 %v6184_v15, %v6218_v14  ;;  %v6386_v26 = vmax.f32 %v6378_v19, 0.0 }
 0x622   : > { %v6393_v23 = vmax.f32 %v6351_v20, %v6385_v13 }
 0x623   : > { %v6268_v17 = vmax.f32 %v6226_v21, %v6260_v16 }
 0x624   : > { %6402 = vst [vmem:[%s10263_s27 + $0x30] sm:$0xff] %v6393_v23 }
 0x625   : > { %v6310_v25 = vmax.f32 %v6268_v17, %v6302_v22  ;;  %6053 = sbr.rel (!%p6051_p1) target bundleno = 1500 (0x5dc), region = 71 }
 0x627   : > { %v6352_v10 = vmax.f32 %v6310_v25, %v6344_v24 }
 0x629   : > { %v6394_v27 = vmax.f32 %v6352_v10, %v6386_v26 }
 0x62b   : > { %6403 = vst [vmem:[%s10263_s27 + $0x38] sm:$0xff] %v6394_v27 }

// kernel: cnn3d_forward.4
= control target key start
LH: loop header
LB: loop body
LE: loop exit
PB: predicated region body
PF: predicated region fallthrough
CT: control target
= control target key end

     0   :  { %v8369_v0 = vmov 0   ;;  %vm3538_vm0 = vcmask 523264   ;;  %s10569_s2 = inlined_call_operand.vmem [shape: f32[1,128], index: 2, kind: input, shape index: {}]   ;;  %s10570_s3 = inlined_call_operand.vmem [shape: f32[1,128], index: 3, kind: input, shape index: {}]   ;;  %s10571_s4 = inlined_call_operand.vmem [shape: f32[64,128], index: 4, kind: output, shape index: {}]   ;;  %s10572_s1 = inlined_call_operand.vmem [shape: bf16[1728,128], index: 1, kind: input, shape index: {}]   ;;  %s10573_s0 = inlined_call_operand.vmem [shape: bf16[512,1728], index: 0, kind: input, shape index: {}]  }
   0x1   :  { %3635 = vmatprep.subr.bf16.mxu1 %v8369_v0  ;;  %4502 = vmatprep.subr.bf16.mxu0 %v8369_v0  ;;  %v7547_v1 = vld [vmem:[%s10572_s1] sm:$0xff]   ;;  %v7549_v3 = vld [vmem:[%s10572_s1 + $0x8] sm:$0xff]   ;;  %v7551_v5 = vld [vmem:[%s10572_s1 + $0x10] sm:$0xff]  }
   0x2   :  { %v7548_v2 = vld [vmem:[%s10572_s1 + $0x180] sm:$0xff]   ;;  %3636 = vmatpush1.bf16.msra.mxu1 %v7547_v1  ;;  %v7550_v4 = vld [vmem:[%s10572_s1 + $0x188] sm:$0xff]   ;;  %v7552_v6 = vld [vmem:[%s10572_s1 + $0x190] sm:$0xff]  }
   0x3   :  { %4503 = vmatpush1.bf16.msra.mxu0 %v7548_v2  ;;  %3637 = vmatprep.subr.bf16.mxu1 %v8369_v0  ;;  %v7553_v7 = vld [vmem:[%s10572_s1 + $0x18] sm:$0xff]   ;;  %v7555_v9 = vld [vmem:[%s10572_s1 + $0x20] sm:$0xff]   ;;  %v7557_v11 = vld [vmem:[%s10572_s1 + $0x28] sm:$0xff]  }
   0x4   :  { %4504 = vmatprep.subr.bf16.mxu0 %v8369_v0  ;;  %v7554_v8 = vld [vmem:[%s10572_s1 + $0x198] sm:$0xff]   ;;  %v7556_v10 = vld [vmem:[%s10572_s1 + $0x1a0] sm:$0xff]   ;;  %v7558_v12 = vld [vmem:[%s10572_s1 + $0x1a8] sm:$0xff]  }
   0x5   :  { %v7559_v13 = vld [vmem:[%s10572_s1 + $0x30] sm:$0xff]   ;;  %v7561_v15 = vld [vmem:[%s10572_s1 + $0x38] sm:$0xff]   ;;  %v7563_v17 = vld [vmem:[%s10572_s1 + $0x40] sm:$0xff]  }
   0x6   :  { %3638 = vmatpush1.bf16.msra.mxu1 %v7549_v3  ;;  %v7560_v14 = vld [vmem:[%s10572_s1 + $0x1b0] sm:$0xff]   ;;  %v7562_v16 = vld [vmem:[%s10572_s1 + $0x1b8] sm:$0xff]   ;;  %v7564_v18 = vld [vmem:[%s10572_s1 + $0x1c0] sm:$0xff]  }
   0x7   :  { %4505 = vmatpush1.bf16.msra.mxu0 %v7550_v4  ;;  %3639 = vmatprep.subr.bf16.mxu1 %v8369_v0  ;;  %v7581_v19 = vld [vmem:[%s10573_s0 + $0x4] ss:$56 sps:$4 sm:$0xff]   ;;  %v7565_v20 = vld [vmem:[%s10572_s1 + $0x48] sm:$0xff]   ;;  %v7567_v23 = vld [vmem:[%s10572_s1 + $0x50] sm:$0xff]  }
   0x8   :  { %4506 = vmatprep.subr.bf16.mxu0 %v8369_v0  ;;  %v7584_v21 = vld [vmem:[%s10573_s0 + $0x1c] ss:$56 sps:$4 sm:$0xff]   ;;  %v7566_v22 = vld [vmem:[%s10572_s1 + $0x1c8] sm:$0xff]   ;;  %3667 = vmatprep.mubr.bf16.mxu1 %v7581_v19  ;;  %v7571_v27 = vld [vmem:[%s10572_s1 + $0x60] sm:$0xff]  }
   0x9   :  { %4534 = vmatprep.mubr.bf16.mxu0 %v7584_v21  ;;  %v7568_v24 = vld [vmem:[%s10572_s1 + $0x1d0] sm:$0xff]   ;;  %v7569_v25 = vld [vmem:[%s10572_s1 + $0x58] sm:$0xff]   ;;  %v7572_v28 = vld [vmem:[%s10572_s1 + $0x1e0] sm:$0xff]  }
   0xa   :  { %3640 = vmatpush1.bf16.msra.mxu1 %v7551_v5  ;;  %v7570_v26 = vld [vmem:[%s10572_s1 + $0x1d8] sm:$0xff]   ;;  %v7573_v29 = vld [vmem:[%s10572_s1 + $0x68] sm:$0xff]   ;;  %v7575_v31 = vld [vmem:[%s10572_s1 + $0x70] sm:$0xff]  }
   0xb   :  { %4507 = vmatpush1.bf16.msra.mxu0 %v7552_v6  ;;  %3641 = vmatprep.subr.bf16.mxu1 %v8369_v0  ;;  %v7574_v30 = vld [vmem:[%s10572_s1 + $0x1e8] sm:$0xff]   ;;  %v7576_v32 = vld [vmem:[%s10572_s1 + $0x1f0] sm:$0xff]   ;;  %v7577_v33 = vld [vmem:[%s10572_s1 + $0x78] sm:$0xff]  }
   0xc   :  { %4508 = vmatprep.subr.bf16.mxu0 %v8369_v0  ;;  %v7578_v34 = vld [vmem:[%s10572_s1 + $0x1f8] sm:$0xff]   ;;  %v7585_v37 = vld [vmem:[%s10572_s1 + $0x80] sm:$0xff]   ;;  %v7587_v39 = vld [vmem:[%s10573_s0 + $0x74] ss:$56 sps:$4 sm:$0xff]  }
   0xd   :  { %v7579_v35 = vld [vmem:[%s10573_s0] ss:$56 sps:$4 sm:$0xff]   ;;  %v7589_v40 = vld [vmem:[%s10573_s0 + $0x8c] ss:$56 sps:$4 sm:$0xff]   ;;  %v7591_v42 = vld [vmem:[%s10573_s0 + $0x70] ss:$56 sps:$4 sm:$0xff]  }
   0xe   :  { %3642 = vmatpush1.bf16.msra.mxu1 %v7553_v7  ;;  %v7582_v36 = vld [vmem:[%s10573_s0 + $0x18] ss:$56 sps:$4 sm:$0xff]   ;;  %v7586_v38 = vld [vmem:[%s10572_s1 + $0x200] sm:$0xff]   ;;  %v7600_v41 = vld [vmem:[%s10572_s1 + $0x88] sm:$0xff]  }
   0xf   :  { %4509 = vmatpush1.bf16.msra.mxu0 %v7554_v8  ;;  %3643 = vmatprep.subr.bf16.mxu1 %v8369_v0  ;;  %v7593_v43 = vld [vmem:[%s10572_s1 + $0x208] sm:$0xff]   ;;  %v7594_v45 = vld [vmem:[%s10573_s0 + $0xe4] ss:$56 sps:$4 sm:$0xff]   ;;  %v7601_v47 = vld [vmem:[%s10572_s1 + $0x210] sm:$0xff]  }
  0x10   :  { %4510 = vmatprep.subr.bf16.mxu0 %v8369_v0  ;;  %v7592_v44 = vld [vmem:[%s10573_s0 + $0x88] ss:$56 sps:$4 sm:$0xff]   ;;  %v7596_v46 = vld [vmem:[%s10573_s0 + $0xfc] ss:$56 sps:$4 sm:$0xff]   ;;  %v7599_v51 = vld [vmem:[%s10573_s0 + $0xf8] ss:$56 sps:$4 sm:$0xff]  }
  0x11   :  { %v7615_v48 = vld [vmem:[%s10572_s1 + $0x90] sm:$0xff]   ;;  %v7598_v49 = vld [vmem:[%s10573_s0 + $0xe0] ss:$56 sps:$4 sm:$0xff]   ;;  %v7604_v54 = vld [vmem:[%s10573_s0 + $0x16c] ss:$56 sps:$4 sm:$0xff]  }
  0x12   :  { %3644 = vmatpush1.bf16.msra.mxu1 %v7555_v9  ;;  %v7608_v50 = vld [vmem:[%s10572_s1 + $0x218] sm:$0xff]   ;;  %v7602_v53 = vld [vmem:[%s10573_s0 + $0x154] ss:$56 sps:$4 sm:$0xff]   ;;  %v7616_v55 = vld [vmem:[%s10572_s1 + $0x220] sm:$0xff]  }
  0x13   :  { %4511 = vmatpush1.bf16.msra.mxu0 %v7556_v10  ;;  %3645 = vmatprep.subr.bf16.mxu1 %v8369_v0  ;;  %v7630_v52 = vld [vmem:[%s10572_s1 + $0x98] sm:$0xff]   ;;  %v7645_v56 = vld [vmem:[%s10572_s1 + $0xa0] sm:$0xff]   ;;  %v7606_v57 = vld [vmem:[%s10573_s0 + $0x150] ss:$56 sps:$4 sm:$0xff]  }
  0x14   :  { %4512 = vmatprep.subr.bf16.mxu0 %v8369_v0  ;;  %v7623_v58 = vld [vmem:[%s10572_s1 + $0x228] sm:$0xff]   ;;  %v7609_v61 = vld [vmem:[%s10573_s0 + $0x1c4] ss:$56 sps:$4 sm:$0xff]   ;;  %v7631_v63 = vld [vmem:[%s10572_s1 + $0x230] sm:$0xff]  }
  0x15   :  { %v7607_v59 = vld [vmem:[%s10573_s0 + $0x168] ss:$56 sps:$4 sm:$0xff]   ;;  %v7611_v62 = vld [vmem:[%s10573_s0 + $0x1dc] ss:$56 sps:$4 sm:$0xff]   ;;  %v7614_v4 = vld [vmem:[%s10573_s0 + $0x1d8] ss:$56 sps:$4 sm:$0xff]  }
  0x16   :  { %3646 = vmatpush1.bf16.msra.mxu1 %v7557_v11  ;;  %v7660_v60 = vld [vmem:[%s10572_s1 + $0xa8] sm:$0xff]   ;;  %v7675_v1 = vld [vmem:[%s10572_s1 + $0xb0] sm:$0xff]   ;;  %v7638_v2 = vld [vmem:[%s10572_s1 + $0x238] sm:$0xff]  }
  0x17   :  { %4513 = vmatpush1.bf16.msra.mxu0 %v7558_v12  ;;  %3647 = vmatprep.subr.bf16.mxu1 %v8369_v0  ;;  %v7613_v3 = vld [vmem:[%s10573_s0 + $0x1c0] ss:$56 sps:$4 sm:$0xff]   ;;  %v7617_v5 = vld [vmem:[%s10573_s0 + $0x234] ss:$56 sps:$4 sm:$0xff]   ;;  %v7621_v9 = vld [vmem:[%s10573_s0 + $0x230] ss:$56 sps:$4 sm:$0xff]  }
  0x18   :  { %4514 = vmatprep.subr.bf16.mxu0 %v8369_v0  ;;  %v7690_v6 = vld [vmem:[%s10572_s1 + $0xb8] sm:$0xff]   ;;  %v7619_v7 = vld [vmem:[%s10573_s0 + $0x24c] ss:$56 sps:$4 sm:$0xff]   ;;  %v7622_v11 = vld [vmem:[%s10573_s0 + $0x248] ss:$56 sps:$4 sm:$0xff]  }
  0x19   :  { %v7646_v8 = vld [vmem:[%s10572_s1 + $0x240] sm:$0xff]   ;;  %v7653_v10 = vld [vmem:[%s10572_s1 + $0x248] sm:$0xff]  }
  0x1a   :  { %3648 = vmatpush1.bf16.msra.mxu1 %v7559_v13  ;;  %v7624_v12 = vld [vmem:[%s10573_s0 + $0x2a4] ss:$56 sps:$4 sm:$0xff]   ;;  %v7632_v19 = vld [vmem:[%s10573_s0 + $0x314] ss:$56 sps:$4 sm:$0xff]  }
  0x1b   :  { %4515 = vmatpush1.bf16.msra.mxu0 %v7560_v14  ;;  %3649 = vmatprep.subr.bf16.mxu1 %v8369_v0  ;;  %v7626_v13 = vld [vmem:[%s10573_s0 + $0x2bc] ss:$56 sps:$4 sm:$0xff]   ;;  %v7705_v14 = vld [vmem:[%s10572_s1 + $0xc0] sm:$0xff]  }
  0x1c   :  { %4516 = vmatprep.subr.bf16.mxu0 %v8369_v0  ;;  %v7634_v21 = vld [vmem:[%s10573_s0 + $0x32c] ss:$56 sps:$4 sm:$0xff]  }
  0x1e   :  { %3650 = vmatpush1.bf16.msra.mxu1 %v7561_v15  ;;  %v7661_v15 = vld [vmem:[%s10572_s1 + $0x250] sm:$0xff]  }
  0x1f   :  { %4517 = vmatpush1.bf16.msra.mxu0 %v7562_v16  ;;  %3651 = vmatprep.subr.bf16.mxu1 %v8369_v0  ;;  %v7628_v16 = vld [vmem:[%s10573_s0 + $0x2a0] ss:$56 sps:$4 sm:$0xff]  }
  0x20   :  { %4518 = vmatprep.subr.bf16.mxu0 %v8369_v0 }
  0x22   :  { %3652 = vmatpush1.bf16.msra.mxu1 %v7563_v17  ;;  %v7668_v17 = vld [vmem:[%s10572_s1 + $0x258] sm:$0xff]  }
  0x23   :  { %4519 = vmatpush1.bf16.msra.mxu0 %v7564_v18  ;;  %3653 = vmatprep.subr.bf16.mxu1 %v8369_v0  ;;  %v7629_v18 = vld [vmem:[%s10573_s0 + $0x2b8] ss:$56 sps:$4 sm:$0xff]  }
  0x24   :  { %4520 = vmatprep.subr.bf16.mxu0 %v8369_v0 }
  0x26   :  { %3654 = vmatpush1.bf16.msra.mxu1 %v7565_v20  ;;  %v7719_v20 = vld [vmem:[%s10572_s1 + $0xc8] sm:$0xff]  }
  0x27   :  { %4521 = vmatpush1.bf16.msra.mxu0 %v7566_v22  ;;  %3655 = vmatprep.subr.bf16.mxu1 %v8369_v0  ;;  %v7676_v22 = vld [vmem:[%s10572_s1 + $0x260] sm:$0xff]  }
  0x28   :  { %4522 = vmatprep.subr.bf16.mxu0 %v8369_v0 }
  0x2a   :  { %3656 = vmatpush1.bf16.msra.mxu1 %v7567_v23  ;;  %v7636_v23 = vld [vmem:[%s10573_s0 + $0x310] ss:$56 sps:$4 sm:$0xff]  }
  0x2b   :  { %4523 = vmatpush1.bf16.msra.mxu0 %v7568_v24  ;;  %3657 = vmatprep.subr.bf16.mxu1 %v8369_v0  ;;  %v7683_v24 = vld [vmem:[%s10572_s1 + $0x268] sm:$0xff]  }
  0x2c   :  { %4524 = vmatprep.subr.bf16.mxu0 %v8369_v0 }
  0x2e   :  { %3658 = vmatpush1.bf16.msra.mxu1 %v7569_v25  ;;  %v7637_v25 = vld [vmem:[%s10573_s0 + $0x328] ss:$56 sps:$4 sm:$0xff]  }
  0x2f   :  { %4525 = vmatpush1.bf16.msra.mxu0 %v7570_v26  ;;  %3659 = vmatprep.subr.bf16.mxu1 %v8369_v0  ;;  %v7733_v26 = vld [vmem:[%s10572_s1 + $0xd0] sm:$0xff]  }
  0x30   :  { %4526 = vmatprep.subr.bf16.mxu0 %v8369_v0 }
  0x32   :  { %3660 = vmatpush1.bf16.msra.mxu1 %v7571_v27  ;;  %v7639_v27 = vld [vmem:[%s10573_s0 + $0x384] ss:$56 sps:$4 sm:$0xff]  }
  0x33   :  { %4527 = vmatpush1.bf16.msra.mxu0 %v7572_v28  ;;  %3661 = vmatprep.subr.bf16.mxu1 %v8369_v0  ;;  %v7641_v28 = vld [vmem:[%s10573_s0 + $0x39c] ss:$56 sps:$4 sm:$0xff]  }
  0x34   :  { %4528 = vmatprep.subr.bf16.mxu0 %v8369_v0 }
  0x36   :  { %3662 = vmatpush1.bf16.msra.mxu1 %v7573_v29  ;;  %v7691_v29 = vld [vmem:[%s10572_s1 + $0x270] sm:$0xff]  }
  0x37   :  { %4529 = vmatpush1.bf16.msra.mxu0 %v7574_v30  ;;  %3663 = vmatprep.subr.bf16.mxu1 %v8369_v0  ;;  %v7643_v30 = vld [vmem:[%s10573_s0 + $0x380] ss:$56 sps:$4 sm:$0xff]  }
  0x38   :  { %4530 = vmatprep.subr.bf16.mxu0 %v8369_v0 }
  0x3a   :  { %3664 = vmatpush1.bf16.msra.mxu1 %v7575_v31  ;;  %v7698_v31 = vld [vmem:[%s10572_s1 + $0x278] sm:$0xff]  }
  0x3b   :  { %4531 = vmatpush1.bf16.msra.mxu0 %v7576_v32  ;;  %3665 = vmatprep.subr.bf16.mxu1 %v8369_v0  ;;  %v7747_v32 = vld [vmem:[%s10572_s1 + $0xd8] sm:$0xff]  }
  0x3c   :  { %4532 = vmatprep.subr.bf16.mxu0 %v8369_v0 }
  0x3e   :  { %3666 = vmatpush1.bf16.msra.mxu1 %v7577_v33  ;;  %v7644_v33 = vld [vmem:[%s10573_s0 + $0x398] ss:$56 sps:$4 sm:$0xff]  }
  0x3f   :  { %4533 = vmatpush1.bf16.msra.mxu0 %v7578_v34  ;;  %3924 = vmatprep.subr.bf16.mxu1 %v8369_v0  ;;  %v7647_v34 = vld [vmem:[%s10573_s0 + $0x3f4] ss:$56 sps:$4 sm:$0xff]  }
  0x40   :  { %4791 = vmatprep.subr.bf16.mxu0 %v8369_v0 }
  0x41   :  { %3668 = vmatmul.mubr.bf16.vlgmr.msra.gmra.mrb[0].mxu1 %v7579_v35  ;;  %v7649_v35 = vld [vmem:[%s10573_s0 + $0x40c] ss:$56 sps:$4 sm:$0xff]  }
  0x42   :  { %4535 = vmatmul.mubr.bf16.vlgmr.msra.gmra.mrb[0].mxu0 %v7582_v36  ;;  %3925 = vmatpush1.bf16.msra.mxu1 %v7585_v37  ;;  %v7761_v36 = vld [vmem:[%s10572_s1 + $0xe0] sm:$0xff]   ;;  %v7651_v37 = vld [vmem:[%s10573_s0 + $0x3f0] ss:$56 sps:$4 sm:$0xff]  }
  0x43   :  { %4792 = vmatpush1.bf16.msra.mxu0 %v7586_v38  ;;  %3675 = vmatprep.mubr.bf16.mxu1 %v7587_v39  ;;  %v7652_v38 = vld [vmem:[%s10573_s0 + $0x408] ss:$56 sps:$4 sm:$0xff]   ;;  %v7654_v39 = vld [vmem:[%s10573_s0 + $0x464] ss:$56 sps:$4 sm:$0xff]  }
  0x44   :  { %4542 = vmatprep.mubr.bf16.mxu0 %v7589_v40  ;;  %4793 = vmatprep.subr.bf16.mxu0 %v8369_v0  ;;  %v7656_v40 = vld [vmem:[%s10573_s0 + $0x47c] ss:$56 sps:$4 sm:$0xff]  }
  0x45   :  { %3926 = vmatprep.subr.bf16.mxu1 %v8369_v0 }
  0x46   :  { %3927 = vmatpush1.bf16.msra.mxu1 %v7600_v41  ;;  %v7658_v41 = vld [vmem:[%s10573_s0 + $0x460] ss:$56 sps:$4 sm:$0xff]  }
  0x47   :  { %4794 = vmatpush1.bf16.msra.mxu0 %v7593_v43  ;;  %3928 = vmatprep.subr.bf16.mxu1 %v8369_v0  ;;  %v7662_v43 = vld [vmem:[%s10573_s0 + $0x4d4] ss:$56 sps:$4 sm:$0xff]  }
  0x48   :  { %4795 = vmatprep.subr.bf16.mxu0 %v8369_v0 }
  0x49   :  { %3676 = vmatmul.mubr.bf16.gmra.mrb[4].mxu1 %v7591_v42  ;;  %v7659_v42 = vld [vmem:[%s10573_s0 + $0x478] ss:$56 sps:$4 sm:$0xff]  }
  0x4a   :  { %4543 = vmatmul.mubr.bf16.gmra.mrb[4].mxu0 %v7592_v44  ;;  %3683 = vmatprep.mubr.bf16.mxu1 %v7594_v45  ;;  %v7664_v44 = vld [vmem:[%s10573_s0 + $0x4ec] ss:$56 sps:$4 sm:$0xff]  }
  0x4b   :  { %4550 = vmatprep.mubr.bf16.mxu0 %v7596_v46  ;;  %4796 = vmatpush1.bf16.msra.mxu0 %v7601_v47  ;;  %v7775_v45 = vld [vmem:[%s10572_s1 + $0xe8] sm:$0xff]  }
  0x4c   :  { %4797 = vmatprep.subr.bf16.mxu0 %v8369_v0  ;;  %3929 = vmatpush1.bf16.msra.mxu1 %v7615_v48  ;;  %v7666_v46 = vld [vmem:[%s10573_s0 + $0x4d0] ss:$56 sps:$4 sm:$0xff]   ;;  %v7669_v48 = vld [vmem:[%s10573_s0 + $0x544] ss:$56 sps:$4 sm:$0xff]  }
  0x4d   :  { %3930 = vmatprep.subr.bf16.mxu1 %v8369_v0  ;;  %v7667_v47 = vld [vmem:[%s10573_s0 + $0x4e8] ss:$56 sps:$4 sm:$0xff]  }
  0x4f   :  { %4798 = vmatpush1.bf16.msra.mxu0 %v7608_v50  ;;  %v7673_v50 = vld [vmem:[%s10573_s0 + $0x540] ss:$56 sps:$4 sm:$0xff]  }
  0x50   :  { %4799 = vmatprep.subr.bf16.mxu0 %v8369_v0  ;;  %3931 = vmatpush1.bf16.msra.mxu1 %v7630_v52  ;;  %v7677_v52 = vld [vmem:[%s10573_s0 + $0x5b4] ss:$56 sps:$4 sm:$0xff]  }
  0x51   :  { %3684 = vmatmul.mubr.bf16.gmra.mrb[8].mxu1 %v7598_v49  ;;  %3932 = vmatprep.subr.bf16.mxu1 %v8369_v0  ;;  %v7671_v49 = vld [vmem:[%s10573_s0 + $0x55c] ss:$56 sps:$4 sm:$0xff]  }
  0x52   :  { %4551 = vmatmul.mubr.bf16.gmra.mrb[8].mxu0 %v7599_v51  ;;  %3691 = vmatprep.mubr.bf16.mxu1 %v7602_v53  ;;  %v7674_v51 = vld [vmem:[%s10573_s0 + $0x558] ss:$56 sps:$4 sm:$0xff]   ;;  %v7679_v53 = vld [vmem:[%s10573_s0 + $0x5cc] ss:$56 sps:$4 sm:$0xff]  }
  0x53   :  { %4558 = vmatprep.mubr.bf16.mxu0 %v7604_v54  ;;  %4800 = vmatpush1.bf16.msra.mxu0 %v7616_v55  ;;  %v7789_v54 = vld [vmem:[%s10572_s1 + $0xf0] sm:$0xff]  }
  0x54   :  { %4801 = vmatprep.subr.bf16.mxu0 %v8369_v0  ;;  %3933 = vmatpush1.bf16.msra.mxu1 %v7645_v56  ;;  %v7681_v55 = vld [vmem:[%s10573_s0 + $0x5b0] ss:$56 sps:$4 sm:$0xff]  }
  0x55   :  { %3934 = vmatprep.subr.bf16.mxu1 %v8369_v0  ;;  %v7682_v56 = vld [vmem:[%s10573_s0 + $0x5c8] ss:$56 sps:$4 sm:$0xff]  }
  0x57   :  { %4802 = vmatpush1.bf16.msra.mxu0 %v7623_v58  ;;  %v7686_v58 = vld [vmem:[%s10573_s0 + $0x63c] ss:$56 sps:$4 sm:$0xff]  }
  0x58   :  { %4803 = vmatprep.subr.bf16.mxu0 %v8369_v0  ;;  %3935 = vmatpush1.bf16.msra.mxu1 %v7660_v60  ;;  %v7689_v60 = vld [vmem:[%s10573_s0 + $0x638] ss:$56 sps:$4 sm:$0xff]  }
  0x59   :  { %3692 = vmatmul.mubr.bf16.gmra.mrb[12].mxu1 %v7606_v57  ;;  %3936 = vmatprep.subr.bf16.mxu1 %v8369_v0  ;;  %v7684_v57 = vld [vmem:[%s10573_s0 + $0x624] ss:$56 sps:$4 sm:$0xff]  }
  0x5a   :  { %4559 = vmatmul.mubr.bf16.gmra.mrb[12].mxu0 %v7607_v59  ;;  %3699 = vmatprep.mubr.bf16.mxu1 %v7609_v61  ;;  %v7688_v59 = vld [vmem:[%s10573_s0 + $0x620] ss:$56 sps:$4 sm:$0xff]   ;;  %v7692_v61 = vld [vmem:[%s10573_s0 + $0x694] ss:$56 sps:$4 sm:$0xff]  }
  0x5b   :  { %4566 = vmatprep.mubr.bf16.mxu0 %v7611_v62  ;;  %4804 = vmatpush1.bf16.msra.mxu0 %v7631_v63  ;;  %v7694_v62 = vld [vmem:[%s10573_s0 + $0x6ac] ss:$56 sps:$4 sm:$0xff]   ;;  %v7803_v63 = vld [vmem:[%s10572_s1 + $0xf8] sm:$0xff]  }
  0x5c   :  { %4805 = vmatprep.subr.bf16.mxu0 %v8369_v0  ;;  %3937 = vmatpush1.bf16.msra.mxu1 %v7675_v1  ;;  %v7696_v1 = vld [vmem:[%s10573_s0 + $0x690] ss:$56 sps:$4 sm:$0xff]  }
  0x5d   :  { %3938 = vmatprep.subr.bf16.mxu1 %v8369_v0 }
  0x5f   :  { %4806 = vmatpush1.bf16.msra.mxu0 %v7638_v2  ;;  %v7697_v2 = vld [vmem:[%s10573_s0 + $0x6a8] ss:$56 sps:$4 sm:$0xff]  }
  0x60   :  { %4807 = vmatprep.subr.bf16.mxu0 %v8369_v0  ;;  %3939 = vmatpush1.bf16.msra.mxu1 %v7690_v6  ;;  %v7701_v6 = vld [vmem:[%s10573_s0 + $0x20] ss:$56 sps:$4 sm:$0xff]  }
  0x61   :  { %3700 = vmatmul.mubr.bf16.gmra.mrb[16].mxu1 %v7613_v3  ;;  %3940 = vmatprep.subr.bf16.mxu1 %v8369_v0  ;;  %v7699_v3 = vld [vmem:[%s10573_s0 + $0x704] ss:$56 sps:$4 sm:$0xff]  }
  0x62   :  { %4567 = vmatmul.mubr.bf16.gmra.mrb[16].mxu0 %v7614_v4  ;;  %3707 = vmatprep.mubr.bf16.mxu1 %v7617_v5  ;;  %v7703_v4 = vld [vmem:[%s10573_s0 + $0x24] ss:$56 sps:$4 sm:$0xff]   ;;  %v7704_v5 = vld [vmem:[%s10573_s0 + $0x700] ss:$56 sps:$4 sm:$0xff]  }
  0x63   :  { %4574 = vmatprep.mubr.bf16.mxu0 %v7619_v7  ;;  %4808 = vmatpush1.bf16.msra.mxu0 %v7646_v8  ;;  %v7707_v7 = vld [vmem:[%s10573_s0 + $0x774] ss:$56 sps:$4 sm:$0xff]   ;;  %v7706_v8 = vld [vmem:[%s10572_s1 + $0x280] sm:$0xff]  }
  0x64   :  { %4809 = vmatprep.subr.bf16.mxu0 %v8369_v0  ;;  %3941 = vmatpush1.bf16.msra.mxu1 %v7705_v14  ;;  %v7715_v14 = vld [vmem:[%s10573_s0 + $0x104] ss:$56 sps:$4 sm:$0xff]  }
  0x65   :  { %3942 = vmatprep.subr.bf16.mxu1 %v8369_v0 }
  0x67   :  { %4810 = vmatpush1.bf16.msra.mxu0 %v7653_v10  ;;  %v7711_v10 = vld [vmem:[%s10573_s0 + $0x770] ss:$56 sps:$4 sm:$0xff]  }
  0x68   :  { %4811 = vmatprep.subr.bf16.mxu0 %v8369_v0  ;;  %3943 = vmatpush1.bf16.msra.mxu1 %v7719_v20  ;;  %v7723_v20 = vld [vmem:[%s10573_s0 + $0x174] ss:$56 sps:$4 sm:$0xff]  }
  0x69   :  { %3708 = vmatmul.mubr.bf16.gmra.mrb[20].mxu1 %v7621_v9  ;;  %3944 = vmatprep.subr.bf16.mxu1 %v8369_v0  ;;  %v7709_v9 = vld [vmem:[%s10573_s0 + $0x94] ss:$56 sps:$4 sm:$0xff]  }
  0x6a   :  { %4575 = vmatmul.mubr.bf16.gmra.mrb[20].mxu0 %v7622_v11  ;;  %3715 = vmatprep.mubr.bf16.mxu1 %v7624_v12  ;;  %v7720_v11 = vld [vmem:[%s10572_s1 + $0x288] sm:$0xff]  }
  0x6b   :  { %4582 = vmatprep.mubr.bf16.mxu0 %v7626_v13  ;;  %4812 = vmatpush1.bf16.msra.mxu0 %v7661_v15  ;;  %v7712_v12 = vld [vmem:[%s10573_s0 + $0x90] ss:$56 sps:$4 sm:$0xff]   ;;  %v7713_v13 = vld [vmem:[%s10573_s0 + $0x7e4] ss:$56 sps:$4 sm:$0xff]  }
  0x6c   :  { %4813 = vmatprep.subr.bf16.mxu0 %v8369_v0  ;;  %3945 = vmatpush1.bf16.msra.mxu1 %v7733_v26  ;;  %v7734_v15 = vld [vmem:[%s10572_s1 + $0x290] sm:$0xff]   ;;  %v7729_v26 = vld [vmem:[%s10573_s0 + $0x1e4] ss:$56 sps:$4 sm:$0xff]  }
  0x6d   :  { %3946 = vmatprep.subr.bf16.mxu1 %v8369_v0 }
  0x6f   :  { %4814 = vmatpush1.bf16.msra.mxu0 %v7668_v17  ;;  %v7748_v17 = vld [vmem:[%s10572_s1 + $0x298] sm:$0xff]  }
  0x70   :  { %4815 = vmatprep.subr.bf16.mxu0 %v8369_v0  ;;  %3947 = vmatpush1.bf16.msra.mxu1 %v7747_v32  ;;  %v7737_v32 = vld [vmem:[%s10573_s0 + $0x254] ss:$56 sps:$4 sm:$0xff]  }
  0x71   :  { %3716 = vmatmul.mubr.bf16.gmra.mrb[24].mxu1 %v7628_v16  ;;  %3948 = vmatprep.subr.bf16.mxu1 %v8369_v0  ;;  %v7717_v16 = vld [vmem:[%s10573_s0 + $0x7e0] ss:$56 sps:$4 sm:$0xff]  }
  0x72   :  { %4583 = vmatmul.mubr.bf16.gmra.mrb[24].mxu0 %v7629_v18  ;;  %3723 = vmatprep.mubr.bf16.mxu1 %v7632_v19  ;;  %v7718_v18 = vld [vmem:[%s10573_s0 + $0x100] ss:$56 sps:$4 sm:$0xff]   ;;  %v7721_v19 = vld [vmem:[%s10573_s0 + $0x854] ss:$56 sps:$4 sm:$0xff]  }
  0x73   :  { %4590 = vmatprep.mubr.bf16.mxu0 %v7634_v21  ;;  %4816 = vmatpush1.bf16.msra.mxu0 %v7676_v22  ;;  %v7762_v21 = vld [vmem:[%s10572_s1 + $0x2a0] sm:$0xff]   ;;  %v7725_v22 = vld [vmem:[%s10573_s0 + $0x850] ss:$56 sps:$4 sm:$0xff]  }
  0x74   :  { %4817 = vmatprep.subr.bf16.mxu0 %v8369_v0  ;;  %3949 = vmatpush1.bf16.msra.mxu1 %v7761_v36  ;;  %v7740_v36 = vld [vmem:[%s10573_s0 + $0x250] ss:$56 sps:$4 sm:$0xff]  }
  0x75   :  { %3950 = vmatprep.subr.bf16.mxu1 %v8369_v0 }
  0x77   :  { %4818 = vmatpush1.bf16.msra.mxu0 %v7683_v24  ;;  %v7726_v24 = vld [vmem:[%s10573_s0 + $0x170] ss:$56 sps:$4 sm:$0xff]  }
  0x78   :  { %4819 = vmatprep.subr.bf16.mxu0 %v8369_v0  ;;  %3951 = vmatpush1.bf16.msra.mxu1 %v7775_v45  ;;  %v7753_v45 = vld [vmem:[%s10573_s0 + $0xa10] ss:$56 sps:$4 sm:$0xff]  }
  0x79   :  { %3724 = vmatmul.mubr.bf16.gmra.mrb[28].mxu1 %v7636_v23  ;;  %3952 = vmatprep.subr.bf16.mxu1 %v8369_v0  ;;  %v7776_v23 = vld [vmem:[%s10572_s1 + $0x2a8] sm:$0xff]  }
  0x7a   :  { %4591 = vmatmul.mubr.bf16.gmra.mrb[28].mxu0 %v7637_v25  ;;  %3731 = vmatprep.mubr.bf16.mxu1 %v7639_v27  ;;  %v7727_v25 = vld [vmem:[%s10573_s0 + $0x8c4] ss:$56 sps:$4 sm:$0xff]   ;;  %v7790_v27 = vld [vmem:[%s10572_s1 + $0x2b0] sm:$0xff]  }
  0x7b   :  { %4598 = vmatprep.mubr.bf16.mxu0 %v7641_v28  ;;  %4820 = vmatpush1.bf16.msra.mxu0 %v7691_v29  ;;  %v7731_v28 = vld [vmem:[%s10573_s0 + $0x8c0] ss:$56 sps:$4 sm:$0xff]  }
  0x7c   :  { %4821 = vmatprep.subr.bf16.mxu0 %v8369_v0  ;;  %3953 = vmatpush1.bf16.msra.mxu1 %v7789_v54  ;;  %v7804_v29 = vld [vmem:[%s10572_s1 + $0x2b8] sm:$0xff]   ;;  %v7767_v54 = vld [vmem:[%s10573_s0 + $0xaf0] ss:$56 sps:$4 sm:$0xff]  }
  0x7d   :  { %3954 = vmatprep.subr.bf16.mxu1 %v8369_v0 }
  0x7f   :  { %4822 = vmatpush1.bf16.msra.mxu0 %v7698_v31  ;;  %v7735_v31 = vld [vmem:[%s10573_s0 + $0x934] ss:$56 sps:$4 sm:$0xff]  }
  0x80   :  { %5080 = vmatprep.subr.bf16.mxu0 %v8369_v0  ;;  %3955 = vmatpush1.bf16.msra.mxu1 %v7803_v63  ;;  %v7781_v63 = vld [vmem:[%s10573_s0 + $0xbd0] ss:$56 sps:$4 sm:$0xff]  }
  0x81   :  { %3732 = vmatmul.mubr.bf16.gmra.mrb[32].mxu1 %v7643_v30  ;;  %4213 = vmatprep.subr.bf16.mxu1 %v8369_v0  ;;  %v7732_v30 = vld [vmem:[%s10573_s0 + $0x1e0] ss:$56 sps:$4 sm:$0xff]  }
  0x82   :  { %4599 = vmatmul.mubr.bf16.gmra.mrb[32].mxu0 %v7644_v33  ;;  %3739 = vmatprep.mubr.bf16.mxu1 %v7647_v34  ;;  %v7818_v33 = vld [vmem:[%s10572_s1 + $0x2c0] sm:$0xff]   ;;  %v7739_v34 = vld [vmem:[%s10573_s0 + $0x930] ss:$56 sps:$4 sm:$0xff]  }
  0x83   :  { %4606 = vmatprep.mubr.bf16.mxu0 %v7649_v35  ;;  %v7832_v35 = vld [vmem:[%s10572_s1 + $0x2c8] sm:$0xff]  }
  0x89   :  { %3740 = vmatmul.mubr.bf16.gmra.mrb[36].mxu1 %v7651_v37  ;;  %v7741_v37 = vld [vmem:[%s10573_s0 + $0x9a4] ss:$56 sps:$4 sm:$0xff]  }
  0x8a   :  { %4607 = vmatmul.mubr.bf16.gmra.mrb[36].mxu0 %v7652_v38  ;;  %3747 = vmatprep.mubr.bf16.mxu1 %v7654_v39  ;;  %v7743_v38 = vld [vmem:[%s10573_s0 + $0x2c4] ss:$56 sps:$4 sm:$0xff]   ;;  %v7846_v39 = vld [vmem:[%s10572_s1 + $0x2d0] sm:$0xff]  }
  0x8b   :  { %4614 = vmatprep.mubr.bf16.mxu0 %v7656_v40  ;;  %v7745_v40 = vld [vmem:[%s10573_s0 + $0x9a0] ss:$56 sps:$4 sm:$0xff]  }
  0x91   :  { %3748 = vmatmul.mubr.bf16.gmra.mrb[40].mxu1 %v7658_v41  ;;  %v7746_v41 = vld [vmem:[%s10573_s0 + $0x2c0] ss:$56 sps:$4 sm:$0xff]  }
  0x92   :  { %4615 = vmatmul.mubr.bf16.gmra.mrb[40].mxu0 %v7659_v42  ;;  %3755 = vmatprep.mubr.bf16.mxu1 %v7662_v43  ;;  %v7749_v42 = vld [vmem:[%s10573_s0 + $0xa14] ss:$56 sps:$4 sm:$0xff]  }
  0x93   :  { %4622 = vmatprep.mubr.bf16.mxu0 %v7664_v44  ;;  %v7751_v43 = vld [vmem:[%s10573_s0 + $0x334] ss:$56 sps:$4 sm:$0xff]   ;;  %v7860_v44 = vld [vmem:[%s10572_s1 + $0x2d8] sm:$0xff]  }
  0x99   :  { %3756 = vmatmul.mubr.bf16.gmra.mrb[44].mxu1 %v7666_v46  ;;  %v7754_v46 = vld [vmem:[%s10573_s0 + $0x330] ss:$56 sps:$4 sm:$0xff]  }
  0x9a   :  { %4623 = vmatmul.mubr.bf16.gmra.mrb[44].mxu0 %v7667_v47  ;;  %3763 = vmatprep.mubr.bf16.mxu1 %v7669_v48  ;;  %v7755_v47 = vld [vmem:[%s10573_s0 + $0xa84] ss:$56 sps:$4 sm:$0xff]  }
  0x9b   :  { %4630 = vmatprep.mubr.bf16.mxu0 %v7671_v49  ;;  %v7757_v48 = vld [vmem:[%s10573_s0 + $0x3a4] ss:$56 sps:$4 sm:$0xff]   ;;  %v7759_v49 = vld [vmem:[%s10573_s0 + $0xa80] ss:$56 sps:$4 sm:$0xff]  }
  0xa1   :  { %3764 = vmatmul.mubr.bf16.gmra.mrb[48].mxu1 %v7673_v50  ;;  %v7760_v50 = vld [vmem:[%s10573_s0 + $0x3a0] ss:$56 sps:$4 sm:$0xff]  }
  0xa2   :  { %4631 = vmatmul.mubr.bf16.gmra.mrb[48].mxu0 %v7674_v51  ;;  %3771 = vmatprep.mubr.bf16.mxu1 %v7677_v52  ;;  %v7763_v51 = vld [vmem:[%s10573_s0 + $0xaf4] ss:$56 sps:$4 sm:$0xff]  }
  0xa3   :  { %4638 = vmatprep.mubr.bf16.mxu0 %v7679_v53  ;;  %v7765_v52 = vld [vmem:[%s10573_s0 + $0x414] ss:$56 sps:$4 sm:$0xff]   ;;  %v7874_v53 = vld [vmem:[%s10572_s1 + $0x2e0] sm:$0xff]  }
  0xa9   :  { %3772 = vmatmul.mubr.bf16.gmra.mrb[52].mxu1 %v7681_v55  ;;  %v7768_v55 = vld [vmem:[%s10573_s0 + $0x410] ss:$56 sps:$4 sm:$0xff]  }
  0xaa   :  { %4639 = vmatmul.mubr.bf16.gmra.mrb[52].mxu0 %v7682_v56  ;;  %3779 = vmatprep.mubr.bf16.mxu1 %v7684_v57  ;;  %v7769_v56 = vld [vmem:[%s10573_s0 + $0xb64] ss:$56 sps:$4 sm:$0xff]  }
  0xab   :  { %4646 = vmatprep.mubr.bf16.mxu0 %v7686_v58  ;;  %v7771_v57 = vld [vmem:[%s10573_s0 + $0x484] ss:$56 sps:$4 sm:$0xff]   ;;  %v7773_v58 = vld [vmem:[%s10573_s0 + $0xb60] ss:$56 sps:$4 sm:$0xff]  }
  0xb1   :  { %3780 = vmatmul.mubr.bf16.gmra.mrb[56].mxu1 %v7688_v59  ;;  %v7774_v59 = vld [vmem:[%s10573_s0 + $0x480] ss:$56 sps:$4 sm:$0xff]  }
  0xb2   :  { %4647 = vmatmul.mubr.bf16.gmra.mrb[56].mxu0 %v7689_v60  ;;  %3787 = vmatprep.mubr.bf16.mxu1 %v7692_v61  ;;  %v7777_v60 = vld [vmem:[%s10573_s0 + $0xbd4] ss:$56 sps:$4 sm:$0xff]  }
  0xb3   :  { %4654 = vmatprep.mubr.bf16.mxu0 %v7694_v62  ;;  %v7779_v61 = vld [vmem:[%s10573_s0 + $0x4f4] ss:$56 sps:$4 sm:$0xff]  }
  0xb4   :  { %v7888_v62 = vld [vmem:[%s10572_s1 + $0x2e8] sm:$0xff]  }
  0xb9   :  { %3788 = vmatmul.mubr.bf16.gmra.mrb[60].mxu1 %v7696_v1  ;;  %v7782_v1 = vld [vmem:[%s10573_s0 + $0x4f0] ss:$56 sps:$4 sm:$0xff]  }
  0xba   :  { %4655 = vmatmul.mubr.bf16.gmra.mrb[60].mxu0 %v7697_v2  ;;  %3795 = vmatprep.mubr.bf16.mxu1 %v7699_v3  ;;  %v7783_v2 = vld [vmem:[%s10573_s0 + $0xc44] ss:$56 sps:$4 sm:$0xff]  }
  0xbb   :  { %4823 = vmatprep.mubr.bf16.mxu0 %v7703_v4  ;;  %v7785_v3 = vld [vmem:[%s10573_s0 + $0x564] ss:$56 sps:$4 sm:$0xff]   ;;  %v7787_v4 = vld [vmem:[%s10573_s0 + $0xc40] ss:$56 sps:$4 sm:$0xff]  }
  0xc1   :  { %3796 = vmatmul.mubr.bf16.gmra.mrb[64].mxu1 %v7704_v5  ;;  %v7788_v5 = vld [vmem:[%s10573_s0 + $0x560] ss:$56 sps:$4 sm:$0xff]  }
  0xc2   :  { %4824 = vmatmul.mubr.bf16.vlgmr.msra.gmra.mrb[0].mxu0 %v7701_v6  ;;  %3803 = vmatprep.mubr.bf16.mxu1 %v7707_v7  ;;  %v7791_v6 = vld [vmem:[%s10573_s0 + $0xcb4] ss:$56 sps:$4 sm:$0xff]  }
  0xc3   :  { %5081 = vmatpush1.bf16.msra.mxu0 %v7706_v8  ;;  %4831 = vmatprep.mubr.bf16.mxu0 %v7709_v9  ;;  %v7793_v7 = vld [vmem:[%s10573_s0 + $0x5d4] ss:$56 sps:$4 sm:$0xff]   ;;  %v7795_v9 = vld [vmem:[%s10573_s0 + $0xcb0] ss:$56 sps:$4 sm:$0xff]  }
  0xc4   :  { %5082 = vmatprep.subr.bf16.mxu0 %v8369_v0  ;;  %v7902_v8 = vld [vmem:[%s10572_s1 + $0x2f0] sm:$0xff]  }
  0xc7   :  { %5083 = vmatpush1.bf16.msra.mxu0 %v7720_v11  ;;  %v7797_v11 = vld [vmem:[%s10573_s0 + $0xd24] ss:$56 sps:$4 sm:$0xff]  }
  0xc8   :  { %5084 = vmatprep.subr.bf16.mxu0 %v8369_v0 }
  0xc9   :  { %3804 = vmatmul.mubr.bf16.gmra.mrb[68].mxu1 %v7711_v10  ;;  %v7796_v10 = vld [vmem:[%s10573_s0 + $0x5d0] ss:$56 sps:$4 sm:$0xff]  }
  0xca   :  { %4832 = vmatmul.mubr.bf16.gmra.mrb[4].mxu0 %v7712_v12  ;;  %3811 = vmatprep.mubr.bf16.mxu1 %v7713_v13  ;;  %v7799_v12 = vld [vmem:[%s10573_s0 + $0x644] ss:$56 sps:$4 sm:$0xff]   ;;  %v7801_v13 = vld [vmem:[%s10573_s0 + $0xd20] ss:$56 sps:$4 sm:$0xff]  }
  0xcb   :  { %4839 = vmatprep.mubr.bf16.mxu0 %v7715_v14  ;;  %5085 = vmatpush1.bf16.msra.mxu0 %v7734_v15  ;;  %v7802_v14 = vld [vmem:[%s10573_s0 + $0x640] ss:$56 sps:$4 sm:$0xff]   ;;  %v7805_v15 = vld [vmem:[%s10573_s0 + $0xd94] ss:$56 sps:$4 sm:$0xff]  }
  0xcc   :  { %5086 = vmatprep.subr.bf16.mxu0 %v8369_v0 }
  0xcf   :  { %5087 = vmatpush1.bf16.msra.mxu0 %v7748_v17  ;;  %v7916_v17 = vld [vmem:[%s10572_s1 + $0x2f8] sm:$0xff]  }
  0xd0   :  { %5088 = vmatprep.subr.bf16.mxu0 %v8369_v0 }
  0xd1   :  { %3812 = vmatmul.mubr.bf16.gmra.mrb[72].mxu1 %v7717_v16  ;;  %v7807_v16 = vld [vmem:[%s10573_s0 + $0x6b4] ss:$56 sps:$4 sm:$0xff]  }
  0xd2   :  { %4840 = vmatmul.mubr.bf16.gmra.mrb[8].mxu0 %v7718_v18  ;;  %3819 = vmatprep.mubr.bf16.mxu1 %v7721_v19  ;;  %v7809_v18 = vld [vmem:[%s10573_s0 + $0xd90] ss:$56 sps:$4 sm:$0xff]  }
  0xd3   :  { %4847 = vmatprep.mubr.bf16.mxu0 %v7723_v20  ;;  %5089 = vmatpush1.bf16.msra.mxu0 %v7762_v21  ;;  %v7810_v19 = vld [vmem:[%s10573_s0 + $0x6b0] ss:$56 sps:$4 sm:$0xff]   ;;  %v7813_v20 = vld [vmem:[%s10573_s0 + $0xc] ss:$56 sps:$4 sm:$0xff]  }
  0xd4   :  { %5090 = vmatprep.subr.bf16.mxu0 %v8369_v0  ;;  %v7814_v21 = vld [vmem:[%s10573_s0 + $0x724] ss:$56 sps:$4 sm:$0xff]  }
  0xd7   :  { %5091 = vmatpush1.bf16.msra.mxu0 %v7776_v23  ;;  %v7816_v23 = vld [vmem:[%s10573_s0 + $0x720] ss:$56 sps:$4 sm:$0xff]  }
  0xd8   :  { %5092 = vmatprep.subr.bf16.mxu0 %v8369_v0 }
  0xd9   :  { %3820 = vmatmul.mubr.bf16.gmra.mrb[76].mxu1 %v7725_v22  ;;  %v7811_v22 = vld [vmem:[%s10573_s0 + $0x8] ss:$56 sps:$4 sm:$0xff]  }
  0xda   :  { %4848 = vmatmul.mubr.bf16.gmra.mrb[12].mxu0 %v7726_v24  ;;  %3827 = vmatprep.mubr.bf16.mxu1 %v7727_v25  ;;  %v7817_v24 = vld [vmem:[%s10572_s1 + $0x100] sm:$0xff]   ;;  %v7819_v25 = vld [vmem:[%s10573_s0 + $0x7c] ss:$56 sps:$4 sm:$0xff]  }
  0xdb   :  { %4855 = vmatprep.mubr.bf16.mxu0 %v7729_v26  ;;  %5093 = vmatpush1.bf16.msra.mxu0 %v7790_v27  ;;  %v7821_v26 = vld [vmem:[%s10573_s0 + $0x794] ss:$56 sps:$4 sm:$0xff]  }
  0xdc   :  { %5094 = vmatprep.subr.bf16.mxu0 %v8369_v0  ;;  %v7831_v27 = vld [vmem:[%s10572_s1 + $0x108] sm:$0xff]  }
  0xdf   :  { %5095 = vmatpush1.bf16.msra.mxu0 %v7804_v29  ;;  %v7824_v29 = vld [vmem:[%s10573_s0 + $0x790] ss:$56 sps:$4 sm:$0xff]  }
  0xe0   :  { %5096 = vmatprep.subr.bf16.mxu0 %v8369_v0 }
  0xe1   :  { %3828 = vmatmul.mubr.bf16.gmra.mrb[80].mxu1 %v7731_v28  ;;  %v7823_v28 = vld [vmem:[%s10573_s0 + $0x78] ss:$56 sps:$4 sm:$0xff]  }
  0xe2   :  { %4856 = vmatmul.mubr.bf16.gmra.mrb[16].mxu0 %v7732_v30  ;;  %3835 = vmatprep.mubr.bf16.mxu1 %v7735_v31  ;;  %v7825_v30 = vld [vmem:[%s10573_s0 + $0xec] ss:$56 sps:$4 sm:$0xff]  }
  0xe3   :  { %4863 = vmatprep.mubr.bf16.mxu0 %v7737_v32  ;;  %5097 = vmatpush1.bf16.msra.mxu0 %v7818_v33  ;;  %v7827_v31 = vld [vmem:[%s10573_s0 + $0x804] ss:$56 sps:$4 sm:$0xff]   ;;  %v7845_v32 = vld [vmem:[%s10572_s1 + $0x110] sm:$0xff]  }
  0xe4   :  { %5098 = vmatprep.subr.bf16.mxu0 %v8369_v0  ;;  %v7859_v33 = vld [vmem:[%s10572_s1 + $0x118] sm:$0xff]  }
  0xe7   :  { %5099 = vmatpush1.bf16.msra.mxu0 %v7832_v35  ;;  %v7830_v35 = vld [vmem:[%s10573_s0 + $0x800] ss:$56 sps:$4 sm:$0xff]  }
  0xe8   :  { %5100 = vmatprep.subr.bf16.mxu0 %v8369_v0 }
  0xe9   :  { %3836 = vmatmul.mubr.bf16.gmra.mrb[84].mxu1 %v7739_v34  ;;  %v7829_v34 = vld [vmem:[%s10573_s0 + $0xe8] ss:$56 sps:$4 sm:$0xff]  }
  0xea   :  { %4864 = vmatmul.mubr.bf16.gmra.mrb[20].mxu0 %v7740_v36  ;;  %3843 = vmatprep.mubr.bf16.mxu1 %v7741_v37  ;;  %v7833_v36 = vld [vmem:[%s10573_s0 + $0x15c] ss:$56 sps:$4 sm:$0xff]  }
  0xeb   :  { %4871 = vmatprep.mubr.bf16.mxu0 %v7743_v38  ;;  %5101 = vmatpush1.bf16.msra.mxu0 %v7846_v39  ;;  %v7835_v37 = vld [vmem:[%s10573_s0 + $0x874] ss:$56 sps:$4 sm:$0xff]   ;;  %v7873_v38 = vld [vmem:[%s10572_s1 + $0x120] sm:$0xff]  }
  0xec   :  { %5102 = vmatprep.subr.bf16.mxu0 %v8369_v0  ;;  %v7887_v39 = vld [vmem:[%s10572_s1 + $0x128] sm:$0xff]  }
  0xef   :  { %5103 = vmatpush1.bf16.msra.mxu0 %v7860_v44  ;;  %v7901_v44 = vld [vmem:[%s10572_s1 + $0x130] sm:$0xff]  }
  0xf0   :  { %5104 = vmatprep.subr.bf16.mxu0 %v8369_v0 }
  0xf1   :  { %3844 = vmatmul.mubr.bf16.gmra.mrb[88].mxu1 %v7745_v40  ;;  %v7837_v40 = vld [vmem:[%s10573_s0 + $0x158] ss:$56 sps:$4 sm:$0xff]  }
  0xf2   :  { %4872 = vmatmul.mubr.bf16.gmra.mrb[24].mxu0 %v7746_v41  ;;  %3851 = vmatprep.mubr.bf16.mxu1 %v7749_v42  ;;  %v7838_v41 = vld [vmem:[%s10573_s0 + $0x870] ss:$56 sps:$4 sm:$0xff]   ;;  %v7839_v42 = vld [vmem:[%s10573_s0 + $0x1cc] ss:$56 sps:$4 sm:$0xff]  }
  0xf3   :  { %4879 = vmatprep.mubr.bf16.mxu0 %v7751_v43  ;;  %5105 = vmatpush1.bf16.msra.mxu0 %v7874_v53  ;;  %v7841_v43 = vld [vmem:[%s10573_s0 + $0x8e4] ss:$56 sps:$4 sm:$0xff]   ;;  %v7852_v53 = vld [vmem:[%s10573_s0 + $0x950] ss:$56 sps:$4 sm:$0xff]  }
  0xf4   :  { %5106 = vmatprep.subr.bf16.mxu0 %v8369_v0 }
  0xf7   :  { %5107 = vmatpush1.bf16.msra.mxu0 %v7888_v62  ;;  %v7865_v62 = vld [vmem:[%s10573_s0 + $0x318] ss:$56 sps:$4 sm:$0xff]  }
  0xf8   :  { %5108 = vmatprep.subr.bf16.mxu0 %v8369_v0 }
  0xf9   :  { %3852 = vmatmul.mubr.bf16.gmra.mrb[92].mxu1 %v7753_v45  ;;  %v7915_v45 = vld [vmem:[%s10572_s1 + $0x138] sm:$0xff]  }
  0xfa   :  { %4880 = vmatmul.mubr.bf16.gmra.mrb[28].mxu0 %v7754_v46  ;;  %3859 = vmatprep.mubr.bf16.mxu1 %v7755_v47  ;;  %v7843_v46 = vld [vmem:[%s10573_s0 + $0x1c8] ss:$56 sps:$4 sm:$0xff]  }
  0xfb   :  { %4887 = vmatprep.mubr.bf16.mxu0 %v7757_v48  ;;  %5109 = vmatpush1.bf16.msra.mxu0 %v7902_v8  ;;  %v7844_v47 = vld [vmem:[%s10573_s0 + $0x8e0] ss:$56 sps:$4 sm:$0xff]   ;;  %v7847_v48 = vld [vmem:[%s10573_s0 + $0x23c] ss:$56 sps:$4 sm:$0xff]  }
  0xfc   :  { %5110 = vmatprep.subr.bf16.mxu0 %v8369_v0  ;;  %v7879_v8 = vld [vmem:[%s10573_s0 + $0x3f8] ss:$56 sps:$4 sm:$0xff]  }
  0xff   :  { %5111 = vmatpush1.bf16.msra.mxu0 %v7916_v17  ;;  %v7893_v17 = vld [vmem:[%s10573_s0 + $0x4d8] ss:$56 sps:$4 sm:$0xff]  }
 0x100   :  { %5369 = vmatprep.subr.bf16.mxu0 %v8369_v0 }
 0x101   :  { %3860 = vmatmul.mubr.bf16.gmra.mrb[96].mxu1 %v7759_v49  ;;  %v7849_v49 = vld [vmem:[%s10573_s0 + $0x954] ss:$56 sps:$4 sm:$0xff]  }
 0x102   :  { %4888 = vmatmul.mubr.bf16.gmra.mrb[32].mxu0 %v7760_v50  ;;  %3867 = vmatprep.mubr.bf16.mxu1 %v7763_v51  ;;  %v7929_v50 = vld [vmem:[%s10572_s1 + $0x140] sm:$0xff]   ;;  %v7943_v51 = vld [vmem:[%s10572_s1 + $0x148] sm:$0xff]  }
 0x103   :  { %4895 = vmatprep.mubr.bf16.mxu0 %v7765_v52  ;;  %v7851_v52 = vld [vmem:[%s10573_s0 + $0x238] ss:$56 sps:$4 sm:$0xff]  }
 0x109   :  { %3868 = vmatmul.mubr.bf16.gmra.mrb[100].mxu1 %v7767_v54  ;;  %v7853_v54 = vld [vmem:[%s10573_s0 + $0x2ac] ss:$56 sps:$4 sm:$0xff]  }
 0x10a   :  { %4896 = vmatmul.mubr.bf16.gmra.mrb[36].mxu0 %v7768_v55  ;;  %3875 = vmatprep.mubr.bf16.mxu1 %v7769_v56  ;;  %v7855_v55 = vld [vmem:[%s10573_s0 + $0x9c4] ss:$56 sps:$4 sm:$0xff]   ;;  %v7957_v56 = vld [vmem:[%s10572_s1 + $0x150] sm:$0xff]  }
 0x10b   :  { %4903 = vmatprep.mubr.bf16.mxu0 %v7771_v57  ;;  %v7857_v57 = vld [vmem:[%s10573_s0 + $0x2a8] ss:$56 sps:$4 sm:$0xff]  }
 0x111   :  { %3876 = vmatmul.mubr.bf16.gmra.mrb[104].mxu1 %v7773_v58  ;;  %v7858_v58 = vld [vmem:[%s10573_s0 + $0x9c0] ss:$56 sps:$4 sm:$0xff]  }
 0x112   :  { %4904 = vmatmul.mubr.bf16.gmra.mrb[40].mxu0 %v7774_v59  ;;  %3883 = vmatprep.mubr.bf16.mxu1 %v7777_v60  ;;  %v7861_v59 = vld [vmem:[%s10573_s0 + $0x31c] ss:$56 sps:$4 sm:$0xff]  }
 0x113   :  { %4911 = vmatprep.mubr.bf16.mxu0 %v7779_v61  ;;  %v7863_v60 = vld [vmem:[%s10573_s0 + $0xa34] ss:$56 sps:$4 sm:$0xff]   ;;  %v7971_v61 = vld [vmem:[%s10572_s1 + $0x158] sm:$0xff]  }
 0x119   :  { %3884 = vmatmul.mubr.bf16.gmra.mrb[108].mxu1 %v7781_v63  ;;  %v7866_v63 = vld [vmem:[%s10573_s0 + $0xa30] ss:$56 sps:$4 sm:$0xff]  }
 0x11a   :  { %4912 = vmatmul.mubr.bf16.gmra.mrb[44].mxu0 %v7782_v1  ;;  %3891 = vmatprep.mubr.bf16.mxu1 %v7783_v2  ;;  %v7867_v1 = vld [vmem:[%s10573_s0 + $0x38c] ss:$56 sps:$4 sm:$0xff]  }
 0x11b   :  { %4919 = vmatprep.mubr.bf16.mxu0 %v7785_v3  ;;  %v7869_v2 = vld [vmem:[%s10573_s0 + $0xaa4] ss:$56 sps:$4 sm:$0xff]   ;;  %v7871_v3 = vld [vmem:[%s10573_s0 + $0x388] ss:$56 sps:$4 sm:$0xff]  }
 0x121   :  { %3892 = vmatmul.mubr.bf16.gmra.mrb[112].mxu1 %v7787_v4  ;;  %v7872_v4 = vld [vmem:[%s10573_s0 + $0xaa0] ss:$56 sps:$4 sm:$0xff]  }
 0x122   :  { %4920 = vmatmul.mubr.bf16.gmra.mrb[48].mxu0 %v7788_v5  ;;  %3899 = vmatprep.mubr.bf16.mxu1 %v7791_v6  ;;  %v7875_v5 = vld [vmem:[%s10573_s0 + $0x3fc] ss:$56 sps:$4 sm:$0xff]  }
 0x123   :  { %4927 = vmatprep.mubr.bf16.mxu0 %v7793_v7  ;;  %v7877_v6 = vld [vmem:[%s10573_s0 + $0xb14] ss:$56 sps:$4 sm:$0xff]   ;;  %v7984_v7 = vld [vmem:[%s10572_s1 + $0x160] sm:$0xff]  }
 0x129   :  { %3900 = vmatmul.mubr.bf16.gmra.mrb[116].mxu1 %v7795_v9  ;;  %v7880_v9 = vld [vmem:[%s10573_s0 + $0xb10] ss:$56 sps:$4 sm:$0xff]  }
 0x12a   :  { %4928 = vmatmul.mubr.bf16.gmra.mrb[52].mxu0 %v7796_v10  ;;  %3907 = vmatprep.mubr.bf16.mxu1 %v7797_v11  ;;  %v7881_v10 = vld [vmem:[%s10573_s0 + $0x46c] ss:$56 sps:$4 sm:$0xff]  }
 0x12b   :  { %4935 = vmatprep.mubr.bf16.mxu0 %v7799_v12  ;;  %v7883_v11 = vld [vmem:[%s10573_s0 + $0xb84] ss:$56 sps:$4 sm:$0xff]   ;;  %v7885_v12 = vld [vmem:[%s10573_s0 + $0x468] ss:$56 sps:$4 sm:$0xff]  }
 0x131   :  { %3908 = vmatmul.mubr.bf16.gmra.mrb[120].mxu1 %v7801_v13  ;;  %v7886_v13 = vld [vmem:[%s10573_s0 + $0xb80] ss:$56 sps:$4 sm:$0xff]  }
 0x132   :  { %4936 = vmatmul.mubr.bf16.gmra.mrb[56].mxu0 %v7802_v14  ;;  %3915 = vmatprep.mubr.bf16.mxu1 %v7805_v15  ;;  %v7889_v14 = vld [vmem:[%s10573_s0 + $0x4dc] ss:$56 sps:$4 sm:$0xff]  }
 0x133   :  { %4943 = vmatprep.mubr.bf16.mxu0 %v7807_v16  ;;  %v7891_v15 = vld [vmem:[%s10573_s0 + $0xbf4] ss:$56 sps:$4 sm:$0xff]  }
 0x134   :  { %v7998_v16 = vld [vmem:[%s10572_s1 + $0x168] sm:$0xff]  }
 0x139   :  { %3916 = vmatmul.mubr.bf16.gmra.mrb[124].mxu1 %v7809_v18  ;;  %v7894_v18 = vld [vmem:[%s10573_s0 + $0xbf0] ss:$56 sps:$4 sm:$0xff]  }
 0x13a   :  { %4944 = vmatmul.mubr.bf16.gmra.mrb[60].mxu0 %v7810_v19  ;;  %3956 = vmatprep.mubr.bf16.mxu1 %v7813_v20  ;;  %v7895_v19 = vld [vmem:[%s10573_s0 + $0x54c] ss:$56 sps:$4 sm:$0xff]  }
 0x13b   :  { %4951 = vmatprep.mubr.bf16.mxu0 %v7814_v21  ;;  %v7897_v20 = vld [vmem:[%s10573_s0 + $0xc64] ss:$56 sps:$4 sm:$0xff]   ;;  %v7899_v21 = vld [vmem:[%s10573_s0 + $0x548] ss:$56 sps:$4 sm:$0xff]  }
 0x141   :  { %3957 = vmatmul.mubr.bf16.vlgmr.msra.gmra.mrb[0].mxu1 %v7811_v22  ;;  %v7900_v22 = vld [vmem:[%s10573_s0 + $0xc60] ss:$56 sps:$4 sm:$0xff]  }
 0x142   :  { %4952 = vmatmul.mubr.bf16.gmra.mrb[64].mxu0 %v7816_v23  ;;  %4214 = vmatpush1.bf16.msra.mxu1 %v7817_v24  ;;  %v7903_v23 = vld [vmem:[%s10573_s0 + $0x5bc] ss:$56 sps:$4 sm:$0xff]  }
 0x143   :  { %3964 = vmatprep.mubr.bf16.mxu1 %v7819_v25  ;;  %4959 = vmatprep.mubr.bf16.mxu0 %v7821_v26  ;;  %v7905_v24 = vld [vmem:[%s10573_s0 + $0xcd4] ss:$56 sps:$4 sm:$0xff]   ;;  %v7907_v26 = vld [vmem:[%s10573_s0 + $0x5b8] ss:$56 sps:$4 sm:$0xff]  }
 0x144   :  { %4215 = vmatprep.subr.bf16.mxu1 %v8369_v0  ;;  %v8012_v25 = vld [vmem:[%s10572_s1 + $0x170] sm:$0xff]  }
 0x146   :  { %4216 = vmatpush1.bf16.msra.mxu1 %v7831_v27  ;;  %v7908_v27 = vld [vmem:[%s10573_s0 + $0xcd0] ss:$56 sps:$4 sm:$0xff]  }
 0x147   :  { %4217 = vmatprep.subr.bf16.mxu1 %v8369_v0 }
 0x149   :  { %3965 = vmatmul.mubr.bf16.gmra.mrb[4].mxu1 %v7823_v28  ;;  %v7909_v28 = vld [vmem:[%s10573_s0 + $0x62c] ss:$56 sps:$4 sm:$0xff]  }
 0x14a   :  { %4960 = vmatmul.mubr.bf16.gmra.mrb[68].mxu0 %v7824_v29  ;;  %3972 = vmatprep.mubr.bf16.mxu1 %v7825_v30  ;;  %v7911_v29 = vld [vmem:[%s10573_s0 + $0xd44] ss:$56 sps:$4 sm:$0xff]   ;;  %v7913_v30 = vld [vmem:[%s10573_s0 + $0x628] ss:$56 sps:$4 sm:$0xff]  }
 0x14b   :  { %4967 = vmatprep.mubr.bf16.mxu0 %v7827_v31  ;;  %4218 = vmatpush1.bf16.msra.mxu1 %v7845_v32  ;;  %v7914_v31 = vld [vmem:[%s10573_s0 + $0xd40] ss:$56 sps:$4 sm:$0xff]   ;;  %v7917_v32 = vld [vmem:[%s10573_s0 + $0x69c] ss:$56 sps:$4 sm:$0xff]  }
 0x14c   :  { %4219 = vmatprep.subr.bf16.mxu1 %v8369_v0 }
 0x14f   :  { %4220 = vmatpush1.bf16.msra.mxu1 %v7859_v33  ;;  %v7919_v33 = vld [vmem:[%s10573_s0 + $0xdb4] ss:$56 sps:$4 sm:$0xff]  }
 0x150   :  { %4221 = vmatprep.subr.bf16.mxu1 %v8369_v0 }
 0x151   :  { %3973 = vmatmul.mubr.bf16.gmra.mrb[8].mxu1 %v7829_v34  ;;  %v8026_v34 = vld [vmem:[%s10572_s1 + $0x178] sm:$0xff]  }
 0x152   :  { %4968 = vmatmul.mubr.bf16.gmra.mrb[72].mxu0 %v7830_v35  ;;  %3980 = vmatprep.mubr.bf16.mxu1 %v7833_v36  ;;  %v7921_v35 = vld [vmem:[%s10573_s0 + $0x698] ss:$56 sps:$4 sm:$0xff]  }
 0x153   :  { %4975 = vmatprep.mubr.bf16.mxu0 %v7835_v37  ;;  %4222 = vmatpush1.bf16.msra.mxu1 %v7873_v38  ;;  %v7922_v36 = vld [vmem:[%s10573_s0 + $0xdb0] ss:$56 sps:$4 sm:$0xff]   ;;  %v7923_v37 = vld [vmem:[%s10573_s0 + $0x70c] ss:$56 sps:$4 sm:$0xff]  }
 0x154   :  { %4223 = vmatprep.subr.bf16.mxu1 %v8369_v0  ;;  %v7927_v38 = vld [vmem:[%s10573_s0 + $0x2c] ss:$56 sps:$4 sm:$0xff]  }
 0x157   :  { %4224 = vmatpush1.bf16.msra.mxu1 %v7887_v39  ;;  %v7928_v39 = vld [vmem:[%s10573_s0 + $0x708] ss:$56 sps:$4 sm:$0xff]  }
 0x158   :  { %4225 = vmatprep.subr.bf16.mxu1 %v8369_v0 }
 0x159   :  { %3981 = vmatmul.mubr.bf16.gmra.mrb[12].mxu1 %v7837_v40  ;;  %v7925_v40 = vld [vmem:[%s10573_s0 + $0x28] ss:$56 sps:$4 sm:$0xff]  }
 0x15a   :  { %4976 = vmatmul.mubr.bf16.gmra.mrb[76].mxu0 %v7838_v41  ;;  %3988 = vmatprep.mubr.bf16.mxu1 %v7839_v42  ;;  %v7931_v41 = vld [vmem:[%s10573_s0 + $0x77c] ss:$56 sps:$4 sm:$0xff]   ;;  %v7930_v42 = vld [vmem:[%s10572_s1 + $0x300] sm:$0xff]  }
 0x15b   :  { %4983 = vmatprep.mubr.bf16.mxu0 %v7841_v43  ;;  %4226 = vmatpush1.bf16.msra.mxu1 %v7901_v44  ;;  %v7933_v43 = vld [vmem:[%s10573_s0 + $0x9c] ss:$56 sps:$4 sm:$0xff]   ;;  %v7948_v44 = vld [vmem:[%s10572_s1 + $0x308] sm:$0xff]  }
 0x15c   :  { %4227 = vmatprep.subr.bf16.mxu1 %v8369_v0 }
 0x15f   :  { %4228 = vmatpush1.bf16.msra.mxu1 %v7915_v45  ;;  %v7935_v45 = vld [vmem:[%s10573_s0 + $0x778] ss:$56 sps:$4 sm:$0xff]  }
 0x160   :  { %4229 = vmatprep.subr.bf16.mxu1 %v8369_v0 }
 0x161   :  { %3989 = vmatmul.mubr.bf16.gmra.mrb[16].mxu1 %v7843_v46  ;;  %v7936_v46 = vld [vmem:[%s10573_s0 + $0x98] ss:$56 sps:$4 sm:$0xff]  }
 0x162   :  { %4984 = vmatmul.mubr.bf16.gmra.mrb[80].mxu0 %v7844_v47  ;;  %3996 = vmatprep.mubr.bf16.mxu1 %v7847_v48  ;;  %v7937_v47 = vld [vmem:[%s10573_s0 + $0x7ec] ss:$56 sps:$4 sm:$0xff]  }
 0x163   :  { %4991 = vmatprep.mubr.bf16.mxu0 %v7849_v49  ;;  %4230 = vmatpush1.bf16.msra.mxu1 %v7929_v50  ;;  %v7939_v48 = vld [vmem:[%s10573_s0 + $0x10c] ss:$56 sps:$4 sm:$0xff]   ;;  %v7964_v49 = vld [vmem:[%s10572_s1 + $0x310] sm:$0xff]   ;;  %v7985_v50 = vld [vmem:[%s10572_s1 + $0x318] sm:$0xff]  }
 0x164   :  { %4231 = vmatprep.subr.bf16.mxu1 %v8369_v0 }
 0x167   :  { %4232 = vmatpush1.bf16.msra.mxu1 %v7943_v51  ;;  %v7941_v51 = vld [vmem:[%s10573_s0 + $0x7e8] ss:$56 sps:$4 sm:$0xff]  }
 0x168   :  { %4233 = vmatprep.subr.bf16.mxu1 %v8369_v0 }
 0x169   :  { %3997 = vmatmul.mubr.bf16.gmra.mrb[20].mxu1 %v7851_v52  ;;  %v7942_v52 = vld [vmem:[%s10573_s0 + $0x108] ss:$56 sps:$4 sm:$0xff]  }
 0x16a   :  { %4992 = vmatmul.mubr.bf16.gmra.mrb[84].mxu0 %v7852_v53  ;;  %4004 = vmatprep.mubr.bf16.mxu1 %v7853_v54  ;;  %v7944_v53 = vld [vmem:[%s10573_s0 + $0x85c] ss:$56 sps:$4 sm:$0xff]  }
 0x16b   :  { %4999 = vmatprep.mubr.bf16.mxu0 %v7855_v55  ;;  %4234 = vmatpush1.bf16.msra.mxu1 %v7957_v56  ;;  %v7946_v54 = vld [vmem:[%s10573_s0 + $0x17c] ss:$56 sps:$4 sm:$0xff]   ;;  %v8003_v55 = vld [vmem:[%s10572_s1 + $0x320] sm:$0xff]   ;;  %v8019_v56 = vld [vmem:[%s10572_s1 + $0x328] sm:$0xff]  }
 0x16c   :  { %4235 = vmatprep.subr.bf16.mxu1 %v8369_v0 }
 0x16f   :  { %4236 = vmatpush1.bf16.msra.mxu1 %v7971_v61  ;;  %v8039_v61 = vld [vmem:[%s10572_s1 + $0x330] sm:$0xff]  }
 0x170   :  { %4237 = vmatprep.subr.bf16.mxu1 %v8369_v0 }
 0x171   :  { %4005 = vmatmul.mubr.bf16.gmra.mrb[24].mxu1 %v7857_v57  ;;  %v7949_v57 = vld [vmem:[%s10573_s0 + $0x858] ss:$56 sps:$4 sm:$0xff]  }
 0x172   :  { %5000 = vmatmul.mubr.bf16.gmra.mrb[88].mxu0 %v7858_v58  ;;  %4012 = vmatprep.mubr.bf16.mxu1 %v7861_v59  ;;  %v7950_v58 = vld [vmem:[%s10573_s0 + $0x178] ss:$56 sps:$4 sm:$0xff]   ;;  %v7951_v59 = vld [vmem:[%s10573_s0 + $0x8cc] ss:$56 sps:$4 sm:$0xff]  }
 0x173   :  { %5007 = vmatprep.mubr.bf16.mxu0 %v7863_v60  ;;  %4238 = vmatpush1.bf16.msra.mxu1 %v7984_v7  ;;  %v7953_v60 = vld [vmem:[%s10573_s0 + $0x1ec] ss:$56 sps:$4 sm:$0xff]  }
 0x174   :  { %4239 = vmatprep.subr.bf16.mxu1 %v8369_v0  ;;  %v7967_v7 = vld [vmem:[%s10573_s0 + $0x2cc] ss:$56 sps:$4 sm:$0xff]  }
 0x177   :  { %4240 = vmatpush1.bf16.msra.mxu1 %v7998_v16  ;;  %v7980_v16 = vld [vmem:[%s10573_s0 + $0x3ac] ss:$56 sps:$4 sm:$0xff]  }
 0x178   :  { %4241 = vmatprep.subr.bf16.mxu1 %v8369_v0 }
 0x179   :  { %4013 = vmatmul.mubr.bf16.gmra.mrb[28].mxu1 %v7865_v62  ;;  %v8056_v62 = vld [vmem:[%s10572_s1 + $0x338] sm:$0xff]  }
 0x17a   :  { %5008 = vmatmul.mubr.bf16.gmra.mrb[92].mxu0 %v7866_v63  ;;  %4020 = vmatprep.mubr.bf16.mxu1 %v7867_v1  ;;  %v7955_v63 = vld [vmem:[%s10573_s0 + $0x8c8] ss:$56 sps:$4 sm:$0xff]  }
 0x17b   :  { %5015 = vmatprep.mubr.bf16.mxu0 %v7869_v2  ;;  %4242 = vmatpush1.bf16.msra.mxu1 %v8012_v25  ;;  %v7956_v1 = vld [vmem:[%s10573_s0 + $0x1e8] ss:$56 sps:$4 sm:$0xff]   ;;  %v7958_v2 = vld [vmem:[%s10573_s0 + $0x93c] ss:$56 sps:$4 sm:$0xff]   ;;  %v7994_v25 = vld [vmem:[%s10573_s0 + $0x48c] ss:$56 sps:$4 sm:$0xff]  }
 0x17c   :  { %4243 = vmatprep.subr.bf16.mxu1 %v8369_v0 }
 0x17f   :  { %4244 = vmatpush1.bf16.msra.mxu1 %v8026_v34  ;;  %v8008_v34 = vld [vmem:[%s10573_s0 + $0x56c] ss:$56 sps:$4 sm:$0xff]  }
 0x180   :  { %6785 = vmatprep.subr.bf16.mxu1 %v8369_v0 }
 0x181   :  { %4021 = vmatmul.mubr.bf16.gmra.mrb[32].mxu1 %v7871_v3  ;;  %v7960_v3 = vld [vmem:[%s10573_s0 + $0x25c] ss:$56 sps:$4 sm:$0xff]  }
 0x182   :  { %5016 = vmatmul.mubr.bf16.gmra.mrb[96].mxu0 %v7872_v4  ;;  %4028 = vmatprep.mubr.bf16.mxu1 %v7875_v5  ;;  %v7962_v4 = vld [vmem:[%s10573_s0 + $0x938] ss:$56 sps:$4 sm:$0xff]  }
 0x183   :  { %5023 = vmatprep.mubr.bf16.mxu0 %v7877_v6  ;;  %v7963_v5 = vld [vmem:[%s10573_s0 + $0x258] ss:$56 sps:$4 sm:$0xff]   ;;  %v7965_v6 = vld [vmem:[%s10573_s0 + $0x9ac] ss:$56 sps:$4 sm:$0xff]  }
 0x189   :  { %4029 = vmatmul.mubr.bf16.gmra.mrb[36].mxu1 %v7879_v8  ;;  %v8071_v8 = vld [vmem:[%s10572_s1 + $0x340] sm:$0xff]  }
 0x18a   :  { %5024 = vmatmul.mubr.bf16.gmra.mrb[100].mxu0 %v7880_v9  ;;  %4036 = vmatprep.mubr.bf16.mxu1 %v7881_v10  ;;  %v7969_v9 = vld [vmem:[%s10573_s0 + $0x9a8] ss:$56 sps:$4 sm:$0xff]  }
 0x18b   :  { %5031 = vmatprep.mubr.bf16.mxu0 %v7883_v11  ;;  %v7970_v10 = vld [vmem:[%s10573_s0 + $0x2c8] ss:$56 sps:$4 sm:$0xff]   ;;  %v7972_v11 = vld [vmem:[%s10573_s0 + $0xa1c] ss:$56 sps:$4 sm:$0xff]  }
 0x191   :  { %4037 = vmatmul.mubr.bf16.gmra.mrb[40].mxu1 %v7885_v12  ;;  %v7974_v12 = vld [vmem:[%s10573_s0 + $0x33c] ss:$56 sps:$4 sm:$0xff]  }
 0x192   :  { %5032 = vmatmul.mubr.bf16.gmra.mrb[104].mxu0 %v7886_v13  ;;  %4044 = vmatprep.mubr.bf16.mxu1 %v7889_v14  ;;  %v7976_v13 = vld [vmem:[%s10573_s0 + $0xa18] ss:$56 sps:$4 sm:$0xff]  }
 0x193   :  { %5039 = vmatprep.mubr.bf16.mxu0 %v7891_v15  ;;  %v7977_v14 = vld [vmem:[%s10573_s0 + $0x338] ss:$56 sps:$4 sm:$0xff]   ;;  %v7978_v15 = vld [vmem:[%s10573_s0 + $0xa8c] ss:$56 sps:$4 sm:$0xff]  }
 0x199   :  { %4045 = vmatmul.mubr.bf16.gmra.mrb[44].mxu1 %v7893_v17  ;;  %v7982_v17 = vld [vmem:[%s10573_s0 + $0xa88] ss:$56 sps:$4 sm:$0xff]  }
 0x19a   :  { %5040 = vmatmul.mubr.bf16.gmra.mrb[108].mxu0 %v7894_v18  ;;  %4052 = vmatprep.mubr.bf16.mxu1 %v7895_v19  ;;  %v7983_v18 = vld [vmem:[%s10573_s0 + $0x3a8] ss:$56 sps:$4 sm:$0xff]   ;;  %v7986_v19 = vld [vmem:[%s10573_s0 + $0xafc] ss:$56 sps:$4 sm:$0xff]  }
 0x19b   :  { %5047 = vmatprep.mubr.bf16.mxu0 %v7897_v20  ;;  %v7988_v20 = vld [vmem:[%s10573_s0 + $0x41c] ss:$56 sps:$4 sm:$0xff]  }
 0x1a1   :  { %4053 = vmatmul.mubr.bf16.gmra.mrb[48].mxu1 %v7899_v21  ;;  %v8090_v21 = vld [vmem:[%s10572_s1 + $0x348] sm:$0xff]  }
 0x1a2   :  { %5048 = vmatmul.mubr.bf16.gmra.mrb[112].mxu0 %v7900_v22  ;;  %4060 = vmatprep.mubr.bf16.mxu1 %v7903_v23  ;;  %v7990_v22 = vld [vmem:[%s10573_s0 + $0xaf8] ss:$56 sps:$4 sm:$0xff]  }
 0x1a3   :  { %5055 = vmatprep.mubr.bf16.mxu0 %v7905_v24  ;;  %v7991_v23 = vld [vmem:[%s10573_s0 + $0x418] ss:$56 sps:$4 sm:$0xff]   ;;  %v7992_v24 = vld [vmem:[%s10573_s0 + $0xb6c] ss:$56 sps:$4 sm:$0xff]  }
 0x1a9   :  { %4061 = vmatmul.mubr.bf16.gmra.mrb[52].mxu1 %v7907_v26  ;;  %v7996_v26 = vld [vmem:[%s10573_s0 + $0xb68] ss:$56 sps:$4 sm:$0xff]  }
 0x1aa   :  { %5056 = vmatmul.mubr.bf16.gmra.mrb[116].mxu0 %v7908_v27  ;;  %4068 = vmatprep.mubr.bf16.mxu1 %v7909_v28  ;;  %v7997_v27 = vld [vmem:[%s10573_s0 + $0x488] ss:$56 sps:$4 sm:$0xff]   ;;  %v7999_v28 = vld [vmem:[%s10573_s0 + $0xbdc] ss:$56 sps:$4 sm:$0xff]  }
 0x1ab   :  { %5063 = vmatprep.mubr.bf16.mxu0 %v7911_v29  ;;  %v8001_v29 = vld [vmem:[%s10573_s0 + $0x4fc] ss:$56 sps:$4 sm:$0xff]  }
 0x1b1   :  { %4069 = vmatmul.mubr.bf16.gmra.mrb[56].mxu1 %v7913_v30  ;;  %v8107_v30 = vld [vmem:[%s10572_s1 + $0x350] sm:$0xff]  }
 0x1b2   :  { %5064 = vmatmul.mubr.bf16.gmra.mrb[120].mxu0 %v7914_v31  ;;  %4076 = vmatprep.mubr.bf16.mxu1 %v7917_v32  ;;  %v8004_v31 = vld [vmem:[%s10573_s0 + $0xbd8] ss:$56 sps:$4 sm:$0xff]  }
 0x1b3   :  { %5071 = vmatprep.mubr.bf16.mxu0 %v7919_v33  ;;  %v8005_v32 = vld [vmem:[%s10573_s0 + $0x4f8] ss:$56 sps:$4 sm:$0xff]   ;;  %v8006_v33 = vld [vmem:[%s10573_s0 + $0xc4c] ss:$56 sps:$4 sm:$0xff]  }
 0x1b9   :  { %4077 = vmatmul.mubr.bf16.gmra.mrb[60].mxu1 %v7921_v35  ;;  %v8010_v35 = vld [vmem:[%s10573_s0 + $0xc48] ss:$56 sps:$4 sm:$0xff]  }
 0x1ba   :  { %5072 = vmatmul.mubr.bf16.gmra.mrb[124].mxu0 %v7922_v36  ;;  %4084 = vmatprep.mubr.bf16.mxu1 %v7923_v37  ;;  %v8011_v36 = vld [vmem:[%s10573_s0 + $0x568] ss:$56 sps:$4 sm:$0xff]   ;;  %v8013_v37 = vld [vmem:[%s10573_s0 + $0xcbc] ss:$56 sps:$4 sm:$0xff]  }
 0x1bb   :  { %5112 = vmatprep.mubr.bf16.mxu0 %v7927_v38  ;;  %v8015_v38 = vld [vmem:[%s10573_s0 + $0x5dc] ss:$56 sps:$4 sm:$0xff]  }
 0x1c1   :  { %4085 = vmatmul.mubr.bf16.gmra.mrb[64].mxu1 %v7928_v39  ;;  %v8017_v39 = vld [vmem:[%s10573_s0 + $0xcb8] ss:$56 sps:$4 sm:$0xff]  }
 0x1c2   :  { %5113 = vmatmul.mubr.bf16.vlgmr.msra.gmra.mrb[0].mxu0 %v7925_v40  ;;  %4092 = vmatprep.mubr.bf16.mxu1 %v7931_v41  ;;  %v8018_v40 = vld [vmem:[%s10573_s0 + $0x5d8] ss:$56 sps:$4 sm:$0xff]   ;;  %v8020_v41 = vld [vmem:[%s10573_s0 + $0xd2c] ss:$56 sps:$4 sm:$0xff]  }
 0x1c3   :  { %5370 = vmatpush1.bf16.msra.mxu0 %v7930_v42  ;;  %5120 = vmatprep.mubr.bf16.mxu0 %v7933_v43  ;;  %v8022_v42 = vld [vmem:[%s10573_s0 + $0x64c] ss:$56 sps:$4 sm:$0xff]   ;;  %v8122_v43 = vld [vmem:[%s10572_s1 + $0x358] sm:$0xff]  }
 0x1c4   :  { %5371 = vmatprep.subr.bf16.mxu0 %v8369_v0 }
 0x1c7   :  { %5372 = vmatpush1.bf16.msra.mxu0 %v7948_v44  ;;  %v8024_v44 = vld [vmem:[%s10573_s0 + $0xd28] ss:$56 sps:$4 sm:$0xff]  }
 0x1c8   :  { %5373 = vmatprep.subr.bf16.mxu0 %v8369_v0 }
 0x1c9   :  { %4093 = vmatmul.mubr.bf16.gmra.mrb[68].mxu1 %v7935_v45  ;;  %v8025_v45 = vld [vmem:[%s10573_s0 + $0x648] ss:$56 sps:$4 sm:$0xff]  }
 0x1ca   :  { %5121 = vmatmul.mubr.bf16.gmra.mrb[4].mxu0 %v7936_v46  ;;  %4100 = vmatprep.mubr.bf16.mxu1 %v7937_v47  ;;  %v8027_v46 = vld [vmem:[%s10573_s0 + $0xd9c] ss:$56 sps:$4 sm:$0xff]  }
 0x1cb   :  { %5128 = vmatprep.mubr.bf16.mxu0 %v7939_v48  ;;  %5374 = vmatpush1.bf16.msra.mxu0 %v7964_v49  ;;  %v8029_v47 = vld [vmem:[%s10573_s0 + $0x6bc] ss:$56 sps:$4 sm:$0xff]   ;;  %v8031_v48 = vld [vmem:[%s10573_s0 + $0xd98] ss:$56 sps:$4 sm:$0xff]  }
 0x1cc   :  { %5375 = vmatprep.subr.bf16.mxu0 %v8369_v0  ;;  %v8032_v49 = vld [vmem:[%s10573_s0 + $0x6b8] ss:$56 sps:$4 sm:$0xff]  }
 0x1cf   :  { %5376 = vmatpush1.bf16.msra.mxu0 %v7985_v50  ;;  %v8035_v50 = vld [vmem:[%s10573_s0 + $0x14] ss:$56 sps:$4 sm:$0xff]  }
 0x1d0   :  { %5377 = vmatprep.subr.bf16.mxu0 %v8369_v0 }
 0x1d1   :  { %4101 = vmatmul.mubr.bf16.gmra.mrb[72].mxu1 %v7941_v51  ;;  %v8036_v51 = vld [vmem:[%s10573_s0 + $0x72c] ss:$56 sps:$4 sm:$0xff]  }
 0x1d2   :  { %5129 = vmatmul.mubr.bf16.gmra.mrb[8].mxu0 %v7942_v52  ;;  %4108 = vmatprep.mubr.bf16.mxu1 %v7944_v53  ;;  %v8033_v52 = vld [vmem:[%s10573_s0 + $0x10] ss:$56 sps:$4 sm:$0xff]  }
 0x1d3   :  { %5136 = vmatprep.mubr.bf16.mxu0 %v7946_v54  ;;  %5378 = vmatpush1.bf16.msra.mxu0 %v8003_v55  ;;  %v8038_v53 = vld [vmem:[%s10573_s0 + $0x728] ss:$56 sps:$4 sm:$0xff]   ;;  %v8040_v54 = vld [vmem:[%s10573_s0 + $0x84] ss:$56 sps:$4 sm:$0xff]  }
 0x1d4   :  { %5379 = vmatprep.subr.bf16.mxu0 %v8369_v0  ;;  %v8042_v55 = vld [vmem:[%s10573_s0 + $0x79c] ss:$56 sps:$4 sm:$0xff]  }
 0x1d7   :  { %5380 = vmatpush1.bf16.msra.mxu0 %v8019_v56  ;;  %v8327_v56 = vld [vmem:[%s10572_s1 + $0x180] sm:$0xff]  }
 0x1d8   :  { %5381 = vmatprep.subr.bf16.mxu0 %v8369_v0 }
 0x1d9   :  { %4109 = vmatmul.mubr.bf16.gmra.mrb[76].mxu1 %v7949_v57  ;;  %v8044_v57 = vld [vmem:[%s10573_s0 + $0x80] ss:$56 sps:$4 sm:$0xff]  }
 0x1da   :  { %5137 = vmatmul.mubr.bf16.gmra.mrb[12].mxu0 %v7950_v58  ;;  %4116 = vmatprep.mubr.bf16.mxu1 %v7951_v59  ;;  %v8045_v58 = vld [vmem:[%s10573_s0 + $0x798] ss:$56 sps:$4 sm:$0xff]   ;;  %v8046_v59 = vld [vmem:[%s10573_s0 + $0xf4] ss:$56 sps:$4 sm:$0xff]  }
 0x1db   :  { %5144 = vmatprep.mubr.bf16.mxu0 %v7953_v60  ;;  %5382 = vmatpush1.bf16.msra.mxu0 %v8039_v61  ;;  %v8328_v60 = vld [vmem:[%s10572_s1 + $0x188] sm:$0xff]  }
 0x1dc   :  { %5383 = vmatprep.subr.bf16.mxu0 %v8369_v0  ;;  %v8048_v61 = vld [vmem:[%s10573_s0 + $0x80c] ss:$56 sps:$4 sm:$0xff]  }
 0x1df   :  { %5384 = vmatpush1.bf16.msra.mxu0 %v8056_v62  ;;  %v8329_v62 = vld [vmem:[%s10572_s1 + $0x190] sm:$0xff]  }
 0x1e0   :  { %5385 = vmatprep.subr.bf16.mxu0 %v8369_v0 }
 0x1e1   :  { %4117 = vmatmul.mubr.bf16.gmra.mrb[80].mxu1 %v7955_v63  ;;  %v8050_v63 = vld [vmem:[%s10573_s0 + $0xf0] ss:$56 sps:$4 sm:$0xff]  }
 0x1e2   :  { %5145 = vmatmul.mubr.bf16.gmra.mrb[16].mxu0 %v7956_v1  ;;  %4124 = vmatprep.mubr.bf16.mxu1 %v7958_v2  ;;  %v8051_v1 = vld [vmem:[%s10573_s0 + $0x808] ss:$56 sps:$4 sm:$0xff]   ;;  %v8052_v2 = vld [vmem:[%s10573_s0 + $0x164] ss:$56 sps:$4 sm:$0xff]  }
 0x1e3   :  { %5152 = vmatprep.mubr.bf16.mxu0 %v7960_v3  ;;  %5386 = vmatpush1.bf16.msra.mxu0 %v8071_v8  ;;  %v8054_v3 = vld [vmem:[%s10573_s0 + $0x87c] ss:$56 sps:$4 sm:$0xff]  }
 0x1e4   :  { %5387 = vmatprep.subr.bf16.mxu0 %v8369_v0  ;;  %v8059_v8 = vld [vmem:[%s10573_s0 + $0x1d4] ss:$56 sps:$4 sm:$0xff]  }
 0x1e7   :  { %5388 = vmatpush1.bf16.msra.mxu0 %v8090_v21  ;;  %v8074_v21 = vld [vmem:[%s10573_s0 + $0x9cc] ss:$56 sps:$4 sm:$0xff]  }
 0x1e8   :  { %5389 = vmatprep.subr.bf16.mxu0 %v8369_v0 }
 0x1e9   :  { %4125 = vmatmul.mubr.bf16.gmra.mrb[84].mxu1 %v7962_v4  ;;  %v8330_v4 = vld [vmem:[%s10572_s1 + $0x198] sm:$0xff]  }
 0x1ea   :  { %5153 = vmatmul.mubr.bf16.gmra.mrb[20].mxu0 %v7963_v5  ;;  %4132 = vmatprep.mubr.bf16.mxu1 %v7965_v6  ;;  %v8331_v5 = vld [vmem:[%s10572_s1 + $0x1a0] sm:$0xff]  }
 0x1eb   :  { %5160 = vmatprep.mubr.bf16.mxu0 %v7967_v7  ;;  %5390 = vmatpush1.bf16.msra.mxu0 %v8107_v30  ;;  %v8057_v6 = vld [vmem:[%s10573_s0 + $0x160] ss:$56 sps:$4 sm:$0xff]  }
 0x1ec   :  { %5391 = vmatprep.subr.bf16.mxu0 %v8369_v0  ;;  %v8058_v7 = vld [vmem:[%s10573_s0 + $0x878] ss:$56 sps:$4 sm:$0xff]  }
 0x1ed   :  { %v8082_v30 = vld [vmem:[%s10573_s0 + $0x320] ss:$56 sps:$4 sm:$0xff]  }
 0x1ef   :  { %5392 = vmatpush1.bf16.msra.mxu0 %v8122_v43  ;;  %v8099_v43 = vld [vmem:[%s10573_s0 + $0xb8c] ss:$56 sps:$4 sm:$0xff]  }
 0x1f1   :  { %4133 = vmatmul.mubr.bf16.gmra.mrb[88].mxu1 %v7969_v9  ;;  %v8061_v9 = vld [vmem:[%s10573_s0 + $0x8ec] ss:$56 sps:$4 sm:$0xff]  }
 0x1f2   :  { %5161 = vmatmul.mubr.bf16.gmra.mrb[24].mxu0 %v7970_v10  ;;  %4140 = vmatprep.mubr.bf16.mxu1 %v7972_v11  ;;  %v8332_v10 = vld [vmem:[%s10572_s1 + $0x1a8] sm:$0xff]   ;;  %v8333_v11 = vld [vmem:[%s10572_s1 + $0x1b0] sm:$0xff]  }
 0x1f3   :  { %5168 = vmatprep.mubr.bf16.mxu0 %v7974_v12  ;;  %v8063_v12 = vld [vmem:[%s10573_s0 + $0x1d0] ss:$56 sps:$4 sm:$0xff]  }
 0x1f9   :  { %4141 = vmatmul.mubr.bf16.gmra.mrb[92].mxu1 %v7976_v13  ;;  %v8064_v13 = vld [vmem:[%s10573_s0 + $0x8e8] ss:$56 sps:$4 sm:$0xff]  }
 0x1fa   :  { %5169 = vmatmul.mubr.bf16.gmra.mrb[28].mxu0 %v7977_v14  ;;  %4148 = vmatprep.mubr.bf16.mxu1 %v7978_v15  ;;  %v8065_v14 = vld [vmem:[%s10573_s0 + $0x244] ss:$56 sps:$4 sm:$0xff]  }
 0x1fb   :  { %5176 = vmatprep.mubr.bf16.mxu0 %v7980_v16  ;;  %v8067_v15 = vld [vmem:[%s10573_s0 + $0x95c] ss:$56 sps:$4 sm:$0xff]  }
 0x1fc   :  { %v8334_v16 = vld [vmem:[%s10572_s1 + $0x1b8] sm:$0xff]  }
 0x201   :  { %4149 = vmatmul.mubr.bf16.gmra.mrb[96].mxu1 %v7982_v17  ;;  %v8335_v17 = vld [vmem:[%s10572_s1 + $0x1c0] sm:$0xff]  }
 0x202   :  { %5177 = vmatmul.mubr.bf16.gmra.mrb[32].mxu0 %v7983_v18  ;;  %4156 = vmatprep.mubr.bf16.mxu1 %v7986_v19  ;;  %v8069_v18 = vld [vmem:[%s10573_s0 + $0x240] ss:$56 sps:$4 sm:$0xff]  }
 0x203   :  { %5184 = vmatprep.mubr.bf16.mxu0 %v7988_v20  ;;  %v8070_v19 = vld [vmem:[%s10573_s0 + $0x958] ss:$56 sps:$4 sm:$0xff]   ;;  %v8072_v20 = vld [vmem:[%s10573_s0 + $0x2b4] ss:$56 sps:$4 sm:$0xff]  }
 0x209   :  { %4157 = vmatmul.mubr.bf16.gmra.mrb[100].mxu1 %v7990_v22  ;;  %v8336_v22 = vld [vmem:[%s10572_s1 + $0x1c8] sm:$0xff]  }
 0x20a   :  { %5185 = vmatmul.mubr.bf16.gmra.mrb[36].mxu0 %v7991_v23  ;;  %4164 = vmatprep.mubr.bf16.mxu1 %v7992_v24  ;;  %v8337_v23 = vld [vmem:[%s10572_s1 + $0x1d0] sm:$0xff]  }
 0x20b   :  { %5192 = vmatprep.mubr.bf16.mxu0 %v7994_v25  ;;  %v8076_v24 = vld [vmem:[%s10573_s0 + $0x2b0] ss:$56 sps:$4 sm:$0xff]  }
 0x20c   :  { %v8077_v25 = vld [vmem:[%s10573_s0 + $0x9c8] ss:$56 sps:$4 sm:$0xff]  }
 0x211   :  { %4165 = vmatmul.mubr.bf16.gmra.mrb[104].mxu1 %v7996_v26  ;;  %v8078_v26 = vld [vmem:[%s10573_s0 + $0x324] ss:$56 sps:$4 sm:$0xff]  }
 0x212   :  { %5193 = vmatmul.mubr.bf16.gmra.mrb[40].mxu0 %v7997_v27  ;;  %4172 = vmatprep.mubr.bf16.mxu1 %v7999_v28  ;;  %v8080_v27 = vld [vmem:[%s10573_s0 + $0xa3c] ss:$56 sps:$4 sm:$0xff]  }
 0x213   :  { %5200 = vmatprep.mubr.bf16.mxu0 %v8001_v29  ;;  %v8338_v28 = vld [vmem:[%s10572_s1 + $0x1d8] sm:$0xff]   ;;  %v8339_v29 = vld [vmem:[%s10572_s1 + $0x1e0] sm:$0xff]  }
 0x219   :  { %4173 = vmatmul.mubr.bf16.gmra.mrb[108].mxu1 %v8004_v31  ;;  %v8083_v31 = vld [vmem:[%s10573_s0 + $0xa38] ss:$56 sps:$4 sm:$0xff]  }
 0x21a   :  { %5201 = vmatmul.mubr.bf16.gmra.mrb[44].mxu0 %v8005_v32  ;;  %4180 = vmatprep.mubr.bf16.mxu1 %v8006_v33  ;;  %v8084_v32 = vld [vmem:[%s10573_s0 + $0x394] ss:$56 sps:$4 sm:$0xff]  }
 0x21b   :  { %5208 = vmatprep.mubr.bf16.mxu0 %v8008_v34  ;;  %v8086_v33 = vld [vmem:[%s10573_s0 + $0xaac] ss:$56 sps:$4 sm:$0xff]  }
 0x21c   :  { %v8340_v34 = vld [vmem:[%s10572_s1 + $0x1e8] sm:$0xff]  }
 0x221   :  { %4181 = vmatmul.mubr.bf16.gmra.mrb[112].mxu1 %v8010_v35  ;;  %v8341_v35 = vld [vmem:[%s10572_s1 + $0x1f0] sm:$0xff]  }
 0x222   :  { %5209 = vmatmul.mubr.bf16.gmra.mrb[48].mxu0 %v8011_v36  ;;  %4188 = vmatprep.mubr.bf16.mxu1 %v8013_v37  ;;  %v8088_v36 = vld [vmem:[%s10573_s0 + $0x390] ss:$56 sps:$4 sm:$0xff]  }
 0x223   :  { %5216 = vmatprep.mubr.bf16.mxu0 %v8015_v38  ;;  %v8089_v37 = vld [vmem:[%s10573_s0 + $0xaa8] ss:$56 sps:$4 sm:$0xff]   ;;  %v8091_v38 = vld [vmem:[%s10573_s0 + $0x404] ss:$56 sps:$4 sm:$0xff]  }
 0x229   :  { %4189 = vmatmul.mubr.bf16.gmra.mrb[116].mxu1 %v8017_v39  ;;  %v8093_v39 = vld [vmem:[%s10573_s0 + $0xb1c] ss:$56 sps:$4 sm:$0xff]  }
 0x22a   :  { %5217 = vmatmul.mubr.bf16.gmra.mrb[52].mxu0 %v8018_v40  ;;  %4196 = vmatprep.mubr.bf16.mxu1 %v8020_v41  ;;  %v8095_v40 = vld [vmem:[%s10573_s0 + $0x400] ss:$56 sps:$4 sm:$0xff]  }
 0x22b   :  { %5224 = vmatprep.mubr.bf16.mxu0 %v8022_v42  ;;  %v8096_v41 = vld [vmem:[%s10573_s0 + $0xb18] ss:$56 sps:$4 sm:$0xff]   ;;  %v8097_v42 = vld [vmem:[%s10573_s0 + $0x474] ss:$56 sps:$4 sm:$0xff]  }
 0x231   :  { %4197 = vmatmul.mubr.bf16.gmra.mrb[120].mxu1 %v8024_v44  ;;  %v8101_v44 = vld [vmem:[%s10573_s0 + $0x470] ss:$56 sps:$4 sm:$0xff]  }
 0x232   :  { %5225 = vmatmul.mubr.bf16.gmra.mrb[56].mxu0 %v8025_v45  ;;  %4204 = vmatprep.mubr.bf16.mxu1 %v8027_v46  ;;  %v8102_v45 = vld [vmem:[%s10573_s0 + $0xb88] ss:$56 sps:$4 sm:$0xff]   ;;  %v8103_v46 = vld [vmem:[%s10573_s0 + $0x4e4] ss:$56 sps:$4 sm:$0xff]  }
 0x233   :  { %5232 = vmatprep.mubr.bf16.mxu0 %v8029_v47  ;;  %v8105_v47 = vld [vmem:[%s10573_s0 + $0xbfc] ss:$56 sps:$4 sm:$0xff]  }
 0x239   :  { %4205 = vmatmul.mubr.bf16.gmra.mrb[124].mxu1 %v8031_v48  ;;  %v8108_v48 = vld [vmem:[%s10573_s0 + $0x4e0] ss:$56 sps:$4 sm:$0xff]  }
 0x23a   :  { %5233 = vmatmul.mubr.bf16.gmra.mrb[60].mxu0 %v8032_v49  ;;  %4245 = vmatprep.mubr.bf16.mxu1 %v8035_v50  ;;  %v8109_v49 = vld [vmem:[%s10573_s0 + $0xbf8] ss:$56 sps:$4 sm:$0xff]   ;;  %v8110_v50 = vld [vmem:[%s10573_s0 + $0x554] ss:$56 sps:$4 sm:$0xff]  }
 0x23b   :  { %5240 = vmatprep.mubr.bf16.mxu0 %v8036_v51  ;;  %v8112_v51 = vld [vmem:[%s10573_s0 + $0xc6c] ss:$56 sps:$4 sm:$0xff]  }
 0x241   :  { %4246 = vmatmul.mubr.bf16.vlgmr.msra.gmra.mrb[0].mxu1 %v8033_v52  ;;  %v8114_v52 = vld [vmem:[%s10573_s0 + $0x550] ss:$56 sps:$4 sm:$0xff]  }
 0x242   :  { %5241 = vmatmul.mubr.bf16.gmra.mrb[64].mxu0 %v8038_v53  ;;  %6801 = vmatpush1.bf16.msra.mxu1 %v8327_v56  ;;  %v8115_v53 = vld [vmem:[%s10573_s0 + $0xc68] ss:$56 sps:$4 sm:$0xff]  }
 0x243   :  { %4253 = vmatprep.mubr.bf16.mxu1 %v8040_v54  ;;  %5248 = vmatprep.mubr.bf16.mxu0 %v8042_v55  ;;  %v8116_v54 = vld [vmem:[%s10573_s0 + $0x5c4] ss:$56 sps:$4 sm:$0xff]   ;;  %v8120_v56 = vld [vmem:[%s10573_s0 + $0x5c0] ss:$56 sps:$4 sm:$0xff]  }
 0x244   :  { %6786 = vmatprep.subr.bf16.mxu1 %v8369_v0  ;;  %v8118_v55 = vld [vmem:[%s10573_s0 + $0xcdc] ss:$56 sps:$4 sm:$0xff]  }
 0x246   :  { %6802 = vmatpush1.bf16.msra.mxu1 %v8328_v60  ;;  %v8127_v60 = vld [vmem:[%s10573_s0 + $0x630] ss:$56 sps:$4 sm:$0xff]  }
 0x247   :  { %6787 = vmatprep.subr.bf16.mxu1 %v8369_v0 }
 0x249   :  { %4254 = vmatmul.mubr.bf16.gmra.mrb[4].mxu1 %v8044_v57  ;;  %v8121_v57 = vld [vmem:[%s10573_s0 + $0xcd8] ss:$56 sps:$4 sm:$0xff]  }
 0x24a   :  { %5249 = vmatmul.mubr.bf16.gmra.mrb[68].mxu0 %v8045_v58  ;;  %4261 = vmatprep.mubr.bf16.mxu1 %v8046_v59  ;;  %v8123_v58 = vld [vmem:[%s10573_s0 + $0x634] ss:$56 sps:$4 sm:$0xff]  }
 0x24b   :  { %5256 = vmatprep.mubr.bf16.mxu0 %v8048_v61  ;;  %6803 = vmatpush1.bf16.msra.mxu1 %v8329_v62  ;;  %v8125_v59 = vld [vmem:[%s10573_s0 + $0xd4c] ss:$56 sps:$4 sm:$0xff]   ;;  %v8128_v61 = vld [vmem:[%s10573_s0 + $0xd48] ss:$56 sps:$4 sm:$0xff]  }
 0x24c   :  { %6788 = vmatprep.subr.bf16.mxu1 %v8369_v0  ;;  %v8129_v62 = vld [vmem:[%s10573_s0 + $0x6a4] ss:$56 sps:$4 sm:$0xff]  }
 0x24f   :  { %6804 = vmatpush1.bf16.msra.mxu1 %v8330_v4  ;;  %v8139_v4 = vld [vmem:[%s10573_s0 + $0x34] ss:$56 sps:$4 sm:$0xff]  }
 0x250   :  { %6789 = vmatprep.subr.bf16.mxu1 %v8369_v0 }
 0x251   :  { %4262 = vmatmul.mubr.bf16.gmra.mrb[8].mxu1 %v8050_v63  ;;  %v8131_v63 = vld [vmem:[%s10573_s0 + $0xdbc] ss:$56 sps:$4 sm:$0xff]  }
 0x252   :  { %5257 = vmatmul.mubr.bf16.gmra.mrb[72].mxu0 %v8051_v1  ;;  %4269 = vmatprep.mubr.bf16.mxu1 %v8052_v2  ;;  %v8133_v1 = vld [vmem:[%s10573_s0 + $0x6a0] ss:$56 sps:$4 sm:$0xff]  }
 0x253   :  { %5264 = vmatprep.mubr.bf16.mxu0 %v8054_v3  ;;  %6805 = vmatpush1.bf16.msra.mxu1 %v8331_v5  ;;  %v8134_v2 = vld [vmem:[%s10573_s0 + $0xdb8] ss:$56 sps:$4 sm:$0xff]   ;;  %v8135_v3 = vld [vmem:[%s10573_s0 + $0x714] ss:$56 sps:$4 sm:$0xff]  }
 0x254   :  { %6790 = vmatprep.subr.bf16.mxu1 %v8369_v0  ;;  %v8140_v5 = vld [vmem:[%s10573_s0 + $0x710] ss:$56 sps:$4 sm:$0xff]  }
 0x257   :  { %6806 = vmatpush1.bf16.msra.mxu1 %v8332_v10  ;;  %v8146_v10 = vld [vmem:[%s10573_s0 + $0xa0] ss:$56 sps:$4 sm:$0xff]  }
 0x258   :  { %6791 = vmatprep.subr.bf16.mxu1 %v8369_v0 }
 0x259   :  { %4270 = vmatmul.mubr.bf16.gmra.mrb[12].mxu1 %v8057_v6  ;;  %v8137_v6 = vld [vmem:[%s10573_s0 + $0x30] ss:$56 sps:$4 sm:$0xff]  }
 0x25a   :  { %5265 = vmatmul.mubr.bf16.gmra.mrb[76].mxu0 %v8058_v7  ;;  %4277 = vmatprep.mubr.bf16.mxu1 %v8059_v8  ;;  %v8141_v7 = vld [vmem:[%s10573_s0 + $0x784] ss:$56 sps:$4 sm:$0xff]  }
 0x25b   :  { %5272 = vmatprep.mubr.bf16.mxu0 %v8061_v9  ;;  %6807 = vmatpush1.bf16.msra.mxu1 %v8333_v11  ;;  %v8143_v8 = vld [vmem:[%s10573_s0 + $0xa4] ss:$56 sps:$4 sm:$0xff]   ;;  %v8145_v9 = vld [vmem:[%s10573_s0 + $0x780] ss:$56 sps:$4 sm:$0xff]   ;;  %v8147_v11 = vld [vmem:[%s10573_s0 + $0x7f4] ss:$56 sps:$4 sm:$0xff]  }
 0x25c   :  { %6792 = vmatprep.subr.bf16.mxu1 %v8369_v0 }
 0x25f   :  { %6808 = vmatpush1.bf16.msra.mxu1 %v8334_v16  ;;  %v8155_v16 = vld [vmem:[%s10573_s0 + $0x184] ss:$56 sps:$4 sm:$0xff]  }
 0x260   :  { %6793 = vmatprep.subr.bf16.mxu1 %v8369_v0 }
 0x261   :  { %4278 = vmatmul.mubr.bf16.gmra.mrb[16].mxu1 %v8063_v12  ;;  %v8149_v12 = vld [vmem:[%s10573_s0 + $0x114] ss:$56 sps:$4 sm:$0xff]  }
 0x262   :  { %5273 = vmatmul.mubr.bf16.gmra.mrb[80].mxu0 %v8064_v13  ;;  %4285 = vmatprep.mubr.bf16.mxu1 %v8065_v14  ;;  %v8151_v13 = vld [vmem:[%s10573_s0 + $0x7f0] ss:$56 sps:$4 sm:$0xff]  }
 0x263   :  { %5280 = vmatprep.mubr.bf16.mxu0 %v8067_v15  ;;  %6809 = vmatpush1.bf16.msra.mxu1 %v8335_v17  ;;  %v8152_v14 = vld [vmem:[%s10573_s0 + $0x110] ss:$56 sps:$4 sm:$0xff]   ;;  %v8153_v15 = vld [vmem:[%s10573_s0 + $0x864] ss:$56 sps:$4 sm:$0xff]   ;;  %v8157_v17 = vld [vmem:[%s10573_s0 + $0x860] ss:$56 sps:$4 sm:$0xff]  }
 0x264   :  { %6794 = vmatprep.subr.bf16.mxu1 %v8369_v0 }
 0x267   :  { %6810 = vmatpush1.bf16.msra.mxu1 %v8336_v22  ;;  %v8164_v22 = vld [vmem:[%s10573_s0 + $0x1f0] ss:$56 sps:$4 sm:$0xff]  }
 0x268   :  { %6795 = vmatprep.subr.bf16.mxu1 %v8369_v0 }
 0x269   :  { %4286 = vmatmul.mubr.bf16.gmra.mrb[20].mxu1 %v8069_v18  ;;  %v8158_v18 = vld [vmem:[%s10573_s0 + $0x180] ss:$56 sps:$4 sm:$0xff]  }
 0x26a   :  { %5281 = vmatmul.mubr.bf16.gmra.mrb[84].mxu0 %v8070_v19  ;;  %4293 = vmatprep.mubr.bf16.mxu1 %v8072_v20  ;;  %v8159_v19 = vld [vmem:[%s10573_s0 + $0x8d4] ss:$56 sps:$4 sm:$0xff]  }
 0x26b   :  { %5288 = vmatprep.mubr.bf16.mxu0 %v8074_v21  ;;  %6811 = vmatpush1.bf16.msra.mxu1 %v8337_v23  ;;  %v8161_v20 = vld [vmem:[%s10573_s0 + $0x1f4] ss:$56 sps:$4 sm:$0xff]   ;;  %v8163_v21 = vld [vmem:[%s10573_s0 + $0x8d0] ss:$56 sps:$4 sm:$0xff]   ;;  %v8165_v23 = vld [vmem:[%s10573_s0 + $0x944] ss:$56 sps:$4 sm:$0xff]  }
 0x26c   :  { %6796 = vmatprep.subr.bf16.mxu1 %v8369_v0 }
 0x26f   :  { %6812 = vmatpush1.bf16.msra.mxu1 %v8338_v28  ;;  %v8173_v28 = vld [vmem:[%s10573_s0 + $0x2d4] ss:$56 sps:$4 sm:$0xff]  }
 0x270   :  { %6797 = vmatprep.subr.bf16.mxu1 %v8369_v0 }
 0x271   :  { %4294 = vmatmul.mubr.bf16.gmra.mrb[24].mxu1 %v8076_v24  ;;  %v8167_v24 = vld [vmem:[%s10573_s0 + $0x264] ss:$56 sps:$4 sm:$0xff]  }
 0x272   :  { %5289 = vmatmul.mubr.bf16.gmra.mrb[88].mxu0 %v8077_v25  ;;  %4301 = vmatprep.mubr.bf16.mxu1 %v8078_v26  ;;  %v8169_v25 = vld [vmem:[%s10573_s0 + $0x940] ss:$56 sps:$4 sm:$0xff]  }
 0x273   :  { %5296 = vmatprep.mubr.bf16.mxu0 %v8080_v27  ;;  %6813 = vmatpush1.bf16.msra.mxu1 %v8339_v29  ;;  %v8170_v26 = vld [vmem:[%s10573_s0 + $0x260] ss:$56 sps:$4 sm:$0xff]   ;;  %v8171_v27 = vld [vmem:[%s10573_s0 + $0x9b4] ss:$56 sps:$4 sm:$0xff]   ;;  %v8175_v29 = vld [vmem:[%s10573_s0 + $0x9b0] ss:$56 sps:$4 sm:$0xff]  }
 0x274   :  { %6798 = vmatprep.subr.bf16.mxu1 %v8369_v0 }
 0x277   :  { %6814 = vmatpush1.bf16.msra.mxu1 %v8340_v34  ;;  %v8182_v34 = vld [vmem:[%s10573_s0 + $0x340] ss:$56 sps:$4 sm:$0xff]  }
 0x278   :  { %6799 = vmatprep.subr.bf16.mxu1 %v8369_v0 }
 0x279   :  { %4302 = vmatmul.mubr.bf16.gmra.mrb[28].mxu1 %v8082_v30  ;;  %v8176_v30 = vld [vmem:[%s10573_s0 + $0x2d0] ss:$56 sps:$4 sm:$0xff]  }
 0x27a   :  { %5297 = vmatmul.mubr.bf16.gmra.mrb[92].mxu0 %v8083_v31  ;;  %4309 = vmatprep.mubr.bf16.mxu1 %v8084_v32  ;;  %v8177_v31 = vld [vmem:[%s10573_s0 + $0xa24] ss:$56 sps:$4 sm:$0xff]  }
 0x27b   :  { %5304 = vmatprep.mubr.bf16.mxu0 %v8086_v33  ;;  %6815 = vmatpush1.bf16.msra.mxu1 %v8341_v35  ;;  %v8179_v32 = vld [vmem:[%s10573_s0 + $0x344] ss:$56 sps:$4 sm:$0xff]   ;;  %v8181_v33 = vld [vmem:[%s10573_s0 + $0xa20] ss:$56 sps:$4 sm:$0xff]   ;;  %v8183_v35 = vld [vmem:[%s10573_s0 + $0xa94] ss:$56 sps:$4 sm:$0xff]  }
 0x27c   :  { %6800 = vmatprep.subr.bf16.mxu1 %v8369_v0  ;;  %v8342_v0 = vld [vmem:[%s10572_s1 + $0x1f8] sm:$0xff]  }
 0x27f   :  { %6816 = vmatpush1.bf16.msra.mxu1 %v8342_v0  ;;  %v8191_v0 = vld [vmem:[%s10573_s0 + $0x424] ss:$56 sps:$4 sm:$0xff]  }
 0x281   :  { %4310 = vmatmul.mubr.bf16.gmra.mrb[32].mxu1 %v8088_v36  ;;  %v8185_v36 = vld [vmem:[%s10573_s0 + $0x3b4] ss:$56 sps:$4 sm:$0xff]  }
 0x282   :  { %5305 = vmatmul.mubr.bf16.gmra.mrb[96].mxu0 %v8089_v37  ;;  %4317 = vmatprep.mubr.bf16.mxu1 %v8091_v38  ;;  %v8187_v37 = vld [vmem:[%s10573_s0 + $0xa90] ss:$56 sps:$4 sm:$0xff]  }
 0x283   :  { %5312 = vmatprep.mubr.bf16.mxu0 %v8093_v39  ;;  %v8188_v38 = vld [vmem:[%s10573_s0 + $0x3b0] ss:$56 sps:$4 sm:$0xff]   ;;  %v8189_v39 = vld [vmem:[%s10573_s0 + $0xb04] ss:$56 sps:$4 sm:$0xff]  }
 0x289   :  { %4318 = vmatmul.mubr.bf16.gmra.mrb[36].mxu1 %v8095_v40  ;;  %v8193_v40 = vld [vmem:[%s10573_s0 + $0xb00] ss:$56 sps:$4 sm:$0xff]  }
 0x28a   :  { %5313 = vmatmul.mubr.bf16.gmra.mrb[100].mxu0 %v8096_v41  ;;  %4325 = vmatprep.mubr.bf16.mxu1 %v8097_v42  ;;  %v8194_v41 = vld [vmem:[%s10573_s0 + $0x420] ss:$56 sps:$4 sm:$0xff]   ;;  %v8195_v42 = vld [vmem:[%s10573_s0 + $0xb74] ss:$56 sps:$4 sm:$0xff]  }
 0x28b   :  { %5320 = vmatprep.mubr.bf16.mxu0 %v8099_v43  ;;  %v8197_v43 = vld [vmem:[%s10573_s0 + $0x494] ss:$56 sps:$4 sm:$0xff]  }
 0x291   :  { %4326 = vmatmul.mubr.bf16.gmra.mrb[40].mxu1 %v8101_v44  ;;  %v8199_v44 = vld [vmem:[%s10573_s0 + $0xb70] ss:$56 sps:$4 sm:$0xff]  }
 0x292   :  { %5321 = vmatmul.mubr.bf16.gmra.mrb[104].mxu0 %v8102_v45  ;;  %4333 = vmatprep.mubr.bf16.mxu1 %v8103_v46  ;;  %v8200_v45 = vld [vmem:[%s10573_s0 + $0x490] ss:$56 sps:$4 sm:$0xff]   ;;  %v8201_v46 = vld [vmem:[%s10573_s0 + $0xbe4] ss:$56 sps:$4 sm:$0xff]  }
 0x293   :  { %5328 = vmatprep.mubr.bf16.mxu0 %v8105_v47  ;;  %v8203_v47 = vld [vmem:[%s10573_s0 + $0x504] ss:$56 sps:$4 sm:$0xff]  }
 0x299   :  { %4334 = vmatmul.mubr.bf16.gmra.mrb[44].mxu1 %v8108_v48 }
 0x29a   :  { %5329 = vmatmul.mubr.bf16.gmra.mrb[108].mxu0 %v8109_v49  ;;  %4341 = vmatprep.mubr.bf16.mxu1 %v8110_v50  ;;  %v8205_v50 = vld [vmem:[%s10573_s0 + $0xbe0] ss:$56 sps:$4 sm:$0xff]  }
 0x29b   :  { %5336 = vmatprep.mubr.bf16.mxu0 %v8112_v51 }
 0x2a1   :  { %4342 = vmatmul.mubr.bf16.gmra.mrb[48].mxu1 %v8114_v52  ;;  %v8206_v52 = vld [vmem:[%s10573_s0 + $0x500] ss:$56 sps:$4 sm:$0xff]  }
 0x2a2   :  { %5337 = vmatmul.mubr.bf16.gmra.mrb[112].mxu0 %v8115_v53  ;;  %4349 = vmatprep.mubr.bf16.mxu1 %v8116_v54  ;;  %v8207_v53 = vld [vmem:[%s10573_s0 + $0xc54] ss:$56 sps:$4 sm:$0xff]  }
 0x2a3   :  { %5344 = vmatprep.mubr.bf16.mxu0 %v8118_v55  ;;  %v8209_v55 = vld [vmem:[%s10573_s0 + $0x574] ss:$56 sps:$4 sm:$0xff]  }
 0x2a9   :  { %4350 = vmatmul.mubr.bf16.gmra.mrb[52].mxu1 %v8120_v56 }
 0x2aa   :  { %5345 = vmatmul.mubr.bf16.gmra.mrb[116].mxu0 %v8121_v57  ;;  %4357 = vmatprep.mubr.bf16.mxu1 %v8123_v58  ;;  %v8211_v58 = vld [vmem:[%s10573_s0 + $0xc50] ss:$56 sps:$4 sm:$0xff]  }
 0x2ab   :  { %5352 = vmatprep.mubr.bf16.mxu0 %v8125_v59 }
 0x2b1   :  { %4358 = vmatmul.mubr.bf16.gmra.mrb[56].mxu1 %v8127_v60  ;;  %v8212_v60 = vld [vmem:[%s10573_s0 + $0x570] ss:$56 sps:$4 sm:$0xff]  }
 0x2b2   :  { %5353 = vmatmul.mubr.bf16.gmra.mrb[120].mxu0 %v8128_v61  ;;  %4365 = vmatprep.mubr.bf16.mxu1 %v8129_v62  ;;  %v8213_v61 = vld [vmem:[%s10573_s0 + $0xcc4] ss:$56 sps:$4 sm:$0xff]  }
 0x2b3   :  { %5360 = vmatprep.mubr.bf16.mxu0 %v8131_v63  ;;  %v8215_v63 = vld [vmem:[%s10573_s0 + $0x5e4] ss:$56 sps:$4 sm:$0xff]  }
 0x2b9   :  { %4366 = vmatmul.mubr.bf16.gmra.mrb[60].mxu1 %v8133_v1 }
 0x2ba   :  { %5361 = vmatmul.mubr.bf16.gmra.mrb[124].mxu0 %v8134_v2  ;;  %4373 = vmatprep.mubr.bf16.mxu1 %v8135_v3  ;;  %v8217_v3 = vld [vmem:[%s10573_s0 + $0xcc0] ss:$56 sps:$4 sm:$0xff]  }
 0x2bb   :  { %6752 = vmatprep.mubr.msk.bf16.mxu0 %vm3538_vm0, %v8139_v4 }
 0x2c1   :  { %4374 = vmatmul.mubr.bf16.gmra.mrb[64].mxu1 %v8140_v5  ;;  %v8218_v5 = vld [vmem:[%s10573_s0 + $0x5e0] ss:$56 sps:$4 sm:$0xff]  }
 0x2c2   :  { %5402 = vmatmul.mubr.bf16.vlgmr.msra.gmra.mrb[0].mxu0 %v8137_v6  ;;  %4381 = vmatprep.mubr.bf16.mxu1 %v8141_v7  ;;  %v8219_v6 = vld [vmem:[%s10573_s0 + $0xd34] ss:$56 sps:$4 sm:$0xff]  }
 0x2c3   :  { %6753 = vmatprep.mubr.msk.bf16.mxu0 %vm3538_vm0, %v8143_v8  ;;  %v8221_v8 = vld [vmem:[%s10573_s0 + $0x654] ss:$56 sps:$4 sm:$0xff]  }
 0x2c9   :  { %4382 = vmatmul.mubr.bf16.gmra.mrb[68].mxu1 %v8145_v9 }
 0x2ca   :  { %5410 = vmatmul.mubr.bf16.gmra.mrb[4].mxu0 %v8146_v10  ;;  %4389 = vmatprep.mubr.bf16.mxu1 %v8147_v11  ;;  %v8223_v11 = vld [vmem:[%s10573_s0 + $0xd30] ss:$56 sps:$4 sm:$0xff]  }
 0x2cb   :  { %6754 = vmatprep.mubr.msk.bf16.mxu0 %vm3538_vm0, %v8149_v12 }
 0x2d1   :  { %4390 = vmatmul.mubr.bf16.gmra.mrb[72].mxu1 %v8151_v13  ;;  %v8224_v13 = vld [vmem:[%s10573_s0 + $0x650] ss:$56 sps:$4 sm:$0xff]  }
 0x2d2   :  { %5418 = vmatmul.mubr.bf16.gmra.mrb[8].mxu0 %v8152_v14  ;;  %4397 = vmatprep.mubr.bf16.mxu1 %v8153_v15  ;;  %v8225_v14 = vld [vmem:[%s10573_s0 + $0xda4] ss:$56 sps:$4 sm:$0xff]  }
 0x2d3   :  { %6755 = vmatprep.mubr.msk.bf16.mxu0 %vm3538_vm0, %v8155_v16  ;;  %v8227_v16 = vld [vmem:[%s10573_s0 + $0x6c4] ss:$56 sps:$4 sm:$0xff]  }
 0x2d9   :  { %4398 = vmatmul.mubr.bf16.gmra.mrb[76].mxu1 %v8157_v17 }
 0x2da   :  { %5426 = vmatmul.mubr.bf16.gmra.mrb[12].mxu0 %v8158_v18  ;;  %4405 = vmatprep.mubr.bf16.mxu1 %v8159_v19  ;;  %v8229_v19 = vld [vmem:[%s10573_s0 + $0xda0] ss:$56 sps:$4 sm:$0xff]  }
 0x2db   :  { %6756 = vmatprep.mubr.msk.bf16.mxu0 %vm3538_vm0, %v8161_v20 }
 0x2e1   :  { %4406 = vmatmul.mubr.bf16.gmra.mrb[80].mxu1 %v8163_v21  ;;  %v8230_v21 = vld [vmem:[%s10573_s0 + $0x6c0] ss:$56 sps:$4 sm:$0xff]  }
 0x2e2   :  { %5434 = vmatmul.mubr.bf16.gmra.mrb[16].mxu0 %v8164_v22  ;;  %4413 = vmatprep.mubr.bf16.mxu1 %v8165_v23  ;;  %v8233_v22 = vld [vmem:[%s10573_s0 + $0x71c] ss:$56 sps:$4 sm:$0xff]  }
 0x2e3   :  { %6757 = vmatprep.mubr.msk.bf16.mxu0 %vm3538_vm0, %v8167_v24  ;;  %v8234_v24 = vld [vmem:[%s10573_s0 + $0x734] ss:$56 sps:$4 sm:$0xff]  }
 0x2e9   :  { %4414 = vmatmul.mubr.bf16.gmra.mrb[84].mxu1 %v8169_v25 }
 0x2ea   :  { %5442 = vmatmul.mubr.bf16.gmra.mrb[20].mxu0 %v8170_v26  ;;  %4421 = vmatprep.mubr.bf16.mxu1 %v8171_v27  ;;  %v8231_v27 = vld [vmem:[%s10573_s0 + $0x718] ss:$56 sps:$4 sm:$0xff]  }
 0x2eb   :  { %6758 = vmatprep.mubr.msk.bf16.mxu0 %vm3538_vm0, %v8173_v28 }
 0x2f1   :  { %4422 = vmatmul.mubr.bf16.gmra.mrb[88].mxu1 %v8175_v29  ;;  %v8236_v29 = vld [vmem:[%s10573_s0 + $0x730] ss:$56 sps:$4 sm:$0xff]  }
 0x2f2   :  { %5450 = vmatmul.mubr.bf16.gmra.mrb[24].mxu0 %v8176_v30  ;;  %4429 = vmatprep.mubr.bf16.mxu1 %v8177_v31  ;;  %v8237_v30 = vld [vmem:[%s10573_s0 + $0x78c] ss:$56 sps:$4 sm:$0xff]  }
 0x2f3   :  { %6759 = vmatprep.mubr.msk.bf16.mxu0 %vm3538_vm0, %v8179_v32  ;;  %v8239_v32 = vld [vmem:[%s10573_s0 + $0x7a4] ss:$56 sps:$4 sm:$0xff]  }
 0x2f9   :  { %4430 = vmatmul.mubr.bf16.gmra.mrb[92].mxu1 %v8181_v33 }
 0x2fa   :  { %5458 = vmatmul.mubr.bf16.gmra.mrb[28].mxu0 %v8182_v34  ;;  %4437 = vmatprep.mubr.bf16.mxu1 %v8183_v35  ;;  %v8241_v35 = vld [vmem:[%s10573_s0 + $0x788] ss:$56 sps:$4 sm:$0xff]  }
 0x2fb   :  { %6760 = vmatprep.mubr.msk.bf16.mxu0 %vm3538_vm0, %v8185_v36 }
 0x301   :  { %4438 = vmatmul.mubr.bf16.gmra.mrb[96].mxu1 %v8187_v37  ;;  %v8242_v37 = vld [vmem:[%s10573_s0 + $0x7a0] ss:$56 sps:$4 sm:$0xff]  }
 0x302   :  { %5466 = vmatmul.mubr.bf16.gmra.mrb[32].mxu0 %v8188_v38  ;;  %4445 = vmatprep.mubr.bf16.mxu1 %v8189_v39  ;;  %v8243_v38 = vld [vmem:[%s10573_s0 + $0x7fc] ss:$56 sps:$4 sm:$0xff]  }
 0x303   :  { %6761 = vmatprep.mubr.msk.bf16.mxu0 %vm3538_vm0, %v8191_v0  ;;  %v8245_v0 = vld [vmem:[%s10573_s0 + $0x814] ss:$56 sps:$4 sm:$0xff]  }
 0x309   :  { %4446 = vmatmul.mubr.bf16.gmra.mrb[100].mxu1 %v8193_v40 }
 0x30a   :  { %5474 = vmatmul.mubr.bf16.gmra.mrb[36].mxu0 %v8194_v41  ;;  %4453 = vmatprep.mubr.bf16.mxu1 %v8195_v42  ;;  %v8247_v42 = vld [vmem:[%s10573_s0 + $0x7f8] ss:$56 sps:$4 sm:$0xff]  }
 0x30b   :  { %6762 = vmatprep.mubr.msk.bf16.mxu0 %vm3538_vm0, %v8197_v43 }
 0x311   :  { %4454 = vmatmul.mubr.bf16.gmra.mrb[104].mxu1 %v8199_v44  ;;  %v8248_v44 = vld [vmem:[%s10573_s0 + $0x810] ss:$56 sps:$4 sm:$0xff]  }
 0x312   :  { %5482 = vmatmul.mubr.bf16.gmra.mrb[40].mxu0 %v8200_v45  ;;  %4461 = vmatprep.mubr.bf16.mxu1 %v8201_v46  ;;  %v8249_v45 = vld [vmem:[%s10573_s0 + $0x86c] ss:$56 sps:$4 sm:$0xff]  }
 0x313   :  { %6763 = vmatprep.mubr.msk.bf16.mxu0 %vm3538_vm0, %v8203_v47  ;;  %v8251_v47 = vld [vmem:[%s10573_s0 + $0x884] ss:$56 sps:$4 sm:$0xff]  }
 0x314   :  { %v10002_v48 = vpop.f32.mrb[0].mxu1 }
 0x315   :  { %v4249_v49 = vpop.f32.mrb[1].mxu1 }
 0x316   :  { %v10007_v51 = vpop.f32.mrb[2].mxu1 }
 0x317   :  { %v4252_v54 = vpop.f32.mrb[3].mxu1 }
 0x318   :  { %v8254_v54 = vld [vmem:[%s10573_s0 + $0x880] ss:$56 sps:$4 sm:$0xff]  }
 0x319   :  { %4462 = vmatmul.mubr.bf16.gmra.mrb[108].mxu1 %v8205_v50 }
 0x31a   :  { %5490 = vmatmul.mubr.bf16.gmra.mrb[44].mxu0 %v8206_v52  ;;  %4469 = vmatprep.mubr.bf16.mxu1 %v8207_v53  ;;  %v8253_v52 = vld [vmem:[%s10573_s0 + $0x868] ss:$56 sps:$4 sm:$0xff]  }
 0x31b   :  { %6764 = vmatprep.mubr.msk.bf16.mxu0 %vm3538_vm0, %v8209_v55  ;;  %v8255_v55 = vld [vmem:[%s10573_s0 + $0x8dc] ss:$56 sps:$4 sm:$0xff]  }
 0x31c   :  { %v10019_v56 = vpop.f32.mrb[4].mxu1 }
 0x31d   :  { %v4257_v57 = vpop.f32.mrb[5].mxu1 }
 0x31e   :  { %v10024_v59 = vpop.f32.mrb[6].mxu1 }
 0x31f   :  { %v4260_v62 = vpop.f32.mrb[7].mxu1 }
 0x320   :  { %v8259_v62 = vld [vmem:[%s10573_s0 + $0x8d8] ss:$56 sps:$4 sm:$0xff]  }
 0x321   :  { %4470 = vmatmul.mubr.bf16.gmra.mrb[112].mxu1 %v8211_v58  ;;  %v8257_v58 = vld [vmem:[%s10573_s0 + $0x8f4] ss:$56 sps:$4 sm:$0xff]  }
 0x322   :  { %5498 = vmatmul.mubr.bf16.gmra.mrb[48].mxu0 %v8212_v60  ;;  %4477 = vmatprep.mubr.bf16.mxu1 %v8213_v61 }
 0x323   :  { %6765 = vmatprep.mubr.msk.bf16.mxu0 %vm3538_vm0, %v8215_v63 }
 0x324   :  { %v10036_v1 = vpop.f32.mrb[8].mxu1 }
 0x325   :  { %v4265_v2 = vpop.f32.mrb[9].mxu1 }
 0x326   :  { %v10041_v4 = vpop.f32.mrb[10].mxu1  ;;  %v8260_v2 = vld [vmem:[%s10573_s0 + $0x8f0] ss:$56 sps:$4 sm:$0xff]  }
 0x327   :  { %v4268_v7 = vpop.f32.mrb[11].mxu1 }
 0x329   :  { %4478 = vmatmul.mubr.bf16.gmra.mrb[116].mxu1 %v8217_v3  ;;  %v8261_v3 = vld [vmem:[%s10573_s0 + $0x94c] ss:$56 sps:$4 sm:$0xff]  }
 0x32a   :  { %5506 = vmatmul.mubr.bf16.gmra.mrb[52].mxu0 %v8218_v5  ;;  %4485 = vmatprep.mubr.bf16.mxu1 %v8219_v6  ;;  %v8263_v6 = vld [vmem:[%s10573_s0 + $0x964] ss:$56 sps:$4 sm:$0xff]  }
 0x32b   :  { %6766 = vmatprep.mubr.msk.bf16.mxu0 %vm3538_vm0, %v8221_v8 }
 0x32c   :  { %v10053_v9 = vpop.f32.mrb[12].mxu1 }
 0x32d   :  { %v4273_v10 = vpop.f32.mrb[13].mxu1 }
 0x32e   :  { %v10058_v12 = vpop.f32.mrb[14].mxu1  ;;  %v8265_v10 = vld [vmem:[%s10573_s0 + $0x948] ss:$56 sps:$4 sm:$0xff]  }
 0x32f   :  { %v4276_v15 = vpop.f32.mrb[15].mxu1 }
 0x331   :  { %4486 = vmatmul.mubr.bf16.gmra.mrb[120].mxu1 %v8223_v11 }
 0x332   :  { %5514 = vmatmul.mubr.bf16.gmra.mrb[56].mxu0 %v8224_v13  ;;  %4493 = vmatprep.mubr.bf16.mxu1 %v8225_v14  ;;  %v8266_v13 = vld [vmem:[%s10573_s0 + $0x960] ss:$56 sps:$4 sm:$0xff]   ;;  %v8267_v14 = vld [vmem:[%s10573_s0 + $0x9bc] ss:$56 sps:$4 sm:$0xff]  }
 0x333   :  { %6767 = vmatprep.mubr.msk.bf16.mxu0 %vm3538_vm0, %v8227_v16  ;;  %v8269_v16 = vld [vmem:[%s10573_s0 + $0x9d4] ss:$56 sps:$4 sm:$0xff]  }
 0x334   :  { %v10070_v17 = vpop.f32.mrb[16].mxu1 }
 0x335   :  { %v4281_v18 = vpop.f32.mrb[17].mxu1 }
 0x336   :  { %v10075_v20 = vpop.f32.mrb[18].mxu1 }
 0x337   :  { %v4284_v23 = vpop.f32.mrb[19].mxu1 }
 0x338   :  { %v8272_v23 = vld [vmem:[%s10573_s0 + $0x9d0] ss:$56 sps:$4 sm:$0xff]  }
 0x339   :  { %4494 = vmatmul.mubr.bf16.gmra.mrb[124].mxu1 %v8229_v19 }
 0x33a   :  { %5522 = vmatmul.mubr.bf16.gmra.mrb[60].mxu0 %v8230_v21  ;;  %4662 = vmatprep.mubr.bf16.mxu1 %v8233_v22  ;;  %v8271_v21 = vld [vmem:[%s10573_s0 + $0x9b8] ss:$56 sps:$4 sm:$0xff]  }
 0x33b   :  { %6768 = vmatprep.mubr.msk.bf16.mxu0 %vm3538_vm0, %v8234_v24  ;;  %v8273_v24 = vld [vmem:[%s10573_s0 + $0xa2c] ss:$56 sps:$4 sm:$0xff]  }
 0x33c   :  { %v10087_v25 = vpop.f32.mrb[20].mxu1 }
 0x33d   :  { %v4289_v26 = vpop.f32.mrb[21].mxu1 }
 0x33e   :  { %v10092_v28 = vpop.f32.mrb[22].mxu1 }
 0x33f   :  { %v4292_v31 = vpop.f32.mrb[23].mxu1 }
 0x340   :  { %v8277_v31 = vld [vmem:[%s10573_s0 + $0xa28] ss:$56 sps:$4 sm:$0xff]  }
 0x341   :  { %4663 = vmatmul.mubr.bf16.vlgmr.msra.gmra.mrb[64].mxu1 %v8231_v27  ;;  %v8275_v27 = vld [vmem:[%s10573_s0 + $0xa44] ss:$56 sps:$4 sm:$0xff]  }
 0x342   :  { %5530 = vmatmul.mubr.bf16.gmra.mrb[64].mxu0 %v8236_v29  ;;  %4670 = vmatprep.mubr.bf16.mxu1 %v8237_v30 }
 0x343   :  { %6769 = vmatprep.mubr.msk.bf16.mxu0 %vm3538_vm0, %v8239_v32 }
 0x344   :  { %v10104_v33 = vpop.f32.mrb[24].mxu1 }
 0x345   :  { %v4297_v34 = vpop.f32.mrb[25].mxu1 }
 0x346   :  { %v10109_v36 = vpop.f32.mrb[26].mxu1  ;;  %v8278_v34 = vld [vmem:[%s10573_s0 + $0xa40] ss:$56 sps:$4 sm:$0xff]  }
 0x347   :  { %v4300_v39 = vpop.f32.mrb[27].mxu1 }
 0x349   :  { %4671 = vmatmul.mubr.bf16.gmra.mrb[68].mxu1 %v8241_v35  ;;  %v8279_v35 = vld [vmem:[%s10573_s0 + $0xa9c] ss:$56 sps:$4 sm:$0xff]  }
 0x34a   :  { %5538 = vmatmul.mubr.bf16.gmra.mrb[68].mxu0 %v8242_v37  ;;  %4678 = vmatprep.mubr.bf16.mxu1 %v8243_v38  ;;  %v8281_v38 = vld [vmem:[%s10573_s0 + $0xab4] ss:$56 sps:$4 sm:$0xff]  }
 0x34b   :  { %6770 = vmatprep.mubr.msk.bf16.mxu0 %vm3538_vm0, %v8245_v0 }
 0x34c   :  { %v10121_v40 = vpop.f32.mrb[28].mxu1 }
 0x34d   :  { %v4305_v41 = vpop.f32.mrb[29].mxu1 }
 0x34e   :  { %v10126_v43 = vpop.f32.mrb[30].mxu1  ;;  %v8283_v41 = vld [vmem:[%s10573_s0 + $0xa98] ss:$56 sps:$4 sm:$0xff]  }
 0x34f   :  { %v4308_v46 = vpop.f32.mrb[31].mxu1 }
 0x351   :  { %4679 = vmatmul.mubr.bf16.gmra.mrb[72].mxu1 %v8247_v42 }
 0x352   :  { %5546 = vmatmul.mubr.bf16.gmra.mrb[72].mxu0 %v8248_v44  ;;  %4686 = vmatprep.mubr.bf16.mxu1 %v8249_v45  ;;  %v8284_v44 = vld [vmem:[%s10573_s0 + $0xab0] ss:$56 sps:$4 sm:$0xff]   ;;  %v8285_v45 = vld [vmem:[%s10573_s0 + $0xb0c] ss:$56 sps:$4 sm:$0xff]  }
 0x353   :  { %6771 = vmatprep.mubr.msk.bf16.mxu0 %vm3538_vm0, %v8251_v47  ;;  %v8287_v47 = vld [vmem:[%s10573_s0 + $0xb24] ss:$56 sps:$4 sm:$0xff]  }
 0x354   :  { %v10138_v49 = vpop.f32.mrb[32].mxu1 }
 0x355   :  { %v4313_v50 = vpop.f32.mrb[33].mxu1 }
 0x356   :  { %v10143_v53 = vpop.f32.mrb[34].mxu1 }
 0x357   :  { %v4316_v57 = vpop.f32.mrb[35].mxu1 }
 0x358   :  { %v8290_v57 = vld [vmem:[%s10573_s0 + $0xb20] ss:$56 sps:$4 sm:$0xff]  }
 0x359   :  { %4687 = vmatmul.mubr.bf16.gmra.mrb[76].mxu1 %v8253_v52 }
 0x35a   :  { %5554 = vmatmul.mubr.bf16.gmra.mrb[76].mxu0 %v8254_v54  ;;  %4694 = vmatprep.mubr.bf16.mxu1 %v8255_v55  ;;  %v8289_v54 = vld [vmem:[%s10573_s0 + $0xb08] ss:$56 sps:$4 sm:$0xff]  }
 0x35b   :  { %6772 = vmatprep.mubr.msk.bf16.mxu0 %vm3538_vm0, %v8257_v58  ;;  %v8291_v58 = vld [vmem:[%s10573_s0 + $0xb7c] ss:$56 sps:$4 sm:$0xff]  }
 0x35c   :  { %v10155_v60 = vpop.f32.mrb[36].mxu1 }
 0x35d   :  { %v4321_v61 = vpop.f32.mrb[37].mxu1 }
 0x35e   :  { %v10160_v63 = vpop.f32.mrb[38].mxu1 }
 0x35f   :  { %v4324_v5 = vpop.f32.mrb[39].mxu1 }
 0x360   :  { %v8295_v5 = vld [vmem:[%s10573_s0 + $0xb78] ss:$56 sps:$4 sm:$0xff]  }
 0x361   :  { %4695 = vmatmul.mubr.bf16.gmra.mrb[80].mxu1 %v8259_v62  ;;  %v8293_v62 = vld [vmem:[%s10573_s0 + $0xb94] ss:$56 sps:$4 sm:$0xff]  }
 0x362   :  { %5562 = vmatmul.mubr.bf16.gmra.mrb[80].mxu0 %v8260_v2  ;;  %4702 = vmatprep.mubr.bf16.mxu1 %v8261_v3 }
 0x363   :  { %6773 = vmatprep.mubr.msk.bf16.mxu0 %vm3538_vm0, %v8263_v6 }
 0x364   :  { %v10172_v7 = vpop.f32.mrb[40].mxu1 }
 0x365   :  { %v4329_v8 = vpop.f32.mrb[41].mxu1 }
 0x366   :  { %v10177_v11 = vpop.f32.mrb[42].mxu1  ;;  %v8296_v8 = vld [vmem:[%s10573_s0 + $0xb90] ss:$56 sps:$4 sm:$0xff]  }
 0x367   :  { %v4332_v15 = vpop.f32.mrb[43].mxu1 }
 0x369   :  { %4703 = vmatmul.mubr.bf16.gmra.mrb[84].mxu1 %v8265_v10  ;;  %v8297_v10 = vld [vmem:[%s10573_s0 + $0xbec] ss:$56 sps:$4 sm:$0xff]  }
 0x36a   :  { %5570 = vmatmul.mubr.bf16.gmra.mrb[84].mxu0 %v8266_v13  ;;  %4710 = vmatprep.mubr.bf16.mxu1 %v8267_v14  ;;  %v8299_v14 = vld [vmem:[%s10573_s0 + $0xc04] ss:$56 sps:$4 sm:$0xff]  }
 0x36b   :  { %6774 = vmatprep.mubr.msk.bf16.mxu0 %vm3538_vm0, %v8269_v16  ;;  %v8301_v16 = vld [vmem:[%s10573_s0 + $0xbe8] ss:$56 sps:$4 sm:$0xff]  }
 0x36c   :  { %v10189_v18 = vpop.f32.mrb[44].mxu1 }
 0x36d   :  { %v4337_v19 = vpop.f32.mrb[45].mxu1 }
 0x36e   :  { %v10194_v22 = vpop.f32.mrb[46].mxu1 }
 0x36f   :  { %v4340_v26 = vpop.f32.mrb[47].mxu1 }
 0x371   :  { %4711 = vmatmul.mubr.bf16.gmra.mrb[88].mxu1 %v8271_v21 }
 0x372   :  { %5578 = vmatmul.mubr.bf16.gmra.mrb[88].mxu0 %v8272_v23  ;;  %4718 = vmatprep.mubr.bf16.mxu1 %v8273_v24  ;;  %v8302_v23 = vld [vmem:[%s10573_s0 + $0xc00] ss:$56 sps:$4 sm:$0xff]   ;;  %v8303_v24 = vld [vmem:[%s10573_s0 + $0xc5c] ss:$56 sps:$4 sm:$0xff]  }
 0x373   :  { %6775 = vmatprep.mubr.msk.bf16.mxu0 %vm3538_vm0, %v8275_v27  ;;  %v8305_v27 = vld [vmem:[%s10573_s0 + $0xc74] ss:$56 sps:$4 sm:$0xff]  }
 0x374   :  { %v10206_v29 = vpop.f32.mrb[48].mxu1 }
 0x375   :  { %v4345_v30 = vpop.f32.mrb[49].mxu1 }
 0x376   :  { %v10211_v32 = vpop.f32.mrb[50].mxu1 }
 0x377   :  { %v4348_v37 = vpop.f32.mrb[51].mxu1 }
 0x379   :  { %4719 = vmatmul.mubr.bf16.gmra.mrb[92].mxu1 %v8277_v31 }
 0x37a   :  { %5586 = vmatmul.mubr.bf16.gmra.mrb[92].mxu0 %v8278_v34  ;;  %4726 = vmatprep.mubr.bf16.mxu1 %v8279_v35  ;;  %v8307_v34 = vld [vmem:[%s10573_s0 + $0xc58] ss:$56 sps:$4 sm:$0xff]  }
 0x37b   :  { %6776 = vmatprep.mubr.msk.bf16.mxu0 %vm3538_vm0, %v8281_v38  ;;  %v8308_v38 = vld [vmem:[%s10573_s0 + $0xc70] ss:$56 sps:$4 sm:$0xff]  }
 0x37c   :  { %v10223_v39 = vpop.f32.mrb[52].mxu1 }
 0x37d   :  { %v4353_v0 = vpop.f32.mrb[53].mxu1 }
 0x37e   :  { %v10228_v42 = vpop.f32.mrb[54].mxu1 }
 0x37f   :  { %v4356_v46 = vpop.f32.mrb[55].mxu1 }
 0x380   :  { %v8313_v46 = vld [vmem:[%s10573_s0 + $0xcc8] ss:$56 sps:$4 sm:$0xff]  }
 0x381   :  { %4727 = vmatmul.mubr.bf16.gmra.mrb[96].mxu1 %v8283_v41  ;;  %v8311_v41 = vld [vmem:[%s10573_s0 + $0xce4] ss:$56 sps:$4 sm:$0xff]  }
 0x382   :  { %5594 = vmatmul.mubr.bf16.gmra.mrb[96].mxu0 %v8284_v44  ;;  %4734 = vmatprep.mubr.bf16.mxu1 %v8285_v45 }
 0x383   :  { %6777 = vmatprep.mubr.msk.bf16.mxu0 %vm3538_vm0, %v8287_v47 }
 0x384   :  { %v10240_v50 = vpop.f32.mrb[56].mxu1 }
 0x385   :  { %v4361_v52 = vpop.f32.mrb[57].mxu1 }
 0x386   :  { %v10245_v55 = vpop.f32.mrb[58].mxu1 }
 0x387   :  { %v4364_v61 = vpop.f32.mrb[59].mxu1 }
 0x389   :  { %4735 = vmatmul.mubr.bf16.gmra.mrb[100].mxu1 %v8289_v54  ;;  %v8314_v54 = vld [vmem:[%s10573_s0 + $0xce0] ss:$56 sps:$4 sm:$0xff]  }
 0x38a   :  { %5602 = vmatmul.mubr.bf16.gmra.mrb[100].mxu0 %v8290_v57  ;;  %4742 = vmatprep.mubr.bf16.mxu1 %v8291_v58  ;;  %v8317_v58 = vld [vmem:[%s10573_s0 + $0xd54] ss:$56 sps:$4 sm:$0xff]  }
 0x38b   :  { %6778 = vmatprep.mubr.msk.bf16.mxu0 %vm3538_vm0, %v8293_v62 }
 0x38c   :  { %v10257_v2 = vpop.f32.mrb[60].mxu1 }
 0x38d   :  { %v4369_v3 = vpop.f32.mrb[61].mxu1 }
 0x38e   :  { %v10262_v6 = vpop.f32.mrb[62].mxu1  ;;  %v8319_v3 = vld [vmem:[%s10573_s0 + $0xd38] ss:$56 sps:$4 sm:$0xff]  }
 0x38f   :  { %v4372_v13 = vpop.f32.mrb[63].mxu1 }
 0x391   :  { %4743 = vmatmul.mubr.bf16.gmra.mrb[104].mxu1 %v8295_v5 }
 0x392   :  { %5610 = vmatmul.mubr.bf16.gmra.mrb[104].mxu0 %v8296_v8  ;;  %4750 = vmatprep.mubr.bf16.mxu1 %v8297_v10  ;;  %v8320_v10 = vld [vmem:[%s10573_s0 + $0xd50] ss:$56 sps:$4 sm:$0xff]  }
 0x393   :  { %6779 = vmatprep.mubr.msk.bf16.mxu0 %vm3538_vm0, %v8299_v14  ;;  %v8323_v14 = vld [vmem:[%s10573_s0 + $0xdc4] ss:$56 sps:$4 sm:$0xff]  }
 0x395   :  { %v5403_v15 = vpop.f32.mrb[0].mxu0 }
 0x396   :  { %v6817_v19 = vadd.f32 %v5403_v15, %v10002_v48  ;;  %v5405_v21 = vpop.f32.mrb[1].mxu0 }
 0x397   :  { %v5406_v26 = vpop.f32.mrb[2].mxu0 }
 0x398   :  { %5658 = vst [vmem:[#allocation2] sm:$0xff] %v6817_v19  ;;  %v6818_v30 = vadd.f32 %v5406_v26, %v10007_v51  ;;  %v5408_v31 = vpop.f32.mrb[3].mxu0  ;;  %v8309_v51 = vld [vmem:[%s10573_s0 + $0xccc] ss:$56 sps:$4 sm:$0xff]   ;;  %v8325_v19 = vld [vmem:[%s10573_s0 + $0xda8] ss:$56 sps:$4 sm:$0xff]  }
 0x399   :  { %4751 = vmatmul.mubr.bf16.gmra.mrb[108].mxu1 %v8301_v16 }
 0x39a   :  { %5659 = vst [vmem:[#allocation2 + $0x8] sm:$0xff] %v6818_v30  ;;  %5618 = vmatmul.mubr.bf16.gmra.mrb[108].mxu0 %v8302_v23  ;;  %4758 = vmatprep.mubr.bf16.mxu1 %v8303_v24  ;;  %v8326_v24 = vld [vmem:[%s10573_s0 + $0xdc0] ss:$56 sps:$4 sm:$0xff]  }
 0x39b   :  { %6780 = vmatprep.mubr.msk.bf16.mxu0 %vm3538_vm0, %v8305_v27 }
 0x39d   :  { %v5411_v48 = vpop.f32.mrb[4].mxu0 }
 0x39e   :  { %v6819_v35 = vadd.f32 %v5411_v48, %v10019_v56  ;;  %v5413_v37 = vpop.f32.mrb[5].mxu0 }
 0x39f   :  { %v5414_v0 = vpop.f32.mrb[6].mxu0 }
 0x3a0   :  { %5660 = vst [vmem:[#allocation2 + $0x10] sm:$0xff] %v6819_v35  ;;  %v6820_v44 = vadd.f32 %v5414_v0, %v10024_v59  ;;  %v5416_v45 = vpop.f32.mrb[7].mxu0  ;;  %v8315_v59 = vld [vmem:[%s10573_s0 + $0xd3c] ss:$56 sps:$4 sm:$0xff]  }
 0x3a1   :  { %4759 = vmatmul.mubr.bf16.gmra.mrb[112].mxu1 %v8307_v34 }
 0x3a2   :  { %5661 = vst [vmem:[#allocation2 + $0x18] sm:$0xff] %v6820_v44  ;;  %5626 = vmatmul.mubr.bf16.gmra.mrb[112].mxu0 %v8308_v38  ;;  %4766 = vmatprep.mubr.bf16.mxu1 %v8309_v51 }
 0x3a3   :  { %6781 = vmatprep.mubr.msk.bf16.mxu0 %vm3538_vm0, %v8311_v41 }
 0x3a5   :  { %v5419_v56 = vpop.f32.mrb[8].mxu0 }
 0x3a6   :  { %v6821_v47 = vadd.f32 %v5419_v56, %v10036_v1  ;;  %v5421_v52 = vpop.f32.mrb[9].mxu0 }
 0x3a7   :  { %v5422_v57 = vpop.f32.mrb[10].mxu0 }
 0x3a8   :  { %5662 = vst [vmem:[#allocation2 + $0x20] sm:$0xff] %v6821_v47  ;;  %v6822_v61 = vadd.f32 %v5422_v57, %v10041_v4  ;;  %v5424_v62 = vpop.f32.mrb[11].mxu0  ;;  %v8321_v4 = vld [vmem:[%s10573_s0 + $0xdac] ss:$56 sps:$4 sm:$0xff]   ;;  %s10368_s0 = smov 0  }
 0x3a9   :  { %4767 = vmatmul.mubr.bf16.gmra.mrb[116].mxu1 %v8313_v46 }
 0x3aa   :  { %5663 = vst [vmem:[#allocation2 + $0x28] sm:$0xff] %v6822_v61  ;;  %5634 = vmatmul.mubr.bf16.gmra.mrb[116].mxu0 %v8314_v54  ;;  %4774 = vmatprep.mubr.bf16.mxu1 %v8315_v59 }
 0x3ab   :  { %6782 = vmatprep.mubr.msk.bf16.mxu0 %vm3538_vm0, %v8317_v58 }
 0x3ad   :  { %v5427_v1 = vpop.f32.mrb[12].mxu0 }
 0x3ae   :  { %v6823_v5 = vadd.f32 %v5427_v1, %v10053_v9  ;;  %v5429_v8 = vpop.f32.mrb[13].mxu0 }
 0x3af   :  { %v5430_v13 = vpop.f32.mrb[14].mxu0 }
 0x3b0   :  { %5664 = vst [vmem:[#allocation2 + $0x30] sm:$0xff] %v6823_v5  ;;  %v6824_v15 = vadd.f32 %v5430_v13, %v10058_v12  ;;  %v5432_v16 = vpop.f32.mrb[15].mxu0 }
 0x3b1   :  { %4775 = vmatmul.mubr.bf16.gmra.mrb[120].mxu1 %v8319_v3 }
 0x3b2   :  { %5665 = vst [vmem:[#allocation2 + $0x38] sm:$0xff] %v6824_v15  ;;  %5642 = vmatmul.mubr.bf16.gmra.mrb[120].mxu0 %v8320_v10  ;;  %4782 = vmatprep.mubr.bf16.mxu1 %v8321_v4 }
 0x3b3   :  { %6783 = vmatprep.mubr.msk.bf16.mxu0 %vm3538_vm0, %v8323_v14 }
 0x3b5   :  { %v5435_v9 = vpop.f32.mrb[16].mxu0 }
 0x3b6   :  { %v6825_v21 = vadd.f32 %v5435_v9, %v10070_v17  ;;  %v5437_v23 = vpop.f32.mrb[17].mxu0 }
 0x3b7   :  { %v5438_v12 = vpop.f32.mrb[18].mxu0 }
 0x3b8   :  { %5666 = vst [vmem:[#allocation2 + $0x40] sm:$0xff] %v6825_v21  ;;  %v6826_v26 = vadd.f32 %v5438_v12, %v10075_v20  ;;  %v5440_v27 = vpop.f32.mrb[19].mxu0 }
 0x3b9   :  { %4783 = vmatmul.mubr.bf16.gmra.mrb[124].mxu1 %v8325_v19 }
 0x3ba   :  { %5667 = vst [vmem:[#allocation2 + $0x48] sm:$0xff] %v6826_v26  ;;  %5650 = vmatmul.mubr.bf16.gmra.mrb[124].mxu0 %v8326_v24 }
 0x3bd   :  { %v5443_v30 = vpop.f32.mrb[20].mxu0 }
 0x3be   :  { %v6827_v31 = vadd.f32 %v5443_v30, %v10087_v25  ;;  %v5445_v48 = vpop.f32.mrb[21].mxu0 }
 0x3bf   :  { %v5446_v34 = vpop.f32.mrb[22].mxu0 }
 0x3c0   :  { %5668 = vst [vmem:[#allocation2 + $0x50] sm:$0xff] %v6827_v31  ;;  %v6828_v17 = vadd.f32 %v5446_v34, %v10092_v28  ;;  %v5448_v35 = vpop.f32.mrb[23].mxu0 }
 0x3c2   :  { %5669 = vst [vmem:[#allocation2 + $0x58] sm:$0xff] %v6828_v17 }
 0x3c5   :  { %v5451_v37 = vpop.f32.mrb[24].mxu0 }
 0x3c6   :  { %v6829_v38 = vadd.f32 %v5451_v37, %v10104_v33  ;;  %v5453_v51 = vpop.f32.mrb[25].mxu0 }
 0x3c7   :  { %v5454_v0 = vpop.f32.mrb[26].mxu0 }
 0x3c8   :  { %5670 = vst [vmem:[#allocation2 + $0x60] sm:$0xff] %v6829_v38  ;;  %v6830_v20 = vadd.f32 %v5454_v0, %v10109_v36  ;;  %v5456_v41 = vpop.f32.mrb[27].mxu0 }
 0x3ca   :  { %5671 = vst [vmem:[#allocation2 + $0x68] sm:$0xff] %v6830_v20 }
 0x3cd   :  { %v5459_v44 = vpop.f32.mrb[28].mxu0 }
 0x3ce   :  { %v6831_v25 = vadd.f32 %v5459_v44, %v10121_v40  ;;  %v5461_v45 = vpop.f32.mrb[29].mxu0 }
 0x3cf   :  { %v5462_v56 = vpop.f32.mrb[30].mxu0 }
 0x3d0   :  { %5672 = vst [vmem:[#allocation2 + $0x70] sm:$0xff] %v6831_v25  ;;  %v6832_v28 = vadd.f32 %v5462_v56, %v10126_v43  ;;  %v5464_v46 = vpop.f32.mrb[31].mxu0 }
 0x3d2   :  { %5673 = vst [vmem:[#allocation2 + $0x78] sm:$0xff] %v6832_v28 }
 0x3d5   :  { %v5467_v47 = vpop.f32.mrb[32].mxu0 }
 0x3d6   :  { %v6833_v33 = vadd.f32 %v5467_v47, %v10138_v49  ;;  %v5469_v52 = vpop.f32.mrb[33].mxu0 }
 0x3d7   :  { %v5470_v54 = vpop.f32.mrb[34].mxu0 }
 0x3d8   :  { %5674 = vst [vmem:[#allocation2 + $0x80] sm:$0xff] %v6833_v33  ;;  %v6834_v36 = vadd.f32 %v5470_v54, %v10143_v53  ;;  %v5472_v59 = vpop.f32.mrb[35].mxu0 }
 0x3da   :  { %5675 = vst [vmem:[#allocation2 + $0x88] sm:$0xff] %v6834_v36 }
 0x3dd   :  { %v5475_v57 = vpop.f32.mrb[36].mxu0 }
 0x3de   :  { %v6835_v40 = vadd.f32 %v5475_v57, %v10155_v60  ;;  %v5477_v58 = vpop.f32.mrb[37].mxu0 }
 0x3df   :  { %v5478_v61 = vpop.f32.mrb[38].mxu0 }
 0x3e0   :  { %5676 = vst [vmem:[#allocation2 + $0x90] sm:$0xff] %v6835_v40  ;;  %v6836_v43 = vadd.f32 %v5478_v61, %v10160_v63  ;;  %v5480_v62 = vpop.f32.mrb[39].mxu0 }
 0x3e2   :  { %5677 = vst [vmem:[#allocation2 + $0x98] sm:$0xff] %v6836_v43 }
 0x3e5   :  { %v5483_v1 = vpop.f32.mrb[40].mxu0 }
 0x3e6   :  { %v6837_v49 = vadd.f32 %v5483_v1, %v10172_v7  ;;  %v5485_v3 = vpop.f32.mrb[41].mxu0 }
 0x3e7   :  { %v5486_v5 = vpop.f32.mrb[42].mxu0 }
 0x3e8   :  { %5678 = vst [vmem:[#allocation2 + $0xa0] sm:$0xff] %v6837_v49  ;;  %v6838_v53 = vadd.f32 %v5486_v5, %v10177_v11  ;;  %v5488_v8 = vpop.f32.mrb[43].mxu0 }
 0x3ea   :  { %5679 = vst [vmem:[#allocation2 + $0xa8] sm:$0xff] %v6838_v53 }
 0x3ed   :  { %v5491_v10 = vpop.f32.mrb[44].mxu0 }
 0x3ee   :  { %v6839_v60 = vadd.f32 %v5491_v10, %v10189_v18  ;;  %v5493_v4 = vpop.f32.mrb[45].mxu0 }
 0x3ef   :  { %v5494_v13 = vpop.f32.mrb[46].mxu0 }
 0x3f0   :  { %5680 = vst [vmem:[#allocation2 + $0xb0] sm:$0xff] %v6839_v60  ;;  %v6840_v63 = vadd.f32 %v5494_v13, %v10194_v22  ;;  %v5496_v14 = vpop.f32.mrb[47].mxu0 }
 0x3f2   :  { %5681 = vst [vmem:[#allocation2 + $0xb8] sm:$0xff] %v6840_v63 }
 0x3f5   :  { %v5499_v15 = vpop.f32.mrb[48].mxu0 }
 0x3f6   :  { %v6841_v7 = vadd.f32 %v5499_v15, %v10206_v29  ;;  %v5501_v16 = vpop.f32.mrb[49].mxu0 }
 0x3f7   :  { %v5502_v9 = vpop.f32.mrb[50].mxu0 }
 0x3f8   :  { %5682 = vst [vmem:[#allocation2 + $0xc0] sm:$0xff] %v6841_v7  ;;  %v6842_v11 = vadd.f32 %v5502_v9, %v10211_v32  ;;  %v5504_v19 = vpop.f32.mrb[51].mxu0 }
 0x3fa   :  { %5683 = vst [vmem:[#allocation2 + $0xc8] sm:$0xff] %v6842_v11 }
 0x3fd   :  { %v5507_v21 = vpop.f32.mrb[52].mxu0 }
 0x3fe   :  { %v6843_v18 = vadd.f32 %v5507_v21, %v10223_v39  ;;  %v5509_v23 = vpop.f32.mrb[53].mxu0 }
 0x3ff   :  { %v5510_v24 = vpop.f32.mrb[54].mxu0 }
 0x400   :  { %5684 = vst [vmem:[#allocation2 + $0xd0] sm:$0xff] %v6843_v18  ;;  %v6844_v22 = vadd.f32 %v5510_v24, %v10228_v42  ;;  %v5512_v12 = vpop.f32.mrb[55].mxu0 }
 0x402   :  { %5685 = vst [vmem:[#allocation2 + $0xd8] sm:$0xff] %v6844_v22 }
 0x405   :  { %v5515_v26 = vpop.f32.mrb[56].mxu0 }
 0x406   :  { %v6845_v29 = vadd.f32 %v5515_v26, %v10240_v50  ;;  %v5517_v27 = vpop.f32.mrb[57].mxu0 }
 0x407   :  { %v5518_v30 = vpop.f32.mrb[58].mxu0 }
 0x408   :  { %5686 = vst [vmem:[#allocation2 + $0xe0] sm:$0xff] %v6845_v29  ;;  %v6846_v32 = vadd.f32 %v5518_v30, %v10245_v55  ;;  %v5520_v31 = vpop.f32.mrb[59].mxu0 }
 0x40a   :  { %5687 = vst [vmem:[#allocation2 + $0xe8] sm:$0xff] %v6846_v32 }
 0x40d   :  { %v5523_v48 = vpop.f32.mrb[60].mxu0 }
 0x40e   :  { %v6847_v39 = vadd.f32 %v5523_v48, %v10257_v2  ;;  %v5525_v34 = vpop.f32.mrb[61].mxu0 }
 0x40f   :  { %v5526_v17 = vpop.f32.mrb[62].mxu0 }
 0x410   :  { %5688 = vst [vmem:[#allocation2 + $0xf0] sm:$0xff] %v6847_v39  ;;  %v6848_v42 = vadd.f32 %v5526_v17, %v10262_v6  ;;  %v5528_v35 = vpop.f32.mrb[63].mxu0 }
 0x412   :  { %5689 = vst [vmem:[#allocation2 + $0xf8] sm:$0xff] %v6848_v42 }
 0x414   :  { %v4664_v37 = vpop.f32.mrb[64].mxu1 }
 0x415   :  { %v5531_v38 = vpop.f32.mrb[64].mxu0  ;;  %v4666_v50 = vpop.f32.mrb[65].mxu1 }
 0x416   :  { %v6849_v51 = vadd.f32 %v5531_v38, %v4664_v37  ;;  %v5533_v0 = vpop.f32.mrb[65].mxu0  ;;  %v4667_v20 = vpop.f32.mrb[66].mxu1 }
 0x417   :  { %v5534_v41 = vpop.f32.mrb[66].mxu0  ;;  %v4669_v55 = vpop.f32.mrb[67].mxu1 }
 0x418   :  { %5690 = vst [vmem:[#allocation2 + $0x100] sm:$0xff] %v6849_v51  ;;  %v6850_v44 = vadd.f32 %v5534_v41, %v4667_v20  ;;  %v5536_v25 = vpop.f32.mrb[67].mxu0 }
 0x41a   :  { %5691 = vst [vmem:[#allocation2 + $0x108] sm:$0xff] %v6850_v44 }
 0x41c   :  { %v4672_v2 = vpop.f32.mrb[68].mxu1 }
 0x41d   :  { %v5539_v45 = vpop.f32.mrb[68].mxu0  ;;  %v4674_v56 = vpop.f32.mrb[69].mxu1 }
 0x41e   :  { %v6851_v28 = vadd.f32 %v5539_v45, %v4672_v2  ;;  %v5541_v46 = vpop.f32.mrb[69].mxu0  ;;  %v4675_v6 = vpop.f32.mrb[70].mxu1 }
 0x41f   :  { %v5542_v47 = vpop.f32.mrb[70].mxu0  ;;  %v4677_v33 = vpop.f32.mrb[71].mxu1 }
 0x420   :  { %5692 = vst [vmem:[#allocation2 + $0x110] sm:$0xff] %v6851_v28  ;;  %v6852_v52 = vadd.f32 %v5542_v47, %v4675_v6  ;;  %v5544_v54 = vpop.f32.mrb[71].mxu0 }
 0x422   :  { %5693 = vst [vmem:[#allocation2 + $0x118] sm:$0xff] %v6852_v52 }
 0x424   :  { %v4680_v36 = vpop.f32.mrb[72].mxu1 }
 0x425   :  { %v5547_v59 = vpop.f32.mrb[72].mxu0  ;;  %v4682_v57 = vpop.f32.mrb[73].mxu1 }
 0x426   :  { %v6853_v40 = vadd.f32 %v5547_v59, %v4680_v36  ;;  %v5549_v58 = vpop.f32.mrb[73].mxu0  ;;  %v4683_v61 = vpop.f32.mrb[74].mxu1 }
 0x427   :  { %v5550_v43 = vpop.f32.mrb[74].mxu0  ;;  %v4685_v62 = vpop.f32.mrb[75].mxu1 }
 0x428   :  { %5694 = vst [vmem:[#allocation2 + $0x120] sm:$0xff] %v6853_v40  ;;  %v6854_v1 = vadd.f32 %v5550_v43, %v4683_v61  ;;  %v5552_v49 = vpop.f32.mrb[75].mxu0 }
 0x42a   :  { %5695 = vst [vmem:[#allocation2 + $0x128] sm:$0xff] %v6854_v1 }
 0x42c   :  { %v4688_v3 = vpop.f32.mrb[76].mxu1 }
 0x42d   :  { %v5555_v5 = vpop.f32.mrb[76].mxu0  ;;  %v4690_v53 = vpop.f32.mrb[77].mxu1 }
 0x42e   :  { %v6855_v8 = vadd.f32 %v5555_v5, %v4688_v3  ;;  %v5557_v10 = vpop.f32.mrb[77].mxu0  ;;  %v4691_v60 = vpop.f32.mrb[78].mxu1 }
 0x42f   :  { %v5558_v4 = vpop.f32.mrb[78].mxu0  ;;  %v4693_v13 = vpop.f32.mrb[79].mxu1 }
 0x430   :  { %5696 = vst [vmem:[#allocation2 + $0x130] sm:$0xff] %v6855_v8  ;;  %v6856_v63 = vadd.f32 %v5558_v4, %v4691_v60  ;;  %v5560_v14 = vpop.f32.mrb[79].mxu0 }
 0x432   :  { %5697 = vst [vmem:[#allocation2 + $0x138] sm:$0xff] %v6856_v63 }
 0x434   :  { %v4696_v15 = vpop.f32.mrb[80].mxu1 }
 0x435   :  { %v5563_v7 = vpop.f32.mrb[80].mxu0  ;;  %v4698_v16 = vpop.f32.mrb[81].mxu1 }
 0x436   :  { %v6857_v9 = vadd.f32 %v5563_v7, %v4696_v15  ;;  %v5565_v11 = vpop.f32.mrb[81].mxu0  ;;  %v4699_v19 = vpop.f32.mrb[82].mxu1 }
 0x437   :  { %v5566_v21 = vpop.f32.mrb[82].mxu0  ;;  %v4701_v18 = vpop.f32.mrb[83].mxu1 }
 0x438   :  { %5698 = vst [vmem:[#allocation2 + $0x140] sm:$0xff] %v6857_v9  ;;  %v6858_v23 = vadd.f32 %v5566_v21, %v4699_v19  ;;  %v5568_v24 = vpop.f32.mrb[83].mxu0 }
 0x43a   :  { %5699 = vst [vmem:[#allocation2 + $0x148] sm:$0xff] %v6858_v23 }
 0x43c   :  { %v4704_v22 = vpop.f32.mrb[84].mxu1 }
 0x43d   :  { %v5571_v12 = vpop.f32.mrb[84].mxu0  ;;  %v4706_v26 = vpop.f32.mrb[85].mxu1 }
 0x43e   :  { %v6859_v29 = vadd.f32 %v5571_v12, %v4704_v22  ;;  %v5573_v27 = vpop.f32.mrb[85].mxu0  ;;  %v4707_v30 = vpop.f32.mrb[86].mxu1 }
 0x43f   :  { %v5574_v32 = vpop.f32.mrb[86].mxu0  ;;  %v4709_v31 = vpop.f32.mrb[87].mxu1 }
 0x440   :  { %5700 = vst [vmem:[#allocation2 + $0x150] sm:$0xff] %v6859_v29  ;;  %v6860_v48 = vadd.f32 %v5574_v32, %v4707_v30  ;;  %v5576_v39 = vpop.f32.mrb[87].mxu0 }
 0x442   :  { %5701 = vst [vmem:[#allocation2 + $0x158] sm:$0xff] %v6860_v48 }
 0x444   :  { %v4712_v34 = vpop.f32.mrb[88].mxu1 }
 0x445   :  { %v5579_v17 = vpop.f32.mrb[88].mxu0  ;;  %v4714_v42 = vpop.f32.mrb[89].mxu1 }
 0x446   :  { %v6861_v35 = vadd.f32 %v5579_v17, %v4712_v34  ;;  %v5581_v37 = vpop.f32.mrb[89].mxu0  ;;  %v4715_v38 = vpop.f32.mrb[90].mxu1 }
 0x447   :  { %v5582_v50 = vpop.f32.mrb[90].mxu0  ;;  %v4717_v51 = vpop.f32.mrb[91].mxu1 }
 0x448   :  { %5702 = vst [vmem:[#allocation2 + $0x160] sm:$0xff] %v6861_v35  ;;  %v6862_v0 = vadd.f32 %v5582_v50, %v4715_v38  ;;  %v5584_v20 = vpop.f32.mrb[91].mxu0 }
 0x44a   :  { %5703 = vst [vmem:[#allocation2 + $0x168] sm:$0xff] %v6862_v0 }
 0x44c   :  { %v4720_v41 = vpop.f32.mrb[92].mxu1 }
 0x44d   :  { %v5587_v55 = vpop.f32.mrb[92].mxu0  ;;  %v4722_v44 = vpop.f32.mrb[93].mxu1 }
 0x44e   :  { %v6863_v25 = vadd.f32 %v5587_v55, %v4720_v41  ;;  %v5589_v2 = vpop.f32.mrb[93].mxu0  ;;  %v4723_v45 = vpop.f32.mrb[94].mxu1 }
 0x44f   :  { %v5590_v56 = vpop.f32.mrb[94].mxu0  ;;  %v4725_v28 = vpop.f32.mrb[95].mxu1 }
 0x450   :  { %5704 = vst [vmem:[#allocation2 + $0x170] sm:$0xff] %v6863_v25  ;;  %v6864_v46 = vadd.f32 %v5590_v56, %v4723_v45  ;;  %v5592_v6 = vpop.f32.mrb[95].mxu0 }
 0x452   :  { %5705 = vst [vmem:[#allocation2 + $0x178] sm:$0xff] %v6864_v46 }
 0x454   :  { %v4728_v47 = vpop.f32.mrb[96].mxu1 }
 0x455   :  { %v5595_v33 = vpop.f32.mrb[96].mxu0  ;;  %v4730_v52 = vpop.f32.mrb[97].mxu1 }
 0x456   :  { %v6865_v54 = vadd.f32 %v5595_v33, %v4728_v47  ;;  %v5597_v36 = vpop.f32.mrb[97].mxu0  ;;  %v4731_v59 = vpop.f32.mrb[98].mxu1 }
 0x457   :  { %v5598_v57 = vpop.f32.mrb[98].mxu0  ;;  %v4733_v40 = vpop.f32.mrb[99].mxu1 }
 0x458   :  { %5706 = vst [vmem:[#allocation2 + $0x180] sm:$0xff] %v6865_v54  ;;  %v6866_v58 = vadd.f32 %v5598_v57, %v4731_v59  ;;  %v5600_v61 = vpop.f32.mrb[99].mxu0 }
 0x45a   :  { %5707 = vst [vmem:[#allocation2 + $0x188] sm:$0xff] %v6866_v58 }
 0x45c   :  { %v4736_v43 = vpop.f32.mrb[100].mxu1 }
 0x45d   :  { %v5603_v62 = vpop.f32.mrb[100].mxu0  ;;  %v4738_v1 = vpop.f32.mrb[101].mxu1 }
 0x45e   :  { %v6867_v49 = vadd.f32 %v5603_v62, %v4736_v43  ;;  %v5605_v3 = vpop.f32.mrb[101].mxu0  ;;  %v4739_v5 = vpop.f32.mrb[102].mxu1 }
 0x45f   :  { %v5606_v53 = vpop.f32.mrb[102].mxu0  ;;  %v4741_v8 = vpop.f32.mrb[103].mxu1 }
 0x460   :  { %5708 = vst [vmem:[#allocation2 + $0x190] sm:$0xff] %v6867_v49  ;;  %v6868_v10 = vadd.f32 %v5606_v53, %v4739_v5  ;;  %v5608_v60 = vpop.f32.mrb[103].mxu0  ;;  %v10364_v53 = vmov 0.0   ;;  %v10366_v8 = vmov 0.0  }
 0x462   :  { %5709 = vst [vmem:[#allocation2 + $0x198] sm:$0xff] %v6868_v10 }
 0x464   :  { %v4744_v4 = vpop.f32.mrb[104].mxu1 }
 0x465   :  { %v5611_v13 = vpop.f32.mrb[104].mxu0  ;;  %v4746_v63 = vpop.f32.mrb[105].mxu1 }
 0x466   :  { %v6869_v14 = vadd.f32 %v5611_v13, %v4744_v4  ;;  %v5613_v15 = vpop.f32.mrb[105].mxu0  ;;  %v4747_v7 = vpop.f32.mrb[106].mxu1 }
 0x467   :  { %v5614_v16 = vpop.f32.mrb[106].mxu0  ;;  %v4749_v9 = vpop.f32.mrb[107].mxu1 }
 0x468   :  { %5710 = vst [vmem:[#allocation2 + $0x1a0] sm:$0xff] %v6869_v14  ;;  %v6870_v11 = vadd.f32 %v5614_v16, %v4747_v7  ;;  %v5616_v19 = vpop.f32.mrb[107].mxu0 }
 0x46a   :  { %5711 = vst [vmem:[#allocation2 + $0x1a8] sm:$0xff] %v6870_v11 }
 0x46c   :  { %v4752_v21 = vpop.f32.mrb[108].mxu1 }
 0x46d   :  { %v5619_v18 = vpop.f32.mrb[108].mxu0  ;;  %v4754_v23 = vpop.f32.mrb[109].mxu1 }
 0x46e   :  { %v6871_v24 = vadd.f32 %v5619_v18, %v4752_v21  ;;  %v5621_v22 = vpop.f32.mrb[109].mxu0  ;;  %v4755_v12 = vpop.f32.mrb[110].mxu1 }
 0x46f   :  { %v5622_v26 = vpop.f32.mrb[110].mxu0  ;;  %v4757_v29 = vpop.f32.mrb[111].mxu1 }
 0x470   :  { %5712 = vst [vmem:[#allocation2 + $0x1b0] sm:$0xff] %v6871_v24  ;;  %v6872_v27 = vadd.f32 %v5622_v26, %v4755_v12  ;;  %v5624_v30 = vpop.f32.mrb[111].mxu0 }
 0x472   :  { %5713 = vst [vmem:[#allocation2 + $0x1b8] sm:$0xff] %v6872_v27 }
 0x474   :  { %v4760_v32 = vpop.f32.mrb[112].mxu1 }
 0x475   :  { %v5627_v31 = vpop.f32.mrb[112].mxu0  ;;  %v4762_v48 = vpop.f32.mrb[113].mxu1 }
 0x476   :  { %v6873_v39 = vadd.f32 %v5627_v31, %v4760_v32  ;;  %v5629_v34 = vpop.f32.mrb[113].mxu0  ;;  %v4763_v17 = vpop.f32.mrb[114].mxu1 }
 0x477   :  { %v5630_v42 = vpop.f32.mrb[114].mxu0  ;;  %v4765_v35 = vpop.f32.mrb[115].mxu1 }
 0x478   :  { %5714 = vst [vmem:[#allocation2 + $0x1c0] sm:$0xff] %v6873_v39  ;;  %v6874_v37 = vadd.f32 %v5630_v42, %v4763_v17  ;;  %v5632_v38 = vpop.f32.mrb[115].mxu0 }
 0x47a   :  { %5715 = vst [vmem:[#allocation2 + $0x1c8] sm:$0xff] %v6874_v37 }
 0x47c   :  { %v4768_v50 = vpop.f32.mrb[116].mxu1 }
 0x47d   :  { %v5635_v51 = vpop.f32.mrb[116].mxu0  ;;  %v4770_v0 = vpop.f32.mrb[117].mxu1 }
 0x47e   :  { %v6875_v20 = vadd.f32 %v5635_v51, %v4768_v50  ;;  %v5637_v41 = vpop.f32.mrb[117].mxu0  ;;  %v4771_v55 = vpop.f32.mrb[118].mxu1 }
 0x47f   :  { %v5638_v44 = vpop.f32.mrb[118].mxu0  ;;  %v4773_v25 = vpop.f32.mrb[119].mxu1 }
 0x480   :  { %5716 = vst [vmem:[#allocation2 + $0x1d0] sm:$0xff] %v6875_v20  ;;  %v6876_v2 = vadd.f32 %v5638_v44, %v4771_v55  ;;  %v5640_v45 = vpop.f32.mrb[119].mxu0 }
 0x482   :  { %5717 = vst [vmem:[#allocation2 + $0x1d8] sm:$0xff] %v6876_v2 }
 0x484   :  { %v4776_v56 = vpop.f32.mrb[120].mxu1 }
 0x485   :  { %v5643_v28 = vpop.f32.mrb[120].mxu0  ;;  %v4778_v46 = vpop.f32.mrb[121].mxu1 }
 0x486   :  { %v6877_v6 = vadd.f32 %v5643_v28, %v4776_v56  ;;  %v5645_v47 = vpop.f32.mrb[121].mxu0  ;;  %v4779_v33 = vpop.f32.mrb[122].mxu1 }
 0x487   :  { %v5646_v52 = vpop.f32.mrb[122].mxu0  ;;  %v4781_v54 = vpop.f32.mrb[123].mxu1 }
 0x488   :  { %5718 = vst [vmem:[#allocation2 + $0x1e0] sm:$0xff] %v6877_v6  ;;  %v6878_v36 = vadd.f32 %v5646_v52, %v4779_v33  ;;  %v5648_v59 = vpop.f32.mrb[123].mxu0 }
 0x48a   :  { %5719 = vst [vmem:[#allocation2 + $0x1e8] sm:$0xff] %v6878_v36 }
 0x48c   :  { %v4784_v57 = vpop.f32.mrb[124].mxu1 }
 0x48d   :  { %v5651_v40 = vpop.f32.mrb[124].mxu0  ;;  %v4786_v58 = vpop.f32.mrb[125].mxu1 }
 0x48e   :  { %v6879_v61 = vadd.f32 %v5651_v40, %v4784_v57  ;;  %v5653_v43 = vpop.f32.mrb[125].mxu0  ;;  %v4787_v62 = vpop.f32.mrb[126].mxu1 }
 0x48f   :  { %v5654_v1 = vpop.f32.mrb[126].mxu0  ;;  %v4789_v49 = vpop.f32.mrb[127].mxu1 }
 0x490   :  { %5720 = vst [vmem:[#allocation2 + $0x1f0] sm:$0xff] %v6879_v61  ;;  %v6880_v3 = vadd.f32 %v5654_v1, %v4787_v62  ;;  %v5656_v5 = vpop.f32.mrb[127].mxu0 }
 0x492   :  { %5721 = vst [vmem:[#allocation2 + $0x1f8] sm:$0xff] %v6880_v3 }
 0x493 LB: > { %s6784_s29 = sshll.u32 %s8367_s0, 7  ;;  %s5727_s0 = sadd.s32 1, %s8367_s0   ;;  %s8367_s0 = sphi %s10368_s0, %s5727_s0   ;;  %v8363_v8 = vphi %v10366_v8, %v10575_v8   ;;  %v8359_v53 = vphi %v10364_v53, %v10574_v53  }
 0x494   : > { %s10380_s30 = scalar_lea.vmem [#allocation2], %s6784_s29  ;;  %p5724_p0 = scmp.ge.s32.totalorder %s5727_s0, 4  }
 0x495   :  { %s8370_s5 = smov (%p5724_p0), 64  }
 0x499   : > { %v5732_v10 = vld [vmem:[%s10380_s30] sm:$0xff]  ;;  %v5733_v60 = vld [vmem:[%s10380_s30 + $0x8] sm:$0xff]  ;;  %v5734_v4 = vld [vmem:[%s10380_s30 + $0x10] sm:$0xff] }
 0x49a   : > { %v5735_v13 = vld [vmem:[%s10380_s30 + $0x18] sm:$0xff]  ;;  %v5748_v63 = vadd.f32 %v5733_v60, %v5732_v10  ;;  %v5770_v14 = vmul.f32 %v5732_v10, %v5732_v10  ;;  %v5771_v15 = vmul.f32 %v5733_v60, %v5733_v60  ;;  %v5772_v7 = vmul.f32 %v5734_v4, %v5734_v4  ;;  %v5736_v16 = vld [vmem:[%s10380_s30 + $0x20] sm:$0xff]  ;;  %v5737_v21 = vld [vmem:[%s10380_s30 + $0x28] sm:$0xff] }
 0x49b   : > { %v5773_v11 = vmul.f32 %v5735_v13, %v5735_v13  ;;  %v5774_v23 = vmul.f32 %v5736_v16, %v5736_v16  ;;  %v5738_v22 = vld [vmem:[%s10380_s30 + $0x30] sm:$0xff]  ;;  %v5775_v26 = vmul.f32 %v5737_v21, %v5737_v21  ;;  %v5739_v27 = vld [vmem:[%s10380_s30 + $0x38] sm:$0xff]  ;;  %v5740_v48 = vld [vmem:[%s10380_s30 + $0x40] sm:$0xff] }
 0x49c   : > { %v5749_v9 = vadd.f32 %v5748_v63, %v5734_v4  ;;  %v5786_v19 = vadd.f32 %v5771_v15, %v5770_v14  ;;  %v5776_v32 = vmul.f32 %v5738_v22, %v5738_v22  ;;  %v5777_v34 = vmul.f32 %v5739_v27, %v5739_v27  ;;  %v5741_v42 = vld [vmem:[%s10380_s30 + $0x48] sm:$0xff]  ;;  %v5742_v50 = vld [vmem:[%s10380_s30 + $0x50] sm:$0xff]  ;;  %v5743_v41 = vld [vmem:[%s10380_s30 + $0x58] sm:$0xff] }
 0x49d   : > { %v5778_v37 = vmul.f32 %v5740_v48, %v5740_v48  ;;  %v5779_v0 = vmul.f32 %v5741_v42, %v5741_v42  ;;  %v5780_v44 = vmul.f32 %v5742_v50, %v5742_v50  ;;  %v5744_v2 = vld [vmem:[%s10380_s30 + $0x60] sm:$0xff]  ;;  %v5781_v56 = vmul.f32 %v5743_v41, %v5743_v41  ;;  %v5745_v46 = vld [vmem:[%s10380_s30 + $0x68] sm:$0xff]  ;;  %v5746_v52 = vld [vmem:[%s10380_s30 + $0x70] sm:$0xff] }
 0x49e   : > { %v5750_v18 = vadd.f32 %v5749_v9, %v5735_v13  ;;  %v5787_v24 = vadd.f32 %v5786_v19, %v5772_v7  ;;  %v5782_v47 = vmul.f32 %v5744_v2, %v5744_v2  ;;  %v5783_v36 = vmul.f32 %v5745_v46, %v5745_v46  ;;  %v5747_v57 = vld [vmem:[%s10380_s30 + $0x78] sm:$0xff] }
 0x49f   : > { %v5784_v58 = vmul.f32 %v5746_v52, %v5746_v52  ;;  %v5785_v62 = vmul.f32 %v5747_v57, %v5747_v57 }
 0x4a0   : > { %v5751_v12 = vadd.f32 %v5750_v18, %v5736_v16  ;;  %v5788_v29 = vadd.f32 %v5787_v24, %v5773_v11 }
 0x4a2   : > { %v5752_v30 = vadd.f32 %v5751_v12, %v5737_v21  ;;  %v5789_v31 = vadd.f32 %v5788_v29, %v5774_v23 }
 0x4a4   : > { %v5753_v39 = vadd.f32 %v5752_v30, %v5738_v22  ;;  %v5790_v17 = vadd.f32 %v5789_v31, %v5775_v26  ;;  %v5835_v31 = vlaneseq (%p5724_p0) }
 0x4a6   : > { %v5754_v35 = vadd.f32 %v5753_v39, %v5739_v27  ;;  %v5791_v38 = vadd.f32 %v5790_v17, %v5776_v32  ;;  %v5819_v39 = vld [vmem:[%s10569_s2] sm:$0x1] (%p5724_p0) }
 0x4a8   : > { %v5755_v51 = vadd.f32 %v5754_v35, %v5740_v48  ;;  %v5792_v20 = vadd.f32 %v5791_v38, %v5777_v34  ;;  %v5836_v48 = vshrl.u32 (%p5724_p0), %v5835_v31, 7  ;;  %v5826_v35 = vld [vmem:[#allocation2] sm:$0xff] (%p5724_p0)  ;;  %v5828_v38 = vld [vmem:[#allocation2 + $0x10] sm:$0xff] (%p5724_p0) }
 0x4aa   : > { %v5756_v55 = vadd.f32 %v5755_v51, %v5741_v42  ;;  %v5793_v25 = vadd.f32 %v5792_v20, %v5778_v37  ;;  %v5823_v42 = vld [vmem:[%s10570_s3] sm:$0x1] (%p5724_p0)  ;;  %v5827_v37 = vld [vmem:[#allocation2 + $0x8] sm:$0xff] (%p5724_p0) }
 0x4ab   :  { %v5830_v51 = vld [vmem:[#allocation2 + $0x20] sm:$0xff] (%p5724_p0)  ;;  %v5831_v20 = vld [vmem:[#allocation2 + $0x28] sm:$0xff] (%p5724_p0) }
 0x4ac   : > { %v5757_v45 = vadd.f32 %v5756_v55, %v5742_v50  ;;  %v5794_v28 = vadd.f32 %v5793_v25, %v5779_v0  ;;  %v5829_v50 = vld [vmem:[#allocation2 + $0x18] sm:$0xff] (%p5724_p0)  ;;  %v5872_v25 = vld [vmem:[#allocation2 + $0x40] sm:$0xff] (%p5724_p0) }
 0x4ad   :  { %v5833_v55 = vld [vmem:[#allocation2 + $0x38] sm:$0xff] (%p5724_p0) }
 0x4ae   : > { %v5758_v6 = vadd.f32 %v5757_v45, %v5743_v41  ;;  %v5795_v33 = vadd.f32 %v5794_v28, %v5780_v44  ;;  %v5832_v41 = vld [vmem:[#allocation2 + $0x30] sm:$0xff] (%p5724_p0) }
 0x4af   :  { %v5874_v45 = vld [vmem:[#allocation2 + $0x50] sm:$0xff] (%p5724_p0) }
 0x4b0   : > { %v5759_v54 = vadd.f32 %v5758_v6, %v5744_v2  ;;  %v5796_v59 = vadd.f32 %v5795_v33, %v5781_v56  ;;  %v5873_v2 = vld [vmem:[#allocation2 + $0x48] sm:$0xff] (%p5724_p0)  ;;  %v5876_v33 = vld [vmem:[#allocation2 + $0x60] sm:$0xff] (%p5724_p0) }
 0x4b2   : > { %v5760_v40 = vadd.f32 %v5759_v54, %v5745_v46  ;;  %v5797_v61 = vadd.f32 %v5796_v59, %v5782_v47  ;;  %v5875_v47 = vld [vmem:[#allocation2 + $0x58] sm:$0xff] (%p5724_p0) }
 0x4b4   : > { %v5761_v43 = vadd.f32 %v5760_v40, %v5746_v52  ;;  %v5798_v1 = vadd.f32 %v5797_v61, %v5783_v36  ;;  %v5877_v52 = vld [vmem:[#allocation2 + $0x68] sm:$0xff] (%p5724_p0) }
 0x4b6   : > { %v5762_v49 = vadd.f32 %v5761_v43, %v5747_v57  ;;  %v5799_v3 = vadd.f32 %v5798_v1, %v5784_v58 }
 0x4b8   : > { %v5763_v5 = vrot.slane %v5762_v49, 4  ;;  %v5800_v10 = vadd.f32 %v5799_v3, %v5785_v62 }
 0x4ba   : > { %v5764_v60 = vadd.f32 %v5763_v5, %v5762_v49  ;;  %v5801_v4 = vrot.slane %v5800_v10, 4 }
 0x4bc   : > { %v5765_v13 = vrot.slane %v5764_v60, 2  ;;  %v5802_v63 = vadd.f32 %v5801_v4, %v5800_v10 }
 0x4be   : > { %v5766_v14 = vadd.f32 %v5765_v13, %v5764_v60  ;;  %v5803_v15 = vrot.slane %v5802_v63, 2 }
 0x4c0   : > { %v5767_v7 = vrot.slane %v5766_v14, 1  ;;  %v5804_v16 = vadd.f32 %v5803_v15, %v5802_v63 }
 0x4c2   : > { %v5768_v9 = vadd.f32 %v5767_v7, %v5766_v14  ;;  %v5805_v11 = vrot.slane %v5804_v16, 1  ;;  %5726 = sbr.rel (!%p5724_p0) target bundleno = 1171 (0x493), region = 51  ;;  %v5878_v7 = vld [vmem:[#allocation2 + $0x70] sm:$0xff] (%p5724_p0) }
 0x4c4   : > { %v5769_v19 = vadd.f32 %v8363_v8, %v5768_v9   ;;  %v5806_v21 = vadd.f32 %v5805_v11, %v5804_v16  ;;  %v5879_v16 = vld [vmem:[#allocation2 + $0x78] sm:$0xff] (%p5724_p0) }
 0x4c6   : > { %v5807_v18 = vadd.f32 %v8359_v53, %v5806_v21   ;;  %v10575_v8 = vmov %v5769_v19  ;;  %5808 = vrot.lane.b32.xlu0 (%p5724_p0), %v5769_v19, %s8370_s5 }
 0x4c8   : > { %v10574_v53 = vmov %v5807_v18 }
 0x4c9   :  { %v5837_v53 = vsub.s32 0, %v5836_v48 }
 0x4ca   :  { %5811 = vrot.lane.b32.xlu0 %v5807_v18, %s8370_s5 }
 0x538   :  { %v5809_v23 = vpop.permute.xlu0 %5808 }
 0x539   :  { %v5810_v24 = vadd.f32 %v5809_v23, %v5769_v19 }
 0x53b   :  { %v5814_v22 = vmul.f32 0.0009765625, %v5810_v24 }
 0x53c   :  { %v5812_v8 = vpop.permute.xlu0 %5811 }
 0x53d   :  { %v5813_v12 = vadd.f32 %v5812_v8, %v5807_v18  ;;  %v5816_v29 = vmul.f32 %v5814_v22, %v5814_v22 }
 0x53f   :  { %v5815_v26 = vmul.f32 0.0009765625, %v5813_v12 }
 0x541   :  { %v5817_v27 = vsub.f32 %v5815_v26, %v5816_v29 }
 0x543   :  { %v5818_v30 = vmax.f32 %v5817_v27, 0.0 }
 0x545   :  { %v5820_v32 = vadd.f32 1e-05, %v5818_v30 }
 0x547   :  { %8343 = vrsqrt.f32 %v5820_v32 }
 0x551   :  { %v8344_v34 = vpop.eup %8343 }
 0x552   :  { %v5822_v17 = vmul.f32 %v8344_v34, %v5819_v39 }
 0x554   :  { %v5824_v0 = vmul.f32 %v5822_v17, %v5814_v22  ;;  %v10413_v44 = vrot.slane %v5822_v17, %v5837_v53  ;;  %v5914_v17 = vld [vmem:[#allocation2 + $0x80] sm:$0xff] }
 0x556   :  { %v5825_v56 = vsub.f32 %v5823_v42, %v5824_v0  ;;  %v5840_v28 = vmul.f32 %v10413_v44, %v5826_v35  ;;  %v5841_v46 = vmul.f32 %v10413_v44, %v5827_v37  ;;  %v5842_v6 = vmul.f32 %v10413_v44, %v5828_v38 }
 0x557   :  { %v5843_v54 = vmul.f32 %v10413_v44, %v5829_v50  ;;  %v5844_v36 = vmul.f32 %v10413_v44, %v5830_v51  ;;  %v5845_v59 = vmul.f32 %v10413_v44, %v5831_v20  ;;  %v5846_v57 = vmul.f32 %v10413_v44, %v5832_v41  ;;  %v5915_v50 = vld [vmem:[#allocation2 + $0x88] sm:$0xff]  ;;  %v5916_v51 = vld [vmem:[#allocation2 + $0x90] sm:$0xff] }
 0x558   :  { %v5847_v40 = vmul.f32 %v10413_v44, %v5833_v55  ;;  %v10423_v58 = vrot.slane %v5825_v56, %v5837_v53  ;;  %v5880_v61 = vmul.f32 %v5872_v25, %v10413_v44  ;;  %v5881_v43 = vmul.f32 %v5873_v2, %v10413_v44  ;;  %v5917_v25 = vld [vmem:[#allocation2 + $0x98] sm:$0xff]  ;;  %v5918_v2 = vld [vmem:[#allocation2 + $0xa0] sm:$0xff] }
 0x559   :  { %v5882_v62 = vmul.f32 %v5874_v45, %v10413_v44  ;;  %v5883_v1 = vmul.f32 %v5875_v47, %v10413_v44  ;;  %v5884_v49 = vmul.f32 %v5876_v33, %v10413_v44  ;;  %v5885_v3 = vmul.f32 %v5877_v52, %v10413_v44  ;;  %v5919_v45 = vld [vmem:[#allocation2 + $0xa8] sm:$0xff]  ;;  %v5920_v47 = vld [vmem:[#allocation2 + $0xb0] sm:$0xff]  ;;  %v5921_v33 = vld [vmem:[#allocation2 + $0xb8] sm:$0xff] }
 0x55a   :  { %v5854_v5 = vadd.f32 %v10423_v58, %v5840_v28  ;;  %v5855_v10 = vadd.f32 %v10423_v58, %v5841_v46  ;;  %v5856_v60 = vadd.f32 %v10423_v58, %v5842_v6  ;;  %v5857_v4 = vadd.f32 %v10423_v58, %v5843_v54 }
 0x55b   :  { %v5858_v13 = vadd.f32 %v10423_v58, %v5844_v36  ;;  %v5859_v63 = vadd.f32 %v10423_v58, %v5845_v59  ;;  %v5860_v14 = vadd.f32 %v10423_v58, %v5846_v57  ;;  %v5861_v15 = vadd.f32 %v10423_v58, %v5847_v40 }
 0x55c   :  { %v5862_v9 = vmax.f32 %v5854_v5, 0.0  ;;  %v5863_v11 = vmax.f32 %v5855_v10, 0.0  ;;  %v5864_v19 = vmax.f32 %v5856_v60, 0.0  ;;  %v5865_v21 = vmax.f32 %v5857_v4, 0.0 }
 0x55d   :  { %v5866_v18 = vmax.f32 %v5858_v13, 0.0  ;;  %v5867_v23 = vmax.f32 %v5859_v63, 0.0  ;;  %v5868_v24 = vmax.f32 %v5860_v14, 0.0  ;;  %v5869_v22 = vmax.f32 %v5861_v15, 0.0 }
 0x55e   :  { %v5886_v8 = vmul.f32 %v5878_v7, %v10413_v44  ;;  %v5887_v12 = vmul.f32 %v5879_v16, %v10413_v44  ;;  %v5888_v26 = vadd.f32 %v5880_v61, %v10423_v58  ;;  %v5889_v29 = vadd.f32 %v5881_v43, %v10423_v58  ;;  %v5956_v7 = vld [vmem:[#allocation2 + $0xc0] sm:$0xff] }
 0x55f   :  { %v5890_v27 = vadd.f32 %v5882_v62, %v10423_v58  ;;  %v5891_v30 = vadd.f32 %v5883_v1, %v10423_v58  ;;  %v5892_v32 = vadd.f32 %v5884_v49, %v10423_v58  ;;  %v5893_v31 = vadd.f32 %v5885_v3, %v10423_v58 }
 0x560   :  { %v5894_v48 = vadd.f32 %v5886_v8, %v10423_v58  ;;  %v5895_v39 = vadd.f32 %v5887_v12, %v10423_v58  ;;  %v5896_v53 = vmax.f32 %v5888_v26, 0.0  ;;  %v5897_v34 = vmax.f32 %v5889_v29, 0.0  ;;  %v5959_v12 = vld [vmem:[#allocation2 + $0xd8] sm:$0xff]  ;;  %v5960_v26 = vld [vmem:[#allocation2 + $0xe0] sm:$0xff]  ;;  %v5961_v29 = vld [vmem:[#allocation2 + $0xe8] sm:$0xff] }
 0x561   :  { %v5898_v42 = vmax.f32 %v5890_v27, 0.0  ;;  %v5899_v35 = vmax.f32 %v5891_v30, 0.0  ;;  %v5900_v37 = vmax.f32 %v5892_v32, 0.0  ;;  %v5901_v38 = vmax.f32 %v5893_v31, 0.0 }
 0x562   :  { %v5902_v0 = vmax.f32 %v5894_v48, 0.0  ;;  %v5903_v20 = vmax.f32 %v5895_v39, 0.0  ;;  %v5904_v41 = vmax.f32 %v5862_v9, %v5896_v53  ;;  %v5905_v55 = vmax.f32 %v5863_v11, %v5897_v34  ;;  %v5962_v48 = vld [vmem:[#allocation2 + $0xf0] sm:$0xff]  ;;  %v5963_v39 = vld [vmem:[#allocation2 + $0xf8] sm:$0xff] }
 0x563   :  { %v5906_v56 = vmax.f32 %v5864_v19, %v5898_v42  ;;  %v5907_v28 = vmax.f32 %v5865_v21, %v5899_v35  ;;  %v5908_v46 = vmax.f32 %v5866_v18, %v5900_v37  ;;  %v5909_v6 = vmax.f32 %v5867_v23, %v5901_v38  ;;  %v5957_v21 = vld [vmem:[#allocation2 + $0xc8] sm:$0xff]  ;;  %v5958_v18 = vld [vmem:[#allocation2 + $0xd0] sm:$0xff] }
 0x564   :  { %v5910_v52 = vmax.f32 %v5868_v24, %v5902_v0  ;;  %v5911_v54 = vmax.f32 %v5869_v22, %v5903_v20  ;;  %v5922_v36 = vmul.f32 %v5914_v17, %v10413_v44  ;;  %v5923_v59 = vmul.f32 %v5915_v50, %v10413_v44 }
 0x565   :  { %v5924_v57 = vmul.f32 %v5916_v51, %v10413_v44  ;;  %v5925_v40 = vmul.f32 %v5917_v25, %v10413_v44  ;;  %v5926_v61 = vmul.f32 %v5918_v2, %v10413_v44  ;;  %v5927_v43 = vmul.f32 %v5919_v45, %v10413_v44 }
 0x566   :  { %v5928_v62 = vmul.f32 %v5920_v47, %v10413_v44  ;;  %v5929_v1 = vmul.f32 %v5921_v33, %v10413_v44  ;;  %v5930_v49 = vadd.f32 %v5922_v36, %v10423_v58  ;;  %v5931_v3 = vadd.f32 %v5923_v59, %v10423_v58  ;;  %v5998_v47 = vld [vmem:[#allocation2 + $0x100] sm:$0xff]  ;;  %v5999_v59 = vld [vmem:[#allocation2 + $0x108] sm:$0xff] }
 0x567   :  { %v5932_v5 = vadd.f32 %v5924_v57, %v10423_v58  ;;  %v5933_v10 = vadd.f32 %v5925_v40, %v10423_v58  ;;  %v5934_v60 = vadd.f32 %v5926_v61, %v10423_v58  ;;  %v5935_v4 = vadd.f32 %v5927_v43, %v10423_v58  ;;  %v6000_v57 = vld [vmem:[#allocation2 + $0x110] sm:$0xff] }
 0x568   :  { %v5936_v13 = vadd.f32 %v5928_v62, %v10423_v58  ;;  %v5937_v63 = vadd.f32 %v5929_v1, %v10423_v58  ;;  %v5938_v14 = vmax.f32 %v5930_v49, 0.0  ;;  %v5939_v15 = vmax.f32 %v5931_v3, 0.0  ;;  %v6001_v1 = vld [vmem:[#allocation2 + $0x118] sm:$0xff]  ;;  %v6002_v49 = vld [vmem:[#allocation2 + $0x120] sm:$0xff]  ;;  %v6003_v3 = vld [vmem:[#allocation2 + $0x128] sm:$0xff] }
 0x569   :  { %v5940_v16 = vmax.f32 %v5932_v5, 0.0  ;;  %v5941_v9 = vmax.f32 %v5933_v10, 0.0  ;;  %v5942_v11 = vmax.f32 %v5934_v60, 0.0  ;;  %v5943_v19 = vmax.f32 %v5935_v4, 0.0 }
 0x56a   :  { %v5944_v23 = vmax.f32 %v5936_v13, 0.0  ;;  %v5945_v24 = vmax.f32 %v5937_v63, 0.0  ;;  %v5946_v22 = vmax.f32 %v5904_v41, %v5938_v14  ;;  %v5947_v8 = vmax.f32 %v5905_v55, %v5939_v15  ;;  %v6004_v13 = vld [vmem:[#allocation2 + $0x130] sm:$0xff]  ;;  %v6005_v63 = vld [vmem:[#allocation2 + $0x138] sm:$0xff] }
 0x56b   :  { %v5948_v27 = vmax.f32 %v5906_v56, %v5940_v16  ;;  %v5949_v30 = vmax.f32 %v5907_v28, %v5941_v9  ;;  %v5950_v32 = vmax.f32 %v5908_v46, %v5942_v11  ;;  %v5951_v31 = vmax.f32 %v5909_v6, %v5943_v19 }
 0x56c   :  { %v5952_v53 = vmax.f32 %v5910_v52, %v5944_v23  ;;  %v5953_v34 = vmax.f32 %v5911_v54, %v5945_v24  ;;  %v5964_v17 = vmul.f32 %v5956_v7, %v10413_v44  ;;  %v5965_v42 = vmul.f32 %v5957_v21, %v10413_v44 }
 0x56d   :  { %v5966_v35 = vmul.f32 %v5958_v18, %v10413_v44  ;;  %v5967_v37 = vmul.f32 %v5959_v12, %v10413_v44  ;;  %v5968_v38 = vmul.f32 %v5960_v26, %v10413_v44  ;;  %v5969_v50 = vmul.f32 %v5961_v29, %v10413_v44 }
 0x56e   :  { %v5970_v51 = vmul.f32 %v5962_v48, %v10413_v44  ;;  %v5971_v0 = vmul.f32 %v5963_v39, %v10413_v44  ;;  %v5972_v20 = vadd.f32 %v5964_v17, %v10423_v58  ;;  %v5973_v41 = vadd.f32 %v5965_v42, %v10423_v58  ;;  %v6040_v48 = vld [vmem:[#allocation2 + $0x140] sm:$0xff]  ;;  %v6041_v42 = vld [vmem:[#allocation2 + $0x148] sm:$0xff] }
 0x56f   :  { %v5974_v55 = vadd.f32 %v5966_v35, %v10423_v58  ;;  %v5975_v25 = vadd.f32 %v5967_v37, %v10423_v58  ;;  %v5976_v2 = vadd.f32 %v5968_v38, %v10423_v58  ;;  %v5977_v45 = vadd.f32 %v5969_v50, %v10423_v58  ;;  %v6042_v35 = vld [vmem:[#allocation2 + $0x150] sm:$0xff] }
 0x570   :  { %v5978_v56 = vadd.f32 %v5970_v51, %v10423_v58  ;;  %v5979_v28 = vadd.f32 %v5971_v0, %v10423_v58  ;;  %v5980_v46 = vmax.f32 %v5972_v20, 0.0  ;;  %v5981_v6 = vmax.f32 %v5973_v41, 0.0  ;;  %v6043_v0 = vld [vmem:[#allocation2 + $0x158] sm:$0xff]  ;;  %v6044_v20 = vld [vmem:[#allocation2 + $0x160] sm:$0xff]  ;;  %v6045_v41 = vld [vmem:[#allocation2 + $0x168] sm:$0xff] }
 0x571   :  { %v5982_v33 = vmax.f32 %v5974_v55, 0.0  ;;  %v5983_v52 = vmax.f32 %v5975_v25, 0.0  ;;  %v5984_v54 = vmax.f32 %v5976_v2, 0.0  ;;  %v5985_v36 = vmax.f32 %v5977_v45, 0.0 }
 0x572   :  { %v5986_v40 = vmax.f32 %v5978_v56, 0.0  ;;  %v5987_v61 = vmax.f32 %v5979_v28, 0.0  ;;  %v5988_v43 = vmax.f32 %v5946_v22, %v5980_v46  ;;  %v5989_v62 = vmax.f32 %v5947_v8, %v5981_v6  ;;  %v6046_v56 = vld [vmem:[#allocation2 + $0x170] sm:$0xff]  ;;  %v6047_v28 = vld [vmem:[#allocation2 + $0x178] sm:$0xff] }
 0x573   :  { %v5990_v5 = vmax.f32 %v5948_v27, %v5982_v33  ;;  %v5991_v10 = vmax.f32 %v5949_v30, %v5983_v52  ;;  %v5992_v60 = vmax.f32 %v5950_v32, %v5984_v54  ;;  %v5993_v4 = vmax.f32 %v5951_v31, %v5985_v36 }
 0x574   :  { %v5994_v14 = vmax.f32 %v5952_v53, %v5986_v40  ;;  %v5995_v15 = vmax.f32 %v5953_v34, %v5987_v61  ;;  %v6006_v7 = vmul.f32 %v5998_v47, %v10413_v44  ;;  %v6007_v16 = vmul.f32 %v5999_v59, %v10413_v44 }
 0x575   :  { %v6008_v9 = vmul.f32 %v6000_v57, %v10413_v44  ;;  %v6009_v11 = vmul.f32 %v6001_v1, %v10413_v44  ;;  %v6010_v19 = vmul.f32 %v6002_v49, %v10413_v44  ;;  %v6011_v21 = vmul.f32 %v6003_v3, %v10413_v44 }
 0x576   :  { %v6012_v18 = vmul.f32 %v6004_v13, %v10413_v44  ;;  %v6013_v23 = vmul.f32 %v6005_v63, %v10413_v44  ;;  %v6014_v24 = vadd.f32 %v6006_v7, %v10423_v58  ;;  %v6015_v22 = vadd.f32 %v6007_v16, %v10423_v58  ;;  %v6082_v13 = vld [vmem:[#allocation2 + $0x180] sm:$0xff]  ;;  %v6083_v16 = vld [vmem:[#allocation2 + $0x188] sm:$0xff] }
 0x577   :  { %v6016_v8 = vadd.f32 %v6008_v9, %v10423_v58  ;;  %v6017_v12 = vadd.f32 %v6009_v11, %v10423_v58  ;;  %v6018_v26 = vadd.f32 %v6010_v19, %v10423_v58  ;;  %v6019_v29 = vadd.f32 %v6011_v21, %v10423_v58  ;;  %v6084_v9 = vld [vmem:[#allocation2 + $0x190] sm:$0xff] }
 0x578   :  { %v6020_v27 = vadd.f32 %v6012_v18, %v10423_v58  ;;  %v6021_v30 = vadd.f32 %v6013_v23, %v10423_v58  ;;  %v6022_v32 = vmax.f32 %v6014_v24, 0.0  ;;  %v6023_v31 = vmax.f32 %v6015_v22, 0.0  ;;  %v6085_v23 = vld [vmem:[#allocation2 + $0x198] sm:$0xff]  ;;  %v6086_v24 = vld [vmem:[#allocation2 + $0x1a0] sm:$0xff]  ;;  %v6087_v22 = vld [vmem:[#allocation2 + $0x1a8] sm:$0xff] }
 0x579   :  { %v6024_v39 = vmax.f32 %v6016_v8, 0.0  ;;  %v6025_v53 = vmax.f32 %v6017_v12, 0.0  ;;  %v6026_v34 = vmax.f32 %v6018_v26, 0.0  ;;  %v6027_v17 = vmax.f32 %v6019_v29, 0.0 }
 0x57a   :  { %v6028_v37 = vmax.f32 %v6020_v27, 0.0  ;;  %v6029_v38 = vmax.f32 %v6021_v30, 0.0  ;;  %v6030_v50 = vmax.f32 %v5988_v43, %v6022_v32  ;;  %v6031_v51 = vmax.f32 %v5989_v62, %v6023_v31  ;;  %v6088_v27 = vld [vmem:[#allocation2 + $0x1b0] sm:$0xff]  ;;  %v6089_v30 = vld [vmem:[#allocation2 + $0x1b8] sm:$0xff] }
 0x57b   :  { %v6032_v55 = vmax.f32 %v5990_v5, %v6024_v39  ;;  %v6033_v25 = vmax.f32 %v5991_v10, %v6025_v53  ;;  %v6034_v2 = vmax.f32 %v5992_v60, %v6026_v34  ;;  %v6035_v45 = vmax.f32 %v5993_v4, %v6027_v17 }
 0x57c   :  { %v6036_v46 = vmax.f32 %v5994_v14, %v6028_v37  ;;  %v6037_v6 = vmax.f32 %v5995_v15, %v6029_v38  ;;  %v6048_v47 = vmul.f32 %v6040_v48, %v10413_v44  ;;  %v6049_v33 = vmul.f32 %v6041_v42, %v10413_v44 }
 0x57d   :  { %v6050_v52 = vmul.f32 %v6042_v35, %v10413_v44  ;;  %v6051_v54 = vmul.f32 %v6043_v0, %v10413_v44  ;;  %v6052_v36 = vmul.f32 %v6044_v20, %v10413_v44  ;;  %v6053_v59 = vmul.f32 %v6045_v41, %v10413_v44 }
 0x57e   :  { %v6054_v57 = vmul.f32 %v6046_v56, %v10413_v44  ;;  %v6055_v40 = vmul.f32 %v6047_v28, %v10413_v44  ;;  %v6056_v61 = vadd.f32 %v6048_v47, %v10423_v58  ;;  %v6057_v43 = vadd.f32 %v6049_v33, %v10423_v58  ;;  %v6124_v56 = vld [vmem:[#allocation2 + $0x1c0] sm:$0xff]  ;;  %v6125_v33 = vld [vmem:[#allocation2 + $0x1c8] sm:$0xff] }
 0x57f   :  { %v6058_v62 = vadd.f32 %v6050_v52, %v10423_v58  ;;  %v6059_v1 = vadd.f32 %v6051_v54, %v10423_v58  ;;  %v6060_v49 = vadd.f32 %v6052_v36, %v10423_v58  ;;  %v6061_v3 = vadd.f32 %v6053_v59, %v10423_v58  ;;  %v6126_v52 = vld [vmem:[#allocation2 + $0x1d0] sm:$0xff] }
 0x580   :  { %v6062_v5 = vadd.f32 %v6054_v57, %v10423_v58  ;;  %v6063_v10 = vadd.f32 %v6055_v40, %v10423_v58  ;;  %v6064_v60 = vmax.f32 %v6056_v61, 0.0  ;;  %v6065_v4 = vmax.f32 %v6057_v43, 0.0  ;;  %v6127_v40 = vld [vmem:[#allocation2 + $0x1d8] sm:$0xff]  ;;  %v6128_v61 = vld [vmem:[#allocation2 + $0x1e0] sm:$0xff]  ;;  %v6129_v43 = vld [vmem:[#allocation2 + $0x1e8] sm:$0xff] }
 0x581   :  { %v6066_v63 = vmax.f32 %v6058_v62, 0.0  ;;  %v6067_v14 = vmax.f32 %v6059_v1, 0.0  ;;  %v6068_v15 = vmax.f32 %v6060_v49, 0.0  ;;  %v6069_v7 = vmax.f32 %v6061_v3, 0.0 }
 0x582   :  { %v6070_v11 = vmax.f32 %v6062_v5, 0.0  ;;  %v6071_v19 = vmax.f32 %v6063_v10, 0.0  ;;  %v6072_v21 = vmax.f32 %v6030_v50, %v6064_v60  ;;  %v6073_v18 = vmax.f32 %v6031_v51, %v6065_v4  ;;  %v6130_v5 = vld [vmem:[#allocation2 + $0x1f0] sm:$0xff]  ;;  %v6131_v10 = vld [vmem:[#allocation2 + $0x1f8] sm:$0xff] }
 0x583   :  { %v6074_v8 = vmax.f32 %v6032_v55, %v6066_v63  ;;  %v6075_v12 = vmax.f32 %v6033_v25, %v6067_v14  ;;  %v6076_v26 = vmax.f32 %v6034_v2, %v6068_v15  ;;  %v6077_v29 = vmax.f32 %v6035_v45, %v6069_v7 }
 0x584   :  { %v6078_v32 = vmax.f32 %v6036_v46, %v6070_v11  ;;  %v6079_v31 = vmax.f32 %v6037_v6, %v6071_v19  ;;  %v6090_v48 = vmul.f32 %v6082_v13, %v10413_v44  ;;  %v6091_v39 = vmul.f32 %v6083_v16, %v10413_v44 }
 0x585   :  { %v6092_v53 = vmul.f32 %v6084_v9, %v10413_v44  ;;  %v6093_v34 = vmul.f32 %v6085_v23, %v10413_v44  ;;  %v6094_v17 = vmul.f32 %v6086_v24, %v10413_v44  ;;  %v6095_v42 = vmul.f32 %v6087_v22, %v10413_v44 }
 0x586   :  { %v6096_v35 = vmul.f32 %v6088_v27, %v10413_v44  ;;  %v6097_v37 = vmul.f32 %v6089_v30, %v10413_v44  ;;  %v6098_v38 = vadd.f32 %v6090_v48, %v10423_v58  ;;  %v6099_v50 = vadd.f32 %v6091_v39, %v10423_v58 }
 0x587   :  { %v6100_v51 = vadd.f32 %v6092_v53, %v10423_v58  ;;  %v6101_v0 = vadd.f32 %v6093_v34, %v10423_v58  ;;  %v6102_v20 = vadd.f32 %v6094_v17, %v10423_v58  ;;  %v6103_v41 = vadd.f32 %v6095_v42, %v10423_v58 }
 0x588   :  { %v6104_v55 = vadd.f32 %v6096_v35, %v10423_v58  ;;  %v6105_v25 = vadd.f32 %v6097_v37, %v10423_v58  ;;  %v6106_v2 = vmax.f32 %v6098_v38, 0.0  ;;  %v6107_v45 = vmax.f32 %v6099_v50, 0.0 }
 0x589   :  { %v6108_v28 = vmax.f32 %v6100_v51, 0.0  ;;  %v6109_v46 = vmax.f32 %v6101_v0, 0.0  ;;  %v6110_v6 = vmax.f32 %v6102_v20, 0.0  ;;  %v6111_v47 = vmax.f32 %v6103_v41, 0.0 }
 0x58a   :  { %v6112_v54 = vmax.f32 %v6104_v55, 0.0  ;;  %v6113_v36 = vmax.f32 %v6105_v25, 0.0  ;;  %v6114_v59 = vmax.f32 %v6072_v21, %v6106_v2  ;;  %v6115_v57 = vmax.f32 %v6073_v18, %v6107_v45 }
 0x58b   :  { %v6116_v62 = vmax.f32 %v6074_v8, %v6108_v28  ;;  %v6117_v1 = vmax.f32 %v6075_v12, %v6109_v46  ;;  %v6118_v49 = vmax.f32 %v6076_v26, %v6110_v6  ;;  %v6119_v3 = vmax.f32 %v6077_v29, %v6111_v47 }
 0x58c   :  { %v6120_v60 = vmax.f32 %v6078_v32, %v6112_v54  ;;  %v6121_v4 = vmax.f32 %v6079_v31, %v6113_v36  ;;  %v6132_v13 = vmul.f32 %v6124_v56, %v10413_v44  ;;  %v6133_v63 = vmul.f32 %v6125_v33, %v10413_v44 }
 0x58d   :  { %v6134_v14 = vmul.f32 %v6126_v52, %v10413_v44  ;;  %v6135_v15 = vmul.f32 %v6127_v40, %v10413_v44  ;;  %v6136_v7 = vmul.f32 %v6128_v61, %v10413_v44  ;;  %v6137_v16 = vmul.f32 %v6129_v43, %v10413_v44 }
 0x58e   :  { %v6138_v9 = vmul.f32 %v6130_v5, %v10413_v44  ;;  %v6139_v11 = vmul.f32 %v6131_v10, %v10413_v44  ;;  %v6140_v19 = vadd.f32 %v6132_v13, %v10423_v58  ;;  %v6141_v21 = vadd.f32 %v6133_v63, %v10423_v58 }
 0x58f   :  { %v6142_v18 = vadd.f32 %v6134_v14, %v10423_v58  ;;  %v6143_v23 = vadd.f32 %v6135_v15, %v10423_v58  ;;  %v6144_v24 = vadd.f32 %v6136_v7, %v10423_v58  ;;  %v6145_v22 = vadd.f32 %v6137_v16, %v10423_v58 }
 0x590   :  { %v6146_v8 = vadd.f32 %v6138_v9, %v10423_v58  ;;  %v6147_v12 = vadd.f32 %v6139_v11, %v10423_v58  ;;  %v6148_v26 = vmax.f32 %v6140_v19, 0.0  ;;  %v6149_v29 = vmax.f32 %v6141_v21, 0.0 }
 0x591   :  { %v6150_v27 = vmax.f32 %v6142_v18, 0.0  ;;  %v6151_v44 = vmax.f32 %v6143_v23, 0.0  ;;  %v6152_v30 = vmax.f32 %v6144_v24, 0.0  ;;  %v6153_v32 = vmax.f32 %v6145_v22, 0.0 }
 0x592   :  { %v6154_v31 = vmax.f32 %v6146_v8, 0.0  ;;  %v6155_v48 = vmax.f32 %v6147_v12, 0.0  ;;  %v6156_v39 = vmax.f32 %v6114_v59, %v6148_v26  ;;  %v6157_v53 = vmax.f32 %v6115_v57, %v6149_v29 }
 0x593   :  { %v6158_v34 = vmax.f32 %v6116_v62, %v6150_v27  ;;  %v6159_v17 = vmax.f32 %v6117_v1, %v6151_v44  ;;  %v6160_v42 = vmax.f32 %v6118_v49, %v6152_v30  ;;  %v6161_v35 = vmax.f32 %v6119_v3, %v6153_v32 }
 0x594   :  { %v6162_v37 = vmax.f32 %v6120_v60, %v6154_v31  ;;  %v6163_v38 = vmax.f32 %v6121_v4, %v6155_v48  ;;  %6164 = vst [vmem:[%s10571_s4] sm:$0xff] %v6156_v39  ;;  %6165 = vst [vmem:[%s10571_s4 + $0x8] sm:$0xff] %v6157_v53 }
 0x595   :  { %6166 = vst [vmem:[%s10571_s4 + $0x10] sm:$0xff] %v6158_v34  ;;  %6167 = vst [vmem:[%s10571_s4 + $0x18] sm:$0xff] %v6159_v17 }
 0x596   :  { %6168 = vst [vmem:[%s10571_s4 + $0x20] sm:$0xff] %v6160_v42  ;;  %6169 = vst [vmem:[%s10571_s4 + $0x28] sm:$0xff] %v6161_v35 }
 0x597   :  { %6170 = vst [vmem:[%s10571_s4 + $0x30] sm:$0xff] %v6162_v37  ;;  %6171 = vst [vmem:[%s10571_s4 + $0x38] sm:$0xff] %v6163_v38 }

// kernel: cnn3d_forward.5
= control target key start
LH: loop header
LB: loop body
LE: loop exit
PB: predicated region body
PF: predicated region fallthrough
CT: control target
= control target key end

     0   :  { %vm1553_vm0 = vcmask 523264   ;;  %s4512_s0 = inlined_call_operand.vmem [shape: bf16[128,1728], index: 0, kind: input, shape index: {}]   ;;  %s4513_s1 = inlined_call_operand.vmem [shape: bf16[1728,128], index: 1, kind: input, shape index: {}]   ;;  %s4514_s2 = inlined_call_operand.vmem [shape: f32[1,128], index: 2, kind: input, shape index: {}]   ;;  %s4515_s3 = inlined_call_operand.vmem [shape: f32[1,128], index: 3, kind: input, shape index: {}]   ;;  %s4516_s4 = inlined_call_operand.vmem [shape: bf16[128,10], index: 4, kind: input, shape index: {}]   ;;  %s4517_s5 = inlined_call_operand.vmem [shape: f32[1,10], index: 5, kind: input, shape index: {}]   ;;  %s4518_s6 = inlined_call_operand.hbm [shape: f32[2,10], index: 6, kind: output, shape index: {}]  }
   0x1   :  { %v3222_v0 = vld [vmem:[%s4513_s1 + $0x40] sm:$0xff]   ;;  %v3224_v2 = vld [vmem:[%s4513_s1 + $0x48] sm:$0xff]   ;;  %v3226_v4 = vld [vmem:[%s4513_s1 + $0x50] sm:$0xff]  }
   0x2   :  { %v3223_v1 = vld [vmem:[%s4513_s1] sm:$0xff]   ;;  %3202 = vmatprep.subr.bf16.mxu1 %v3222_v0  ;;  %2789 = vmatprep.subr.bf16.mxu0 %v3222_v0  ;;  %v3225_v3 = vld [vmem:[%s4513_s1 + $0x8] sm:$0xff]   ;;  %v3227_v5 = vld [vmem:[%s4513_s1 + $0x10] sm:$0xff]  }
   0x3   :  { %3210 = vmatpush3.bf16.msra.mxu1 %v3223_v1  ;;  %2790 = vmatpush3.bf16.msra.mxu0 %v3223_v1  ;;  %v3228_v6 = vld [vmem:[%s4513_s1 + $0x58] sm:$0xff]   ;;  %v3230_v8 = vld [vmem:[%s4513_s1 + $0x60] sm:$0xff]   ;;  %v3232_v10 = vld [vmem:[%s4513_s1 + $0x68] sm:$0xff]  }
   0x4   :  { %3203 = vmatprep.subr.bf16.mxu1 %v3224_v2  ;;  %2791 = vmatprep.subr.bf16.mxu0 %v3224_v2  ;;  %v3229_v7 = vld [vmem:[%s4513_s1 + $0x18] sm:$0xff]   ;;  %v3231_v9 = vld [vmem:[%s4513_s1 + $0x20] sm:$0xff]   ;;  %v3233_v12 = vld [vmem:[%s4513_s1 + $0x28] sm:$0xff]  }
   0x5   :  { %v3240_v11 = vld [vmem:[%s4512_s0 + $0x1c4] ss:$56 sps:$4 sm:$0xff]   ;;  %v3234_v14 = vld [vmem:[%s4513_s1 + $0x70] sm:$0xff]   ;;  %v3238_v19 = vld [vmem:[%s4512_s0 + $0x1c0] ss:$56 sps:$4 sm:$0xff]  }
   0x6   :  { %v3244_v13 = vld [vmem:[%s4512_s0 + $0x4] ss:$56 sps:$4 sm:$0xff]   ;;  %1642 = vmatprep.mubr.bf16.mxu1 %v3240_v11  ;;  %v3235_v15 = vld [vmem:[%s4513_s1 + $0x30] sm:$0xff]   ;;  %v3242_v20 = vld [vmem:[%s4512_s0] ss:$56 sps:$4 sm:$0xff]  }
   0x7   :  { %3211 = vmatpush3.bf16.msra.mxu1 %v3225_v3  ;;  %2792 = vmatpush3.bf16.msra.mxu0 %v3225_v3  ;;  %v3236_v16 = vld [vmem:[%s4513_s1 + $0x78] sm:$0xff]   ;;  %v3241_v18 = vld [vmem:[%s4513_s1 + $0xc0] sm:$0xff]   ;;  %v3248_v24 = vld [vmem:[%s4513_s1 + $0xc8] sm:$0xff]  }
   0x8   :  { %3204 = vmatprep.subr.bf16.mxu1 %v3226_v4  ;;  %2793 = vmatprep.subr.bf16.mxu0 %v3226_v4  ;;  %v3237_v17 = vld [vmem:[%s4513_s1 + $0x38] sm:$0xff]   ;;  %v3246_v21 = vld [vmem:[%s4513_s1 + $0x140] sm:$0xff]   ;;  %v3250_v25 = vld [vmem:[%s4513_s1 + $0x148] sm:$0xff]  }
   0x9   :  { %1610 = vmatprep.mubr.bf16.mxu0 %v3244_v13  ;;  %v3245_v22 = vld [vmem:[%s4513_s1 + $0x80] sm:$0xff]   ;;  %v3251_v26 = vld [vmem:[%s4512_s0 + $0x234] ss:$56 sps:$4 sm:$0xff]   ;;  %v3254_v31 = vld [vmem:[%s4512_s0 + $0x230] ss:$56 sps:$4 sm:$0xff]  }
   0xa   :  { %v3247_v23 = vld [vmem:[%s4513_s1 + $0x100] sm:$0xff]   ;;  %v3249_v27 = vld [vmem:[%s4513_s1 + $0x88] sm:$0xff]   ;;  %v3255_v30 = vld [vmem:[%s4513_s1 + $0xd0] sm:$0xff]  }
   0xb   :  { %3212 = vmatpush3.bf16.msra.mxu1 %v3227_v5  ;;  %2794 = vmatpush3.bf16.msra.mxu0 %v3227_v5  ;;  %v3256_v28 = vld [vmem:[%s4512_s0 + $0x74] ss:$56 sps:$4 sm:$0xff]   ;;  %v3259_v34 = vld [vmem:[%s4512_s0 + $0x70] ss:$56 sps:$4 sm:$0xff]   ;;  %v3262_v36 = vld [vmem:[%s4513_s1 + $0xd8] sm:$0xff]  }
   0xc   :  { %3205 = vmatprep.subr.bf16.mxu1 %v3228_v6  ;;  %2795 = vmatprep.subr.bf16.mxu0 %v3228_v6  ;;  %v3253_v29 = vld [vmem:[%s4513_s1 + $0x108] sm:$0xff]   ;;  %v3260_v32 = vld [vmem:[%s4513_s1 + $0x150] sm:$0xff]   ;;  %v3264_v37 = vld [vmem:[%s4513_s1 + $0x158] sm:$0xff]  }
   0xd   :  { %v3258_v33 = vld [vmem:[%s4513_s1 + $0x90] sm:$0xff]   ;;  %v3263_v38 = vld [vmem:[%s4513_s1 + $0x98] sm:$0xff]   ;;  %v3269_v42 = vld [vmem:[%s4513_s1 + $0xe0] sm:$0xff]  }
   0xe   :  { %v3261_v35 = vld [vmem:[%s4513_s1 + $0x110] sm:$0xff]   ;;  %v3265_v39 = vld [vmem:[%s4512_s0 + $0x2a4] ss:$56 sps:$4 sm:$0xff]   ;;  %v3268_v43 = vld [vmem:[%s4512_s0 + $0x2a0] ss:$56 sps:$4 sm:$0xff]  }
   0xf   :  { %3213 = vmatpush3.bf16.msra.mxu1 %v3229_v7  ;;  %2796 = vmatpush3.bf16.msra.mxu0 %v3229_v7  ;;  %v3270_v40 = vld [vmem:[%s4512_s0 + $0xe4] ss:$56 sps:$4 sm:$0xff]   ;;  %v3273_v46 = vld [vmem:[%s4512_s0 + $0xe0] ss:$56 sps:$4 sm:$0xff]   ;;  %v3276_v48 = vld [vmem:[%s4513_s1 + $0xe8] sm:$0xff]  }
  0x10   :  { %3206 = vmatprep.subr.bf16.mxu1 %v3230_v8  ;;  %2797 = vmatprep.subr.bf16.mxu0 %v3230_v8  ;;  %v3267_v41 = vld [vmem:[%s4513_s1 + $0x118] sm:$0xff]   ;;  %v3274_v44 = vld [vmem:[%s4513_s1 + $0x160] sm:$0xff]   ;;  %v3278_v49 = vld [vmem:[%s4513_s1 + $0x168] sm:$0xff]  }
  0x11   :  { %v3272_v45 = vld [vmem:[%s4513_s1 + $0xa0] sm:$0xff]   ;;  %v3277_v50 = vld [vmem:[%s4513_s1 + $0xa8] sm:$0xff]   ;;  %v3283_v55 = vld [vmem:[%s4513_s1 + $0xf0] sm:$0xff]  }
  0x12   :  { %v3275_v47 = vld [vmem:[%s4513_s1 + $0x120] sm:$0xff]   ;;  %v3279_v51 = vld [vmem:[%s4512_s0 + $0x314] ss:$56 sps:$4 sm:$0xff]   ;;  %v3282_v54 = vld [vmem:[%s4512_s0 + $0x310] ss:$56 sps:$4 sm:$0xff]  }
  0x13   :  { %3214 = vmatpush3.bf16.msra.mxu1 %v3231_v9  ;;  %2798 = vmatpush3.bf16.msra.mxu0 %v3231_v9  ;;  %v3281_v52 = vld [vmem:[%s4513_s1 + $0x128] sm:$0xff]   ;;  %v3286_v56 = vld [vmem:[%s4513_s1 + $0xb0] sm:$0xff]   ;;  %v3290_v60 = vld [vmem:[%s4513_s1 + $0xf8] sm:$0xff]  }
  0x14   :  { %3207 = vmatprep.subr.bf16.mxu1 %v3232_v10  ;;  %2799 = vmatprep.subr.bf16.mxu0 %v3232_v10  ;;  %v3284_v53 = vld [vmem:[%s4512_s0 + $0x154] ss:$56 sps:$4 sm:$0xff]   ;;  %v3287_v58 = vld [vmem:[%s4512_s0 + $0x150] ss:$56 sps:$4 sm:$0xff]   ;;  %v3292_v61 = vld [vmem:[%s4513_s1 + $0x178] sm:$0xff]  }
  0x15   :  { %v3288_v57 = vld [vmem:[%s4513_s1 + $0x170] sm:$0xff]   ;;  %v3291_v62 = vld [vmem:[%s4513_s1 + $0xb8] sm:$0xff]   ;;  %v3295_v63 = vld [vmem:[%s4512_s0 + $0xc] ss:$56 sps:$4 sm:$0xff]  }
  0x16   :  { %v3289_v59 = vld [vmem:[%s4513_s1 + $0x130] sm:$0xff]   ;;  %v3296_v0 = vld [vmem:[%s4513_s1 + $0x138] sm:$0xff]   ;;  %v3293_v1 = vld [vmem:[%s4512_s0 + $0x8] ss:$56 sps:$4 sm:$0xff]  }
  0x17   :  { %3215 = vmatpush3.bf16.msra.mxu1 %v3233_v12  ;;  %2800 = vmatpush3.bf16.msra.mxu0 %v3233_v12  ;;  %v3297_v2 = vld [vmem:[%s4513_s1 + $0x1c0] sm:$0xff]   ;;  %v3298_v3 = vld [vmem:[%s4512_s0 + $0x10] ss:$56 sps:$4 sm:$0xff]   ;;  %v3300_v4 = vld [vmem:[%s4512_s0 + $0x14] ss:$56 sps:$4 sm:$0xff]  }
  0x18   :  { %3208 = vmatprep.subr.bf16.mxu1 %v3234_v14  ;;  %2801 = vmatprep.subr.bf16.mxu0 %v3234_v14  ;;  %v3301_v5 = vld [vmem:[%s4513_s1 + $0x180] sm:$0xff]   ;;  %v3304_v8 = vld [vmem:[%s4512_s0 + $0x7c] ss:$56 sps:$4 sm:$0xff]   ;;  %v3307_v9 = vld [vmem:[%s4513_s1 + $0x1c8] sm:$0xff]  }
  0x19   :  { %v3302_v6 = vld [vmem:[%s4513_s1 + $0x240] sm:$0xff]   ;;  %v3306_v10 = vld [vmem:[%s4512_s0 + $0x78] ss:$56 sps:$4 sm:$0xff]   ;;  %v3310_v12 = vld [vmem:[%s4513_s1 + $0x188] sm:$0xff]  }
  0x1a   :  { %v3303_v7 = vld [vmem:[%s4513_s1 + $0x200] sm:$0xff]   ;;  %v3312_v14 = vld [vmem:[%s4513_s1 + $0x248] sm:$0xff]  }
  0x1b   :  { %3216 = vmatpush3.bf16.msra.mxu1 %v3235_v15  ;;  %2802 = vmatpush3.bf16.msra.mxu0 %v3235_v15  ;;  %v3308_v11 = vld [vmem:[%s4512_s0 + $0x84] ss:$56 sps:$4 sm:$0xff]   ;;  %v3311_v13 = vld [vmem:[%s4512_s0 + $0x80] ss:$56 sps:$4 sm:$0xff]   ;;  %v3313_v15 = vld [vmem:[%s4513_s1 + $0x208] sm:$0xff]  }
  0x1c   :  { %3209 = vmatprep.subr.bf16.mxu1 %v3236_v16  ;;  %2803 = vmatprep.subr.bf16.mxu0 %v3236_v16  ;;  %v3314_v16 = vld [vmem:[%s4512_s0 + $0xec] ss:$56 sps:$4 sm:$0xff]  }
  0x1f   :  { %3217 = vmatpush3.bf16.msra.mxu1 %v3237_v17  ;;  %2804 = vmatpush3.bf16.msra.mxu0 %v3237_v17  ;;  %v3317_v17 = vld [vmem:[%s4513_s1 + $0x1d0] sm:$0xff]  }
  0x20   :  { %2853 = vmatprep.subr.bf16.mxu1 %v3241_v18  ;;  %2917 = vmatprep.subr.bf16.mxu0 %v3246_v21  ;;  %v3318_v18 = vld [vmem:[%s4512_s0 + $0xf4] ss:$56 sps:$4 sm:$0xff]   ;;  %v3321_v21 = vld [vmem:[%s4512_s0 + $0xf0] ss:$56 sps:$4 sm:$0xff]  }
  0x22   :  { %1643 = vmatmul.mubr.bf16.vlgmr.msra.gmra.mrb[0].mxu1 %v3238_v19  ;;  %1611 = vmatmul.mubr.bf16.vlgmr.msra.gmra.mrb[0].mxu0 %v3242_v20  ;;  %v3316_v19 = vld [vmem:[%s4512_s0 + $0xe8] ss:$56 sps:$4 sm:$0xff]   ;;  %v3320_v20 = vld [vmem:[%s4513_s1 + $0x190] sm:$0xff]  }
  0x23   :  { %2854 = vmatpush3.bf16.msra.mxu1 %v3245_v22  ;;  %2918 = vmatpush3.bf16.msra.mxu0 %v3247_v23  ;;  %v3322_v22 = vld [vmem:[%s4513_s1 + $0x250] sm:$0xff]  }
  0x24   :  { %2855 = vmatprep.subr.bf16.mxu1 %v3248_v24  ;;  %2919 = vmatprep.subr.bf16.mxu0 %v3250_v25  ;;  %v3323_v23 = vld [vmem:[%s4513_s1 + $0x210] sm:$0xff]   ;;  %v3327_v25 = vld [vmem:[%s4513_s1 + $0x1d8] sm:$0xff]  }
  0x25   :  { %1650 = vmatprep.mubr.bf16.mxu1 %v3251_v26  ;;  %1618 = vmatprep.mubr.bf16.mxu0 %v3256_v28  ;;  %v3324_v24 = vld [vmem:[%s4512_s0 + $0x15c] ss:$56 sps:$4 sm:$0xff]   ;;  %v3326_v28 = vld [vmem:[%s4512_s0 + $0x158] ss:$56 sps:$4 sm:$0xff]  }
  0x26   :  { %v3328_v26 = vld [vmem:[%s4512_s0 + $0x164] ss:$56 sps:$4 sm:$0xff]  }
  0x27   :  { %2856 = vmatpush3.bf16.msra.mxu1 %v3249_v27  ;;  %2920 = vmatpush3.bf16.msra.mxu0 %v3253_v29  ;;  %v3330_v27 = vld [vmem:[%s4513_s1 + $0x198] sm:$0xff]  }
  0x28   :  { %2857 = vmatprep.subr.bf16.mxu1 %v3255_v30  ;;  %2921 = vmatprep.subr.bf16.mxu0 %v3260_v32  ;;  %v3332_v29 = vld [vmem:[%s4513_s1 + $0x258] sm:$0xff]   ;;  %v3334_v32 = vld [vmem:[%s4512_s0 + $0x1cc] ss:$56 sps:$4 sm:$0xff]  }
  0x29   :  { %v3333_v30 = vld [vmem:[%s4513_s1 + $0x218] sm:$0xff]  }
  0x2a   :  { %1651 = vmatmul.mubr.bf16.gmra.mrb[4].mxu1 %v3254_v31  ;;  %1619 = vmatmul.mubr.bf16.gmra.mrb[4].mxu0 %v3259_v34  ;;  %v3331_v31 = vld [vmem:[%s4512_s0 + $0x160] ss:$56 sps:$4 sm:$0xff]   ;;  %v3338_v34 = vld [vmem:[%s4512_s0 + $0x1d4] ss:$56 sps:$4 sm:$0xff]  }
  0x2b   :  { %2858 = vmatpush3.bf16.msra.mxu1 %v3258_v33  ;;  %2922 = vmatpush3.bf16.msra.mxu0 %v3261_v35  ;;  %v3337_v33 = vld [vmem:[%s4513_s1 + $0x1e0] sm:$0xff]  }
  0x2c   :  { %2859 = vmatprep.subr.bf16.mxu1 %v3262_v36  ;;  %2923 = vmatprep.subr.bf16.mxu0 %v3264_v37  ;;  %v3340_v35 = vld [vmem:[%s4513_s1 + $0x1a0] sm:$0xff]  }
  0x2d   :  { %1658 = vmatprep.mubr.bf16.mxu1 %v3265_v39  ;;  %1626 = vmatprep.mubr.bf16.mxu0 %v3270_v40  ;;  %v3342_v36 = vld [vmem:[%s4513_s1 + $0x260] sm:$0xff]   ;;  %v3341_v39 = vld [vmem:[%s4512_s0 + $0x1d0] ss:$56 sps:$4 sm:$0xff]   ;;  %v3344_v40 = vld [vmem:[%s4512_s0 + $0x23c] ss:$56 sps:$4 sm:$0xff]  }
  0x2e   :  { %v3343_v37 = vld [vmem:[%s4513_s1 + $0x220] sm:$0xff]  }
  0x2f   :  { %2860 = vmatpush3.bf16.msra.mxu1 %v3263_v38  ;;  %2924 = vmatpush3.bf16.msra.mxu0 %v3267_v41  ;;  %v3336_v38 = vld [vmem:[%s4512_s0 + $0x1c8] ss:$56 sps:$4 sm:$0xff]  }
  0x30   :  { %2861 = vmatprep.subr.bf16.mxu1 %v3269_v42  ;;  %2925 = vmatprep.subr.bf16.mxu0 %v3274_v44  ;;  %v3347_v41 = vld [vmem:[%s4513_s1 + $0x1e8] sm:$0xff]   ;;  %v3348_v42 = vld [vmem:[%s4512_s0 + $0x244] ss:$56 sps:$4 sm:$0xff]  }
  0x31   :  { %v3352_v44 = vld [vmem:[%s4513_s1 + $0x268] sm:$0xff]  }
  0x32   :  { %1659 = vmatmul.mubr.bf16.gmra.mrb[8].mxu1 %v3268_v43  ;;  %1627 = vmatmul.mubr.bf16.gmra.mrb[8].mxu0 %v3273_v46  ;;  %v3350_v43 = vld [vmem:[%s4513_s1 + $0x1a8] sm:$0xff]   ;;  %v3346_v46 = vld [vmem:[%s4512_s0 + $0x238] ss:$56 sps:$4 sm:$0xff]  }
  0x33   :  { %2862 = vmatpush3.bf16.msra.mxu1 %v3272_v45  ;;  %2926 = vmatpush3.bf16.msra.mxu0 %v3275_v47  ;;  %v3353_v45 = vld [vmem:[%s4513_s1 + $0x228] sm:$0xff]   ;;  %v3351_v47 = vld [vmem:[%s4512_s0 + $0x240] ss:$56 sps:$4 sm:$0xff]  }
  0x34   :  { %2863 = vmatprep.subr.bf16.mxu1 %v3276_v48  ;;  %2927 = vmatprep.subr.bf16.mxu0 %v3278_v49  ;;  %v3357_v48 = vld [vmem:[%s4513_s1 + $0x1f0] sm:$0xff]   ;;  %v3354_v49 = vld [vmem:[%s4512_s0 + $0x2ac] ss:$56 sps:$4 sm:$0xff]  }
  0x35   :  { %1666 = vmatprep.mubr.bf16.mxu1 %v3279_v51  ;;  %1634 = vmatprep.mubr.bf16.mxu0 %v3284_v53  ;;  %v3358_v51 = vld [vmem:[%s4512_s0 + $0x2b4] ss:$56 sps:$4 sm:$0xff]  }
  0x36   :  { %v3363_v53 = vld [vmem:[%s4513_s1 + $0x230] sm:$0xff]  }
  0x37   :  { %2864 = vmatpush3.bf16.msra.mxu1 %v3277_v50  ;;  %2928 = vmatpush3.bf16.msra.mxu0 %v3281_v52  ;;  %v3360_v50 = vld [vmem:[%s4513_s1 + $0x1b0] sm:$0xff]  }
  0x38   :  { %2865 = vmatprep.subr.bf16.mxu1 %v3283_v55  ;;  %2929 = vmatprep.subr.bf16.mxu0 %v3288_v57  ;;  %v3362_v52 = vld [vmem:[%s4513_s1 + $0x270] sm:$0xff]   ;;  %v3356_v55 = vld [vmem:[%s4512_s0 + $0x2a8] ss:$56 sps:$4 sm:$0xff]  }
  0x39   :  { %v3364_v57 = vld [vmem:[%s4512_s0 + $0x31c] ss:$56 sps:$4 sm:$0xff]  }
  0x3a   :  { %1667 = vmatmul.mubr.bf16.gmra.mrb[12].mxu1 %v3282_v54  ;;  %1635 = vmatmul.mubr.bf16.gmra.mrb[12].mxu0 %v3287_v58  ;;  %v3367_v54 = vld [vmem:[%s4513_s1 + $0x1f8] sm:$0xff]  }
  0x3b   :  { %2866 = vmatpush3.bf16.msra.mxu1 %v3286_v56  ;;  %2930 = vmatpush3.bf16.msra.mxu0 %v3289_v59  ;;  %v3361_v56 = vld [vmem:[%s4512_s0 + $0x2b0] ss:$56 sps:$4 sm:$0xff]   ;;  %v3368_v58 = vld [vmem:[%s4512_s0 + $0x324] ss:$56 sps:$4 sm:$0xff]  }
  0x3c   :  { %2867 = vmatprep.subr.bf16.mxu1 %v3290_v60  ;;  %2931 = vmatprep.subr.bf16.mxu0 %v3292_v61  ;;  %v3370_v59 = vld [vmem:[%s4513_s1 + $0x1b8] sm:$0xff]  }
  0x3d   :  { %1707 = vmatprep.mubr.bf16.mxu1 %v3295_v63  ;;  %1804 = vmatprep.mubr.bf16.mxu0 %v3300_v4  ;;  %v3372_v60 = vld [vmem:[%s4513_s1 + $0x278] sm:$0xff]   ;;  %v3532_v63 = vmov 0  }
  0x3e   :  { %v3373_v61 = vld [vmem:[%s4513_s1 + $0x238] sm:$0xff]  }
  0x3f   :  { %2868 = vmatpush3.bf16.msra.mxu1 %v3291_v62  ;;  %2932 = vmatpush3.bf16.msra.mxu0 %v3296_v0  ;;  %v3377_v62 = vld [vmem:[%s4513_s1 + $0x2c0] sm:$0xff]   ;;  %v3366_v0 = vld [vmem:[%s4512_s0 + $0x318] ss:$56 sps:$4 sm:$0xff]  }
  0x40   :  { %2981 = vmatprep.subr.bf16.mxu1 %v3297_v2  ;;  %3045 = vmatprep.subr.bf16.mxu0 %v3302_v6  ;;  %v3376_v2 = vld [vmem:[%s4512_s0 + $0x1c] ss:$56 sps:$4 sm:$0xff]   ;;  %v3374_v4 = vld [vmem:[%s4512_s0 + $0x18] ss:$56 sps:$4 sm:$0xff]   ;;  %v3381_v6 = vld [vmem:[%s4513_s1 + $0x280] sm:$0xff]  }
  0x42   :  { %1708 = vmatmul.mubr.bf16.vlgmr.msra.gmra.mrb[16].mxu1 %v3293_v1  ;;  %1805 = vmatmul.mubr.bf16.vlgmr.msra.gmra.mrb[16].mxu0 %v3298_v3  ;;  %v3371_v1 = vld [vmem:[%s4512_s0 + $0x320] ss:$56 sps:$4 sm:$0xff]   ;;  %v3380_v3 = vld [vmem:[%s4512_s0 + $0x24] ss:$56 sps:$4 sm:$0xff]  }
  0x43   :  { %2982 = vmatpush3.bf16.msra.mxu1 %v3301_v5  ;;  %3046 = vmatpush3.bf16.msra.mxu0 %v3303_v7  ;;  %v3378_v5 = vld [vmem:[%s4512_s0 + $0x20] ss:$56 sps:$4 sm:$0xff]  }
  0x44   :  { %1715 = vmatprep.mubr.bf16.mxu1 %v3304_v8  ;;  %2983 = vmatprep.subr.bf16.mxu1 %v3307_v9  ;;  %v3382_v7 = vld [vmem:[%s4513_s1 + $0x300] sm:$0xff]   ;;  %v3386_v9 = vld [vmem:[%s4513_s1 + $0x2c8] sm:$0xff]  }
  0x45   :  { %1812 = vmatprep.mubr.bf16.mxu0 %v3308_v11  ;;  %3047 = vmatprep.subr.bf16.mxu0 %v3312_v14  ;;  %v3383_v8 = vld [vmem:[%s4512_s0 + $0x8c] ss:$56 sps:$4 sm:$0xff]   ;;  %v3385_v14 = vld [vmem:[%s4512_s0 + $0x88] ss:$56 sps:$4 sm:$0xff]  }
  0x46   :  { %v3389_v11 = vld [vmem:[%s4513_s1 + $0x288] sm:$0xff]  }
  0x47   :  { %2984 = vmatpush3.bf16.msra.mxu1 %v3310_v12  ;;  %3048 = vmatpush3.bf16.msra.mxu0 %v3313_v15  ;;  %v3391_v12 = vld [vmem:[%s4513_s1 + $0x308] sm:$0xff]  }
  0x48   :  { %2985 = vmatprep.subr.bf16.mxu1 %v3317_v17  ;;  %3049 = vmatprep.subr.bf16.mxu0 %v3322_v22  ;;  %v3390_v15 = vld [vmem:[%s4512_s0 + $0x90] ss:$56 sps:$4 sm:$0xff]   ;;  %v3396_v17 = vld [vmem:[%s4512_s0 + $0x104] ss:$56 sps:$4 sm:$0xff]  }
  0x49   :  { %v3394_v22 = vld [vmem:[%s4512_s0 + $0xf8] ss:$56 sps:$4 sm:$0xff]  }
  0x4a   :  { %1716 = vmatmul.mubr.bf16.gmra.mrb[20].mxu1 %v3306_v10  ;;  %1813 = vmatmul.mubr.bf16.gmra.mrb[20].mxu0 %v3311_v13  ;;  %v3387_v10 = vld [vmem:[%s4512_s0 + $0x94] ss:$56 sps:$4 sm:$0xff]  }
  0x4b   :  { %1723 = vmatprep.mubr.bf16.mxu1 %v3314_v16  ;;  %1820 = vmatprep.mubr.bf16.mxu0 %v3318_v18  ;;  %v3395_v13 = vld [vmem:[%s4513_s1 + $0x2d0] sm:$0xff]  }
  0x4c   :  { %2986 = vmatpush3.bf16.msra.mxu1 %v3320_v20  ;;  %3050 = vmatpush3.bf16.msra.mxu0 %v3323_v23  ;;  %v3392_v16 = vld [vmem:[%s4512_s0 + $0xfc] ss:$56 sps:$4 sm:$0xff]   ;;  %v3400_v23 = vld [vmem:[%s4512_s0 + $0x100] ss:$56 sps:$4 sm:$0xff]  }
  0x4d   :  { %2987 = vmatprep.subr.bf16.mxu1 %v3327_v25  ;;  %3051 = vmatprep.subr.bf16.mxu0 %v3332_v29  ;;  %v3398_v18 = vld [vmem:[%s4513_s1 + $0x290] sm:$0xff]   ;;  %v3405_v20 = vld [vmem:[%s4513_s1 + $0x2d8] sm:$0xff]   ;;  %v3414_v25 = vld [vmem:[%s4513_s1 + $0x2e0] sm:$0xff]  }
  0x4e   :  { %v3417_v29 = vld [vmem:[%s4513_s1 + $0x2a0] sm:$0xff]  }
  0x50   :  { %2988 = vmatpush3.bf16.msra.mxu1 %v3330_v27  ;;  %3052 = vmatpush3.bf16.msra.mxu0 %v3333_v30  ;;  %v3406_v27 = vld [vmem:[%s4512_s0 + $0x174] ss:$56 sps:$4 sm:$0xff]  }
  0x51   :  { %2989 = vmatprep.subr.bf16.mxu1 %v3337_v33  ;;  %3053 = vmatprep.subr.bf16.mxu0 %v3342_v36  ;;  %v3424_v30 = vld [vmem:[%s4513_s1 + $0x2e8] sm:$0xff]   ;;  %v3415_v36 = vld [vmem:[%s4512_s0 + $0x1e4] ss:$56 sps:$4 sm:$0xff]  }
  0x52   :  { %1724 = vmatmul.mubr.bf16.gmra.mrb[24].mxu1 %v3316_v19  ;;  %1821 = vmatmul.mubr.bf16.gmra.mrb[24].mxu0 %v3321_v21  ;;  %v3399_v19 = vld [vmem:[%s4513_s1 + $0x310] sm:$0xff]   ;;  %v3401_v21 = vld [vmem:[%s4513_s1 + $0x318] sm:$0xff]  }
  0x53   :  { %1731 = vmatprep.mubr.bf16.mxu1 %v3324_v24  ;;  %1828 = vmatprep.mubr.bf16.mxu0 %v3328_v26  ;;  %v3408_v24 = vld [vmem:[%s4513_s1 + $0x298] sm:$0xff]   ;;  %v3402_v26 = vld [vmem:[%s4512_s0 + $0x16c] ss:$56 sps:$4 sm:$0xff]   ;;  %v3409_v33 = vld [vmem:[%s4512_s0 + $0x170] ss:$56 sps:$4 sm:$0xff]  }
  0x54   :  { %2990 = vmatpush3.bf16.msra.mxu1 %v3340_v35  ;;  %3054 = vmatpush3.bf16.msra.mxu0 %v3343_v37  ;;  %v3411_v35 = vld [vmem:[%s4512_s0 + $0x1dc] ss:$56 sps:$4 sm:$0xff]  }
  0x55   :  { %2991 = vmatprep.subr.bf16.mxu1 %v3347_v41  ;;  %3055 = vmatprep.subr.bf16.mxu0 %v3352_v44  ;;  %v3433_v37 = vld [vmem:[%s4513_s1 + $0x2f0] sm:$0xff]   ;;  %v3421_v44 = vld [vmem:[%s4512_s0 + $0x24c] ss:$56 sps:$4 sm:$0xff]  }
  0x56   :  { %v3413_v41 = vld [vmem:[%s4512_s0 + $0x1d8] ss:$56 sps:$4 sm:$0xff]  }
  0x58   :  { %2992 = vmatpush3.bf16.msra.mxu1 %v3350_v43  ;;  %3056 = vmatpush3.bf16.msra.mxu0 %v3353_v45  ;;  %v3443_v43 = vld [vmem:[%s4513_s1 + $0x2f8] sm:$0xff]  }
  0x59   :  { %2993 = vmatprep.subr.bf16.mxu1 %v3357_v48  ;;  %3057 = vmatprep.subr.bf16.mxu0 %v3362_v52  ;;  %v3446_v45 = vld [vmem:[%s4513_s1 + $0x2b8] sm:$0xff]   ;;  %v3439_v48 = vld [vmem:[%s4513_s1 + $0x348] sm:$0xff]  }
  0x5a   :  { %1732 = vmatmul.mubr.bf16.gmra.mrb[28].mxu1 %v3326_v28  ;;  %1829 = vmatmul.mubr.bf16.gmra.mrb[28].mxu0 %v3331_v31  ;;  %v3410_v28 = vld [vmem:[%s4513_s1 + $0x320] sm:$0xff]   ;;  %v3418_v31 = vld [vmem:[%s4513_s1 + $0x328] sm:$0xff]  }
  0x5b   :  { %1739 = vmatprep.mubr.bf16.mxu1 %v3334_v32  ;;  %1836 = vmatprep.mubr.bf16.mxu0 %v3338_v34  ;;  %v3404_v32 = vld [vmem:[%s4512_s0 + $0x168] ss:$56 sps:$4 sm:$0xff]   ;;  %v3434_v52 = vld [vmem:[%s4512_s0 + $0x2c4] ss:$56 sps:$4 sm:$0xff]  }
  0x5c   :  { %2994 = vmatpush3.bf16.msra.mxu1 %v3360_v50  ;;  %3058 = vmatpush3.bf16.msra.mxu0 %v3363_v53  ;;  %v3427_v34 = vld [vmem:[%s4513_s1 + $0x2a8] sm:$0xff]   ;;  %v3448_v53 = vld [vmem:[%s4513_s1 + $0x350] sm:$0xff]  }
  0x5d   :  { %2995 = vmatprep.subr.bf16.mxu1 %v3367_v54  ;;  %3059 = vmatprep.subr.bf16.mxu0 %v3372_v60  ;;  %v3428_v50 = vld [vmem:[%s4512_s0 + $0x250] ss:$56 sps:$4 sm:$0xff]   ;;  %v3452_v54 = vld [vmem:[%s4513_s1 + $0x358] sm:$0xff]  }
  0x5e   :  { %v3447_v60 = vld [vmem:[%s4512_s0 + $0x330] ss:$56 sps:$4 sm:$0xff]  }
  0x60   :  { %2996 = vmatpush3.bf16.msra.mxu1 %v3370_v59  ;;  %3060 = vmatpush3.bf16.msra.mxu0 %v3373_v61  ;;  %v3442_v59 = vld [vmem:[%s4512_s0 + $0x328] ss:$56 sps:$4 sm:$0xff]   ;;  %v3451_v61 = vld [vmem:[%s4512_s0 + $0x2c] ss:$56 sps:$4 sm:$0xff]  }
  0x61   :  { %3109 = vmatprep.subr.bf16.mxu1 %v3377_v62  ;;  %2160 = vmatprep.subr.bf16.mxu0 %v3532_v63  ;;  %v3455_v62 = vld [vmem:[%s4512_s0 + $0x34] ss:$56 sps:$4 sm:$0xff]  }
  0x62   :  { %1740 = vmatmul.mubr.bf16.gmra.mrb[32].mxu1 %v3336_v38  ;;  %1837 = vmatmul.mubr.bf16.gmra.mrb[32].mxu0 %v3341_v39  ;;  %v3420_v38 = vld [vmem:[%s4513_s1 + $0x330] sm:$0xff]  }
  0x63   :  { %1747 = vmatprep.mubr.bf16.mxu1 %v3344_v40  ;;  %1844 = vmatprep.mubr.bf16.mxu0 %v3348_v42  ;;  %v3436_v39 = vld [vmem:[%s4513_s1 + $0x2b0] sm:$0xff]   ;;  %v3429_v40 = vld [vmem:[%s4513_s1 + $0x338] sm:$0xff]  }
  0x64   :  { %v3419_v42 = vld [vmem:[%s4512_s0 + $0x1e0] ss:$56 sps:$4 sm:$0xff]  }
  0x6a   :  { %1748 = vmatmul.mubr.bf16.gmra.mrb[36].mxu1 %v3346_v46  ;;  %1845 = vmatmul.mubr.bf16.gmra.mrb[36].mxu0 %v3351_v47  ;;  %v3425_v46 = vld [vmem:[%s4512_s0 + $0x254] ss:$56 sps:$4 sm:$0xff]   ;;  %v3437_v47 = vld [vmem:[%s4513_s1 + $0x340] sm:$0xff]  }
  0x6b   :  { %1755 = vmatprep.mubr.bf16.mxu1 %v3354_v49  ;;  %1852 = vmatprep.mubr.bf16.mxu0 %v3358_v51  ;;  %v3423_v49 = vld [vmem:[%s4512_s0 + $0x248] ss:$56 sps:$4 sm:$0xff]   ;;  %v3430_v51 = vld [vmem:[%s4512_s0 + $0x2bc] ss:$56 sps:$4 sm:$0xff]  }
  0x72   :  { %1756 = vmatmul.mubr.bf16.gmra.mrb[40].mxu1 %v3356_v55  ;;  %1853 = vmatmul.mubr.bf16.gmra.mrb[40].mxu0 %v3361_v56  ;;  %v3432_v55 = vld [vmem:[%s4512_s0 + $0x2b8] ss:$56 sps:$4 sm:$0xff]  }
  0x73   :  { %1763 = vmatprep.mubr.bf16.mxu1 %v3364_v57  ;;  %1860 = vmatprep.mubr.bf16.mxu0 %v3368_v58  ;;  %v3438_v56 = vld [vmem:[%s4512_s0 + $0x2c0] ss:$56 sps:$4 sm:$0xff]   ;;  %v3440_v57 = vld [vmem:[%s4512_s0 + $0x32c] ss:$56 sps:$4 sm:$0xff]  }
  0x74   :  { %v3444_v58 = vld [vmem:[%s4512_s0 + $0x334] ss:$56 sps:$4 sm:$0xff]  }
  0x7a   :  { %1764 = vmatmul.mubr.bf16.gmra.mrb[44].mxu1 %v3366_v0  ;;  %1861 = vmatmul.mubr.bf16.gmra.mrb[44].mxu0 %v3371_v1 }
  0x7b   :  { %1901 = vmatprep.mubr.bf16.mxu1 %v3376_v2  ;;  %1998 = vmatprep.mubr.bf16.mxu0 %v3380_v3 }
  0x82   :  { %1902 = vmatmul.mubr.bf16.vlgmr.msra.gmra.mrb[48].mxu1 %v3374_v4  ;;  %1999 = vmatmul.mubr.bf16.vlgmr.msra.gmra.mrb[48].mxu0 %v3378_v5 }
  0x83   :  { %3110 = vmatpush3.bf16.msra.mxu1 %v3381_v6  ;;  %2161 = vmatpush1.bf16.msra.mxu0 %v3382_v7 }
  0x84   :  { %1909 = vmatprep.mubr.bf16.mxu1 %v3383_v8  ;;  %3111 = vmatprep.subr.bf16.mxu1 %v3386_v9 }
  0x85   :  { %2006 = vmatprep.mubr.bf16.mxu0 %v3387_v10  ;;  %2162 = vmatprep.subr.bf16.mxu0 %v3532_v63 }
  0x87   :  { %3112 = vmatpush3.bf16.msra.mxu1 %v3389_v11  ;;  %2163 = vmatpush1.bf16.msra.mxu0 %v3391_v12 }
  0x88   :  { %3113 = vmatprep.subr.bf16.mxu1 %v3395_v13  ;;  %2164 = vmatprep.subr.bf16.mxu0 %v3532_v63 }
  0x8a   :  { %1910 = vmatmul.mubr.bf16.gmra.mrb[52].mxu1 %v3385_v14  ;;  %2007 = vmatmul.mubr.bf16.gmra.mrb[52].mxu0 %v3390_v15 }
  0x8b   :  { %1917 = vmatprep.mubr.bf16.mxu1 %v3392_v16  ;;  %2014 = vmatprep.mubr.bf16.mxu0 %v3396_v17 }
  0x8c   :  { %3114 = vmatpush3.bf16.msra.mxu1 %v3398_v18  ;;  %2165 = vmatpush1.bf16.msra.mxu0 %v3399_v19 }
  0x8d   :  { %2166 = vmatprep.subr.bf16.mxu0 %v3532_v63  ;;  %3115 = vmatprep.subr.bf16.mxu1 %v3405_v20 }
  0x90   :  { %2167 = vmatpush1.bf16.msra.mxu0 %v3401_v21  ;;  %3116 = vmatpush3.bf16.msra.mxu1 %v3408_v24 }
  0x91   :  { %2168 = vmatprep.subr.bf16.mxu0 %v3532_v63  ;;  %3117 = vmatprep.subr.bf16.mxu1 %v3414_v25 }
  0x92   :  { %1918 = vmatmul.mubr.bf16.gmra.mrb[56].mxu1 %v3394_v22  ;;  %2015 = vmatmul.mubr.bf16.gmra.mrb[56].mxu0 %v3400_v23 }
  0x93   :  { %1925 = vmatprep.mubr.bf16.mxu1 %v3402_v26  ;;  %2022 = vmatprep.mubr.bf16.mxu0 %v3406_v27 }
  0x94   :  { %2169 = vmatpush1.bf16.msra.mxu0 %v3410_v28  ;;  %3118 = vmatpush3.bf16.msra.mxu1 %v3417_v29 }
  0x95   :  { %2170 = vmatprep.subr.bf16.mxu0 %v3532_v63  ;;  %3119 = vmatprep.subr.bf16.mxu1 %v3424_v30 }
  0x98   :  { %2171 = vmatpush1.bf16.msra.mxu0 %v3418_v31  ;;  %3120 = vmatpush3.bf16.msra.mxu1 %v3427_v34 }
  0x99   :  { %2172 = vmatprep.subr.bf16.mxu0 %v3532_v63  ;;  %3121 = vmatprep.subr.bf16.mxu1 %v3433_v37 }
  0x9a   :  { %1926 = vmatmul.mubr.bf16.gmra.mrb[60].mxu1 %v3404_v32  ;;  %2023 = vmatmul.mubr.bf16.gmra.mrb[60].mxu0 %v3409_v33 }
  0x9b   :  { %1933 = vmatprep.mubr.bf16.mxu1 %v3411_v35  ;;  %2030 = vmatprep.mubr.bf16.mxu0 %v3415_v36 }
  0x9c   :  { %2173 = vmatpush1.bf16.msra.mxu0 %v3420_v38  ;;  %3122 = vmatpush3.bf16.msra.mxu1 %v3436_v39 }
  0x9d   :  { %2174 = vmatprep.subr.bf16.mxu0 %v3532_v63  ;;  %3123 = vmatprep.subr.bf16.mxu1 %v3443_v43 }
  0xa0   :  { %2175 = vmatpush1.bf16.msra.mxu0 %v3429_v40  ;;  %3124 = vmatpush3.bf16.msra.mxu1 %v3446_v45 }
  0xa1   :  { %2176 = vmatprep.subr.bf16.mxu0 %v3532_v63 }
  0xa2   :  { %1934 = vmatmul.mubr.bf16.gmra.mrb[64].mxu1 %v3413_v41  ;;  %2031 = vmatmul.mubr.bf16.gmra.mrb[64].mxu0 %v3419_v42 }
  0xa3   :  { %1941 = vmatprep.mubr.bf16.mxu1 %v3421_v44  ;;  %2038 = vmatprep.mubr.bf16.mxu0 %v3425_v46 }
  0xa4   :  { %2177 = vmatpush1.bf16.msra.mxu0 %v3437_v47 }
  0xa5   :  { %2178 = vmatprep.subr.bf16.mxu0 %v3532_v63 }
  0xa8   :  { %2179 = vmatpush1.bf16.msra.mxu0 %v3439_v48 }
  0xa9   :  { %2180 = vmatprep.subr.bf16.mxu0 %v3532_v63 }
  0xaa   :  { %1942 = vmatmul.mubr.bf16.gmra.mrb[68].mxu1 %v3423_v49  ;;  %2039 = vmatmul.mubr.bf16.gmra.mrb[68].mxu0 %v3428_v50 }
  0xab   :  { %1949 = vmatprep.mubr.bf16.mxu1 %v3430_v51  ;;  %2046 = vmatprep.mubr.bf16.mxu0 %v3434_v52 }
  0xac   :  { %2181 = vmatpush1.bf16.msra.mxu0 %v3448_v53 }
  0xad   :  { %2182 = vmatprep.subr.bf16.mxu0 %v3532_v63 }
  0xb0   :  { %2183 = vmatpush1.bf16.msra.mxu0 %v3452_v54 }
  0xb2   :  { %1950 = vmatmul.mubr.bf16.gmra.mrb[72].mxu1 %v3432_v55  ;;  %2047 = vmatmul.mubr.bf16.gmra.mrb[72].mxu0 %v3438_v56 }
  0xb3   :  { %1957 = vmatprep.mubr.bf16.mxu1 %v3440_v57  ;;  %2054 = vmatprep.mubr.bf16.mxu0 %v3444_v58 }
  0xba   :  { %1958 = vmatmul.mubr.bf16.gmra.mrb[76].mxu1 %v3442_v59  ;;  %2055 = vmatmul.mubr.bf16.gmra.mrb[76].mxu0 %v3447_v60 }
  0xbb   :  { %2095 = vmatprep.mubr.bf16.mxu1 %v3451_v61  ;;  %2772 = vmatprep.mubr.msk.bf16.mxu0 %vm1553_vm0, %v3455_v62 }
  0xbc   :  { %11 = vsyncpa [#allocation3], 0  ;;  %v3449_v63 = vld [vmem:[%s4512_s0 + $0x28] ss:$56 sps:$4 sm:$0xff]   ;;  %v3456_v1 = vld [vmem:[%s4512_s0 + $0x9c] ss:$56 sps:$4 sm:$0xff]  }
  0xbd   :  { %v3453_v0 = vld [vmem:[%s4512_s0 + $0x30] ss:$56 sps:$4 sm:$0xff]   ;;  %v3459_v2 = vld [vmem:[%s4512_s0 + $0xa4] ss:$56 sps:$4 sm:$0xff]   ;;  %v3461_v4 = vld [vmem:[%s4512_s0 + $0xa0] ss:$56 sps:$4 sm:$0xff]  }
  0xbe   :  { %v3458_v3 = vld [vmem:[%s4512_s0 + $0x98] ss:$56 sps:$4 sm:$0xff]   ;;  %v3462_v5 = vld [vmem:[%s4512_s0 + $0x10c] ss:$56 sps:$4 sm:$0xff]   ;;  %v3464_v7 = vld [vmem:[%s4512_s0 + $0x108] ss:$56 sps:$4 sm:$0xff]  }
  0xbf   :  { %v3465_v6 = vld [vmem:[%s4512_s0 + $0x114] ss:$56 sps:$4 sm:$0xff]   ;;  %v3467_v8 = vld [vmem:[%s4512_s0 + $0x110] ss:$56 sps:$4 sm:$0xff]   ;;  %v3471_v10 = vld [vmem:[%s4512_s0 + $0x184] ss:$56 sps:$4 sm:$0xff]  }
  0xc0   :  { %v3468_v9 = vld [vmem:[%s4512_s0 + $0x17c] ss:$56 sps:$4 sm:$0xff]   ;;  %v3470_v11 = vld [vmem:[%s4512_s0 + $0x178] ss:$56 sps:$4 sm:$0xff]   ;;  %v3474_v13 = vld [vmem:[%s4512_s0 + $0x1ec] ss:$56 sps:$4 sm:$0xff]  }
  0xc1   :  { %v3473_v12 = vld [vmem:[%s4512_s0 + $0x180] ss:$56 sps:$4 sm:$0xff]   ;;  %v3477_v14 = vld [vmem:[%s4512_s0 + $0x1f4] ss:$56 sps:$4 sm:$0xff]   ;;  %v3479_v16 = vld [vmem:[%s4512_s0 + $0x1f0] ss:$56 sps:$4 sm:$0xff]  }
  0xc2   :  { %2096 = vmatmul.mubr.bf16.vlgmr.msra.gmra.mrb[80].mxu1 %v3449_v63  ;;  %2193 = vmatmul.mubr.bf16.vlgmr.msra.gmra.mrb[80].mxu0 %v3453_v0  ;;  %v3476_v15 = vld [vmem:[%s4512_s0 + $0x1e8] ss:$56 sps:$4 sm:$0xff]   ;;  %v3480_v17 = vld [vmem:[%s4512_s0 + $0x25c] ss:$56 sps:$4 sm:$0xff]   ;;  %v3482_v19 = vld [vmem:[%s4512_s0 + $0x258] ss:$56 sps:$4 sm:$0xff]  }
  0xc3   :  { %2103 = vmatprep.mubr.bf16.mxu1 %v3456_v1  ;;  %2773 = vmatprep.mubr.msk.bf16.mxu0 %vm1553_vm0, %v3459_v2  ;;  %v3483_v18 = vld [vmem:[%s4512_s0 + $0x264] ss:$56 sps:$4 sm:$0xff]   ;;  %v3485_v20 = vld [vmem:[%s4512_s0 + $0x260] ss:$56 sps:$4 sm:$0xff]   ;;  %v3489_v22 = vld [vmem:[%s4512_s0 + $0x2d4] ss:$56 sps:$4 sm:$0xff]  }
  0xc4   :  { %v3486_v21 = vld [vmem:[%s4512_s0 + $0x2cc] ss:$56 sps:$4 sm:$0xff]   ;;  %v3488_v23 = vld [vmem:[%s4512_s0 + $0x2c8] ss:$56 sps:$4 sm:$0xff]   ;;  %v3492_v25 = vld [vmem:[%s4512_s0 + $0x33c] ss:$56 sps:$4 sm:$0xff]  }
  0xc5   :  { %v3491_v24 = vld [vmem:[%s4512_s0 + $0x2d0] ss:$56 sps:$4 sm:$0xff]   ;;  %v3495_v26 = vld [vmem:[%s4512_s0 + $0x344] ss:$56 sps:$4 sm:$0xff]   ;;  %v3497_v32 = vld [vmem:[%s4512_s0 + $0x340] ss:$56 sps:$4 sm:$0xff]  }
  0xc6   :  { %v3494_v31 = vld [vmem:[%s4512_s0 + $0x338] ss:$56 sps:$4 sm:$0xff]   ;;  %vm3534_vm1 = vmmov 0   ;;  %vm2444_vm2 = vcmask 1041409   ;;  %s3535_s19 = smov [#allocation2]   ;;  %vm2536_vm3 = vcmask 74752  }
  0xc7   :  { %s2544_s20 = sshll.u32 %s3535_s19, 4  ;;  %s2545_s20 = int_to_ptr.vmem [resolvable:$true] %s2544_s20 }
  0xc8   :  { %s3508_s21 = scalar_lea.vmem %s2545_s20, 32  ;;  %p3513_p1 = scmp.lt.s32.totalorder %s2545_s20, %s2545_s20 }
  0xc9   :  { %p3509_p0 = scmp.ne.s32.totalorder %s2545_s20, %s3508_s21  ;;  %p3514_p2 = scmp.lt.s32.totalorder %s3508_s21, %s3508_s21 }
  0xca   :  { %2104 = vmatmul.mubr.bf16.gmra.mrb[84].mxu1 %v3458_v3  ;;  %2201 = vmatmul.mubr.bf16.gmra.mrb[84].mxu0 %v3461_v4 }
  0xcb   :  { %2111 = vmatprep.mubr.bf16.mxu1 %v3462_v5  ;;  %2774 = vmatprep.mubr.msk.bf16.mxu0 %vm1553_vm0, %v3465_v6  ;;  %p3515_p3 = por %p3514_p2, %p3513_p1 }
  0xcd   :  { %p3516_p4 = pnand %p3515_p3, %p3509_p0 }
  0xd2   :  { %2112 = vmatmul.mubr.bf16.gmra.mrb[88].mxu1 %v3464_v7  ;;  %2209 = vmatmul.mubr.bf16.gmra.mrb[88].mxu0 %v3467_v8 }
  0xd3   :  { %2119 = vmatprep.mubr.bf16.mxu1 %v3468_v9  ;;  %2775 = vmatprep.mubr.msk.bf16.mxu0 %vm1553_vm0, %v3471_v10 }
  0xda   :  { %2120 = vmatmul.mubr.bf16.gmra.mrb[92].mxu1 %v3470_v11  ;;  %2217 = vmatmul.mubr.bf16.gmra.mrb[92].mxu0 %v3473_v12 }
  0xdb   :  { %2127 = vmatprep.mubr.bf16.mxu1 %v3474_v13  ;;  %2776 = vmatprep.mubr.msk.bf16.mxu0 %vm1553_vm0, %v3477_v14 }
  0xe2   :  { %2128 = vmatmul.mubr.bf16.gmra.mrb[96].mxu1 %v3476_v15  ;;  %2225 = vmatmul.mubr.bf16.gmra.mrb[96].mxu0 %v3479_v16 }
  0xe3   :  { %2135 = vmatprep.mubr.bf16.mxu1 %v3480_v17  ;;  %2777 = vmatprep.mubr.msk.bf16.mxu0 %vm1553_vm0, %v3483_v18 }
  0xea   :  { %2136 = vmatmul.mubr.bf16.gmra.mrb[100].mxu1 %v3482_v19  ;;  %2233 = vmatmul.mubr.bf16.gmra.mrb[100].mxu0 %v3485_v20 }
  0xeb   :  { %2143 = vmatprep.mubr.bf16.mxu1 %v3486_v21  ;;  %2778 = vmatprep.mubr.msk.bf16.mxu0 %vm1553_vm0, %v3489_v22 }
  0xf2   :  { %2144 = vmatmul.mubr.bf16.gmra.mrb[104].mxu1 %v3488_v23  ;;  %2241 = vmatmul.mubr.bf16.gmra.mrb[104].mxu0 %v3491_v24 }
  0xf3   :  { %2151 = vmatprep.mubr.bf16.mxu1 %v3492_v25  ;;  %2779 = vmatprep.mubr.msk.bf16.mxu0 %vm1553_vm0, %v3495_v26 }
  0xf5   :  { %v2829_v27 = vpop.f32.mrb[0].mxu1  ;;  %v2805_v28 = vpop.f32.mrb[0].mxu0 }
  0xf6   :  { %v2830_v29 = vpop.f32.mrb[1].mxu1  ;;  %v2806_v30 = vpop.f32.mrb[1].mxu0 }
  0xf7   :  { %v4251_v33 = vadd.f32 %v2830_v29, %v2829_v27  ;;  %v2832_v34 = vpop.f32.mrb[2].mxu1  ;;  %v2807_v35 = vadd.f32 %v2806_v30, %v2805_v28  ;;  %v2808_v36 = vpop.f32.mrb[2].mxu0 }
  0xf8   :  { %v2833_v37 = vpop.f32.mrb[3].mxu1  ;;  %v2809_v38 = vpop.f32.mrb[3].mxu0 }
  0xf9   :  { %v4253_v39 = vadd.f32 %v2833_v37, %v2832_v34  ;;  %v2810_v40 = vadd.f32 %v2809_v38, %v2808_v36 }
  0xfa   :  { %2152 = vmatmul.mubr.bf16.gmra.mrb[108].mxu1 %v3494_v31  ;;  %2249 = vmatmul.mubr.bf16.gmra.mrb[108].mxu0 %v3497_v32 }
  0xfd   :  { %v2835_v41 = vpop.f32.mrb[4].mxu1  ;;  %v2811_v42 = vpop.f32.mrb[4].mxu0 }
  0xfe   :  { %v2836_v43 = vpop.f32.mrb[5].mxu1  ;;  %v2812_v44 = vpop.f32.mrb[5].mxu0 }
  0xff   :  { %v4255_v45 = vadd.f32 %v2836_v43, %v2835_v41  ;;  %v2838_v46 = vpop.f32.mrb[6].mxu1  ;;  %v2813_v47 = vadd.f32 %v2812_v44, %v2811_v42  ;;  %v2814_v48 = vpop.f32.mrb[6].mxu0 }
 0x100   :  { %v2839_v49 = vpop.f32.mrb[7].mxu1  ;;  %v2815_v50 = vpop.f32.mrb[7].mxu0 }
 0x101   :  { %v4257_v51 = vadd.f32 %v2839_v49, %v2838_v46  ;;  %v2816_v52 = vadd.f32 %v2815_v50, %v2814_v48 }
 0x105   :  { %v2841_v53 = vpop.f32.mrb[8].mxu1  ;;  %v2817_v54 = vpop.f32.mrb[8].mxu0 }
 0x106   :  { %v2842_v55 = vpop.f32.mrb[9].mxu1  ;;  %v2818_v56 = vpop.f32.mrb[9].mxu0 }
 0x107   :  { %v4259_v57 = vadd.f32 %v2842_v55, %v2841_v53  ;;  %v2844_v58 = vpop.f32.mrb[10].mxu1  ;;  %v2819_v59 = vadd.f32 %v2818_v56, %v2817_v54  ;;  %v2820_v60 = vpop.f32.mrb[10].mxu0 }
 0x108   :  { %v2845_v61 = vpop.f32.mrb[11].mxu1  ;;  %v2821_v62 = vpop.f32.mrb[11].mxu0 }
 0x109   :  { %v4261_v63 = vadd.f32 %v2845_v61, %v2844_v58  ;;  %v2822_v0 = vadd.f32 %v2821_v62, %v2820_v60 }
 0x10d   :  { %v2847_v1 = vpop.f32.mrb[12].mxu1  ;;  %v2823_v2 = vpop.f32.mrb[12].mxu0 }
 0x10e   :  { %v2848_v3 = vpop.f32.mrb[13].mxu1  ;;  %v2824_v4 = vpop.f32.mrb[13].mxu0 }
 0x10f   :  { %v4263_v5 = vadd.f32 %v2848_v3, %v2847_v1  ;;  %v2850_v6 = vpop.f32.mrb[14].mxu1  ;;  %v4265_v7 = vadd.f32 %v2824_v4, %v2823_v2  ;;  %v2826_v8 = vpop.f32.mrb[14].mxu0 }
 0x110   :  { %v2851_v9 = vpop.f32.mrb[15].mxu1  ;;  %v2827_v10 = vpop.f32.mrb[15].mxu0 }
 0x111   :  { %v4267_v11 = vadd.f32 %v2851_v9, %v2850_v6  ;;  %v2828_v12 = vadd.f32 %v2827_v10, %v2826_v8 }
 0x115   :  { %v2869_v13 = vpop.f32.mrb[16].mxu1  ;;  %v2933_v14 = vpop.f32.mrb[16].mxu0 }
 0x116   :  { %v2870_v15 = vpop.f32.mrb[17].mxu1  ;;  %v2934_v16 = vpop.f32.mrb[17].mxu0 }
 0x117   :  { %v2871_v17 = vadd.f32 %v2870_v15, %v2869_v13  ;;  %v2872_v18 = vpop.f32.mrb[18].mxu1  ;;  %v2935_v19 = vadd.f32 %v2934_v16, %v2933_v14  ;;  %v2936_v20 = vpop.f32.mrb[18].mxu0 }
 0x118   :  { %v2873_v21 = vpop.f32.mrb[19].mxu1  ;;  %v2937_v22 = vpop.f32.mrb[19].mxu0 }
 0x119   :  { %v1710_v23 = vadd.f32 %v2871_v17, %v2807_v35  ;;  %v2874_v24 = vadd.f32 %v2873_v21, %v2872_v18  ;;  %v2938_v25 = vadd.f32 %v2937_v22, %v2936_v20 }
 0x11b   :  { %v1713_v26 = vadd.f32 %v2874_v24, %v2810_v40  ;;  %v4269_v27 = vadd.f32 %v2935_v19, %v1710_v23 }
 0x11d   :  { %v4271_v28 = vadd.f32 %v2938_v25, %v1713_v26  ;;  %v2875_v29 = vpop.f32.mrb[20].mxu1  ;;  %v2939_v30 = vpop.f32.mrb[20].mxu0 }
 0x11e   :  { %v2876_v31 = vpop.f32.mrb[21].mxu1  ;;  %v2940_v32 = vpop.f32.mrb[21].mxu0 }
 0x11f   :  { %v2877_v34 = vadd.f32 %v2876_v31, %v2875_v29  ;;  %v2878_v36 = vpop.f32.mrb[22].mxu1  ;;  %v2941_v37 = vadd.f32 %v2940_v32, %v2939_v30  ;;  %v2942_v38 = vpop.f32.mrb[22].mxu0 }
 0x120   :  { %v2879_v41 = vpop.f32.mrb[23].mxu1  ;;  %v2943_v42 = vpop.f32.mrb[23].mxu0 }
 0x121   :  { %v1718_v43 = vadd.f32 %v2877_v34, %v2813_v47  ;;  %v2880_v44 = vadd.f32 %v2879_v41, %v2878_v36  ;;  %v2944_v35 = vadd.f32 %v2943_v42, %v2942_v38 }
 0x123   :  { %v1721_v46 = vadd.f32 %v2880_v44, %v2816_v52  ;;  %v4273_v48 = vadd.f32 %v2941_v37, %v1718_v43 }
 0x125   :  { %v4275_v40 = vadd.f32 %v2944_v35, %v1721_v46  ;;  %v2881_v49 = vpop.f32.mrb[24].mxu1  ;;  %v2945_v50 = vpop.f32.mrb[24].mxu0 }
 0x126   :  { %v2882_v53 = vpop.f32.mrb[25].mxu1  ;;  %v2946_v54 = vpop.f32.mrb[25].mxu0 }
 0x127   :  { %v2883_v55 = vadd.f32 %v2882_v53, %v2881_v49  ;;  %v2884_v56 = vpop.f32.mrb[26].mxu1  ;;  %v2947_v58 = vadd.f32 %v2946_v54, %v2945_v50  ;;  %v2948_v60 = vpop.f32.mrb[26].mxu0 }
 0x128   :  { %v2885_v61 = vpop.f32.mrb[27].mxu1  ;;  %v2949_v62 = vpop.f32.mrb[27].mxu0 }
 0x129   :  { %v1726_v1 = vadd.f32 %v2883_v55, %v2819_v59  ;;  %v2886_v2 = vadd.f32 %v2885_v61, %v2884_v56  ;;  %v2950_v47 = vadd.f32 %v2949_v62, %v2948_v60 }
 0x12b   :  { %v1729_v3 = vadd.f32 %v2886_v2, %v2822_v0  ;;  %v4277_v4 = vadd.f32 %v2947_v58, %v1726_v1 }
 0x12d   :  { %v4279_v52 = vadd.f32 %v2950_v47, %v1729_v3  ;;  %v2887_v6 = vpop.f32.mrb[28].mxu1  ;;  %v2951_v8 = vpop.f32.mrb[28].mxu0 }
 0x12e   :  { %v2888_v9 = vpop.f32.mrb[29].mxu1  ;;  %v2952_v10 = vpop.f32.mrb[29].mxu0 }
 0x12f   :  { %v2889_v13 = vadd.f32 %v2888_v9, %v2887_v6  ;;  %v2890_v14 = vpop.f32.mrb[30].mxu1  ;;  %v2953_v15 = vadd.f32 %v2952_v10, %v2951_v8  ;;  %v2954_v16 = vpop.f32.mrb[30].mxu0 }
 0x130   :  { %v2891_v17 = vpop.f32.mrb[31].mxu1  ;;  %v2955_v18 = vpop.f32.mrb[31].mxu0 }
 0x131   :  { %v1734_v19 = vadd.f32 %v2889_v13, %v4265_v7  ;;  %v2892_v59 = vadd.f32 %v2891_v17, %v2890_v14  ;;  %v2956_v20 = vadd.f32 %v2955_v18, %v2954_v16 }
 0x133   :  { %v1737_v21 = vadd.f32 %v2892_v59, %v2828_v12  ;;  %v4282_v0 = vadd.f32 %v2953_v15, %v1734_v19 }
 0x135   :  { %v4284_v22 = vadd.f32 %v2956_v20, %v1737_v21  ;;  %v2893_v23 = vpop.f32.mrb[32].mxu1  ;;  %v2957_v24 = vpop.f32.mrb[32].mxu0 }
 0x136   :  { %v2894_v25 = vpop.f32.mrb[33].mxu1  ;;  %v2958_v26 = vpop.f32.mrb[33].mxu0 }
 0x137   :  { %v2895_v29 = vadd.f32 %v2894_v25, %v2893_v23  ;;  %v2896_v30 = vpop.f32.mrb[34].mxu1  ;;  %v2959_v31 = vadd.f32 %v2958_v26, %v2957_v24  ;;  %v2960_v32 = vpop.f32.mrb[34].mxu0 }
 0x138   :  { %v2897_v34 = vpop.f32.mrb[35].mxu1  ;;  %v2961_v36 = vpop.f32.mrb[35].mxu0 }
 0x139   :  { %v1742_v37 = vadd.f32 %v2895_v29, %v4251_v33  ;;  %v2898_v7 = vadd.f32 %v2897_v34, %v2896_v30  ;;  %v2962_v38 = vadd.f32 %v2961_v36, %v2960_v32 }
 0x13b   :  { %v1745_v12 = vadd.f32 %v2898_v7, %v4253_v39  ;;  %v4288_v41 = vadd.f32 %v2959_v31, %v1742_v37 }
 0x13d   :  { %v4290_v42 = vadd.f32 %v2962_v38, %v1745_v12  ;;  %v2899_v43 = vpop.f32.mrb[36].mxu1  ;;  %v2963_v44 = vpop.f32.mrb[36].mxu0 }
 0x13e   :  { %v2900_v35 = vpop.f32.mrb[37].mxu1  ;;  %v2964_v46 = vpop.f32.mrb[37].mxu0 }
 0x13f   :  { %v2901_v49 = vadd.f32 %v2900_v35, %v2899_v43  ;;  %v2902_v50 = vpop.f32.mrb[38].mxu1  ;;  %v2965_v53 = vadd.f32 %v2964_v46, %v2963_v44  ;;  %v2966_v54 = vpop.f32.mrb[38].mxu0 }
 0x140   :  { %v2903_v55 = vpop.f32.mrb[39].mxu1  ;;  %v2967_v56 = vpop.f32.mrb[39].mxu0 }
 0x141   :  { %v1750_v33 = vadd.f32 %v2901_v49, %v4255_v45  ;;  %v2904_v58 = vadd.f32 %v2903_v55, %v2902_v50  ;;  %v2968_v60 = vadd.f32 %v2967_v56, %v2966_v54 }
 0x143   :  { %v1753_v39 = vadd.f32 %v2904_v58, %v4257_v51  ;;  %v4294_v61 = vadd.f32 %v2965_v53, %v1750_v33 }
 0x145   :  { %v4296_v62 = vadd.f32 %v2968_v60, %v1753_v39  ;;  %v2905_v1 = vpop.f32.mrb[40].mxu1  ;;  %v2969_v2 = vpop.f32.mrb[40].mxu0 }
 0x146   :  { %v2906_v47 = vpop.f32.mrb[41].mxu1  ;;  %v2970_v3 = vpop.f32.mrb[41].mxu0 }
 0x147   :  { %v2907_v6 = vadd.f32 %v2906_v47, %v2905_v1  ;;  %v2908_v8 = vpop.f32.mrb[42].mxu1  ;;  %v2971_v9 = vadd.f32 %v2970_v3, %v2969_v2  ;;  %v2972_v10 = vpop.f32.mrb[42].mxu0 }
 0x148   :  { %v2909_v13 = vpop.f32.mrb[43].mxu1  ;;  %v2973_v14 = vpop.f32.mrb[43].mxu0 }
 0x149   :  { %v1758_v45 = vadd.f32 %v2907_v6, %v4259_v57  ;;  %v2910_v15 = vadd.f32 %v2909_v13, %v2908_v8  ;;  %v2974_v16 = vadd.f32 %v2973_v14, %v2972_v10 }
 0x14b   :  { %v1761_v51 = vadd.f32 %v2910_v15, %v4261_v63  ;;  %v4300_v17 = vadd.f32 %v2971_v9, %v1758_v45 }
 0x14d   :  { %v4302_v18 = vadd.f32 %v2974_v16, %v1761_v51  ;;  %v2911_v19 = vpop.f32.mrb[44].mxu1  ;;  %v2975_v59 = vpop.f32.mrb[44].mxu0 }
 0x14e   :  { %v2912_v20 = vpop.f32.mrb[45].mxu1  ;;  %v2976_v21 = vpop.f32.mrb[45].mxu0 }
 0x14f   :  { %v2913_v23 = vadd.f32 %v2912_v20, %v2911_v19  ;;  %v2914_v24 = vpop.f32.mrb[46].mxu1  ;;  %v2977_v25 = vadd.f32 %v2976_v21, %v2975_v59  ;;  %v2978_v26 = vpop.f32.mrb[46].mxu0 }
 0x150   :  { %v2915_v29 = vpop.f32.mrb[47].mxu1  ;;  %v2979_v30 = vpop.f32.mrb[47].mxu0 }
 0x151   :  { %v1766_v57 = vadd.f32 %v2913_v23, %v4263_v5  ;;  %v2916_v31 = vadd.f32 %v2915_v29, %v2914_v24  ;;  %v2980_v32 = vadd.f32 %v2979_v30, %v2978_v26 }
 0x153   :  { %v1769_v63 = vadd.f32 %v2916_v31, %v4267_v11  ;;  %v4306_v34 = vadd.f32 %v2977_v25, %v1766_v57 }
 0x155   :  { %v4308_v36 = vadd.f32 %v2980_v32, %v1769_v63  ;;  %v2997_v37 = vpop.f32.mrb[48].mxu1  ;;  %v3061_v7 = vpop.f32.mrb[48].mxu0 }
 0x156   :  { %v2998_v38 = vpop.f32.mrb[49].mxu1  ;;  %v3062_v12 = vpop.f32.mrb[49].mxu0 }
 0x157   :  { %v2999_v43 = vadd.f32 %v2998_v38, %v2997_v37  ;;  %v3000_v44 = vpop.f32.mrb[50].mxu1  ;;  %v3063_v35 = vadd.f32 %v3062_v12, %v3061_v7  ;;  %v3064_v46 = vpop.f32.mrb[50].mxu0 }
 0x158   :  { %v3001_v49 = vpop.f32.mrb[51].mxu1  ;;  %v3065_v50 = vpop.f32.mrb[51].mxu0 }
 0x159   :  { %v1904_v5 = vadd.f32 %v2999_v43, %v4269_v27  ;;  %v3002_v53 = vadd.f32 %v3001_v49, %v3000_v44  ;;  %v3066_v54 = vadd.f32 %v3065_v50, %v3064_v46 }
 0x15b   :  { %v1907_v11 = vadd.f32 %v3002_v53, %v4271_v28  ;;  %v4312_v55 = vadd.f32 %v3063_v35, %v1904_v5 }
 0x15d   :  { %v4314_v56 = vadd.f32 %v3066_v54, %v1907_v11  ;;  %v3003_v33 = vpop.f32.mrb[52].mxu1  ;;  %v3067_v58 = vpop.f32.mrb[52].mxu0 }
 0x15e   :  { %v3004_v60 = vpop.f32.mrb[53].mxu1  ;;  %v3068_v39 = vpop.f32.mrb[53].mxu0 }
 0x15f   :  { %v3005_v1 = vadd.f32 %v3004_v60, %v3003_v33  ;;  %v3006_v2 = vpop.f32.mrb[54].mxu1  ;;  %v3069_v47 = vadd.f32 %v3068_v39, %v3067_v58  ;;  %v3070_v3 = vpop.f32.mrb[54].mxu0 }
 0x160   :  { %v3007_v6 = vpop.f32.mrb[55].mxu1  ;;  %v3071_v8 = vpop.f32.mrb[55].mxu0 }
 0x161   :  { %v1912_v27 = vadd.f32 %v3005_v1, %v4273_v48  ;;  %v3008_v9 = vadd.f32 %v3007_v6, %v3006_v2  ;;  %v3072_v10 = vadd.f32 %v3071_v8, %v3070_v3 }
 0x163   :  { %v1915_v28 = vadd.f32 %v3008_v9, %v4275_v40  ;;  %v4318_v13 = vadd.f32 %v3069_v47, %v1912_v27 }
 0x165   :  { %v4320_v14 = vadd.f32 %v3072_v10, %v1915_v28  ;;  %v3009_v45 = vpop.f32.mrb[56].mxu1  ;;  %v3073_v15 = vpop.f32.mrb[56].mxu0 }
 0x166   :  { %v3010_v16 = vpop.f32.mrb[57].mxu1  ;;  %v3074_v51 = vpop.f32.mrb[57].mxu0 }
 0x167   :  { %v3011_v19 = vadd.f32 %v3010_v16, %v3009_v45  ;;  %v3012_v59 = vpop.f32.mrb[58].mxu1  ;;  %v3075_v20 = vadd.f32 %v3074_v51, %v3073_v15  ;;  %v3076_v21 = vpop.f32.mrb[58].mxu0 }
 0x168   :  { %v3013_v23 = vpop.f32.mrb[59].mxu1  ;;  %v3077_v24 = vpop.f32.mrb[59].mxu0 }
 0x169   :  { %v1920_v48 = vadd.f32 %v3011_v19, %v4277_v4  ;;  %v3014_v25 = vadd.f32 %v3013_v23, %v3012_v59  ;;  %v3078_v26 = vadd.f32 %v3077_v24, %v3076_v21 }
 0x16b   :  { %v1923_v40 = vadd.f32 %v3014_v25, %v4279_v52  ;;  %v4324_v29 = vadd.f32 %v3075_v20, %v1920_v48 }
 0x16d   :  { %v4326_v30 = vadd.f32 %v3078_v26, %v1923_v40  ;;  %v3015_v57 = vpop.f32.mrb[60].mxu1  ;;  %v3079_v31 = vpop.f32.mrb[60].mxu0 }
 0x16e   :  { %v3016_v32 = vpop.f32.mrb[61].mxu1  ;;  %v3080_v63 = vpop.f32.mrb[61].mxu0 }
 0x16f   :  { %v3017_v37 = vadd.f32 %v3016_v32, %v3015_v57  ;;  %v3018_v7 = vpop.f32.mrb[62].mxu1  ;;  %v3081_v38 = vadd.f32 %v3080_v63, %v3079_v31  ;;  %v3082_v12 = vpop.f32.mrb[62].mxu0 }
 0x170   :  { %v3019_v43 = vpop.f32.mrb[63].mxu1  ;;  %v3083_v44 = vpop.f32.mrb[63].mxu0 }
 0x171   :  { %v1928_v4 = vadd.f32 %v3017_v37, %v4282_v0  ;;  %v3020_v35 = vadd.f32 %v3019_v43, %v3018_v7  ;;  %v3084_v46 = vadd.f32 %v3083_v44, %v3082_v12 }
 0x173   :  { %v1931_v52 = vadd.f32 %v3020_v35, %v4284_v22  ;;  %v4330_v49 = vadd.f32 %v3081_v38, %v1928_v4  ;;  %v3533_v4 = vmov 0.0  }
 0x174   :  { %3182 = vmatprep.subr.bf16.mxu1 %v3533_v4  ;;  %3198 = vmatprep.mubr.msk.bf16.mxu1 %vm3534_vm1, %v3533_v4 }
 0x175   :  { %v4332_v50 = vadd.f32 %v3084_v46, %v1931_v52  ;;  %v3021_v5 = vpop.f32.mrb[64].mxu1  ;;  %v3085_v53 = vpop.f32.mrb[64].mxu0 }
 0x176   :  { %v3022_v54 = vpop.f32.mrb[65].mxu1  ;;  %v3086_v11 = vpop.f32.mrb[65].mxu0 }
 0x177   :  { %v3023_v33 = vadd.f32 %v3022_v54, %v3021_v5  ;;  %v3024_v58 = vpop.f32.mrb[66].mxu1  ;;  %v3087_v60 = vadd.f32 %v3086_v11, %v3085_v53  ;;  %v3088_v39 = vpop.f32.mrb[66].mxu0  ;;  %v3499_v53 = vld [vmem:[%s4516_s4 + $0x8] sm:$0xff]  }
 0x178   :  { %v3025_v1 = vpop.f32.mrb[67].mxu1  ;;  %v3089_v2 = vpop.f32.mrb[67].mxu0 }
 0x179   :  { %v1936_v0 = vadd.f32 %v3023_v33, %v4288_v41  ;;  %v3026_v47 = vadd.f32 %v3025_v1, %v3024_v58  ;;  %v3090_v3 = vadd.f32 %v3089_v2, %v3088_v39 }
 0x17b   :  { %v1939_v22 = vadd.f32 %v3026_v47, %v4290_v42  ;;  %v4336_v6 = vadd.f32 %v3087_v60, %v1936_v0  ;;  %v3500_v0 = vld [vmem:[%s4516_s4 + $0x10] sm:$0xff]  }
 0x17d   :  { %v4338_v8 = vadd.f32 %v3090_v3, %v1939_v22  ;;  %v3027_v27 = vpop.f32.mrb[68].mxu1  ;;  %v3091_v9 = vpop.f32.mrb[68].mxu0 }
 0x17e   :  { %v3028_v10 = vpop.f32.mrb[69].mxu1  ;;  %v3092_v28 = vpop.f32.mrb[69].mxu0 }
 0x17f   :  { %v3029_v45 = vadd.f32 %v3028_v10, %v3027_v27  ;;  %v3030_v15 = vpop.f32.mrb[70].mxu1  ;;  %v3093_v16 = vadd.f32 %v3092_v28, %v3091_v9  ;;  %v3094_v51 = vpop.f32.mrb[70].mxu0  ;;  %v3501_v28 = vld [vmem:[%s4516_s4 + $0x18] sm:$0xff]  }
 0x180   :  { %v3031_v19 = vpop.f32.mrb[71].mxu1  ;;  %v3095_v59 = vpop.f32.mrb[71].mxu0 }
 0x181   :  { %v1944_v41 = vadd.f32 %v3029_v45, %v4294_v61  ;;  %v3032_v20 = vadd.f32 %v3031_v19, %v3030_v15  ;;  %v3096_v21 = vadd.f32 %v3095_v59, %v3094_v51 }
 0x183   :  { %v1947_v42 = vadd.f32 %v3032_v20, %v4296_v62  ;;  %v4342_v23 = vadd.f32 %v3093_v16, %v1944_v41  ;;  %v3498_v62 = vld [vmem:[%s4516_s4] sm:$0xff]  }
 0x184   :  { %3183 = vmatpush3.bf16.msra.mxu1 %v3498_v62  ;;  %v3502_v41 = vld [vmem:[%s4516_s4 + $0x20] sm:$0xff]   ;;  %v3505_v62 = vld [vmem:[%s4516_s4 + $0x38] sm:$0xff]  }
 0x185   :  { %v4344_v24 = vadd.f32 %v3096_v21, %v1947_v42  ;;  %v3033_v48 = vpop.f32.mrb[72].mxu1  ;;  %v3097_v25 = vpop.f32.mrb[72].mxu0  ;;  %3184 = vmatprep.subr.bf16.mxu1 %v3533_v4 }
 0x186   :  { %v3034_v26 = vpop.f32.mrb[73].mxu1  ;;  %v3098_v40 = vpop.f32.mrb[73].mxu0 }
 0x187   :  { %v3035_v57 = vadd.f32 %v3034_v26, %v3033_v48  ;;  %v3036_v31 = vpop.f32.mrb[74].mxu1  ;;  %v3099_v32 = vadd.f32 %v3098_v40, %v3097_v25  ;;  %v3100_v63 = vpop.f32.mrb[74].mxu0 }
 0x188   :  { %v3037_v37 = vpop.f32.mrb[75].mxu1  ;;  %v3101_v7 = vpop.f32.mrb[75].mxu0  ;;  %3185 = vmatpush3.bf16.msra.mxu1 %v3499_v53 }
 0x189   :  { %v1952_v61 = vadd.f32 %v3035_v57, %v4300_v17  ;;  %v3038_v38 = vadd.f32 %v3037_v37, %v3036_v31  ;;  %v3102_v12 = vadd.f32 %v3101_v7, %v3100_v63  ;;  %3186 = vmatprep.subr.bf16.mxu1 %v3533_v4 }
 0x18b   :  { %v1955_v43 = vadd.f32 %v3038_v38, %v4302_v18  ;;  %v4351_v44 = vadd.f32 %v3099_v32, %v1952_v61  ;;  %v3504_v61 = vld [vmem:[%s4516_s4 + $0x30] sm:$0xff]  }
 0x18c   :  { %3187 = vmatpush3.bf16.msra.mxu1 %v3500_v0 }
 0x18d   :  { %v4354_v35 = vadd.f32 %v3102_v12, %v1955_v43  ;;  %v3039_v46 = vpop.f32.mrb[76].mxu1  ;;  %v3103_v52 = vpop.f32.mrb[76].mxu0  ;;  %3188 = vmatprep.subr.bf16.mxu1 %v3533_v4 }
 0x18e   :  { %v3040_v17 = vpop.f32.mrb[77].mxu1  ;;  %v3104_v5 = vpop.f32.mrb[77].mxu0 }
 0x18f   :  { %v3041_v54 = vadd.f32 %v3040_v17, %v3039_v46  ;;  %v3042_v18 = vpop.f32.mrb[78].mxu1  ;;  %v3105_v11 = vadd.f32 %v3104_v5, %v3103_v52  ;;  %v3106_v33 = vpop.f32.mrb[78].mxu0 }
 0x190   :  { %v3043_v58 = vpop.f32.mrb[79].mxu1  ;;  %v3107_v60 = vpop.f32.mrb[79].mxu0  ;;  %3189 = vmatpush3.bf16.msra.mxu1 %v3501_v28 }
 0x191   :  { %v1960_v39 = vadd.f32 %v3041_v54, %v4306_v34  ;;  %v3044_v1 = vadd.f32 %v3043_v58, %v3042_v18  ;;  %v3108_v2 = vadd.f32 %v3107_v60, %v3106_v33  ;;  %3190 = vmatprep.subr.bf16.mxu1 %v3533_v4 }
 0x193   :  { %v1963_v47 = vadd.f32 %v3044_v1, %v4308_v36  ;;  %v4366_v3 = vadd.f32 %v3105_v11, %v1960_v39 }
 0x194   :  { %3191 = vmatpush3.bf16.msra.mxu1 %v3502_v41 }
 0x195   :  { %v4368_v22 = vadd.f32 %v3108_v2, %v1963_v47  ;;  %v3125_v27 = vpop.f32.mrb[80].mxu1  ;;  %v2194_v9 = vpop.f32.mrb[80].mxu0  ;;  %3192 = vmatprep.subr.bf16.mxu1 %v3533_v4 }
 0x196   :  { %v3126_v34 = vpop.f32.mrb[81].mxu1  ;;  %v2196_v10 = vpop.f32.mrb[81].mxu0 }
 0x197   :  { %v3127_v45 = vadd.f32 %v3126_v34, %v3125_v27  ;;  %v3128_v15 = vpop.f32.mrb[82].mxu1  ;;  %v2197_v16 = vpop.f32.mrb[82].mxu0 }
 0x198   :  { %v3129_v51 = vpop.f32.mrb[83].mxu1  ;;  %v2199_v36 = vpop.f32.mrb[83].mxu0 }
 0x199   :  { %v3130_v19 = vadd.f32 %v3129_v51, %v3128_v15  ;;  %v2098_v59 = vadd.f32 %v3127_v45, %v4312_v55  ;;  %v3503_v55 = vld [vmem:[%s4516_s4 + $0x28] sm:$0xff]  }
 0x19a   :  { %3193 = vmatpush3.bf16.msra.mxu1 %v3503_v55 }
 0x19b   :  { %v4379_v20 = vadd.f32 %v2194_v9, %v2098_v59  ;;  %v2101_v21 = vadd.f32 %v3130_v19, %v4314_v56  ;;  %3194 = vmatprep.subr.bf16.mxu1 %v3533_v4 }
 0x19d   :  { %v4382_v42 = vadd.f32 %v2197_v16, %v2101_v21  ;;  %v3131_v48 = vpop.f32.mrb[84].mxu1  ;;  %v2202_v25 = vpop.f32.mrb[84].mxu0 }
 0x19e   :  { %v3132_v26 = vpop.f32.mrb[85].mxu1  ;;  %v2204_v40 = vpop.f32.mrb[85].mxu0  ;;  %3195 = vmatpush3.bf16.msra.mxu1 %v3504_v61 }
 0x19f   :  { %v3133_v57 = vadd.f32 %v3132_v26, %v3131_v48  ;;  %v3134_v31 = vpop.f32.mrb[86].mxu1  ;;  %v2205_v32 = vpop.f32.mrb[86].mxu0  ;;  %3196 = vmatprep.subr.bf16.mxu1 %v3533_v4  ;;  %v2257_v53 = vadd.f32 %v4382_v42, %v4379_v20 }
 0x1a0   :  { %v3135_v63 = vpop.f32.mrb[87].mxu1  ;;  %v2207_v37 = vpop.f32.mrb[87].mxu0 }
 0x1a1   :  { %v3136_v56 = vadd.f32 %v3135_v63, %v3134_v31  ;;  %v2106_v7 = vadd.f32 %v3133_v57, %v4318_v13  ;;  %v2279_v13 = vmul.f32 %v4382_v42, %v4382_v42 }
 0x1a2   :  { %3197 = vmatpush3.bf16.msra.mxu1 %v3505_v62 }
 0x1a3   :  { %v4393_v38 = vadd.f32 %v2202_v25, %v2106_v7  ;;  %v2109_v12 = vadd.f32 %v3136_v56, %v4320_v14  ;;  %v2278_v14 = vmul.f32 %v4379_v20, %v4379_v20 }
 0x1a5   :  { %v4402_v43 = vadd.f32 %v2205_v32, %v2109_v12  ;;  %v3137_v46 = vpop.f32.mrb[88].mxu1  ;;  %v2210_v52 = vpop.f32.mrb[88].mxu0  ;;  %v2280_v54 = vmul.f32 %v4393_v38, %v4393_v38  ;;  %v2294_v39 = vadd.f32 %v2279_v13, %v2278_v14  ;;  %v2258_v4 = vadd.f32 %v2257_v53, %v4393_v38 }
 0x1a6   :  { %v3138_v17 = vpop.f32.mrb[89].mxu1  ;;  %v2212_v5 = vpop.f32.mrb[89].mxu0 }
 0x1a7   :  { %v3139_v18 = vadd.f32 %v3138_v17, %v3137_v46  ;;  %v3140_v11 = vpop.f32.mrb[90].mxu1  ;;  %v2213_v33 = vpop.f32.mrb[90].mxu0  ;;  %v2295_v0 = vadd.f32 %v2294_v39, %v2280_v54  ;;  %v2281_v47 = vmul.f32 %v4402_v43, %v4402_v43  ;;  %v2259_v34 = vadd.f32 %v2258_v4, %v4402_v43 }
 0x1a8   :  { %v3141_v58 = vpop.f32.mrb[91].mxu1  ;;  %v2215_v60 = vpop.f32.mrb[91].mxu0 }
 0x1a9   :  { %v3142_v1 = vadd.f32 %v3141_v58, %v3140_v11  ;;  %v2114_v2 = vadd.f32 %v3139_v18, %v4324_v29  ;;  %v2296_v29 = vadd.f32 %v2295_v0, %v2281_v47 }
 0x1ab   :  { %v4415_v27 = vadd.f32 %v2210_v52, %v2114_v2  ;;  %v2117_v9 = vadd.f32 %v3142_v1, %v4326_v30 }
 0x1ad   :  { %v2282_v10 = vmul.f32 %v4415_v27, %v4415_v27  ;;  %v4421_v28 = vadd.f32 %v2213_v33, %v2117_v9  ;;  %v3143_v45 = vpop.f32.mrb[92].mxu1  ;;  %v2218_v15 = vpop.f32.mrb[92].mxu0  ;;  %v2260_v36 = vadd.f32 %v2259_v34, %v4415_v27 }
 0x1ae   :  { %v3144_v16 = vpop.f32.mrb[93].mxu1  ;;  %v2220_v51 = vpop.f32.mrb[93].mxu0 }
 0x1af   :  { %v3145_v19 = vadd.f32 %v3144_v16, %v3143_v45  ;;  %v3146_v59 = vpop.f32.mrb[94].mxu1  ;;  %v2221_v41 = vpop.f32.mrb[94].mxu0  ;;  %v2297_v30 = vadd.f32 %v2296_v29, %v2282_v10  ;;  %v2283_v25 = vmul.f32 %v4421_v28, %v4421_v28  ;;  %v2261_v55 = vadd.f32 %v2260_v36, %v4421_v28 }
 0x1b0   :  { %v3147_v21 = vpop.f32.mrb[95].mxu1  ;;  %v2223_v48 = vpop.f32.mrb[95].mxu0 }
 0x1b1   :  { %v3148_v26 = vadd.f32 %v3147_v21, %v3146_v59  ;;  %v2122_v40 = vadd.f32 %v3145_v19, %v4330_v49  ;;  %v2298_v32 = vadd.f32 %v2297_v30, %v2283_v25 }
 0x1b3   :  { %v4428_v57 = vadd.f32 %v2218_v15, %v2122_v40  ;;  %v2125_v31 = vadd.f32 %v3148_v26, %v4332_v50 }
 0x1b5   :  { %v2262_v63 = vadd.f32 %v2261_v55, %v4428_v57  ;;  %v2284_v37 = vmul.f32 %v4428_v57, %v4428_v57  ;;  %v4434_v56 = vadd.f32 %v2221_v41, %v2125_v31  ;;  %v3149_v7 = vpop.f32.mrb[96].mxu1  ;;  %v2226_v61 = vpop.f32.mrb[96].mxu0 }
 0x1b6   :  { %v3150_v12 = vpop.f32.mrb[97].mxu1  ;;  %v2228_v62 = vpop.f32.mrb[97].mxu0 }
 0x1b7   :  { %v2299_v13 = vadd.f32 %v2298_v32, %v2284_v37  ;;  %v2263_v49 = vadd.f32 %v2262_v63, %v4434_v56  ;;  %v2285_v46 = vmul.f32 %v4434_v56, %v4434_v56  ;;  %v3151_v52 = vadd.f32 %v3150_v12, %v3149_v7  ;;  %v3152_v50 = vpop.f32.mrb[98].mxu1  ;;  %v2229_v17 = vpop.f32.mrb[98].mxu0 }
 0x1b8   :  { %v3153_v5 = vpop.f32.mrb[99].mxu1  ;;  %v2231_v14 = vpop.f32.mrb[99].mxu0 }
 0x1b9   :  { %v2300_v53 = vadd.f32 %v2299_v13, %v2285_v46  ;;  %v3154_v54 = vadd.f32 %v3153_v5, %v3152_v50  ;;  %v2130_v18 = vadd.f32 %v3151_v52, %v4336_v6 }
 0x1bb   :  { %v4440_v11 = vadd.f32 %v2226_v61, %v2130_v18  ;;  %v2133_v33 = vadd.f32 %v3154_v54, %v4338_v8 }
 0x1bd   :  { %v2264_v58 = vadd.f32 %v2263_v49, %v4440_v11  ;;  %v2286_v60 = vmul.f32 %v4440_v11, %v4440_v11  ;;  %v4446_v39 = vadd.f32 %v2229_v17, %v2133_v33  ;;  %v3155_v4 = vpop.f32.mrb[100].mxu1  ;;  %v2234_v1 = vpop.f32.mrb[100].mxu0 }
 0x1be   :  { %v3156_v2 = vpop.f32.mrb[101].mxu1  ;;  %v2236_v0 = vpop.f32.mrb[101].mxu0 }
 0x1bf   :  { %v2301_v47 = vadd.f32 %v2300_v53, %v2286_v60  ;;  %v2265_v9 = vadd.f32 %v2264_v58, %v4446_v39  ;;  %v2287_v6 = vmul.f32 %v4446_v39, %v4446_v39  ;;  %v3157_v34 = vadd.f32 %v3156_v2, %v3155_v4  ;;  %v3158_v10 = vpop.f32.mrb[102].mxu1  ;;  %v2237_v8 = vpop.f32.mrb[102].mxu0 }
 0x1c0   :  { %v3159_v45 = vpop.f32.mrb[103].mxu1  ;;  %v2239_v15 = vpop.f32.mrb[103].mxu0 }
 0x1c1   :  { %v2302_v16 = vadd.f32 %v2301_v47, %v2287_v6  ;;  %v3160_v51 = vadd.f32 %v3159_v45, %v3158_v10  ;;  %v2138_v29 = vadd.f32 %v3157_v34, %v4342_v23 }
 0x1c3   :  { %v4452_v36 = vadd.f32 %v2234_v1, %v2138_v29  ;;  %v2141_v19 = vadd.f32 %v3160_v51, %v4344_v24 }
 0x1c5   :  { %v2266_v59 = vadd.f32 %v2265_v9, %v4452_v36  ;;  %v2288_v41 = vmul.f32 %v4452_v36, %v4452_v36  ;;  %v4458_v21 = vadd.f32 %v2237_v8, %v2141_v19  ;;  %v3161_v48 = vpop.f32.mrb[104].mxu1  ;;  %v2242_v30 = vpop.f32.mrb[104].mxu0 }
 0x1c6   :  { %v3162_v25 = vpop.f32.mrb[105].mxu1  ;;  %v2244_v26 = vpop.f32.mrb[105].mxu0 }
 0x1c7   :  { %v2303_v40 = vadd.f32 %v2302_v16, %v2288_v41  ;;  %v2267_v55 = vadd.f32 %v2266_v59, %v4458_v21  ;;  %v2289_v23 = vmul.f32 %v4458_v21, %v4458_v21  ;;  %v3163_v31 = vadd.f32 %v3162_v25, %v3161_v48  ;;  %v3164_v32 = vpop.f32.mrb[106].mxu1  ;;  %v2245_v24 = vpop.f32.mrb[106].mxu0 }
 0x1c8   :  { %v3165_v63 = vpop.f32.mrb[107].mxu1  ;;  %v2247_v37 = vpop.f32.mrb[107].mxu0 }
 0x1c9   :  { %v2304_v7 = vadd.f32 %v2303_v40, %v2289_v23  ;;  %v3166_v61 = vadd.f32 %v3165_v63, %v3164_v32  ;;  %v2146_v12 = vadd.f32 %v3163_v31, %v4351_v44  ;;  %v2328_v63 = vlaneseq }
 0x1cb   :  { %v4464_v62 = vadd.f32 %v2242_v30, %v2146_v12  ;;  %v2149_v13 = vadd.f32 %v3166_v61, %v4354_v35  ;;  %v2329_v37 = vshrl.u32 %v2328_v63, 7 }
 0x1cd   :  { %v2268_v49 = vadd.f32 %v2267_v55, %v4464_v62  ;;  %v2290_v46 = vmul.f32 %v4464_v62, %v4464_v62  ;;  %v2246_v52 = vadd.f32 %v2245_v24, %v2149_v13  ;;  %v3167_v50 = vpop.f32.mrb[108].mxu1  ;;  %v2250_v17 = vpop.f32.mrb[108].mxu0  ;;  %v2330_v61 = vsub.s32 0, %v2329_v37 }
 0x1ce   :  { %v3168_v5 = vpop.f32.mrb[109].mxu1  ;;  %v2252_v14 = vpop.f32.mrb[109].mxu0 }
 0x1cf   :  { %v2305_v53 = vadd.f32 %v2304_v7, %v2290_v46  ;;  %v2269_v54 = vadd.f32 %v2268_v49, %v2246_v52  ;;  %v2291_v18 = vmul.f32 %v2246_v52, %v2246_v52  ;;  %v3169_v33 = vadd.f32 %v3168_v5, %v3167_v50  ;;  %v3170_v58 = vpop.f32.mrb[110].mxu1  ;;  %v2253_v44 = vpop.f32.mrb[110].mxu0  ;;  %v2320_v7 = vld [vmem:[%s4514_s2] sm:$0x1] }
 0x1d0   :  { %v3171_v60 = vpop.f32.mrb[111].mxu1  ;;  %v2255_v4 = vpop.f32.mrb[111].mxu0  ;;  %v2324_v49 = vld [vmem:[%s4515_s3] sm:$0x1] }
 0x1d1   :  { %v2306_v1 = vadd.f32 %v2305_v53, %v2291_v18  ;;  %v3172_v35 = vadd.f32 %v3171_v60, %v3170_v58  ;;  %v2154_v2 = vadd.f32 %v3169_v33, %v4366_v3 }
 0x1d3   :  { %v4471_v0 = vadd.f32 %v2250_v17, %v2154_v2  ;;  %v2157_v47 = vadd.f32 %v3172_v35, %v4368_v22 }
 0x1d5   :  { %v2270_v9 = vadd.f32 %v2269_v54, %v4471_v0  ;;  %v2292_v6 = vmul.f32 %v4471_v0, %v4471_v0  ;;  %v2254_v34 = vadd.f32 %v2253_v44, %v2157_v47 }
 0x1d7   :  { %v2307_v10 = vadd.f32 %v2306_v1, %v2292_v6  ;;  %v2271_v8 = vadd.f32 %v2270_v9, %v2254_v34  ;;  %v2293_v45 = vmul.f32 %v2254_v34, %v2254_v34 }
 0x1d9   :  { %v2272_v15 = vrot.slane %v2271_v8, 4  ;;  %v2308_v16 = vadd.f32 %v2307_v10, %v2293_v45 }
 0x1db   :  { %v2273_v51 = vadd.f32 %v2272_v15, %v2271_v8  ;;  %v2309_v29 = vrot.slane %v2308_v16, 4 }
 0x1dd   :  { %v2274_v19 = vrot.slane %v2273_v51, 2  ;;  %v2310_v59 = vadd.f32 %v2309_v29, %v2308_v16 }
 0x1df   :  { %v2275_v3 = vadd.f32 %v2274_v19, %v2273_v51  ;;  %v2311_v41 = vrot.slane %v2310_v59, 2 }
 0x1e1   :  { %v2276_v48 = vrot.slane %v2275_v3, 1  ;;  %v2312_v30 = vadd.f32 %v2311_v41, %v2310_v59 }
 0x1e3   :  { %v2277_v22 = vadd.f32 %v2276_v48, %v2275_v3  ;;  %v2313_v25 = vrot.slane %v2312_v30, 1 }
 0x1e5   :  { %v2314_v26 = vadd.f32 %v2313_v25, %v2312_v30  ;;  %v2315_v40 = vmul.f32 0.0078125, %v2277_v22 }
 0x1e7   :  { %v2316_v55 = vmul.f32 0.0078125, %v2314_v26  ;;  %v2317_v23 = vmul.f32 %v2315_v40, %v2315_v40 }
 0x1e9   :  { %v2318_v31 = vsub.f32 %v2316_v55, %v2317_v23 }
 0x1eb   :  { %v2319_v32 = vmax.f32 %v2318_v31, 0.0 }
 0x1ed   :  { %v2321_v24 = vadd.f32 1e-05, %v2319_v32 }
 0x1ef   :  { %3506 = vrsqrt.f32 %v2321_v24 }
 0x1f9   :  { %v3507_v12 = vpop.eup %3506 }
 0x1fa   :  { %v2323_v13 = vmul.f32 %v3507_v12, %v2320_v7 }
 0x1fc   :  { %v2325_v46 = vmul.f32 %v2323_v13, %v2315_v40  ;;  %v2331_v50 = vrot.slane %v2323_v13, %v2330_v61 }
 0x1fe   :  { %v2326_v17 = vsub.f32 %v2324_v49, %v2325_v46  ;;  %v2338_v5 = vmul.f32 %v2331_v50, %v4421_v28  ;;  %v2340_v14 = vmul.f32 %v2331_v50, %v4434_v56  ;;  %v2342_v53 = vmul.f32 %v2331_v50, %v4446_v39 }
 0x1ff   :  { %v2344_v54 = vmul.f32 %v2331_v50, %v4458_v21  ;;  %v2346_v18 = vmul.f32 %v2331_v50, %v2246_v52  ;;  %v2334_v33 = vmul.f32 %v2331_v50, %v4382_v42  ;;  %v2336_v58 = vmul.f32 %v2331_v50, %v4402_v43 }
 0x200   :  { %v2348_v44 = vmul.f32 %v2331_v50, %v2254_v34  ;;  %v2353_v60 = vrot.slane %v2326_v17, %v2330_v61  ;;  %v2339_v4 = vmul.f32 %v2331_v50, %v4428_v57  ;;  %v2341_v1 = vmul.f32 %v2331_v50, %v4440_v11 }
 0x201   :  { %v2343_v35 = vmul.f32 %v2331_v50, %v4452_v36  ;;  %v2333_v43 = vmul.f32 %v2331_v50, %v4379_v20  ;;  %v2335_v57 = vmul.f32 %v2331_v50, %v4393_v38  ;;  %v2337_v11 = vmul.f32 %v2331_v50, %v4415_v27 }
 0x202   :  { %v2356_v28 = vadd.f32 %v2353_v60, %v2334_v33  ;;  %v2358_v2 = vadd.f32 %v2353_v60, %v2336_v58  ;;  %v2360_v56 = vadd.f32 %v2353_v60, %v2338_v5  ;;  %v2362_v47 = vadd.f32 %v2353_v60, %v2340_v14 }
 0x203   :  { %v2364_v39 = vadd.f32 %v2353_v60, %v2342_v53  ;;  %v2366_v9 = vadd.f32 %v2353_v60, %v2344_v54  ;;  %v2368_v21 = vadd.f32 %v2353_v60, %v2346_v18  ;;  %v2370_v52 = vadd.f32 %v2353_v60, %v2348_v44 }
 0x204   :  { %v2372_v6 = vmax.f32 %v2356_v28, 0.0  ;;  %v2374_v42 = vmax.f32 %v2358_v2, 0.0  ;;  %v2376_v34 = vmax.f32 %v2360_v56, 0.0  ;;  %v2378_v10 = vmax.f32 %v2362_v47, 0.0 }
 0x205   :  { %v2345_v36 = vmul.f32 %v2331_v50, %v4464_v62  ;;  %v2347_v45 = vmul.f32 %v2331_v50, %v4471_v0  ;;  %v2355_v15 = vadd.f32 %v2353_v60, %v2333_v43  ;;  %v2357_v16 = vadd.f32 %v2353_v60, %v2335_v57 }
 0x206   :  { %v2388_v8 = vmax.f32 %v2372_v6, %v2374_v42  ;;  %v2359_v51 = vadd.f32 %v2353_v60, %v2337_v11  ;;  %v2361_v29 = vadd.f32 %v2353_v60, %v2339_v4  ;;  %v2363_v19 = vadd.f32 %v2353_v60, %v2341_v1 }
 0x207   :  { %v2365_v3 = vadd.f32 %v2353_v60, %v2343_v35  ;;  %v2367_v41 = vadd.f32 %v2353_v60, %v2345_v36  ;;  %v2369_v20 = vadd.f32 %v2353_v60, %v2347_v45  ;;  %v2371_v48 = vmax.f32 %v2355_v15, 0.0 }
 0x208   :  { %v2390_v59 = vmax.f32 %v2388_v8, %v2376_v34  ;;  %v2373_v30 = vmax.f32 %v2357_v16, 0.0  ;;  %v2380_v22 = vmax.f32 %v2364_v39, 0.0  ;;  %v2375_v25 = vmax.f32 %v2359_v51, 0.0 }
 0x209   :  { %v2382_v26 = vmax.f32 %v2366_v9, 0.0  ;;  %v2377_v62 = vmax.f32 %v2361_v29, 0.0  ;;  %v2384_v0 = vmax.f32 %v2368_v21, 0.0  ;;  %v2379_v31 = vmax.f32 %v2363_v19, 0.0 }
 0x20a   :  { %v2392_v38 = vmax.f32 %v2390_v59, %v2378_v10  ;;  %v2387_v27 = vmax.f32 %v2371_v48, %v2373_v30  ;;  %v2386_v24 = vmax.f32 %v2370_v52, 0.0  ;;  %v2381_v37 = vmax.f32 %v2365_v3, 0.0  ;;  %v2780_v52 = vld [vmem:[%s4517_s5] ss:$0 sm:$0xff] }
 0x20b   :  { %v2383_v12 = vmax.f32 %v2367_v41, 0.0  ;;  %v2385_v46 = vmax.f32 %v2369_v20, 0.0 }
 0x20c   :  { %v2394_v40 = vmax.f32 %v2392_v38, %v2380_v22  ;;  %v2389_v55 = vmax.f32 %v2387_v27, %v2375_v25 }
 0x20e   :  { %v2396_v23 = vmax.f32 %v2394_v40, %v2382_v26  ;;  %v2391_v32 = vmax.f32 %v2389_v55, %v2377_v62 }
 0x210   :  { %v2398_v63 = vmax.f32 %v2396_v23, %v2384_v0  ;;  %v2393_v7 = vmax.f32 %v2391_v32, %v2379_v31 }
 0x212   :  { %v2400_v61 = vmax.f32 %v2398_v63, %v2386_v24  ;;  %v2395_v13 = vmax.f32 %v2393_v7, %v2381_v37 }
 0x214   :  { %v2407_v49 = vrot.slane %v2400_v61, 4  ;;  %v2397_v50 = vmax.f32 %v2395_v13, %v2383_v12 }
 0x216   :  { %v2408_v17 = vadd.f32 %v2407_v49, %v2400_v61  ;;  %v2399_v5 = vmax.f32 %v2397_v50, %v2385_v46 }
 0x218   :  { %v2409_v14 = vrot.slane %v2408_v17, 2  ;;  %v2401_v53 = vrot.slane %v2399_v5, 4 }
 0x21a   :  { %v2410_v54 = vadd.f32 %v2409_v14, %v2408_v17  ;;  %v2402_v18 = vadd.f32 %v2401_v53, %v2399_v5 }
 0x21c   :  { %v2411_v33 = vrot.slane %v2410_v54, 1  ;;  %v2403_v58 = vrot.slane %v2402_v18, 2 }
 0x21e   :  { %v2412_v44 = vadd.f32 %v2411_v33, %v2410_v54  ;;  %v2404_v60 = vadd.f32 %v2403_v58, %v2402_v18 }
 0x220   :  { %v2414_v4 = vmul.f32 0.125, %v2412_v44  ;;  %v2405_v1 = vrot.slane %v2404_v60, 1 }
 0x222   :  { %v2416_v35 = vpack.c.bf16 %v2414_v4, %v2414_v4  ;;  %v2406_v28 = vadd.f32 %v2405_v1, %v2404_v60 }
 0x224   :  { %v2413_v2 = vmul.f32 0.125, %v2406_v28  ;;  %v2443_v47 = vunpack.c.l.b16 %v2416_v35 }
 0x226   :  { %v2415_v56 = vpack.c.bf16 %v2413_v2, %v2413_v2 }
 0x228   :  { %v2442_v39 = vunpack.c.l.b16 %v2415_v56 }
 0x22a   :  { %v2445_v9 = vsel %vm2444_vm2, %v2443_v47, %v2442_v39 }
 0x22b   :  { %v2446_v21 = vpack.c.b16 %v2445_v9, %v2445_v9 }
 0x22d   :  { %3199 = vmatmul.mubr.bf16.vlgmr.msra.gmra.mrb[112].mxu1 %v2446_v21 }
 0x300   :  { %v2530_v6 = vpop.f32.mrb[112].mxu1 }
 0x301   :  { %v2531_v42 = vadd.f32 %v2780_v52, %v2530_v6  ;;  %v3200_v43 = vpop.f32.mrb[113].mxu1 }
 0x302   :  { %v2533_v34 = vpop.f32.mrb[114].mxu1 }
 0x303   :  { %v3201_v10 = vpop.f32.mrb[115].mxu1  ;;  %2537 = vst.msk [vmem:[#allocation2] sm:$0x3] %vm2536_vm3, %v2531_v42 }
 0x304   :  { %3519 = shalt.err (!%p3516_p4)
}
 0x305   :  { %s3520_s5 = scalar_lea.hbm %s4518_s6, 32 }
 0x306   :  { %p3521_p5 = scmp.ne.s32.totalorder %s4518_s6, %s3520_s5  ;;  %p3524_p6 = scmp.lt.u32.totalorder %s3520_s5, %s4518_s6 }
 0x308   :  { %p3526_p7 = pnand %p3524_p6, %p3521_p5 }
 0x30a   :  { %3529 = shalt.err (!%p3526_p7)
}
 0x30b   :  { %2547 = dma.vmem_to_hbm [thread:$0]  %s2545_s20, 32, %s4518_s6, [#allocation3]  }
 0x30c   :  { %3530 = dma.done.wait [#allocation3], 32  }
 0x30d   :  { %3531 = vsyncadd [#allocation3], 4294967264 }
 0x30e   :  { %2551 = vsyncpa [#allocation3], 1 }

</bundles_post_ra>
